<compile_context>
chip_gen: v5e
topology: v5e:2x2
jax: 0.10.0
libtpu: 0.0.40
codegen_flags: <defaults>
</compile_context>

<pallas_src>
import functools

import jax
import jax.numpy as jnp
from jax.experimental import pallas as pl
from jax.experimental.pallas import tpu as pltpu


# ----------------------------------------------------------------------------
# Shape helpers
# ----------------------------------------------------------------------------
def _conv_out(size, k, stride):
    return (size - k) // stride + 1


# ----------------------------------------------------------------------------
# Wrapper-side patch gather (pure XLA data movement, fused into the jit).
# Emits conv1 patches duplicated to every (conv2-tap, conv2-position) so the
# in-kernel conv2 im2col is a plain lane-concat of contiguous row slices.
# Row order per block: (tap2 = kh2*3+kw2, p2 = h2*W2+w2, n_local).
# Patch feature order: (C, kh1, kw1), matching w1.reshape(32, C*64).
# TODO(synk): fold this patch gather into the kernel with strided VMEM reads
# to drop the remaining HBM materialization of the patch matrix.
# ----------------------------------------------------------------------------
def build_patches(x, nb):
    N, C, H, W = x.shape
    H1, W1 = _conv_out(H, 8, 4), _conv_out(W, 8, 4)
    H2, W2 = _conv_out(H1, 3, 2), _conv_out(W1, 3, 2)
    nblk = N // nb
    wins = []
    for i in range(8):
        for j in range(8):
            wins.append(x[:, :, i:i + 4 * (H1 - 1) + 1:4,
                             j:j + 4 * (W1 - 1) + 1:4])       # (N, C, H1, W1)
    patches = jnp.stack(wins, axis=2).reshape(N, C * 64, H1, W1)
    patches = patches.transpose(0, 2, 3, 1)                   # (N, H1, W1, C*64)
    taps = []
    for kh in range(3):
        for kw in range(3):
            taps.append(patches[:, kh:kh + 2 * (H2 - 1) + 1:2,
                                   kw:kw + 2 * (W2 - 1) + 1:2, :])  # (N,H2,W2,CK)
    t = jnp.stack(taps, axis=0)                               # (9, N, H2, W2, CK)
    t = t.reshape(9, nblk, nb, H2 * W2, C * 64)
    t = t.transpose(1, 0, 3, 2, 4)                            # (nblk, tap2, p2, n, CK)
    return t.reshape(nblk, 9 * H2 * W2 * nb, C * 64).astype(jnp.bfloat16)


# ----------------------------------------------------------------------------
# One-time parameter preparation (layout permutations + bf16 cast)
# ----------------------------------------------------------------------------
def prepare_params(params, n_out_pad=128):
    bf16, f32 = jnp.bfloat16, jnp.float32
    w1, w2, w3, w4, w5 = (params[k] for k in ("w1", "w2", "w3", "w4", "w5"))
    c3 = w3.shape[0]                       # 64
    n_sp3 = w4.shape[1] // c3              # H3*W3 = 15
    n_out = w5.shape[0]
    assert n_out <= n_out_pad

    # fc5 padded to a lane-dense 128-wide output (zeros in the extra lanes).
    w5_pad = jnp.zeros((w5.shape[1], n_out_pad), f32).at[:, :n_out].set(w5.T)
    b5_pad = jnp.zeros((1, n_out_pad), f32).at[0, :n_out].set(params["b5"])

    w4_perm = (w4.reshape(w4.shape[0], c3, n_sp3)            # (512, 64, 15)
                 .transpose(2, 1, 0)                          # (15, 64, 512)
                 .reshape(n_sp3 * c3, w4.shape[0]))           # (960, 512)

    return {
        # conv1: (32, C, 8, 8) -> (C*64, 32); patch feature order (C, kh, kw)
        "w1": w1.reshape(w1.shape[0], -1).T.astype(bf16),
        "b1": params["b1"].reshape(1, -1).astype(f32),
        # conv2/3: taps fused along K -> (9*C_in, C_out), tap-major feature order
        "w2": w2.transpose(2, 3, 1, 0).reshape(9 * w2.shape[1], w2.shape[0]).astype(bf16),
        "b2": params["b2"].reshape(1, -1).astype(f32),
        "w3": w3.transpose(2, 3, 1, 0).reshape(9 * w3.shape[1], w3.shape[0]).astype(bf16),
        "b3": params["b3"].reshape(1, -1).astype(f32),
        # fc4: torch (512, 960) with feature order (c, h, w) -> (960, 512) with
        #      feature order (r = h*W3+w, c) to match the in-kernel lane-concat
        "w4": w4_perm.astype(bf16),
        "b4": params["b4"].reshape(1, -1).astype(f32),
        "w5": w5_pad.astype(bf16),
        "b5": b5_pad,
    }


# ----------------------------------------------------------------------------
# The fused Pallas kernel: whole network per batch block, all in VMEM.
# Activation row order is spatial-major, sample-minor so every tap / flatten
# extraction is a contiguous static row slice (no gathers, no strided reads).
# ----------------------------------------------------------------------------
def _net_fused_kernel(p1_ref, w1_ref, b1_ref, w2_ref, b2_ref, w3_ref, b3_ref,
                      w4_ref, b4_ref, w5_ref, b5_ref, out_ref,
                      *, nb, H2, W2, H3, W3):
    f32, bf16 = jnp.float32, jnp.bfloat16
    m2 = H2 * W2 * nb                      # conv2 output rows per block
    n_rr = (H3 - 1) * W2 + W3              # shifted conv3 rows per sample
    m3 = n_rr * nb

    # conv1 at the duplicated (tap2, p2, n) positions: one K=C*64 matmul.
    h1 = jnp.dot(p1_ref[0], w1_ref[...], preferred_element_type=f32)
    h1 = jnp.maximum(h1 + b1_ref[...], 0.0).astype(bf16)          # (9*m2, 32)

    # conv2: im2col = lane-concat of the 9 per-tap row groups -> one K=288 matmul.
    x2 = jnp.concatenate([h1[t * m2:(t + 1) * m2, :] for t in range(9)], axis=1)
    h2 = jnp.dot(x2, w2_ref[...], preferred_element_type=f32)
    h2 = jnp.maximum(h2 + b2_ref[...], 0.0).astype(bf16)          # (m2, 64)

    # conv3 (stride 1): taps are contiguous shifted row slices of h2
    # -> one K=576 matmul.  Rows with w3 >= W3 are garbage and never consumed.
    x3 = jnp.concatenate(
        [h2[(kh * W2 + kw) * nb:(kh * W2 + kw) * nb + m3, :]
         for kh in range(3) for kw in range(3)], axis=1)          # (m3, 576)
    h3 = jnp.dot(x3, w3_ref[...], preferred_element_type=f32)
    h3 = jnp.maximum(h3 + b3_ref[...], 0.0).astype(bf16)          # (m3, 64)

    # fc4: per-sample flatten of the H3*W3 valid spatial rows via lane-concat
    # -> one (nb, 960) @ (960, 512) matmul.
    x4 = jnp.concatenate(
        [h3[(h * W2 + w) * nb:(h * W2 + w + 1) * nb, :]
         for h in range(H3) for w in range(W3)], axis=1)          # (nb, 960)
    h4 = jnp.dot(x4, w4_ref[...], preferred_element_type=f32)
    h4 = jnp.maximum(h4 + b4_ref[...], 0.0).astype(bf16)          # (nb, 512)

    # fc5 (no ReLU), lane-dense padded output -> the only HBM store.
    out = jnp.dot(h4, w5_ref[...], preferred_element_type=f32) + b5_ref[...]
    out_ref[0] = out.astype(out_ref.dtype)                        # (nb, 128)


# ----------------------------------------------------------------------------
# Jitted forward: XLA patch gather + one fused pallas_call
# ----------------------------------------------------------------------------
@functools.partial(jax.jit, static_argnames=("n_out", "nb"))
def net_forward(prep, x, *, n_out, nb=8):
    N, C, H, W = x.shape
    # TODO(synk): pad or add a remainder block for batches not divisible by nb.
    assert N % nb == 0, (N, nb)
    H1, W1 = _conv_out(H, 8, 4), _conv_out(W, 8, 4)
    H2, W2 = _conv_out(H1, 3, 2), _conv_out(W1, 3, 2)
    H3, W3 = _conv_out(H2, 3, 1), _conv_out(W2, 3, 1)
    nblk = N // nb
    CK = C * 64
    m1 = 9 * H2 * W2 * nb
    n_out_pad = prep["w5"].shape[1]
    assert prep["w1"].shape[0] == CK
    assert prep["w4"].shape[0] == H3 * W3 * 64   # fc4 expects 960 features

    p1 = build_patches(x, nb)                    # (nblk, m1, CK) bf16

    def _const_spec(arr):
        nd = arr.ndim
        return pl.BlockSpec(arr.shape, lambda i, _nd=nd: (0,) * _nd)

    kernel = functools.partial(_net_fused_kernel, nb=nb, H2=H2, W2=W2, H3=H3, W3=W3)
    out = pl.pallas_call(
        kernel,
        out_shape=jax.ShapeDtypeStruct((nblk, nb, n_out_pad), jnp.float32),
        grid=(nblk,),
        in_specs=[pl.BlockSpec((1, m1, CK), lambda i: (i, 0, 0))]
                 + [_const_spec(prep[k]) for k in
                    ("w1", "b1", "w2", "b2", "w3", "b3", "w4", "b4", "w5", "b5")],
        out_specs=pl.BlockSpec((1, nb, n_out_pad), lambda i: (i, 0, 0)),
        compiler_params=pltpu.CompilerParams(
            dimension_semantics=("parallel",)),   # 2-TC sharding on v7x
    )(p1, prep["w1"], prep["b1"], prep["w2"], prep["b2"], prep["w3"],
      prep["b3"], prep["w4"], prep["b4"], prep["w5"], prep["b5"])
    return out.reshape(N, n_out_pad)[:, :n_out]


# ----------------------------------------------------------------------------
# Parameter construction (mirrors the torch module's init shapes)
# ----------------------------------------------------------------------------
def init_params(key, n_channel, n_out):
    ks = jax.random.split(key, 10)

    def kaiming(k, shape, fan_in):
        return jax.random.normal(k, shape, jnp.float32) * jnp.sqrt(2.0 / fan_in)

    def torch_default_bias(k, fan_in, n):
        bound = 1.0 / jnp.sqrt(fan_in)
        return jax.random.uniform(k, (n,), jnp.float32, -bound, bound)

    params = {}
    params["w1"] = kaiming(ks[0], (32, n_channel, 8, 8), n_channel * 8 * 8)
    params["b1"] = torch_default_bias(ks[1], n_channel * 8 * 8, 32)
    params["w2"] = kaiming(ks[2], (64, 32, 3, 3), 32 * 3 * 3)
    params["b2"] = torch_default_bias(ks[3], 32 * 3 * 3, 64)
    params["w3"] = kaiming(ks[4], (64, 64, 3, 3), 64 * 3 * 3)
    params["b3"] = torch_default_bias(ks[5], 64 * 3 * 3, 64)
    params["w4"] = kaiming(ks[6], (512, 960), 960)
    params["b4"] = torch_default_bias(ks[7], 960, 512)
    bound5 = 1.0 / jnp.sqrt(512.0)
    params["w5"] = jax.random.uniform(ks[8], (n_out, 512), jnp.float32, -bound5, bound5)
    params["b5"] = torch_default_bias(ks[9], 512, n_out)
    return params


# ----------------------------------------------------------------------------
# Pure-JAX reference (f32, HIGHEST precision) for a sanity check
# ----------------------------------------------------------------------------
def net_reference(params, x):
    def conv(h, w, b, stride):
        y = jax.lax.conv_general_dilated(
            h, w, window_strides=(stride, stride), padding="VALID",
            dimension_numbers=("NCHW", "OIHW", "NCHW"),
            precision=jax.lax.Precision.HIGHEST)
        return jax.nn.relu(y + b[None, :, None, None])

    h = conv(x, params["w1"], params["b1"], 4)
    h = conv(h, params["w2"], params["b2"], 2)
    h = conv(h, params["w3"], params["b3"], 1)
    h = h.reshape(h.shape[0], -1)
    h = jax.nn.relu(h @ params["w4"].T + params["b4"])
    return h @ params["w5"].T + params["b5"]


if __name__ == "__main__":
    # 48x64 input -> conv stack yields 64*3*5 = 960 flattened features (fc4 input).
    n_channel, n_out, batch, nb = 4, 8, 16, 8   # nb=8 per step, nblk=2 blocks
    key = jax.random.PRNGKey(0)
    k_x, k_p = jax.random.split(key)
    x = jax.random.normal(k_x, (batch, n_channel, 48, 64), jnp.float32)
    params = init_params(k_p, n_channel, n_out)

    prep = prepare_params(params)               # one-time layout prep (bf16 weights)
    out = net_forward(prep, x, n_out=n_out, nb=nb)
    out = jax.block_until_ready(out)
    assert out.shape == (batch, n_out), out.shape
    assert bool(jnp.all(jnp.isfinite(out)))

    # loose bf16-tolerance check against the f32 reference
    ref = net_reference(params, x)
    err = float(jnp.max(jnp.abs(out - ref)))
    scale = float(jnp.max(jnp.abs(ref))) + 1e-6
    assert err <= 0.1 * scale + 0.1, (err, scale)

    print("KERNEL_OK")
</pallas_src>

<mosaic_0001>
module attributes {stable_mosaic.version = 11 : i64} {
  func.func @_net_fused_kernel(%arg0: i32, %arg1: memref<1x2520x256xbf16, #tpu.memory_space<vmem>>, %arg2: memref<256x32xbf16, #tpu.memory_space<vmem>>, %arg3: memref<1x32xf32, #tpu.memory_space<vmem>>, %arg4: memref<288x64xbf16, #tpu.memory_space<vmem>>, %arg5: memref<1x64xf32, #tpu.memory_space<vmem>>, %arg6: memref<576x64xbf16, #tpu.memory_space<vmem>>, %arg7: memref<1x64xf32, #tpu.memory_space<vmem>>, %arg8: memref<960x512xbf16, #tpu.memory_space<vmem>>, %arg9: memref<1x512xf32, #tpu.memory_space<vmem>>, %arg10: memref<512x128xbf16, #tpu.memory_space<vmem>>, %arg11: memref<1x128xf32, #tpu.memory_space<vmem>>, %arg12: memref<1x8x128xf32, #tpu.memory_space<vmem>>) attributes {dimension_semantics = [#tpu.dimension_semantics<parallel>], iteration_bounds = array<i64: 2>, scalar_prefetch = 0 : i64, scratch_operands = 0 : i64, tpu.core_type = #tpu.core_type<tc>, window_params = [{transform_indices = @transform_0, window_bounds = array<i64: 1, 2520, 256>}, {pipeline_mode = #tpu.pipeline_mode<synchronous>, transform_indices = @transform_1, window_bounds = array<i64: 256, 32>}, {pipeline_mode = #tpu.pipeline_mode<synchronous>, transform_indices = @transform_2, window_bounds = array<i64: 1, 32>}, {pipeline_mode = #tpu.pipeline_mode<synchronous>, transform_indices = @transform_3, window_bounds = array<i64: 288, 64>}, {pipeline_mode = #tpu.pipeline_mode<synchronous>, transform_indices = @transform_4, window_bounds = array<i64: 1, 64>}, {pipeline_mode = #tpu.pipeline_mode<synchronous>, transform_indices = @transform_5, window_bounds = array<i64: 576, 64>}, {pipeline_mode = #tpu.pipeline_mode<synchronous>, transform_indices = @transform_6, window_bounds = array<i64: 1, 64>}, {pipeline_mode = #tpu.pipeline_mode<synchronous>, transform_indices = @transform_7, window_bounds = array<i64: 960, 512>}, {pipeline_mode = #tpu.pipeline_mode<synchronous>, transform_indices = @transform_8, window_bounds = array<i64: 1, 512>}, {pipeline_mode = #tpu.pipeline_mode<synchronous>, transform_indices = @transform_9, window_bounds = array<i64: 512, 128>}, {pipeline_mode = #tpu.pipeline_mode<synchronous>, transform_indices = @transform_10, window_bounds = array<i64: 1, 128>}, {transform_indices = @transform_11, window_bounds = array<i64: 1, 8, 128>}]} {
    %c0 = arith.constant 0 : index
    %c0_0 = arith.constant 0 : index
    %c0_1 = arith.constant 0 : index
    %0 = vector.load %arg1[%c0, %c0_0, %c0_1] : memref<1x2520x256xbf16, #tpu.memory_space<vmem>>, vector<1x2520x256xbf16>
    %1 = vector.shape_cast %0 : vector<1x2520x256xbf16> to vector<2520x256xbf16>
    %c0_2 = arith.constant 0 : index
    %c0_3 = arith.constant 0 : index
    %2 = vector.load %arg2[%c0_2, %c0_3] : memref<256x32xbf16, #tpu.memory_space<vmem>>, vector<256x32xbf16>
    %cst = arith.constant dense<0.000000e+00> : vector<2520x32xf32>
    %3 = tpu.matmul %1, %2, %cst {dimension_numbers = #tpu.dot_dimension_numbers<[1], [0], [0], [1], [0, 0, 1, 1], [], []>} : vector<2520x256xbf16>, vector<256x32xbf16>, vector<2520x32xf32> -> vector<2520x32xf32>
    %c0_4 = arith.constant 0 : index
    %c0_5 = arith.constant 0 : index
    %4 = vector.load %arg3[%c0_4, %c0_5] : memref<1x32xf32, #tpu.memory_space<vmem>>, vector<1x32xf32>
    %5 = vector.broadcast %4 : vector<1x32xf32> to vector<2520x32xf32>
    %6 = arith.addf %3, %5 : vector<2520x32xf32>
    %cst_6 = arith.constant 0.000000e+00 : f32
    %7 = vector.broadcast %cst_6 : f32 to vector<2520x32xf32>
    %8 = arith.maximumf %6, %7 : vector<2520x32xf32>
    %9 = arith.truncf %8 : vector<2520x32xf32> to vector<2520x32xbf16>
    %10 = vector.extract_strided_slice %9 {offsets = [0, 0], sizes = [280, 32], strides = [1, 1]} : vector<2520x32xbf16> to vector<280x32xbf16>
    %11 = vector.extract_strided_slice %9 {offsets = [280, 0], sizes = [280, 32], strides = [1, 1]} : vector<2520x32xbf16> to vector<280x32xbf16>
    %12 = vector.extract_strided_slice %9 {offsets = [560, 0], sizes = [280, 32], strides = [1, 1]} : vector<2520x32xbf16> to vector<280x32xbf16>
    %13 = vector.extract_strided_slice %9 {offsets = [840, 0], sizes = [280, 32], strides = [1, 1]} : vector<2520x32xbf16> to vector<280x32xbf16>
    %14 = vector.extract_strided_slice %9 {offsets = [1120, 0], sizes = [280, 32], strides = [1, 1]} : vector<2520x32xbf16> to vector<280x32xbf16>
    %15 = vector.extract_strided_slice %9 {offsets = [1400, 0], sizes = [280, 32], strides = [1, 1]} : vector<2520x32xbf16> to vector<280x32xbf16>
    %16 = vector.extract_strided_slice %9 {offsets = [1680, 0], sizes = [280, 32], strides = [1, 1]} : vector<2520x32xbf16> to vector<280x32xbf16>
    %17 = vector.extract_strided_slice %9 {offsets = [1960, 0], sizes = [280, 32], strides = [1, 1]} : vector<2520x32xbf16> to vector<280x32xbf16>
    %18 = vector.extract_strided_slice %9 {offsets = [2240, 0], sizes = [280, 32], strides = [1, 1]} : vector<2520x32xbf16> to vector<280x32xbf16>
    %19 = tpu.concatenate %10, %11, %12, %13, %14, %15, %16, %17, %18 in 1 : vector<280x32xbf16>, vector<280x32xbf16>, vector<280x32xbf16>, vector<280x32xbf16>, vector<280x32xbf16>, vector<280x32xbf16>, vector<280x32xbf16>, vector<280x32xbf16>, vector<280x32xbf16> -> vector<280x288xbf16>
    %c0_7 = arith.constant 0 : index
    %c0_8 = arith.constant 0 : index
    %20 = vector.load %arg4[%c0_7, %c0_8] : memref<288x64xbf16, #tpu.memory_space<vmem>>, vector<288x64xbf16>
    %cst_9 = arith.constant dense<0.000000e+00> : vector<280x64xf32>
    %21 = tpu.matmul %19, %20, %cst_9 {dimension_numbers = #tpu.dot_dimension_numbers<[1], [0], [0], [1], [0, 0, 1, 1], [], []>} : vector<280x288xbf16>, vector<288x64xbf16>, vector<280x64xf32> -> vector<280x64xf32>
    %c0_10 = arith.constant 0 : index
    %c0_11 = arith.constant 0 : index
    %22 = vector.load %arg5[%c0_10, %c0_11] : memref<1x64xf32, #tpu.memory_space<vmem>>, vector<1x64xf32>
    %23 = vector.broadcast %22 : vector<1x64xf32> to vector<280x64xf32>
    %24 = arith.addf %21, %23 : vector<280x64xf32>
    %cst_12 = arith.constant 0.000000e+00 : f32
    %25 = vector.broadcast %cst_12 : f32 to vector<280x64xf32>
    %26 = arith.maximumf %24, %25 : vector<280x64xf32>
    %27 = arith.truncf %26 : vector<280x64xf32> to vector<280x64xbf16>
    %28 = vector.extract_strided_slice %27 {offsets = [0, 0], sizes = [152, 64], strides = [1, 1]} : vector<280x64xbf16> to vector<152x64xbf16>
    %29 = vector.extract_strided_slice %27 {offsets = [8, 0], sizes = [152, 64], strides = [1, 1]} : vector<280x64xbf16> to vector<152x64xbf16>
    %30 = vector.extract_strided_slice %27 {offsets = [16, 0], sizes = [152, 64], strides = [1, 1]} : vector<280x64xbf16> to vector<152x64xbf16>
    %31 = vector.extract_strided_slice %27 {offsets = [56, 0], sizes = [152, 64], strides = [1, 1]} : vector<280x64xbf16> to vector<152x64xbf16>
    %32 = vector.extract_strided_slice %27 {offsets = [64, 0], sizes = [152, 64], strides = [1, 1]} : vector<280x64xbf16> to vector<152x64xbf16>
    %33 = vector.extract_strided_slice %27 {offsets = [72, 0], sizes = [152, 64], strides = [1, 1]} : vector<280x64xbf16> to vector<152x64xbf16>
    %34 = vector.extract_strided_slice %27 {offsets = [112, 0], sizes = [152, 64], strides = [1, 1]} : vector<280x64xbf16> to vector<152x64xbf16>
    %35 = vector.extract_strided_slice %27 {offsets = [120, 0], sizes = [152, 64], strides = [1, 1]} : vector<280x64xbf16> to vector<152x64xbf16>
    %36 = vector.extract_strided_slice %27 {offsets = [128, 0], sizes = [152, 64], strides = [1, 1]} : vector<280x64xbf16> to vector<152x64xbf16>
    %37 = tpu.concatenate %28, %29, %30, %31, %32, %33, %34, %35, %36 in 1 : vector<152x64xbf16>, vector<152x64xbf16>, vector<152x64xbf16>, vector<152x64xbf16>, vector<152x64xbf16>, vector<152x64xbf16>, vector<152x64xbf16>, vector<152x64xbf16>, vector<152x64xbf16> -> vector<152x576xbf16>
    %c0_13 = arith.constant 0 : index
    %c0_14 = arith.constant 0 : index
    %38 = vector.load %arg6[%c0_13, %c0_14] : memref<576x64xbf16, #tpu.memory_space<vmem>>, vector<576x64xbf16>
    %cst_15 = arith.constant dense<0.000000e+00> : vector<152x64xf32>
    %39 = tpu.matmul %37, %38, %cst_15 {dimension_numbers = #tpu.dot_dimension_numbers<[1], [0], [0], [1], [0, 0, 1, 1], [], []>} : vector<152x576xbf16>, vector<576x64xbf16>, vector<152x64xf32> -> vector<152x64xf32>
    %c0_16 = arith.constant 0 : index
    %c0_17 = arith.constant 0 : index
    %40 = vector.load %arg7[%c0_16, %c0_17] : memref<1x64xf32, #tpu.memory_space<vmem>>, vector<1x64xf32>
    %41 = vector.broadcast %40 : vector<1x64xf32> to vector<152x64xf32>
    %42 = arith.addf %39, %41 : vector<152x64xf32>
    %cst_18 = arith.constant 0.000000e+00 : f32
    %43 = vector.broadcast %cst_18 : f32 to vector<152x64xf32>
    %44 = arith.maximumf %42, %43 : vector<152x64xf32>
    %45 = arith.truncf %44 : vector<152x64xf32> to vector<152x64xbf16>
    %46 = vector.extract_strided_slice %45 {offsets = [0, 0], sizes = [8, 64], strides = [1, 1]} : vector<152x64xbf16> to vector<8x64xbf16>
    %47 = vector.extract_strided_slice %45 {offsets = [8, 0], sizes = [8, 64], strides = [1, 1]} : vector<152x64xbf16> to vector<8x64xbf16>
    %48 = vector.extract_strided_slice %45 {offsets = [16, 0], sizes = [8, 64], strides = [1, 1]} : vector<152x64xbf16> to vector<8x64xbf16>
    %49 = vector.extract_strided_slice %45 {offsets = [24, 0], sizes = [8, 64], strides = [1, 1]} : vector<152x64xbf16> to vector<8x64xbf16>
    %50 = vector.extract_strided_slice %45 {offsets = [32, 0], sizes = [8, 64], strides = [1, 1]} : vector<152x64xbf16> to vector<8x64xbf16>
    %51 = vector.extract_strided_slice %45 {offsets = [56, 0], sizes = [8, 64], strides = [1, 1]} : vector<152x64xbf16> to vector<8x64xbf16>
    %52 = vector.extract_strided_slice %45 {offsets = [64, 0], sizes = [8, 64], strides = [1, 1]} : vector<152x64xbf16> to vector<8x64xbf16>
    %53 = vector.extract_strided_slice %45 {offsets = [72, 0], sizes = [8, 64], strides = [1, 1]} : vector<152x64xbf16> to vector<8x64xbf16>
    %54 = vector.extract_strided_slice %45 {offsets = [80, 0], sizes = [8, 64], strides = [1, 1]} : vector<152x64xbf16> to vector<8x64xbf16>
    %55 = vector.extract_strided_slice %45 {offsets = [88, 0], sizes = [8, 64], strides = [1, 1]} : vector<152x64xbf16> to vector<8x64xbf16>
    %56 = vector.extract_strided_slice %45 {offsets = [112, 0], sizes = [8, 64], strides = [1, 1]} : vector<152x64xbf16> to vector<8x64xbf16>
    %57 = vector.extract_strided_slice %45 {offsets = [120, 0], sizes = [8, 64], strides = [1, 1]} : vector<152x64xbf16> to vector<8x64xbf16>
    %58 = vector.extract_strided_slice %45 {offsets = [128, 0], sizes = [8, 64], strides = [1, 1]} : vector<152x64xbf16> to vector<8x64xbf16>
    %59 = vector.extract_strided_slice %45 {offsets = [136, 0], sizes = [8, 64], strides = [1, 1]} : vector<152x64xbf16> to vector<8x64xbf16>
    %60 = vector.extract_strided_slice %45 {offsets = [144, 0], sizes = [8, 64], strides = [1, 1]} : vector<152x64xbf16> to vector<8x64xbf16>
    %61 = tpu.concatenate %46, %47, %48, %49, %50, %51, %52, %53, %54, %55, %56, %57, %58, %59, %60 in 1 : vector<8x64xbf16>, vector<8x64xbf16>, vector<8x64xbf16>, vector<8x64xbf16>, vector<8x64xbf16>, vector<8x64xbf16>, vector<8x64xbf16>, vector<8x64xbf16>, vector<8x64xbf16>, vector<8x64xbf16>, vector<8x64xbf16>, vector<8x64xbf16>, vector<8x64xbf16>, vector<8x64xbf16>, vector<8x64xbf16> -> vector<8x960xbf16>
    %c0_19 = arith.constant 0 : index
    %c0_20 = arith.constant 0 : index
    %62 = vector.load %arg8[%c0_19, %c0_20] : memref<960x512xbf16, #tpu.memory_space<vmem>>, vector<960x512xbf16>
    %cst_21 = arith.constant dense<0.000000e+00> : vector<8x512xf32>
    %63 = tpu.matmul %61, %62, %cst_21 {dimension_numbers = #tpu.dot_dimension_numbers<[1], [0], [0], [1], [0, 0, 1, 1], [], []>} : vector<8x960xbf16>, vector<960x512xbf16>, vector<8x512xf32> -> vector<8x512xf32>
    %c0_22 = arith.constant 0 : index
    %c0_23 = arith.constant 0 : index
    %64 = vector.load %arg9[%c0_22, %c0_23] : memref<1x512xf32, #tpu.memory_space<vmem>>, vector<1x512xf32>
    %65 = vector.broadcast %64 : vector<1x512xf32> to vector<8x512xf32>
    %66 = arith.addf %63, %65 : vector<8x512xf32>
    %cst_24 = arith.constant 0.000000e+00 : f32
    %67 = vector.broadcast %cst_24 : f32 to vector<8x512xf32>
    %68 = arith.maximumf %66, %67 : vector<8x512xf32>
    %69 = arith.truncf %68 : vector<8x512xf32> to vector<8x512xbf16>
    %c0_25 = arith.constant 0 : index
    %c0_26 = arith.constant 0 : index
    %70 = vector.load %arg10[%c0_25, %c0_26] : memref<512x128xbf16, #tpu.memory_space<vmem>>, vector<512x128xbf16>
    %cst_27 = arith.constant dense<0.000000e+00> : vector<8x128xf32>
    %71 = tpu.matmul %69, %70, %cst_27 {dimension_numbers = #tpu.dot_dimension_numbers<[1], [0], [0], [1], [0, 0, 1, 1], [], []>} : vector<8x512xbf16>, vector<512x128xbf16>, vector<8x128xf32> -> vector<8x128xf32>
    %c0_28 = arith.constant 0 : index
    %c0_29 = arith.constant 0 : index
    %72 = vector.load %arg11[%c0_28, %c0_29] : memref<1x128xf32, #tpu.memory_space<vmem>>, vector<1x128xf32>
    %73 = vector.broadcast %72 : vector<1x128xf32> to vector<8x128xf32>
    %74 = arith.addf %71, %73 : vector<8x128xf32>
    %c0_30 = arith.constant 0 : index
    %c0_31 = arith.constant 0 : index
    %c0_32 = arith.constant 0 : index
    %75 = vector.load %arg12[%c0_30, %c0_31, %c0_32] : memref<1x8x128xf32, #tpu.memory_space<vmem>>, vector<1x8x128xf32>
    %76 = vector.shape_cast %75 : vector<1x8x128xf32> to vector<8x128xf32>
    %77 = vector.shape_cast %74 : vector<8x128xf32> to vector<1x8x128xf32>
    tpu.vector_store %arg12[%c0_30, %c0_31, %c0_32], %77 {strides = array<i32>} : memref<1x8x128xf32, #tpu.memory_space<vmem>>, vector<1x8x128xf32>,
    return
  }
  func.func @transform_0(%arg0: i32) -> (i32, i32, i32) {
    %c0_i32 = arith.constant 0 : i32
    %c0_i32_0 = arith.constant 0 : i32
    %c0_i32_1 = arith.constant 0 : i32
    return %arg0, %c0_i32, %c0_i32_0 : i32, i32, i32
  }
  func.func @transform_1(%arg0: i32) -> (i32, i32) {
    %c0_i32 = arith.constant 0 : i32
    %c0_i32_0 = arith.constant 0 : i32
    %c0_i32_1 = arith.constant 0 : i32
    return %c0_i32, %c0_i32_0 : i32, i32
  }
  func.func @transform_2(%arg0: i32) -> (i32, i32) {
    %c0_i32 = arith.constant 0 : i32
    %c0_i32_0 = arith.constant 0 : i32
    %c0_i32_1 = arith.constant 0 : i32
    return %c0_i32, %c0_i32_0 : i32, i32
  }
  func.func @transform_3(%arg0: i32) -> (i32, i32) {
    %c0_i32 = arith.constant 0 : i32
    %c0_i32_0 = arith.constant 0 : i32
    %c0_i32_1 = arith.constant 0 : i32
    return %c0_i32, %c0_i32_0 : i32, i32
  }
  func.func @transform_4(%arg0: i32) -> (i32, i32) {
    %c0_i32 = arith.constant 0 : i32
    %c0_i32_0 = arith.constant 0 : i32
    %c0_i32_1 = arith.constant 0 : i32
    return %c0_i32, %c0_i32_0 : i32, i32
  }
  func.func @transform_5(%arg0: i32) -> (i32, i32) {
    %c0_i32 = arith.constant 0 : i32
    %c0_i32_0 = arith.constant 0 : i32
    %c0_i32_1 = arith.constant 0 : i32
    return %c0_i32, %c0_i32_0 : i32, i32
  }
  func.func @transform_6(%arg0: i32) -> (i32, i32) {
    %c0_i32 = arith.constant 0 : i32
    %c0_i32_0 = arith.constant 0 : i32
    %c0_i32_1 = arith.constant 0 : i32
    return %c0_i32, %c0_i32_0 : i32, i32
  }
  func.func @transform_7(%arg0: i32) -> (i32, i32) {
    %c0_i32 = arith.constant 0 : i32
    %c0_i32_0 = arith.constant 0 : i32
    %c0_i32_1 = arith.constant 0 : i32
    return %c0_i32, %c0_i32_0 : i32, i32
  }
  func.func @transform_8(%arg0: i32) -> (i32, i32) {
    %c0_i32 = arith.constant 0 : i32
    %c0_i32_0 = arith.constant 0 : i32
    %c0_i32_1 = arith.constant 0 : i32
    return %c0_i32, %c0_i32_0 : i32, i32
  }
  func.func @transform_9(%arg0: i32) -> (i32, i32) {
    %c0_i32 = arith.constant 0 : i32
    %c0_i32_0 = arith.constant 0 : i32
    %c0_i32_1 = arith.constant 0 : i32
    return %c0_i32, %c0_i32_0 : i32, i32
  }
  func.func @transform_10(%arg0: i32) -> (i32, i32) {
    %c0_i32 = arith.constant 0 : i32
    %c0_i32_0 = arith.constant 0 : i32
    %c0_i32_1 = arith.constant 0 : i32
    return %c0_i32, %c0_i32_0 : i32, i32
  }
  func.func @transform_11(%arg0: i32) -> (i32, i32, i32) {
    %c0_i32 = arith.constant 0 : i32
    %c0_i32_0 = arith.constant 0 : i32
    %c0_i32_1 = arith.constant 0 : i32
    return %arg0, %c0_i32, %c0_i32_0 : i32, i32, i32
  }
}

</mosaic_0001>

<bundles_post_ra>
// kernel: net_forward.1
= control target key start
LH: loop header
LB: loop body
LE: loop exit
PB: predicated region body
PF: predicated region fallthrough
CT: control target
= control target key end

     0   :  { %s13105_s17 = smov 0   ;;  %s17437_s0 = inlined_call_operand.vmem [shape: bf16[2,2520,256], index: 0, kind: input, shape index: {}]   ;;  %s17438_s1 = inlined_call_operand.vmem [shape: bf16[256,32], index: 1, kind: input, shape index: {}]   ;;  %s17439_s2 = inlined_call_operand.vmem [shape: f32[1,32], index: 2, kind: input, shape index: {}]   ;;  %s17440_s3 = inlined_call_operand.vmem [shape: bf16[288,64], index: 3, kind: input, shape index: {}]   ;;  %s17441_s4 = inlined_call_operand.vmem [shape: f32[1,64], index: 4, kind: input, shape index: {}]   ;;  %s17442_s5 = inlined_call_operand.vmem [shape: bf16[576,64], index: 5, kind: input, shape index: {}]   ;;  %s17443_s6 = inlined_call_operand.vmem [shape: f32[1,64], index: 6, kind: input, shape index: {}]   ;;  %s17444_s7 = inlined_call_operand.vmem [shape: bf16[960,512], index: 7, kind: input, shape index: {}]   ;;  %s17445_s8 = inlined_call_operand.vmem [shape: f32[1,512], index: 8, kind: input, shape index: {}]   ;;  %s17446_s9 = inlined_call_operand.vmem [shape: bf16[512,128], index: 9, kind: input, shape index: {}]   ;;  %s17447_s10 = inlined_call_operand.vmem [shape: f32[1,128], index: 10, kind: input, shape index: {}]   ;;  %s17448_s11 = inlined_call_operand.vmem [shape: f32[2,8,128], index: 11, kind: output, shape index: {}]  }
   0x1 LB: > { %s9671_s18 = sadd.s32 4294967295, %s13040_s17   ;;  %p9675_p0 = scmp.ge.s32.totalorder %s13040_s17, 1  ;;  %s13040_s17 = sphi %s13105_s17, %s21_s17  }
   0x2   : > { %p337_p1 = scmp.lt.s32.totalorder %s13040_s17, 3 }
   0x4   : > { %p338_p2 = pnand %p9675_p0, %p337_p1 }
   0x6   : > { %341 = sbr.rel (%p338_p2) target bundleno = 3696 (0xe70), region = 64 }
   0xb   : > { %v12657_v0 = vld [vmem:[%s17438_s1 + $0x38] sm:$0xff]  ;;  %v12656_v2 = vld [vmem:[%s17438_s1 + $0x30] sm:$0xff]  ;;  %v12655_v4 = vld [vmem:[%s17438_s1 + $0x28] sm:$0xff]  ;;  %p376_p3 = scmp.lt.s32.totalorder %s9671_s18, 1  ;;  %s13042_s23 = smov 32   ;;  %vm5644_vm0 = vcmask 261120  }
   0xc   : > { %v12665_v1 = vld [vmem:[%s17438_s1 + $0x78] sm:$0xff]  ;;  %2410 = vmatpush.bf16.msra.mxu0 %v12657_v0  ;;  %v12664_v3 = vld [vmem:[%s17438_s1 + $0x70] sm:$0xff]  ;;  %12992 = vmatpush.bf16.msra.mxu2 %v12657_v0  ;;  %v12663_v5 = vld [vmem:[%s17438_s1 + $0x68] sm:$0xff]  ;;  %s13044_s29 = smov 96   ;;  %vm5699_vm1 = vcmask 523264   ;;  %vm5736_vm2 = vcmask 785408  }
   0xd   : > { %3208 = vmatpush.bf16.msra.mxu1 %v12665_v1  ;;  %13000 = vmatpush.bf16.msra.mxu3 %v12665_v1  ;;  %v12654_v6 = vld [vmem:[%s17438_s1 + $0x20] sm:$0xff]  ;;  %v12653_v8 = vld [vmem:[%s17438_s1 + $0x18] sm:$0xff]  ;;  %s17598_s18 = smov (!%p376_p3, %s9671_s18), 1  ;;  %v12652_v10 = vld [vmem:[%s17438_s1 + $0x10] sm:$0xff] }
   0xe   : > { %v12662_v7 = vld [vmem:[%s17438_s1 + $0x60] sm:$0xff]  ;;  %v12661_v9 = vld [vmem:[%s17438_s1 + $0x58] sm:$0xff]  ;;  %v12660_v11 = vld [vmem:[%s17438_s1 + $0x50] sm:$0xff]  ;;  %s13008_s26 = smul.u32 2520, %s17598_s18  ;;  %s9677_s13 = sshll.u32 %s17598_s18, 3 }
   0xf   : > { %v12651_v12 = vld [vmem:[%s17438_s1 + $0x8] sm:$0xff]  ;;  %v12650_v14 = vld [vmem:[%s17438_s1] sm:$0xff] }
  0x10   : > { %2411 = vmatpush.bf16.msra.mxu0 %v12656_v2  ;;  %12993 = vmatpush.bf16.msra.mxu2 %v12656_v2  ;;  %v12659_v13 = vld [vmem:[%s17438_s1 + $0x48] sm:$0xff]  ;;  %s13165_s14 = scalar_lea.vmem %s17437_s0, %s13008_s26  ;;  %v12658_v15 = vld [vmem:[%s17438_s1 + $0x40] sm:$0xff]  ;;  %s13043_s26 = smov 64  }
  0x11   : > { %3209 = vmatpush.bf16.msra.mxu1 %v12664_v3  ;;  %13001 = vmatpush.bf16.msra.mxu3 %v12664_v3  ;;  %v9680_v16 = vld [vmem:[%s13165_s14] sm:$0xf]  ;;  %v12337_v17 = vld [vmem:[%s13165_s14 + $0x4] sm:$0xf0]  ;;  %v12336_v18 = vld [vmem:[%s13165_s14 + $0x4] sm:$0xf] }
  0x12   : > { %v9682_v19 = vld [vmem:[%s13165_s14 + $0x8] sm:$0xf0]  ;;  %v9681_v20 = vor.u32 %v12337_v17, %v9680_v16  ;;  %v9688_v22 = vld [vmem:[%s13165_s14 + $0x10] sm:$0xf]  ;;  %v12339_v23 = vld [vmem:[%s13165_s14 + $0x14] sm:$0xf0] }
  0x13   : > { %v9685_v21 = vor.u32 %v12336_v18, %v9682_v19  ;;  %v12338_v24 = vld [vmem:[%s13165_s14 + $0x14] sm:$0xf]  ;;  %v9690_v25 = vld [vmem:[%s13165_s14 + $0x18] sm:$0xf0]  ;;  %v9689_v26 = vor.u32 %v12339_v23, %v9688_v22  ;;  %v9696_v28 = vld [vmem:[%s13165_s14 + $0x20] sm:$0xf] }
  0x14   : > { %2412 = vmatpush.bf16.msra.mxu0 %v12655_v4  ;;  %12994 = vmatpush.bf16.msra.mxu2 %v12655_v4  ;;  %v9693_v27 = vor.u32 %v12338_v24, %v9690_v25  ;;  %v12341_v29 = vld [vmem:[%s13165_s14 + $0x24] sm:$0xf0]  ;;  %v12340_v30 = vld [vmem:[%s13165_s14 + $0x24] sm:$0xf]  ;;  %v9698_v31 = vld [vmem:[%s13165_s14 + $0x28] sm:$0xf0] }
  0x15   : > { %3210 = vmatpush.bf16.msra.mxu1 %v12663_v5  ;;  %13002 = vmatpush.bf16.msra.mxu3 %v12663_v5  ;;  %v9697_v32 = vor.u32 %v12341_v29, %v9696_v28  ;;  %v9701_v33 = vor.u32 %v12340_v30, %v9698_v31  ;;  %v9704_v34 = vld [vmem:[%s13165_s14 + $0x30] sm:$0xf]  ;;  %v12343_v35 = vld [vmem:[%s13165_s14 + $0x34] sm:$0xf0]  ;;  %v12342_v36 = vld [vmem:[%s13165_s14 + $0x34] sm:$0xf] }
  0x16   : > { %v9706_v37 = vld [vmem:[%s13165_s14 + $0x38] sm:$0xf0]  ;;  %v9705_v38 = vor.u32 %v12343_v35, %v9704_v34  ;;  %v9712_v40 = vld [vmem:[%s13165_s14 + $0x40] sm:$0xf]  ;;  %v12345_v41 = vld [vmem:[%s13165_s14 + $0x44] sm:$0xf0] }
  0x17   : > { %v9709_v39 = vor.u32 %v12342_v36, %v9706_v37  ;;  %v12344_v42 = vld [vmem:[%s13165_s14 + $0x44] sm:$0xf]  ;;  %v9714_v43 = vld [vmem:[%s13165_s14 + $0x48] sm:$0xf0]  ;;  %v9713_v44 = vor.u32 %v12345_v41, %v9712_v40  ;;  %v9720_v46 = vld [vmem:[%s13165_s14 + $0x50] sm:$0xf] }
  0x18   : > { %2413 = vmatpush.bf16.msra.mxu0 %v12654_v6  ;;  %12995 = vmatpush.bf16.msra.mxu2 %v12654_v6  ;;  %v9717_v45 = vor.u32 %v12344_v42, %v9714_v43  ;;  %v12347_v47 = vld [vmem:[%s13165_s14 + $0x54] sm:$0xf0]  ;;  %v12346_v48 = vld [vmem:[%s13165_s14 + $0x54] sm:$0xf]  ;;  %v9722_v49 = vld [vmem:[%s13165_s14 + $0x58] sm:$0xf0] }
  0x19   : > { %3211 = vmatpush.bf16.msra.mxu1 %v12662_v7  ;;  %13003 = vmatpush.bf16.msra.mxu3 %v12662_v7  ;;  %v9721_v50 = vor.u32 %v12347_v47, %v9720_v46  ;;  %v9725_v51 = vor.u32 %v12346_v48, %v9722_v49  ;;  %v9728_v52 = vld [vmem:[%s13165_s14 + $0x60] sm:$0xf]  ;;  %v12349_v53 = vld [vmem:[%s13165_s14 + $0x64] sm:$0xf0]  ;;  %v12348_v54 = vld [vmem:[%s13165_s14 + $0x64] sm:$0xf] }
  0x1a   : > { %v9730_v55 = vld [vmem:[%s13165_s14 + $0x68] sm:$0xf0]  ;;  %v9729_v56 = vor.u32 %v12349_v53, %v9728_v52  ;;  %v9736_v58 = vld [vmem:[%s13165_s14 + $0x70] sm:$0xf]  ;;  %v12351_v59 = vld [vmem:[%s13165_s14 + $0x74] sm:$0xf0] }
  0x1b   : > { %v9733_v57 = vor.u32 %v12348_v54, %v9730_v55  ;;  %v12350_v60 = vld [vmem:[%s13165_s14 + $0x74] sm:$0xf]  ;;  %v9738_v61 = vld [vmem:[%s13165_s14 + $0x78] sm:$0xf0]  ;;  %v9737_v62 = vor.u32 %v12351_v59, %v9736_v58  ;;  %v9744_v0 = vld [vmem:[%s13165_s14 + $0x80] sm:$0xf] }
  0x1c   : > { %2414 = vmatpush.bf16.msra.mxu0 %v12653_v8  ;;  %12996 = vmatpush.bf16.msra.mxu2 %v12653_v8  ;;  %v9741_v63 = vor.u32 %v12350_v60, %v9738_v61  ;;  %v12353_v1 = vld [vmem:[%s13165_s14 + $0x84] sm:$0xf0]  ;;  %v12352_v2 = vld [vmem:[%s13165_s14 + $0x84] sm:$0xf]  ;;  %v9746_v3 = vld [vmem:[%s13165_s14 + $0x88] sm:$0xf0] }
  0x1d   : > { %3212 = vmatpush.bf16.msra.mxu1 %v12661_v9  ;;  %13004 = vmatpush.bf16.msra.mxu3 %v12661_v9  ;;  %v13212_v4 = vld [vmem:[%s17439_s2] ss:$0 sm:$0xff]  ;;  %v9745_v5 = vor.u32 %v12353_v1, %v9744_v0  ;;  %v9749_v6 = vor.u32 %v12352_v2, %v9746_v3  ;;  %v9752_v16 = vld [vmem:[%s13165_s14 + $0x90] sm:$0xf]  ;;  %v12355_v17 = vld [vmem:[%s13165_s14 + $0x94] sm:$0xf0] }
  0x1e   : > { %v12354_v18 = vld [vmem:[%s13165_s14 + $0x94] sm:$0xf]  ;;  %v9754_v19 = vld [vmem:[%s13165_s14 + $0x98] sm:$0xf0]  ;;  %v9753_v23 = vor.u32 %v12355_v17, %v9752_v16  ;;  %v9760_v37 = vld [vmem:[%s13165_s14 + $0xa0] sm:$0xf] }
  0x1f   : > { %v9757_v24 = vor.u32 %v12354_v18, %v9754_v19  ;;  %v9762_v40 = vld [vmem:[%s13165_s14 + $0xa8] sm:$0xf0]  ;;  %v9768_v58 = vld [vmem:[%s13165_s14 + $0xb0] sm:$0xf]  ;;  %v12359_v59 = vld [vmem:[%s13165_s14 + $0xb4] sm:$0xf0] }
  0x20   : > { %2415 = vmatpush.bf16.msra.mxu0 %v12652_v10  ;;  %12997 = vmatpush.bf16.msra.mxu2 %v12652_v10  ;;  %v12358_v60 = vld [vmem:[%s13165_s14 + $0xb4] sm:$0xf]  ;;  %v9770_v61 = vld [vmem:[%s13165_s14 + $0xb8] sm:$0xf0]  ;;  %v9769_v1 = vor.u32 %v12359_v59, %v9768_v58  ;;  %v9776_v16 = vld [vmem:[%s13165_s14 + $0xc0] sm:$0xf] }
  0x21   : > { %3213 = vmatpush.bf16.msra.mxu1 %v12660_v11  ;;  %13005 = vmatpush.bf16.msra.mxu3 %v12660_v11  ;;  %v9773_v2 = vor.u32 %v12358_v60, %v9770_v61  ;;  %v12361_v17 = vld [vmem:[%s13165_s14 + $0xc4] sm:$0xf0]  ;;  %v12360_v18 = vld [vmem:[%s13165_s14 + $0xc4] sm:$0xf]  ;;  %v9778_v19 = vld [vmem:[%s13165_s14 + $0xc8] sm:$0xf0] }
  0x22   : > { %v9792_v60 = vld [vmem:[%s13165_s14 + $0xe0] sm:$0xf]  ;;  %v12365_v61 = vld [vmem:[%s13165_s14 + $0xe4] sm:$0xf0] }
  0x24   : > { %2416 = vmatpush.bf16.msra.mxu0 %v12651_v12  ;;  %12998 = vmatpush.bf16.msra.mxu2 %v12651_v12 }
  0x25   : > { %3214 = vmatpush.bf16.msra.mxu1 %v12659_v13  ;;  %13006 = vmatpush.bf16.msra.mxu3 %v12659_v13 }
  0x28   : > { %2417 = vmatpush.bf16.msra.mxu0 %v12650_v14  ;;  %12999 = vmatpush.bf16.msra.mxu2 %v12650_v14 }
  0x29   : > { %3215 = vmatpush.bf16.msra.mxu1 %v12658_v15  ;;  %13007 = vmatpush.bf16.msra.mxu3 %v12658_v15 }
  0x2b   : > { %2418 = vmatmul.bf16.vlgmr.msra.gmra.mxu0 %v9681_v20 }
  0x2c   : > { %3216 = vmatmul.bf16.vlgmr.msra.gmra.mxu1 %v9685_v21 }
  0x3b   : > { %2423 = vmatmul.bf16.gmra.mxu0 %v9689_v26 }
  0x3c   : > { %3221 = vmatmul.bf16.gmra.mxu1 %v9693_v27 }
  0x4b   : > { %2428 = vmatmul.bf16.gmra.mxu0 %v9697_v32 }
  0x4c   : > { %3226 = vmatmul.bf16.gmra.mxu1 %v9701_v33 }
  0x5b   : > { %2433 = vmatmul.bf16.gmra.mxu0 %v9705_v38  ;;  %v12357_v38 = vld [vmem:[%s13165_s14 + $0xa4] sm:$0xf0] }
  0x5c   : > { %3231 = vmatmul.bf16.gmra.mxu1 %v9709_v39  ;;  %v12356_v39 = vld [vmem:[%s13165_s14 + $0xa4] sm:$0xf] }
  0x6b   : > { %2438 = vmatmul.bf16.gmra.mxu0 %v9713_v44  ;;  %v9761_v44 = vor.u32 %v12357_v38, %v9760_v37  ;;  %v9784_v38 = vld [vmem:[%s13165_s14 + $0xd0] sm:$0xf] }
  0x6c   : > { %3236 = vmatmul.bf16.gmra.mxu1 %v9717_v45  ;;  %v9765_v45 = vor.u32 %v12356_v39, %v9762_v40  ;;  %v12363_v39 = vld [vmem:[%s13165_s14 + $0xd4] sm:$0xf0]  ;;  %v12362_v40 = vld [vmem:[%s13165_s14 + $0xd4] sm:$0xf] }
  0x7b   : > { %2443 = vmatmul.bf16.gmra.mxu0 %v9721_v50 }
  0x7c   : > { %3241 = vmatmul.bf16.gmra.mxu1 %v9725_v51 }
  0x8b   : > { %2448 = vmatmul.bf16.gmra.mxu0 %v9729_v56 }
  0x8c   : > { %3246 = vmatmul.bf16.gmra.mxu1 %v9733_v57 }
  0x9b   : > { %2453 = vmatmul.bf16.gmra.mxu0 %v9737_v62 }
  0x9c   : > { %3251 = vmatmul.bf16.gmra.mxu1 %v9741_v63 }
  0xa8   : > { %v2419_v7 = vpop.f32.mrf.mxu0 }
  0xa9   : > { %v3217_v8 = vpop.f32.mrf.mxu1  ;;  %v2420_v9 = vadd.f32 %v13212_v4, %v2419_v7 }
  0xab   : > { %v3218_v10 = vadd.f32 %v3217_v8, %v2420_v9  ;;  %2458 = vmatmul.bf16.gmra.mxu0 %v9745_v5 }
  0xac   : > { %3256 = vmatmul.bf16.gmra.mxu1 %v9749_v6 }
  0xad   : > { %v4006_v13 = vmax.f32 %v3218_v10, 0.0 }
  0xaf   : > { %v4321_v20 = vpack.c.bf16 %v4006_v13, %v4006_v13 }
  0xb0   : > { %v2421_v11 = vpop.f32.mrf.mxu0 }
  0xb1   : > { %v3219_v12 = vpop.f32.mrf.mxu1  ;;  %v2422_v14 = vadd.f32 %v13212_v4, %v2421_v11  ;;  %v4671_v27 = vunpack.c.l.b16 %v4321_v20 }
  0xb3   : > { %v3220_v15 = vadd.f32 %v3219_v12, %v2422_v14 }
  0xb5   : > { %v4007_v21 = vmax.f32 %v3220_v15, 0.0 }
  0xb7   : > { %v4322_v22 = vpack.c.bf16 %v4007_v21, %v4007_v21 }
  0xb8   : > { %v2424_v25 = vpop.f32.mrf.mxu0 }
  0xb9   : > { %v3222_v26 = vpop.f32.mrf.mxu1  ;;  %v4672_v28 = vunpack.c.l.b16 %v4322_v22  ;;  %v2425_v29 = vadd.f32 %v13212_v4, %v2424_v25 }
  0xbb   : > { %v13221_v30 = vpack.c.b16 %v4672_v28, %v4671_v27  ;;  %v3223_v31 = vadd.f32 %v3222_v26, %v2425_v29  ;;  %2463 = vmatmul.bf16.gmra.mxu0 %v9753_v23  ;;  %v9777_v23 = vor.u32 %v12361_v17, %v9776_v16 }
  0xbc   : > { %3261 = vmatmul.bf16.gmra.mxu1 %v9757_v24  ;;  %v9781_v24 = vor.u32 %v12360_v18, %v9778_v19  ;;  %v9800_v19 = vld [vmem:[%s13165_s14 + $0xf0] sm:$0xf] }
  0xbd   : > { %v4008_v34 = vmax.f32 %v3223_v31, 0.0 }
  0xbf   : > { %v4323_v41 = vpack.c.bf16 %v4008_v34, %v4008_v34 }
  0xc0   : > { %v2426_v32 = vpop.f32.mrf.mxu0 }
  0xc1   : > { %v3224_v33 = vpop.f32.mrf.mxu1  ;;  %v2427_v35 = vadd.f32 %v13212_v4, %v2426_v32  ;;  %v4673_v48 = vunpack.c.l.b16 %v4323_v41  ;;  %v9786_v41 = vld [vmem:[%s13165_s14 + $0xd8] sm:$0xf0] }
  0xc3   : > { %v3225_v36 = vadd.f32 %v3224_v33, %v2427_v35 }
  0xc5   : > { %v4009_v42 = vmax.f32 %v3225_v36, 0.0 }
  0xc7   : > { %v4324_v43 = vpack.c.bf16 %v4009_v42, %v4009_v42 }
  0xc8   : > { %v2429_v46 = vpop.f32.mrf.mxu0 }
  0xc9   : > { %v3227_v47 = vpop.f32.mrf.mxu1  ;;  %v4674_v49 = vunpack.c.l.b16 %v4324_v43  ;;  %v2430_v50 = vadd.f32 %v13212_v4, %v2429_v46  ;;  %v9789_v46 = vor.u32 %v12362_v40, %v9786_v41 }
  0xcb   : > { %v13229_v51 = vpack.c.b16 %v4674_v49, %v4673_v48  ;;  %v3228_v52 = vadd.f32 %v3227_v47, %v2430_v50  ;;  %2468 = vmatmul.bf16.gmra.mxu0 %v9761_v44 }
  0xcc   : > { %3266 = vmatmul.bf16.gmra.mxu1 %v9765_v45  ;;  %v9785_v45 = vor.u32 %v12363_v39, %v9784_v38 }
  0xcd   : > { %v4010_v55 = vmax.f32 %v3228_v52, 0.0 }
  0xcf   : > { %v4325_v62 = vpack.c.bf16 %v4010_v55, %v4010_v55 }
  0xd0   : > { %v2431_v53 = vpop.f32.mrf.mxu0 }
  0xd1   : > { %v3229_v54 = vpop.f32.mrf.mxu1  ;;  %v2432_v56 = vadd.f32 %v13212_v4, %v2431_v53  ;;  %v4675_v6 = vunpack.c.l.b16 %v4325_v62  ;;  %v12364_v62 = vld [vmem:[%s13165_s14 + $0xe4] sm:$0xf] }
  0xd3   : > { %v3230_v57 = vadd.f32 %v3229_v54, %v2432_v56 }
  0xd5   : > { %v4011_v63 = vmax.f32 %v3230_v57, 0.0 }
  0xd7   : > { %v4326_v0 = vpack.c.bf16 %v4011_v63, %v4011_v63  ;;  %v9794_v63 = vld [vmem:[%s13165_s14 + $0xe8] sm:$0xf0] }
  0xd8   : > { %v2434_v3 = vpop.f32.mrf.mxu0 }
  0xd9   : > { %v3232_v5 = vpop.f32.mrf.mxu1  ;;  %v4676_v7 = vunpack.c.l.b16 %v4326_v0  ;;  %v2435_v8 = vadd.f32 %v13212_v4, %v2434_v3  ;;  %v9793_v3 = vor.u32 %v12365_v61, %v9792_v60 }
  0xdb   : > { %v13237_v9 = vpack.c.b16 %v4676_v7, %v4675_v6  ;;  %v3233_v10 = vadd.f32 %v3232_v5, %v2435_v8  ;;  %2473 = vmatmul.bf16.gmra.mxu0 %v9769_v1  ;;  %v9797_v5 = vor.u32 %v12364_v62, %v9794_v63 }
  0xdc   : > { %3271 = vmatmul.bf16.gmra.mxu1 %v9773_v2 }
  0xdd   : > { %v4012_v13 = vmax.f32 %v3233_v10, 0.0 }
  0xdf   : > { %v4327_v20 = vpack.c.bf16 %v4012_v13, %v4012_v13 }
  0xe0   : > { %v2436_v11 = vpop.f32.mrf.mxu0 }
  0xe1   : > { %v3234_v12 = vpop.f32.mrf.mxu1  ;;  %v2437_v14 = vadd.f32 %v13212_v4, %v2436_v11  ;;  %v4677_v27 = vunpack.c.l.b16 %v4327_v20  ;;  %v12367_v20 = vld [vmem:[%s13165_s14 + $0xf4] sm:$0xf0] }
  0xe3   : > { %v3235_v15 = vadd.f32 %v3234_v12, %v2437_v14 }
  0xe5   : > { %v4013_v21 = vmax.f32 %v3235_v15, 0.0 }
  0xe7   : > { %v4328_v22 = vpack.c.bf16 %v4013_v21, %v4013_v21  ;;  %v12366_v21 = vld [vmem:[%s13165_s14 + $0xf4] sm:$0xf] }
  0xe8   : > { %v2439_v25 = vpop.f32.mrf.mxu0 }
  0xe9   : > { %v3237_v26 = vpop.f32.mrf.mxu1  ;;  %v4678_v28 = vunpack.c.l.b16 %v4328_v22  ;;  %v2440_v29 = vadd.f32 %v13212_v4, %v2439_v25  ;;  %v9802_v22 = vld [vmem:[%s13165_s14 + $0xf8] sm:$0xf0] }
  0xeb   : > { %v13245_v31 = vpack.c.b16 %v4678_v28, %v4677_v27  ;;  %v3238_v32 = vadd.f32 %v3237_v26, %v2440_v29  ;;  %2478 = vmatmul.bf16.gmra.mxu0 %v9777_v23  ;;  %v9801_v26 = vor.u32 %v12367_v20, %v9800_v19  ;;  %v9805_v27 = vor.u32 %v12366_v21, %v9802_v22 }
  0xec   : > { %3276 = vmatmul.bf16.gmra.mxu1 %v9781_v24 }
  0xed   : > { %v4014_v35 = vmax.f32 %v3238_v32, 0.0 }
  0xef   : > { %v4329_v42 = vpack.c.bf16 %v4014_v35, %v4014_v35 }
  0xf0   : > { %v2441_v33 = vpop.f32.mrf.mxu0 }
  0xf1   : > { %v3239_v34 = vpop.f32.mrf.mxu1  ;;  %v2442_v36 = vadd.f32 %v13212_v4, %v2441_v33  ;;  %v4679_v49 = vunpack.c.l.b16 %v4329_v42  ;;  %v9808_v42 = vld [vmem:[%s13165_s14 + $0x100] sm:$0xf] }
  0xf3   : > { %v3240_v37 = vadd.f32 %v3239_v34, %v2442_v36 }
  0xf5   : > { %v4015_v43 = vmax.f32 %v3240_v37, 0.0 }
  0xf7   : > { %v4330_v44 = vpack.c.bf16 %v4015_v43, %v4015_v43  ;;  %v12369_v43 = vld [vmem:[%s13165_s14 + $0x104] sm:$0xf0] }
  0xf8   : > { %v2444_v47 = vpop.f32.mrf.mxu0 }
  0xf9   : > { %v3242_v48 = vpop.f32.mrf.mxu1  ;;  %v4680_v50 = vunpack.c.l.b16 %v4330_v44  ;;  %v2445_v52 = vadd.f32 %v13212_v4, %v2444_v47  ;;  %v12368_v44 = vld [vmem:[%s13165_s14 + $0x104] sm:$0xf] }
  0xfb   : > { %v13253_v53 = vpack.c.b16 %v4680_v50, %v4679_v49  ;;  %v3243_v54 = vadd.f32 %v3242_v48, %v2445_v52  ;;  %2483 = vmatmul.bf16.gmra.mxu0 %v9785_v45  ;;  %v9810_v45 = vld [vmem:[%s13165_s14 + $0x108] sm:$0xf0]  ;;  %v9809_v49 = vor.u32 %v12369_v43, %v9808_v42 }
  0xfc   : > { %3281 = vmatmul.bf16.gmra.mxu1 %v9789_v46  ;;  %v9813_v50 = vor.u32 %v12368_v44, %v9810_v45 }
  0xfd   : > { %v4016_v57 = vmax.f32 %v3243_v54, 0.0 }
  0xff   : > { %v4331_v0 = vpack.c.bf16 %v4016_v57, %v4016_v57 }
 0x100   : > { %v2446_v55 = vpop.f32.mrf.mxu0 }
 0x101   : > { %v3244_v56 = vpop.f32.mrf.mxu1  ;;  %v2447_v58 = vadd.f32 %v13212_v4, %v2446_v55  ;;  %v4681_v8 = vunpack.c.l.b16 %v4331_v0 }
 0x103   : > { %v3245_v59 = vadd.f32 %v3244_v56, %v2447_v58 }
 0x105   : > { %v4017_v1 = vmax.f32 %v3245_v59, 0.0 }
 0x107   : > { %v4332_v2 = vpack.c.bf16 %v4017_v1, %v4017_v1  ;;  %v9816_v1 = vld [vmem:[%s13165_s14 + $0x110] sm:$0xf] }
 0x108   : > { %v2449_v6 = vpop.f32.mrf.mxu0 }
 0x109   : > { %v3247_v7 = vpop.f32.mrf.mxu1  ;;  %v4682_v10 = vunpack.c.l.b16 %v4332_v2  ;;  %v2450_v11 = vadd.f32 %v13212_v4, %v2449_v6  ;;  %v12371_v2 = vld [vmem:[%s13165_s14 + $0x114] sm:$0xf0] }
 0x10b   : > { %v13261_v12 = vpack.c.b16 %v4682_v10, %v4681_v8  ;;  %v3248_v13 = vadd.f32 %v3247_v7, %v2450_v11  ;;  %2488 = vmatmul.bf16.gmra.mxu0 %v9793_v3  ;;  %v12370_v3 = vld [vmem:[%s13165_s14 + $0x114] sm:$0xf]  ;;  %v9817_v10 = vor.u32 %v12371_v2, %v9816_v1 }
 0x10c   : > { %3286 = vmatmul.bf16.gmra.mxu1 %v9797_v5  ;;  %v9818_v5 = vld [vmem:[%s13165_s14 + $0x118] sm:$0xf0] }
 0x10d   : > { %v4018_v16 = vmax.f32 %v3248_v13, 0.0  ;;  %v9821_v11 = vor.u32 %v12370_v3, %v9818_v5 }
 0x10f   : > { %v4333_v23 = vpack.c.bf16 %v4018_v16, %v4018_v16 }
 0x110   : > { %v2451_v14 = vpop.f32.mrf.mxu0 }
 0x111   : > { %v3249_v15 = vpop.f32.mrf.mxu1  ;;  %v2452_v17 = vadd.f32 %v13212_v4, %v2451_v14  ;;  %v4683_v32 = vunpack.c.l.b16 %v4333_v23 }
 0x113   : > { %v3250_v18 = vadd.f32 %v3249_v15, %v2452_v17 }
 0x115   : > { %v4019_v24 = vmax.f32 %v3250_v18, 0.0 }
 0x117   : > { %v4334_v25 = vpack.c.bf16 %v4019_v24, %v4019_v24 }
 0x118   : > { %v2454_v28 = vpop.f32.mrf.mxu0 }
 0x119   : > { %v3252_v29 = vpop.f32.mrf.mxu1  ;;  %v4684_v33 = vunpack.c.l.b16 %v4334_v25  ;;  %v2455_v34 = vadd.f32 %v13212_v4, %v2454_v28  ;;  %v9824_v25 = vld [vmem:[%s13165_s14 + $0x120] sm:$0xf]  ;;  %v9826_v28 = vld [vmem:[%s13165_s14 + $0x128] sm:$0xf0] }
 0x11b   : > { %v13269_v35 = vpack.c.b16 %v4684_v33, %v4683_v32  ;;  %v3253_v36 = vadd.f32 %v3252_v29, %v2455_v34  ;;  %2493 = vmatmul.bf16.gmra.mxu0 %v9801_v26  ;;  %v12373_v26 = vld [vmem:[%s13165_s14 + $0x124] sm:$0xf0] }
 0x11c   : > { %3291 = vmatmul.bf16.gmra.mxu1 %v9805_v27  ;;  %v12372_v27 = vld [vmem:[%s13165_s14 + $0x124] sm:$0xf]  ;;  %v9825_v34 = vor.u32 %v12373_v26, %v9824_v25 }
 0x11d   : > { %v4020_v39 = vmax.f32 %v3253_v36, 0.0  ;;  %v9829_v36 = vor.u32 %v12372_v27, %v9826_v28 }
 0x11f   : > { %v4335_v46 = vpack.c.bf16 %v4020_v39, %v4020_v39 }
 0x120   : > { %v2456_v37 = vpop.f32.mrf.mxu0 }
 0x121   : > { %v3254_v38 = vpop.f32.mrf.mxu1  ;;  %v2457_v40 = vadd.f32 %v13212_v4, %v2456_v37  ;;  %v4685_v55 = vunpack.c.l.b16 %v4335_v46 }
 0x123   : > { %v3255_v41 = vadd.f32 %v3254_v38, %v2457_v40 }
 0x125   : > { %v4021_v47 = vmax.f32 %v3255_v41, 0.0 }
 0x127   : > { %v4336_v48 = vpack.c.bf16 %v4021_v47, %v4021_v47 }
 0x128   : > { %v2459_v52 = vpop.f32.mrf.mxu0 }
 0x129   : > { %v3257_v54 = vpop.f32.mrf.mxu1  ;;  %v4686_v56 = vunpack.c.l.b16 %v4336_v48  ;;  %v2460_v57 = vadd.f32 %v13212_v4, %v2459_v52  ;;  %v12374_v52 = vld [vmem:[%s13165_s14 + $0x134] sm:$0xf] }
 0x12b   : > { %v13277_v58 = vpack.c.b16 %v4686_v56, %v4685_v55  ;;  %v3258_v59 = vadd.f32 %v3257_v54, %v2460_v57  ;;  %2498 = vmatmul.bf16.gmra.mxu0 %v9809_v49  ;;  %v9832_v49 = vld [vmem:[%s13165_s14 + $0x130] sm:$0xf]  ;;  %v9834_v54 = vld [vmem:[%s13165_s14 + $0x138] sm:$0xf0] }
 0x12c   : > { %3296 = vmatmul.bf16.gmra.mxu1 %v9813_v50  ;;  %v12375_v50 = vld [vmem:[%s13165_s14 + $0x134] sm:$0xf0] }
 0x12d   : > { %v4022_v62 = vmax.f32 %v3258_v59, 0.0  ;;  %v9833_v59 = vor.u32 %v12375_v50, %v9832_v49 }
 0x12f   : > { %v4337_v6 = vpack.c.bf16 %v4022_v62, %v4022_v62 }
 0x130   : > { %v2461_v60 = vpop.f32.mrf.mxu0 }
 0x131   : > { %v3259_v61 = vpop.f32.mrf.mxu1  ;;  %v2462_v63 = vadd.f32 %v13212_v4, %v2461_v60  ;;  %v4687_v15 = vunpack.c.l.b16 %v4337_v6  ;;  %v9837_v60 = vor.u32 %v12374_v52, %v9834_v54 }
 0x133   : > { %v3260_v0 = vadd.f32 %v3259_v61, %v2462_v63 }
 0x135   : > { %v4023_v7 = vmax.f32 %v3260_v0, 0.0 }
 0x137   : > { %v4338_v8 = vpack.c.bf16 %v4023_v7, %v4023_v7 }
 0x138   : > { %v2464_v13 = vpop.f32.mrf.mxu0 }
 0x139   : > { %v3262_v14 = vpop.f32.mrf.mxu1  ;;  %v4688_v16 = vunpack.c.l.b16 %v4338_v8  ;;  %v2465_v17 = vadd.f32 %v13212_v4, %v2464_v13  ;;  %v12377_v13 = vld [vmem:[%s13165_s14 + $0x144] sm:$0xf0] }
 0x13b   : > { %v13285_v18 = vpack.c.b16 %v4688_v16, %v4687_v15  ;;  %v3263_v19 = vadd.f32 %v3262_v14, %v2465_v17  ;;  %2503 = vmatmul.bf16.gmra.mxu0 %v9817_v10  ;;  %v12376_v14 = vld [vmem:[%s13165_s14 + $0x144] sm:$0xf]  ;;  %v9842_v15 = vld [vmem:[%s13165_s14 + $0x148] sm:$0xf0] }
 0x13c   : > { %3301 = vmatmul.bf16.gmra.mxu1 %v9821_v11  ;;  %v9840_v11 = vld [vmem:[%s13165_s14 + $0x140] sm:$0xf] }
 0x13d   : > { %v4024_v22 = vmax.f32 %v3263_v19, 0.0 }
 0x13f   : > { %v4339_v29 = vpack.c.bf16 %v4024_v22, %v4024_v22 }
 0x140   : > { %v2466_v20 = vpop.f32.mrf.mxu0 }
 0x141   : > { %v3264_v21 = vpop.f32.mrf.mxu1  ;;  %v2467_v23 = vadd.f32 %v13212_v4, %v2466_v20  ;;  %v4689_v39 = vunpack.c.l.b16 %v4339_v29  ;;  %v9841_v20 = vor.u32 %v12377_v13, %v9840_v11 }
 0x143   : > { %v3265_v24 = vadd.f32 %v3264_v21, %v2467_v23  ;;  %v9845_v21 = vor.u32 %v12376_v14, %v9842_v15 }
 0x145   : > { %v4025_v32 = vmax.f32 %v3265_v24, 0.0 }
 0x147   : > { %v4340_v33 = vpack.c.bf16 %v4025_v32, %v4025_v32 }
 0x148   : > { %v2469_v37 = vpop.f32.mrf.mxu0 }
 0x149   : > { %v3267_v38 = vpop.f32.mrf.mxu1  ;;  %v4690_v40 = vunpack.c.l.b16 %v4340_v33  ;;  %v2470_v41 = vadd.f32 %v13212_v4, %v2469_v37  ;;  %v9848_v37 = vld [vmem:[%s13165_s14 + $0x150] sm:$0xf] }
 0x14b   : > { %v13293_v42 = vpack.c.b16 %v4690_v40, %v4689_v39  ;;  %v3268_v43 = vadd.f32 %v3267_v38, %v2470_v41  ;;  %2508 = vmatmul.bf16.gmra.mxu0 %v9825_v34  ;;  %v12379_v38 = vld [vmem:[%s13165_s14 + $0x154] sm:$0xf0]  ;;  %v12378_v39 = vld [vmem:[%s13165_s14 + $0x154] sm:$0xf]  ;;  %v9850_v40 = vld [vmem:[%s13165_s14 + $0x158] sm:$0xf0] }
 0x14c   : > { %3306 = vmatmul.bf16.gmra.mxu1 %v9829_v36 }
 0x14d   : > { %v4026_v46 = vmax.f32 %v3268_v43, 0.0 }
 0x14f   : > { %v4341_v55 = vpack.c.bf16 %v4026_v46, %v4026_v46  ;;  %v9853_v46 = vor.u32 %v12378_v39, %v9850_v40 }
 0x150   : > { %v2471_v44 = vpop.f32.mrf.mxu0 }
 0x151   : > { %v3269_v45 = vpop.f32.mrf.mxu1  ;;  %v2472_v47 = vadd.f32 %v13212_v4, %v2471_v44  ;;  %v4691_v63 = vunpack.c.l.b16 %v4341_v55 }
 0x153   : > { %v3270_v48 = vadd.f32 %v3269_v45, %v2472_v47  ;;  %v9849_v45 = vor.u32 %v12379_v38, %v9848_v37 }
 0x155   : > { %v4027_v56 = vmax.f32 %v3270_v48, 0.0 }
 0x157   : > { %v4342_v57 = vpack.c.bf16 %v4027_v56, %v4027_v56 }
 0x158   : > { %v2474_v61 = vpop.f32.mrf.mxu0 }
 0x159   : > { %v3272_v62 = vpop.f32.mrf.mxu1  ;;  %v4692_v0 = vunpack.c.l.b16 %v4342_v57  ;;  %v2475_v1 = vadd.f32 %v13212_v4, %v2474_v61 }
 0x15b   : > { %v13301_v2 = vpack.c.b16 %v4692_v0, %v4691_v63  ;;  %v3273_v3 = vadd.f32 %v3272_v62, %v2475_v1  ;;  %2513 = vmatmul.bf16.gmra.mxu0 %v9833_v59  ;;  %v9856_v62 = vld [vmem:[%s13165_s14 + $0x160] sm:$0xf]  ;;  %v12381_v63 = vld [vmem:[%s13165_s14 + $0x164] sm:$0xf0]  ;;  %v12380_v0 = vld [vmem:[%s13165_s14 + $0x164] sm:$0xf] }
 0x15c   : > { %3311 = vmatmul.bf16.gmra.mxu1 %v9837_v60  ;;  %v9858_v1 = vld [vmem:[%s13165_s14 + $0x168] sm:$0xf0] }
 0x15d   : > { %v4028_v7 = vmax.f32 %v3273_v3, 0.0 }
 0x15f   : > { %v4343_v16 = vpack.c.bf16 %v4028_v7, %v4028_v7  ;;  %v9857_v7 = vor.u32 %v12381_v63, %v9856_v62 }
 0x160   : > { %v2476_v5 = vpop.f32.mrf.mxu0 }
 0x161   : > { %v3274_v6 = vpop.f32.mrf.mxu1  ;;  %v2477_v8 = vadd.f32 %v13212_v4, %v2476_v5  ;;  %v4693_v24 = vunpack.c.l.b16 %v4343_v16 }
 0x163   : > { %v3275_v10 = vadd.f32 %v3274_v6, %v2477_v8  ;;  %v9861_v8 = vor.u32 %v12380_v0, %v9858_v1 }
 0x165   : > { %v4029_v17 = vmax.f32 %v3275_v10, 0.0 }
 0x167   : > { %v4344_v19 = vpack.c.bf16 %v4029_v17, %v4029_v17 }
 0x168   : > { %v2479_v22 = vpop.f32.mrf.mxu0 }
 0x169   : > { %v3277_v23 = vpop.f32.mrf.mxu1  ;;  %v4694_v25 = vunpack.c.l.b16 %v4344_v19  ;;  %v2480_v26 = vadd.f32 %v13212_v4, %v2479_v22 }
 0x16b   : > { %v13309_v27 = vpack.c.b16 %v4694_v25, %v4693_v24  ;;  %v3278_v28 = vadd.f32 %v3277_v23, %v2480_v26  ;;  %2518 = vmatmul.bf16.gmra.mxu0 %v9841_v20  ;;  %v9864_v24 = vld [vmem:[%s13165_s14 + $0x170] sm:$0xf]  ;;  %v12383_v25 = vld [vmem:[%s13165_s14 + $0x174] sm:$0xf0]  ;;  %v12382_v26 = vld [vmem:[%s13165_s14 + $0x174] sm:$0xf] }
 0x16c   : > { %3316 = vmatmul.bf16.gmra.mxu1 %v9845_v21 }
 0x16d   : > { %v4030_v33 = vmax.f32 %v3278_v28, 0.0  ;;  %v9866_v28 = vld [vmem:[%s13165_s14 + $0x178] sm:$0xf0] }
 0x16f   : > { %v4345_v41 = vpack.c.bf16 %v4030_v33, %v4030_v33 }
 0x170   : > { %v2481_v29 = vpop.f32.mrf.mxu0 }
 0x171   : > { %v3279_v32 = vpop.f32.mrf.mxu1  ;;  %v2482_v34 = vadd.f32 %v13212_v4, %v2481_v29  ;;  %v4695_v49 = vunpack.c.l.b16 %v4345_v41 }
 0x173   : > { %v3280_v36 = vadd.f32 %v3279_v32, %v2482_v34  ;;  %v9865_v34 = vor.u32 %v12383_v25, %v9864_v24 }
 0x175   : > { %v4031_v43 = vmax.f32 %v3280_v36, 0.0  ;;  %v9869_v36 = vor.u32 %v12382_v26, %v9866_v28 }
 0x177   : > { %v4346_v44 = vpack.c.bf16 %v4031_v43, %v4031_v43 }
 0x178   : > { %v2484_v47 = vpop.f32.mrf.mxu0 }
 0x179   : > { %v3282_v48 = vpop.f32.mrf.mxu1  ;;  %v4696_v50 = vunpack.c.l.b16 %v4346_v44  ;;  %v2485_v52 = vadd.f32 %v13212_v4, %v2484_v47 }
 0x17b   : > { %v13317_v54 = vpack.c.b16 %v4696_v50, %v4695_v49  ;;  %v3283_v55 = vadd.f32 %v3282_v48, %v2485_v52  ;;  %2523 = vmatmul.bf16.gmra.mxu0 %v9849_v45  ;;  %v9872_v50 = vld [vmem:[%s13165_s14 + $0x180] sm:$0xf]  ;;  %v12385_v52 = vld [vmem:[%s13165_s14 + $0x184] sm:$0xf0] }
 0x17c   : > { %3321 = vmatmul.bf16.gmra.mxu1 %v9853_v46 }
 0x17d   : > { %v4032_v59 = vmax.f32 %v3283_v55, 0.0  ;;  %v12384_v55 = vld [vmem:[%s13165_s14 + $0x184] sm:$0xf] }
 0x17f   : > { %v4347_v3 = vpack.c.bf16 %v4032_v59, %v4032_v59 }
 0x180   : > { %v2486_v56 = vpop.f32.mrf.mxu0 }
 0x181   : > { %v3284_v57 = vpop.f32.mrf.mxu1  ;;  %v2487_v60 = vadd.f32 %v13212_v4, %v2486_v56  ;;  %v4697_v13 = vunpack.c.l.b16 %v4347_v3  ;;  %v9874_v56 = vld [vmem:[%s13165_s14 + $0x188] sm:$0xf0] }
 0x182   : > { %v9877_v62 = vor.u32 %v12384_v55, %v9874_v56 }
 0x183   : > { %v3285_v61 = vadd.f32 %v3284_v57, %v2487_v60 }
 0x185   : > { %v4033_v5 = vmax.f32 %v3285_v61, 0.0  ;;  %v9873_v61 = vor.u32 %v12385_v52, %v9872_v50 }
 0x187   : > { %v4348_v6 = vpack.c.bf16 %v4033_v5, %v4033_v5 }
 0x188   : > { %v2489_v10 = vpop.f32.mrf.mxu0 }
 0x189   : > { %v3287_v11 = vpop.f32.mrf.mxu1  ;;  %v4698_v14 = vunpack.c.l.b16 %v4348_v6  ;;  %v2490_v15 = vadd.f32 %v13212_v4, %v2489_v10 }
 0x18b   : > { %v13325_v16 = vpack.c.b16 %v4698_v14, %v4697_v13  ;;  %v3288_v17 = vadd.f32 %v3287_v11, %v2490_v15  ;;  %2528 = vmatmul.bf16.gmra.mxu0 %v9857_v7  ;;  %v9880_v15 = vld [vmem:[%s13165_s14 + $0x190] sm:$0xf] }
 0x18c   : > { %3326 = vmatmul.bf16.gmra.mxu1 %v9861_v8 }
 0x18d   : > { %17449 = vst [vmem:[#allocation2_spill] sm:$0xff] %v13325_v16  ;;  %v4034_v21 = vmax.f32 %v3288_v17, 0.0  ;;  %v12387_v17 = vld [vmem:[%s13165_s14 + $0x194] sm:$0xf0] }
 0x18e   : > { %v9881_v24 = vor.u32 %v12387_v17, %v9880_v15 }
 0x18f   : > { %v4349_v29 = vpack.c.bf16 %v4034_v21, %v4034_v21 }
 0x190   : > { %v2491_v19 = vpop.f32.mrf.mxu0 }
 0x191   : > { %v3289_v20 = vpop.f32.mrf.mxu1  ;;  %v2492_v22 = vadd.f32 %v13212_v4, %v2491_v19  ;;  %v4699_v39 = vunpack.c.l.b16 %v4349_v29  ;;  %v12386_v19 = vld [vmem:[%s13165_s14 + $0x194] sm:$0xf] }
 0x193   : > { %v3290_v23 = vadd.f32 %v3289_v20, %v2492_v22  ;;  %v9882_v20 = vld [vmem:[%s13165_s14 + $0x198] sm:$0xf0] }
 0x194   : > { %v9885_v25 = vor.u32 %v12386_v19, %v9882_v20 }
 0x195   : > { %v4035_v32 = vmax.f32 %v3290_v23, 0.0 }
 0x197   : > { %v4350_v33 = vpack.c.bf16 %v4035_v32, %v4035_v32 }
 0x198   : > { %v2494_v37 = vpop.f32.mrf.mxu0 }
 0x199   : > { %v3292_v38 = vpop.f32.mrf.mxu1  ;;  %v4700_v40 = vunpack.c.l.b16 %v4350_v33  ;;  %v2495_v41 = vadd.f32 %v13212_v4, %v2494_v37 }
 0x19b   : > { %v13333_v43 = vpack.c.b16 %v4700_v40, %v4699_v39  ;;  %v3293_v44 = vadd.f32 %v3292_v38, %v2495_v41  ;;  %2533 = vmatmul.bf16.gmra.mxu0 %v9865_v34  ;;  %v9888_v40 = vld [vmem:[%s13165_s14 + $0x1a0] sm:$0xf]  ;;  %v12389_v41 = vld [vmem:[%s13165_s14 + $0x1a4] sm:$0xf0] }
 0x19c   : > { %3331 = vmatmul.bf16.gmra.mxu1 %v9869_v36 }
 0x19d   : > { %17450 = vst [vmem:[#allocation3_spill] sm:$0xff] %v13333_v43  ;;  %v4036_v47 = vmax.f32 %v3293_v44, 0.0  ;;  %v12388_v44 = vld [vmem:[%s13165_s14 + $0x1a4] sm:$0xf] }
 0x19f   : > { %v4351_v57 = vpack.c.bf16 %v4036_v47, %v4036_v47  ;;  %v9889_v47 = vor.u32 %v12389_v41, %v9888_v40  ;;  %v12392_v40 = vld [vmem:[%s13165_s14 + $0x1c4] sm:$0xf]  ;;  %v9906_v41 = vld [vmem:[%s13165_s14 + $0x1c8] sm:$0xf0] }
 0x1a0   : > { %v2496_v45 = vpop.f32.mrf.mxu0 }
 0x1a1   : > { %v3294_v46 = vpop.f32.mrf.mxu1  ;;  %v2497_v48 = vadd.f32 %v13212_v4, %v2496_v45  ;;  %v4701_v1 = vunpack.c.l.b16 %v4351_v57  ;;  %v9890_v45 = vld [vmem:[%s13165_s14 + $0x1a8] sm:$0xf0] }
 0x1a3   : > { %v3295_v49 = vadd.f32 %v3294_v46, %v2497_v48  ;;  %v9893_v48 = vor.u32 %v12388_v44, %v9890_v45  ;;  %v9909_v45 = vor.u32 %v12392_v40, %v9906_v41 }
 0x1a5   : > { %v4037_v59 = vmax.f32 %v3295_v49, 0.0 }
 0x1a7   : > { %v4352_v60 = vpack.c.bf16 %v4037_v59, %v4037_v59 }
 0x1a8   : > { %v2499_v63 = vpop.f32.mrf.mxu0 }
 0x1a9   : > { %v3297_v0 = vpop.f32.mrf.mxu1  ;;  %v4702_v3 = vunpack.c.l.b16 %v4352_v60  ;;  %v2500_v5 = vadd.f32 %v13212_v4, %v2499_v63 }
 0x1ab   : > { %v13341_v6 = vpack.c.b16 %v4702_v3, %v4701_v1  ;;  %v3298_v7 = vadd.f32 %v3297_v0, %v2500_v5  ;;  %2538 = vmatmul.bf16.gmra.mxu0 %v9873_v61 }
 0x1ac   : > { %3336 = vmatmul.bf16.gmra.mxu1 %v9877_v62 }
 0x1ad   : > { %17451 = vst [vmem:[#allocation4_spill] sm:$0xff] %v13341_v6  ;;  %v4038_v11 = vmax.f32 %v3298_v7, 0.0  ;;  %v9896_v7 = vld [vmem:[%s13165_s14 + $0x1b0] sm:$0xf] }
 0x1af   : > { %v4353_v21 = vpack.c.bf16 %v4038_v11, %v4038_v11  ;;  %v9898_v11 = vld [vmem:[%s13165_s14 + $0x1b8] sm:$0xf0] }
 0x1b0   : > { %v2501_v8 = vpop.f32.mrf.mxu0 }
 0x1b1   : > { %v3299_v10 = vpop.f32.mrf.mxu1  ;;  %v2502_v13 = vadd.f32 %v13212_v4, %v2501_v8  ;;  %v4703_v29 = vunpack.c.l.b16 %v4353_v21  ;;  %v12391_v8 = vld [vmem:[%s13165_s14 + $0x1b4] sm:$0xf0] }
 0x1b3   : > { %v3300_v14 = vadd.f32 %v3299_v10, %v2502_v13  ;;  %v12390_v10 = vld [vmem:[%s13165_s14 + $0x1b4] sm:$0xf]  ;;  %v9897_v13 = vor.u32 %v12391_v8, %v9896_v7  ;;  %v9914_v7 = vld [vmem:[%s13165_s14 + $0x1d8] sm:$0xf0] }
 0x1b5   : > { %v4039_v22 = vmax.f32 %v3300_v14, 0.0  ;;  %v9901_v14 = vor.u32 %v12390_v10, %v9898_v11 }
 0x1b7   : > { %v4354_v23 = vpack.c.bf16 %v4039_v22, %v4039_v22 }
 0x1b8   : > { %v2504_v26 = vpop.f32.mrf.mxu0 }
 0x1b9   : > { %v3302_v28 = vpop.f32.mrf.mxu1  ;;  %v4704_v32 = vunpack.c.l.b16 %v4354_v23  ;;  %v2505_v33 = vadd.f32 %v13212_v4, %v2504_v26 }
 0x1bb   : > { %v13349_v34 = vpack.c.b16 %v4704_v32, %v4703_v29  ;;  %v13351_v36 = vadd.f32 %v3302_v28, %v2505_v33  ;;  %2543 = vmatmul.bf16.gmra.mxu0 %v9881_v24 }
 0x1bc   : > { %3341 = vmatmul.bf16.gmra.mxu1 %v9885_v25 }
 0x1bd   : > { %17452 = vst [vmem:[#allocation5_spill] sm:$0xff] %v13349_v34 }
 0x1be   : > { %17453 = vst [vmem:[#allocation6_spill] sm:$0xff] %v13351_v36 }
 0x1c0   : > { %v2506_v37 = vpop.f32.mrf.mxu0 }
 0x1c1   : > { %v3304_v38 = vpop.f32.mrf.mxu1  ;;  %v2507_v39 = vadd.f32 %v13212_v4, %v2506_v37  ;;  %v9904_v37 = vld [vmem:[%s13165_s14 + $0x1c0] sm:$0xf] }
 0x1c3   : > { %v3305_v46 = vadd.f32 %v3304_v38, %v2507_v39  ;;  %v12393_v39 = vld [vmem:[%s13165_s14 + $0x1c4] sm:$0xf0] }
 0x1c4   : > { %v9905_v44 = vor.u32 %v12393_v39, %v9904_v37  ;;  %v12396_v37 = vld [vmem:[%s13165_s14 + $0x1e4] sm:$0xf]  ;;  %v9922_v39 = vld [vmem:[%s13165_s14 + $0x1e8] sm:$0xf0] }
 0x1c5   : > { %v4041_v52 = vmax.f32 %v3305_v46, 0.0  ;;  %v9925_v41 = vor.u32 %v12396_v37, %v9922_v39  ;;  %v9936_v37 = vld [vmem:[%s13165_s14 + $0x200] sm:$0xf] }
 0x1c7   : > { %v4356_v57 = vpack.c.bf16 %v4041_v52, %v4041_v52 }
 0x1c8   : > { %v2509_v49 = vpop.f32.mrf.mxu0 }
 0x1c9   : > { %v3307_v50 = vpop.f32.mrf.mxu1  ;;  %v2510_v55 = vadd.f32 %v13212_v4, %v2509_v49  ;;  %v4759_v63 = vunpack.c.l.b16 %v4356_v57 }
 0x1cb   : > { %v3308_v56 = vadd.f32 %v3307_v50, %v2510_v55  ;;  %2548 = vmatmul.bf16.gmra.mxu0 %v9889_v47 }
 0x1cc   : > { %3346 = vmatmul.bf16.gmra.mxu1 %v9893_v48 }
 0x1cd   : > { %v4042_v59 = vmax.f32 %v3308_v56, 0.0 }
 0x1cf   : > { %v4357_v60 = vpack.c.bf16 %v4042_v59, %v4042_v59 }
 0x1d0   : > { %v2511_v61 = vpop.f32.mrf.mxu0 }
 0x1d1   : > { %v3309_v62 = vpop.f32.mrf.mxu1  ;;  %v4760_v0 = vunpack.c.l.b16 %v4357_v60  ;;  %v2512_v1 = vadd.f32 %v13212_v4, %v2511_v61 }
 0x1d3   : > { %v3310_v3 = vadd.f32 %v3309_v62, %v2512_v1  ;;  %v4794_v5 = vpack.c.b16 %v4760_v0, %v4759_v63  ;;  %v9912_v0 = vld [vmem:[%s13165_s14 + $0x1d0] sm:$0xf] }
 0x1d5   : > { %4812 = vrot.lane.b32.xlu0 %v4794_v5, %s13042_s23  ;;  %v4043_v19 = vmax.f32 %v3310_v3, 0.0  ;;  %v12395_v3 = vld [vmem:[%s13165_s14 + $0x1d4] sm:$0xf0]  ;;  %v12394_v5 = vld [vmem:[%s13165_s14 + $0x1d4] sm:$0xf] }
 0x1d6   : > { %v9913_v8 = vor.u32 %v12395_v3, %v9912_v0  ;;  %v9917_v10 = vor.u32 %v12394_v5, %v9914_v7  ;;  %v12399_v0 = vld [vmem:[%s13165_s14 + $0x1f4] sm:$0xf0]  ;;  %v12398_v3 = vld [vmem:[%s13165_s14 + $0x1f4] sm:$0xf]  ;;  %v9930_v5 = vld [vmem:[%s13165_s14 + $0x1f8] sm:$0xf0] }
 0x1d7   : > { %v4358_v22 = vpack.c.bf16 %v4043_v19, %v4043_v19  ;;  %v10656_v7 = vld [vmem:[%s13165_s14 + $0x7a0] sm:$0xf] }
 0x1d8   : > { %v2514_v15 = vpop.f32.mrf.mxu0 }
 0x1d9   : > { %v3312_v17 = vpop.f32.mrf.mxu1  ;;  %v2515_v20 = vadd.f32 %v13212_v4, %v2514_v15  ;;  %v4761_v28 = vunpack.c.l.b16 %v4358_v22 }
 0x1db   : > { %v3313_v21 = vadd.f32 %v3312_v17, %v2515_v20  ;;  %2553 = vmatmul.bf16.gmra.mxu0 %v9897_v13 }
 0x1dc   : > { %3351 = vmatmul.bf16.gmra.mxu1 %v9901_v14 }
 0x1dd   : > { %v4044_v23 = vmax.f32 %v3313_v21, 0.0 }
 0x1df   : > { %v4359_v24 = vpack.c.bf16 %v4044_v23, %v4044_v23 }
 0x1e0   : > { %v2516_v25 = vpop.f32.mrf.mxu0 }
 0x1e1   : > { %v3314_v26 = vpop.f32.mrf.mxu1  ;;  %v4762_v29 = vunpack.c.l.b16 %v4359_v24  ;;  %v2517_v32 = vadd.f32 %v13212_v4, %v2516_v25 }
 0x1e3   : > { %v3315_v33 = vadd.f32 %v3314_v26, %v2517_v32  ;;  %v13368_v38 = vpack.c.b16 %v4762_v29, %v4761_v28  ;;  %v9920_v29 = vld [vmem:[%s13165_s14 + $0x1e0] sm:$0xf] }
 0x1e5   : > { %v4045_v48 = vmax.f32 %v3315_v33, 0.0  ;;  %v12397_v33 = vld [vmem:[%s13165_s14 + $0x1e4] sm:$0xf0] }
 0x1e6   : > { %v9921_v40 = vor.u32 %v12397_v33, %v9920_v29 }
 0x1e7   : > { %v4360_v52 = vpack.c.bf16 %v4045_v48, %v4045_v48 }
 0x1e8   : > { %v2519_v46 = vpop.f32.mrf.mxu0 }
 0x1e9   : > { %v3317_v47 = vpop.f32.mrf.mxu1  ;;  %v2520_v49 = vadd.f32 %v13212_v4, %v2519_v46  ;;  %v4763_v60 = vunpack.c.l.b16 %v4360_v52 }
 0x1eb   : > { %v3318_v50 = vadd.f32 %v3317_v47, %v2520_v49  ;;  %2558 = vmatmul.bf16.gmra.mxu0 %v9905_v44 }
 0x1ec   : > { %3356 = vmatmul.bf16.gmra.mxu1 %v9909_v45 }
 0x1ed   : > { %v4046_v55 = vmax.f32 %v3318_v50, 0.0 }
 0x1ef   : > { %v4361_v56 = vpack.c.bf16 %v4046_v55, %v4046_v55 }
 0x1f0   : > { %v2521_v57 = vpop.f32.mrf.mxu0 }
 0x1f1   : > { %v3319_v59 = vpop.f32.mrf.mxu1  ;;  %v4764_v61 = vunpack.c.l.b16 %v4361_v56  ;;  %v2522_v62 = vadd.f32 %v13212_v4, %v2521_v57 }
 0x1f3   : > { %v3320_v63 = vadd.f32 %v3319_v59, %v2522_v62  ;;  %v13376_v1 = vpack.c.b16 %v4764_v61, %v4763_v60  ;;  %v13393_v60 = vld [vmem:[%s17439_s2] ss:$0 sm:$0xff]  ;;  %v9928_v62 = vld [vmem:[%s13165_s14 + $0x1f0] sm:$0xf] }
 0x1f5   : > { %v4047_v14 = vmax.f32 %v3320_v63, 0.0 }
 0x1f7   : > { %v4362_v19 = vpack.c.bf16 %v4047_v14, %v4047_v14 }
 0x1f8   : > { %v2524_v11 = vpop.f32.mrf.mxu0 }
 0x1f9   : > { %v3322_v13 = vpop.f32.mrf.mxu1  ;;  %v2525_v15 = vadd.f32 %v13212_v4, %v2524_v11  ;;  %v4765_v24 = vunpack.c.l.b16 %v4362_v19  ;;  %v9933_v11 = vor.u32 %v12398_v3, %v9930_v5 }
 0x1fb   : > { %v3323_v17 = vadd.f32 %v3322_v13, %v2525_v15  ;;  %2563 = vmatmul.bf16.gmra.mxu0 %v9913_v8  ;;  %v12581_v8 = vld [vmem:[%s13165_s14 + $0x7a4] sm:$0xf0] }
 0x1fc   : > { %3361 = vmatmul.bf16.gmra.mxu1 %v9917_v10  ;;  %v9929_v10 = vor.u32 %v12399_v0, %v9928_v62  ;;  %v10657_v13 = vor.u32 %v12581_v8, %v10656_v7 }
 0x1fd   : > { %v4048_v20 = vmax.f32 %v3323_v17, 0.0 }
 0x1fe   : > { %3028 = vmatmul.bf16.vlgmr.msra.gmra.mxu2 %v10657_v13  ;;  %v12403_v13 = vld [vmem:[%s13165_s14 + $0x214] sm:$0xf0] }
 0x1ff   : > { %v4363_v21 = vpack.c.bf16 %v4048_v20, %v4048_v20 }
 0x200   : > { %v2526_v22 = vpop.f32.mrf.mxu0 }
 0x201   : > { %v3324_v23 = vpop.f32.mrf.mxu1  ;;  %v4766_v25 = vunpack.c.l.b16 %v4363_v21  ;;  %v2527_v26 = vadd.f32 %v13212_v4, %v2526_v22 }
 0x203   : > { %v3325_v28 = vadd.f32 %v3324_v23, %v2527_v26  ;;  %v13384_v32 = vpack.c.b16 %v4766_v25, %v4765_v24 }
 0x205   : > { %v4049_v46 = vmax.f32 %v3325_v28, 0.0 }
 0x207   : > { %v4364_v49 = vpack.c.bf16 %v4049_v46, %v4049_v46  ;;  %v12583_v46 = vld [vmem:[%s13165_s14 + $0x7b4] sm:$0xf0] }
 0x208   : > { %v2529_v44 = vpop.f32.mrf.mxu0 }
 0x209   : > { %v3327_v45 = vpop.f32.mrf.mxu1  ;;  %v2530_v47 = vadd.f32 %v13212_v4, %v2529_v44  ;;  %v4767_v57 = vunpack.c.l.b16 %v4364_v49  ;;  %v9938_v44 = vld [vmem:[%s13165_s14 + $0x208] sm:$0xf0] }
 0x20b   : > { %v3328_v48 = vadd.f32 %v3327_v45, %v2530_v47  ;;  %2568 = vmatmul.bf16.gmra.mxu0 %v9921_v40  ;;  %v12401_v40 = vld [vmem:[%s13165_s14 + $0x204] sm:$0xf0]  ;;  %v10664_v45 = vld [vmem:[%s13165_s14 + $0x7b0] sm:$0xf] }
 0x20c   : > { %3366 = vmatmul.bf16.gmra.mxu1 %v9925_v41  ;;  %v12400_v41 = vld [vmem:[%s13165_s14 + $0x204] sm:$0xf]  ;;  %v9937_v47 = vor.u32 %v12401_v40, %v9936_v37  ;;  %v10665_v49 = vor.u32 %v12583_v46, %v10664_v45 }
 0x20d   : > { %v4050_v50 = vmax.f32 %v3328_v48, 0.0  ;;  %v9941_v48 = vor.u32 %v12400_v41, %v9938_v44 }
 0x20e   : > { %3033 = vmatmul.bf16.gmra.mxu2 %v10665_v49 }
 0x20f   : > { %v4365_v52 = vpack.c.bf16 %v4050_v50, %v4050_v50 }
 0x210   : > { %v2531_v55 = vpop.f32.mrf.mxu0 }
 0x211   : > { %v3329_v56 = vpop.f32.mrf.mxu1  ;;  %v4768_v59 = vunpack.c.l.b16 %v4365_v52  ;;  %v2532_v4 = vadd.f32 %v13393_v60, %v2531_v55 }
 0x213   : > { %v3330_v61 = vadd.f32 %v3329_v56, %v2532_v4  ;;  %v13397_v63 = vpack.c.b16 %v4768_v59, %v4767_v57 }
 0x215   : > { %v4051_v17 = vmax.f32 %v3330_v61, 0.0 }
 0x217   : > { %v4366_v21 = vpack.c.bf16 %v4051_v17, %v4051_v17  ;;  %v10672_v17 = vld [vmem:[%s13165_s14 + $0x7c0] sm:$0xf] }
 0x218   : > { %v2534_v14 = vpop.f32.mrf.mxu0 }
 0x219   : > { %v3332_v15 = vpop.f32.mrf.mxu1  ;;  %v2535_v19 = vadd.f32 %v13393_v60, %v2534_v14  ;;  %v4769_v26 = vunpack.c.l.b16 %v4366_v21  ;;  %v12402_v14 = vld [vmem:[%s13165_s14 + $0x214] sm:$0xf] }
 0x21b   : > { %v3333_v20 = vadd.f32 %v3332_v15, %v2535_v19  ;;  %2573 = vmatmul.bf16.gmra.mxu0 %v9929_v10  ;;  %v9944_v10 = vld [vmem:[%s13165_s14 + $0x210] sm:$0xf]  ;;  %v9946_v15 = vld [vmem:[%s13165_s14 + $0x218] sm:$0xf0]  ;;  %v12585_v19 = vld [vmem:[%s13165_s14 + $0x7c4] sm:$0xf0] }
 0x21c   : > { %3371 = vmatmul.bf16.gmra.mxu1 %v9933_v11  ;;  %v9949_v21 = vor.u32 %v12402_v14, %v9946_v15 }
 0x21d   : > { %v4052_v22 = vmax.f32 %v3333_v20, 0.0  ;;  %v9945_v20 = vor.u32 %v12403_v13, %v9944_v10 }
 0x21f   : > { %v4367_v23 = vpack.c.bf16 %v4052_v22, %v4052_v22  ;;  %v10673_v22 = vor.u32 %v12585_v19, %v10672_v17 }
 0x220   : > { %v2536_v24 = vpop.f32.mrf.mxu0 }
 0x221   : > { %v3334_v25 = vpop.f32.mrf.mxu1  ;;  %v4770_v28 = vunpack.c.l.b16 %v4367_v23  ;;  %v2537_v29 = vadd.f32 %v13393_v60, %v2536_v24  ;;  %3038 = vmatmul.bf16.gmra.mxu2 %v10673_v22  ;;  %v9960_v22 = vld [vmem:[%s13165_s14 + $0x230] sm:$0xf] }
 0x223   : > { %v3335_v33 = vadd.f32 %v3334_v25, %v2537_v29  ;;  %v13407_v39 = vpack.c.b16 %v4770_v28, %v4769_v26 }
 0x225   : > { %v4053_v55 = vmax.f32 %v3335_v33, 0.0 }
 0x227   : > { %v4368_v59 = vpack.c.bf16 %v4053_v55, %v4053_v55  ;;  %v9954_v55 = vld [vmem:[%s13165_s14 + $0x228] sm:$0xf0] }
 0x228   : > { %v2539_v50 = vpop.f32.mrf.mxu0 }
 0x229   : > { %v3337_v52 = vpop.f32.mrf.mxu1  ;;  %v2540_v56 = vadd.f32 %v13393_v60, %v2539_v50  ;;  %v4771_v3 = vunpack.c.l.b16 %v4368_v59  ;;  %v12405_v50 = vld [vmem:[%s13165_s14 + $0x224] sm:$0xf0] }
 0x22b   : > { %v3338_v57 = vadd.f32 %v3337_v52, %v2540_v56  ;;  %2578 = vmatmul.bf16.gmra.mxu0 %v9937_v47  ;;  %v12404_v52 = vld [vmem:[%s13165_s14 + $0x224] sm:$0xf]  ;;  %v10680_v56 = vld [vmem:[%s13165_s14 + $0x7d0] sm:$0xf] }
 0x22c   : > { %3376 = vmatmul.bf16.gmra.mxu1 %v9941_v48  ;;  %v9952_v48 = vld [vmem:[%s13165_s14 + $0x220] sm:$0xf] }
 0x22d   : > { %v4054_v4 = vmax.f32 %v3338_v57, 0.0  ;;  %v12587_v57 = vld [vmem:[%s13165_s14 + $0x7d4] sm:$0xf0]  ;;  %v9953_v59 = vor.u32 %v12405_v50, %v9952_v48 }
 0x22f   : > { %v4369_v61 = vpack.c.bf16 %v4054_v4, %v4054_v4  ;;  %v9957_v4 = vor.u32 %v12404_v52, %v9954_v55 }
 0x230   : > { %v2541_v62 = vpop.f32.mrf.mxu0 }
 0x231   : > { %v3339_v0 = vpop.f32.mrf.mxu1  ;;  %v4772_v5 = vunpack.c.l.b16 %v4369_v61  ;;  %v2542_v7 = vadd.f32 %v13393_v60, %v2541_v62  ;;  %v10681_v61 = vor.u32 %v12587_v57, %v10680_v56 }
 0x233   : > { %v3340_v8 = vadd.f32 %v3339_v0, %v2542_v7  ;;  %v13417_v11 = vpack.c.b16 %v4772_v5, %v4771_v3  ;;  %3043 = vmatmul.bf16.gmra.mxu2 %v10681_v61 }
 0x235   : > { %v4055_v25 = vmax.f32 %v3340_v8, 0.0 }
 0x237   : > { %v4370_v29 = vpack.c.bf16 %v4055_v25, %v4055_v25  ;;  %v12406_v25 = vld [vmem:[%s13165_s14 + $0x234] sm:$0xf] }
 0x238   : > { %v2544_v23 = vpop.f32.mrf.mxu0 }
 0x239   : > { %v3342_v24 = vpop.f32.mrf.mxu1  ;;  %v2545_v26 = vadd.f32 %v13393_v60, %v2544_v23  ;;  %v4773_v44 = vunpack.c.l.b16 %v4370_v29  ;;  %v12589_v29 = vld [vmem:[%s13165_s14 + $0x7e4] sm:$0xf0] }
 0x23b   : > { %v3343_v28 = vadd.f32 %v3342_v24, %v2545_v26  ;;  %2583 = vmatmul.bf16.gmra.mxu0 %v9945_v20  ;;  %v12407_v24 = vld [vmem:[%s13165_s14 + $0x234] sm:$0xf0]  ;;  %v9962_v26 = vld [vmem:[%s13165_s14 + $0x238] sm:$0xf0] }
 0x23c   : > { %3381 = vmatmul.bf16.gmra.mxu1 %v9949_v21 }
 0x23d   : > { %v4056_v33 = vmax.f32 %v3343_v28, 0.0  ;;  %v10688_v28 = vld [vmem:[%s13165_s14 + $0x7e0] sm:$0xf] }
 0x23f   : > { %v4371_v37 = vpack.c.bf16 %v4056_v33, %v4056_v33  ;;  %v9961_v33 = vor.u32 %v12407_v24, %v9960_v22 }
 0x240   : > { %v2546_v40 = vpop.f32.mrf.mxu0 }
 0x241   : > { %v3344_v41 = vpop.f32.mrf.mxu1  ;;  %v4774_v45 = vunpack.c.l.b16 %v4371_v37  ;;  %v2547_v46 = vadd.f32 %v13393_v60, %v2546_v40  ;;  %v9965_v37 = vor.u32 %v12406_v25, %v9962_v26  ;;  %v10689_v40 = vor.u32 %v12589_v29, %v10688_v28 }
 0x243   : > { %v3345_v47 = vadd.f32 %v3344_v41, %v2547_v46  ;;  %v13427_v49 = vpack.c.b16 %v4774_v45, %v4773_v44  ;;  %3048 = vmatmul.bf16.gmra.mxu2 %v10689_v40 }
 0x245   : > { %v4057_v3 = vmax.f32 %v3345_v47, 0.0 }
 0x247   : > { %v4372_v8 = vpack.c.bf16 %v4057_v3, %v4057_v3  ;;  %v12409_v3 = vld [vmem:[%s13165_s14 + $0x244] sm:$0xf0] }
 0x248   : > { %v2549_v62 = vpop.f32.mrf.mxu0 }
 0x249   : > { %v3347_v0 = vpop.f32.mrf.mxu1  ;;  %v2550_v5 = vadd.f32 %v13393_v60, %v2549_v62  ;;  %v4775_v17 = vunpack.c.l.b16 %v4372_v8  ;;  %v9968_v62 = vld [vmem:[%s13165_s14 + $0x240] sm:$0xf]  ;;  %v10696_v8 = vld [vmem:[%s13165_s14 + $0x7f0] sm:$0xf] }
 0x24b   : > { %v3348_v7 = vadd.f32 %v3347_v0, %v2550_v5  ;;  %2588 = vmatmul.bf16.gmra.mxu0 %v9953_v59  ;;  %v12408_v5 = vld [vmem:[%s13165_s14 + $0x244] sm:$0xf] }
 0x24c   : > { %3386 = vmatmul.bf16.gmra.mxu1 %v9957_v4 }
 0x24d   : > { %v4058_v10 = vmax.f32 %v3348_v7, 0.0  ;;  %v9970_v7 = vld [vmem:[%s13165_s14 + $0x248] sm:$0xf0] }
 0x24f   : > { %v4373_v13 = vpack.c.bf16 %v4058_v10, %v4058_v10  ;;  %v12591_v10 = vld [vmem:[%s13165_s14 + $0x7f4] sm:$0xf0] }
 0x250   : > { %v2551_v14 = vpop.f32.mrf.mxu0 }
 0x251   : > { %v3349_v15 = vpop.f32.mrf.mxu1  ;;  %v4776_v19 = vunpack.c.l.b16 %v4373_v13  ;;  %v2552_v20 = vadd.f32 %v13393_v60, %v2551_v14  ;;  %v9969_v13 = vor.u32 %v12409_v3, %v9968_v62  ;;  %v9973_v14 = vor.u32 %v12408_v5, %v9970_v7 }
 0x253   : > { %v3350_v21 = vadd.f32 %v3349_v15, %v2552_v20  ;;  %v13437_v23 = vpack.c.b16 %v4776_v19, %v4775_v17  ;;  %v10697_v15 = vor.u32 %v12591_v10, %v10696_v8 }
 0x255   : > { %v4059_v45 = vmax.f32 %v3350_v21, 0.0  ;;  %3053 = vmatmul.bf16.gmra.mxu2 %v10697_v15 }
 0x257   : > { %v4374_v48 = vpack.c.bf16 %v4059_v45, %v4059_v45 }
 0x258   : > { %v2554_v41 = vpop.f32.mrf.mxu0 }
 0x259   : > { %v3352_v44 = vpop.f32.mrf.mxu1  ;;  %v2555_v46 = vadd.f32 %v13393_v60, %v2554_v41  ;;  %v4777_v57 = vunpack.c.l.b16 %v4374_v48  ;;  %v9978_v48 = vld [vmem:[%s13165_s14 + $0x258] sm:$0xf0] }
 0x25b   : > { %v3353_v47 = vadd.f32 %v3352_v44, %v2555_v46  ;;  %2593 = vmatmul.bf16.gmra.mxu0 %v9961_v33  ;;  %v9976_v44 = vld [vmem:[%s13165_s14 + $0x250] sm:$0xf]  ;;  %v12411_v46 = vld [vmem:[%s13165_s14 + $0x254] sm:$0xf0] }
 0x25c   : > { %3391 = vmatmul.bf16.gmra.mxu1 %v9965_v37 }
 0x25d   : > { %v4060_v50 = vmax.f32 %v3353_v47, 0.0  ;;  %v12410_v47 = vld [vmem:[%s13165_s14 + $0x254] sm:$0xf] }
 0x25f   : > { %v4375_v52 = vpack.c.bf16 %v4060_v50, %v4060_v50  ;;  %v10704_v50 = vld [vmem:[%s13165_s14 + $0x800] sm:$0xf] }
 0x260   : > { %v2556_v55 = vpop.f32.mrf.mxu0 }
 0x261   : > { %v3354_v56 = vpop.f32.mrf.mxu1  ;;  %v4778_v59 = vunpack.c.l.b16 %v4375_v52  ;;  %v2557_v4 = vadd.f32 %v13393_v60, %v2556_v55  ;;  %v12593_v52 = vld [vmem:[%s13165_s14 + $0x804] sm:$0xf0]  ;;  %v9977_v55 = vor.u32 %v12411_v46, %v9976_v44 }
 0x263   : > { %v3355_v61 = vadd.f32 %v3354_v56, %v2557_v4  ;;  %v13447_v0 = vpack.c.b16 %v4778_v59, %v4777_v57  ;;  %v9981_v56 = vor.u32 %v12410_v47, %v9978_v48  ;;  %v10705_v57 = vor.u32 %v12593_v52, %v10704_v50 }
 0x265   : > { %v4061_v20 = vmax.f32 %v3355_v61, 0.0  ;;  %3058 = vmatmul.bf16.gmra.mxu2 %v10705_v57 }
 0x267   : > { %v4376_v24 = vpack.c.bf16 %v4061_v20, %v4061_v20  ;;  %v9984_v20 = vld [vmem:[%s13165_s14 + $0x260] sm:$0xf] }
 0x268   : > { %v2559_v17 = vpop.f32.mrf.mxu0 }
 0x269   : > { %v3357_v19 = vpop.f32.mrf.mxu1  ;;  %v2560_v21 = vadd.f32 %v13393_v60, %v2559_v17  ;;  %v4779_v33 = vunpack.c.l.b16 %v4376_v24  ;;  %v12412_v24 = vld [vmem:[%s13165_s14 + $0x264] sm:$0xf] }
 0x26b   : > { %v3358_v22 = vadd.f32 %v3357_v19, %v2560_v21  ;;  %2598 = vmatmul.bf16.gmra.mxu0 %v9969_v13 }
 0x26c   : > { %3396 = vmatmul.bf16.gmra.mxu1 %v9973_v14 }
 0x26d   : > { %v4062_v25 = vmax.f32 %v3358_v22, 0.0  ;;  %v12413_v22 = vld [vmem:[%s13165_s14 + $0x264] sm:$0xf0] }
 0x26f   : > { %v4377_v26 = vpack.c.bf16 %v4062_v25, %v4062_v25  ;;  %v9986_v25 = vld [vmem:[%s13165_s14 + $0x268] sm:$0xf0] }
 0x270   : > { %v2561_v28 = vpop.f32.mrf.mxu0 }
 0x271   : > { %v3359_v29 = vpop.f32.mrf.mxu1  ;;  %v4780_v37 = vunpack.c.l.b16 %v4377_v26  ;;  %v2562_v40 = vadd.f32 %v13393_v60, %v2561_v28  ;;  %v10712_v26 = vld [vmem:[%s13165_s14 + $0x810] sm:$0xf]  ;;  %v12595_v28 = vld [vmem:[%s13165_s14 + $0x814] sm:$0xf0] }
 0x273   : > { %v3360_v41 = vadd.f32 %v3359_v29, %v2562_v40  ;;  %v13457_v45 = vpack.c.b16 %v4780_v37, %v4779_v33  ;;  %v9985_v29 = vor.u32 %v12413_v22, %v9984_v20  ;;  %v9989_v33 = vor.u32 %v12412_v24, %v9986_v25 }
 0x274   : > { %v10713_v37 = vor.u32 %v12595_v28, %v10712_v26 }
 0x275   : > { %v4063_v61 = vmax.f32 %v3360_v41, 0.0 }
 0x276   : > { %3063 = vmatmul.bf16.gmra.mxu2 %v10713_v37 }
 0x277   : > { %v4378_v5 = vpack.c.bf16 %v4063_v61, %v4063_v61 }
 0x278   : > { %v2564_v59 = vpop.f32.mrf.mxu0 }
 0x279   : > { %v3362_v4 = vpop.f32.mrf.mxu1  ;;  %v2565_v62 = vadd.f32 %v13393_v60, %v2564_v59  ;;  %v4781_v14 = vunpack.c.l.b16 %v4378_v5  ;;  %v12415_v5 = vld [vmem:[%s13165_s14 + $0x274] sm:$0xf0] }
 0x27b   : > { %v3363_v3 = vadd.f32 %v3362_v4, %v2565_v62  ;;  %2603 = vmatmul.bf16.gmra.mxu0 %v9977_v55  ;;  %v9992_v62 = vld [vmem:[%s13165_s14 + $0x270] sm:$0xf] }
 0x27c   : > { %3401 = vmatmul.bf16.gmra.mxu1 %v9981_v56 }
 0x27d   : > { %v4064_v7 = vmax.f32 %v3363_v3, 0.0 }
 0x27f   : > { %v4379_v8 = vpack.c.bf16 %v4064_v7, %v4064_v7  ;;  %v12414_v7 = vld [vmem:[%s13165_s14 + $0x274] sm:$0xf] }
 0x280   : > { %v2566_v10 = vpop.f32.mrf.mxu0 }
 0x281   : > { %v3364_v13 = vpop.f32.mrf.mxu1  ;;  %v4782_v15 = vunpack.c.l.b16 %v4379_v8  ;;  %v2567_v17 = vadd.f32 %v13393_v60, %v2566_v10  ;;  %v9994_v8 = vld [vmem:[%s13165_s14 + $0x278] sm:$0xf0]  ;;  %v10720_v10 = vld [vmem:[%s13165_s14 + $0x820] sm:$0xf]  ;;  %v13485_v26 = vpop.f32.mrf.mxu2 }
 0x283   : > { %v3365_v19 = vadd.f32 %v3364_v13, %v2567_v17  ;;  %v13467_v21 = vpack.c.b16 %v4782_v15, %v4781_v14  ;;  %v12597_v13 = vld [vmem:[%s13165_s14 + $0x824] sm:$0xf0]  ;;  %v9993_v14 = vor.u32 %v12415_v5, %v9992_v62  ;;  %v9997_v15 = vor.u32 %v12414_v7, %v9994_v8 }
 0x284   : > { %v10721_v17 = vor.u32 %v12597_v13, %v10720_v10 }
 0x285   : > { %v4065_v44 = vmax.f32 %v3365_v19, 0.0 }
 0x286   : > { %3068 = vmatmul.bf16.gmra.mxu2 %v10721_v17 }
 0x287   : > { %v4380_v48 = vpack.c.bf16 %v4065_v44, %v4065_v44 }
 0x288   : > { %v2569_v40 = vpop.f32.mrf.mxu0 }
 0x289   : > { %v3367_v41 = vpop.f32.mrf.mxu1  ;;  %v2570_v46 = vadd.f32 %v13393_v60, %v2569_v40  ;;  %v4783_v57 = vunpack.c.l.b16 %v4380_v48  ;;  %v10000_v48 = vld [vmem:[%s13165_s14 + $0x280] sm:$0xf] }
 0x28b   : > { %v3368_v47 = vadd.f32 %v3367_v41, %v2570_v46  ;;  %2608 = vmatmul.bf16.gmra.mxu0 %v9985_v29 }
 0x28c   : > { %3406 = vmatmul.bf16.gmra.mxu1 %v9989_v33 }
 0x28d   : > { %v4066_v50 = vmax.f32 %v3368_v47, 0.0 }
 0x28f   : > { %v4381_v52 = vpack.c.bf16 %v4066_v50, %v4066_v50 }
 0x290   : > { %v2571_v55 = vpop.f32.mrf.mxu0 }
 0x291   : > { %v3369_v56 = vpop.f32.mrf.mxu1  ;;  %v4784_v59 = vunpack.c.l.b16 %v4381_v52  ;;  %v2572_v4 = vadd.f32 %v13393_v60, %v2571_v55  ;;  %v12417_v52 = vld [vmem:[%s13165_s14 + $0x284] sm:$0xf0]  ;;  %v12416_v55 = vld [vmem:[%s13165_s14 + $0x284] sm:$0xf] }
 0x293   : > { %v3370_v61 = vadd.f32 %v3369_v56, %v2572_v4  ;;  %v13477_v3 = vpack.c.b16 %v4784_v59, %v4783_v57  ;;  %v10002_v56 = vld [vmem:[%s13165_s14 + $0x288] sm:$0xf0]  ;;  %v13494_v57 = vpop.f32.mrf.mxu2  ;;  %v10728_v59 = vld [vmem:[%s13165_s14 + $0x830] sm:$0xf]  ;;  %v12599_v4 = vld [vmem:[%s13165_s14 + $0x834] sm:$0xf0] }
 0x294   : > { %v10005_v62 = vor.u32 %v12416_v55, %v10002_v56  ;;  %v10729_v5 = vor.u32 %v12599_v4, %v10728_v59 }
 0x295   : > { %v4067_v22 = vmax.f32 %v3370_v61, 0.0  ;;  %v10001_v61 = vor.u32 %v12417_v52, %v10000_v48  ;;  %v10736_v48 = vld [vmem:[%s13165_s14 + $0x840] sm:$0xf]  ;;  %v12601_v52 = vld [vmem:[%s13165_s14 + $0x844] sm:$0xf0] }
 0x296   : > { %3073 = vmatmul.bf16.gmra.mxu2 %v10729_v5  ;;  %v10737_v59 = vor.u32 %v12601_v52, %v10736_v48  ;;  %v12603_v48 = vld [vmem:[%s13165_s14 + $0x854] sm:$0xf0] }
 0x297   : > { %v4382_v28 = vpack.c.bf16 %v4067_v22, %v4067_v22 }
 0x298   : > { %v2574_v19 = vpop.f32.mrf.mxu0 }
 0x299   : > { %v3372_v20 = vpop.f32.mrf.mxu1  ;;  %v2575_v24 = vadd.f32 %v13393_v60, %v2574_v19  ;;  %v4785_v41 = vunpack.c.l.b16 %v4382_v28 }
 0x29b   : > { %v3373_v25 = vadd.f32 %v3372_v20, %v2575_v24  ;;  %2613 = vmatmul.bf16.gmra.mxu0 %v9993_v14 }
 0x29c   : > { %3411 = vmatmul.bf16.gmra.mxu1 %v9997_v15  ;;  %v13499_v15 = vpop.f32.mrf.mxu2 }
 0x29d   : > { %v4068_v29 = vmax.f32 %v3373_v25, 0.0 }
 0x29f   : > { %v4383_v33 = vpack.c.bf16 %v4068_v29, %v4068_v29 }
 0x2a0   : > { %v2576_v37 = vpop.f32.mrf.mxu0 }
 0x2a1   : > { %v3374_v40 = vpop.f32.mrf.mxu1  ;;  %v4786_v44 = vunpack.c.l.b16 %v4383_v33  ;;  %v2577_v46 = vadd.f32 %v13393_v60, %v2576_v37  ;;  %v10008_v37 = vld [vmem:[%s13165_s14 + $0x290] sm:$0xf] }
 0x2a3   : > { %v3375_v47 = vadd.f32 %v3374_v40, %v2577_v46  ;;  %v13489_v50 = vpack.c.b16 %v4786_v44, %v4785_v41  ;;  %v12419_v41 = vld [vmem:[%s13165_s14 + $0x294] sm:$0xf0]  ;;  %v12418_v44 = vld [vmem:[%s13165_s14 + $0x294] sm:$0xf]  ;;  %v10010_v46 = vld [vmem:[%s13165_s14 + $0x298] sm:$0xf0] }
 0x2a4   : > { %v10009_v55 = vor.u32 %v12419_v41, %v10008_v37  ;;  %v10013_v56 = vor.u32 %v12418_v44, %v10010_v46  ;;  %v12420_v37 = vld [vmem:[%s13165_s14 + $0x2a4] sm:$0xf]  ;;  %v10018_v41 = vld [vmem:[%s13165_s14 + $0x2a8] sm:$0xf0]  ;;  %v10744_v46 = vld [vmem:[%s13165_s14 + $0x850] sm:$0xf] }
 0x2a5   : > { %17454 = vst [vmem:[#allocation7_spill] sm:$0xff] %v13489_v50  ;;  %v4069_v10 = vmax.f32 %v3375_v47, 0.0  ;;  %v13508_v47 = vpop.f32.mrf.mxu2 }
 0x2a6   : > { %3078 = vmatmul.bf16.gmra.mxu2 %v10737_v59 }
 0x2a7   : > { %v4384_v17 = vpack.c.bf16 %v4069_v10, %v4069_v10 }
 0x2a8   : > { %v2579_v7 = vpop.f32.mrf.mxu0 }
 0x2a9   : > { %v3377_v8 = vpop.f32.mrf.mxu1  ;;  %v2580_v13 = vadd.f32 %v13393_v60, %v2579_v7  ;;  %v4787_v25 = vunpack.c.l.b16 %v4384_v17 }
 0x2ab   : > { %v3378_v14 = vadd.f32 %v3377_v8, %v2580_v13  ;;  %2618 = vmatmul.bf16.gmra.mxu0 %v10001_v61 }
 0x2ac   : > { %3416 = vmatmul.bf16.gmra.mxu1 %v10005_v62 }
 0x2ad   : > { %v4070_v19 = vmax.f32 %v3378_v14, 0.0  ;;  %v13513_v8 = vpop.f32.mrf.mxu2 }
 0x2af   : > { %v4385_v20 = vpack.c.bf16 %v4070_v19, %v4070_v19 }
 0x2b0   : > { %v2581_v22 = vpop.f32.mrf.mxu0 }
 0x2b1   : > { %v3379_v24 = vpop.f32.mrf.mxu1  ;;  %v4788_v28 = vunpack.c.l.b16 %v4385_v20  ;;  %v2582_v29 = vadd.f32 %v13393_v60, %v2581_v22 }
 0x2b3   : > { %v3380_v33 = vadd.f32 %v3379_v24, %v2582_v29  ;;  %v13503_v40 = vpack.c.b16 %v4788_v28, %v4787_v25  ;;  %v10016_v28 = vld [vmem:[%s13165_s14 + $0x2a0] sm:$0xf] }
 0x2b5   : > { %17455 = vst [vmem:[#allocation8_spill] sm:$0xff] %v13503_v40  ;;  %v4071_v62 = vmax.f32 %v3380_v33, 0.0  ;;  %v12421_v33 = vld [vmem:[%s13165_s14 + $0x2a4] sm:$0xf0]  ;;  %v13522_v44 = vpop.f32.mrf.mxu2 }
 0x2b6   : > { %v10017_v52 = vor.u32 %v12421_v33, %v10016_v28  ;;  %v10024_v28 = vld [vmem:[%s13165_s14 + $0x2b0] sm:$0xf] }
 0x2b7   : > { %v4386_v10 = vpack.c.bf16 %v4071_v62, %v4071_v62 }
 0x2b8   : > { %v2584_v4 = vpop.f32.mrf.mxu0 }
 0x2b9   : > { %v3382_v61 = vpop.f32.mrf.mxu1  ;;  %v2585_v5 = vadd.f32 %v13393_v60, %v2584_v4  ;;  %v4789_v20 = vunpack.c.l.b16 %v4386_v10 }
 0x2bb   : > { %v3383_v7 = vadd.f32 %v3382_v61, %v2585_v5  ;;  %2623 = vmatmul.bf16.gmra.mxu0 %v10009_v55  ;;  %v10021_v55 = vor.u32 %v12420_v37, %v10018_v41  ;;  %v12423_v37 = vld [vmem:[%s13165_s14 + $0x2b4] sm:$0xf0]  ;;  %v12422_v41 = vld [vmem:[%s13165_s14 + $0x2b4] sm:$0xf] }
 0x2bc   : > { %3421 = vmatmul.bf16.gmra.mxu1 %v10013_v56  ;;  %v10745_v56 = vor.u32 %v12603_v48, %v10744_v46  ;;  %v10026_v46 = vld [vmem:[%s13165_s14 + $0x2b8] sm:$0xf0] }
 0x2bd   : > { %v4072_v13 = vmax.f32 %v3383_v7, 0.0  ;;  %v13527_v7 = vpop.f32.mrf.mxu2 }
 0x2be   : > { %3083 = vmatmul.bf16.gmra.mxu2 %v10745_v56  ;;  %v10025_v56 = vor.u32 %v12423_v37, %v10024_v28  ;;  %v12425_v28 = vld [vmem:[%s13165_s14 + $0x2c4] sm:$0xf0]  ;;  %v12424_v37 = vld [vmem:[%s13165_s14 + $0x2c4] sm:$0xf] }
 0x2bf   : > { %v4387_v14 = vpack.c.bf16 %v4072_v13, %v4072_v13 }
 0x2c0   : > { %v2586_v17 = vpop.f32.mrf.mxu0 }
 0x2c1   : > { %v3384_v19 = vpop.f32.mrf.mxu1  ;;  %v4790_v22 = vunpack.c.l.b16 %v4387_v14  ;;  %v2587_v24 = vadd.f32 %v13393_v60, %v2586_v17 }
 0x2c3   : > { %v3385_v25 = vadd.f32 %v3384_v19, %v2587_v24  ;;  %v13517_v29 = vpack.c.b16 %v4790_v22, %v4789_v20 }
 0x2c5   : > { %17456 = vst [vmem:[#allocation9_spill] sm:$0xff] %v13517_v29  ;;  %v4073_v61 = vmax.f32 %v3385_v25, 0.0  ;;  %v13538_v48 = vpop.f32.mrf.mxu2 }
 0x2c7   : > { %v4388_v10 = vpack.c.bf16 %v4073_v61, %v4073_v61 }
 0x2c8   : > { %v2589_v59 = vpop.f32.mrf.mxu0 }
 0x2c9   : > { %v3387_v4 = vpop.f32.mrf.mxu1  ;;  %v2590_v62 = vadd.f32 %v13393_v60, %v2589_v59  ;;  %v4791_v20 = vunpack.c.l.b16 %v4388_v10  ;;  %v10029_v59 = vor.u32 %v12422_v41, %v10026_v46  ;;  %v10034_v41 = vld [vmem:[%s13165_s14 + $0x2c8] sm:$0xf0] }
 0x2ca   : > { %v10037_v36 = vor.u32 %v12424_v37, %v10034_v41 }
 0x2cb   : > { %v3388_v5 = vadd.f32 %v3387_v4, %v2590_v62  ;;  %2628 = vmatmul.bf16.gmra.mxu0 %v10017_v52  ;;  %v10752_v52 = vld [vmem:[%s13165_s14 + $0x860] sm:$0xf] }
 0x2cc   : > { %3426 = vmatmul.bf16.gmra.mxu1 %v10021_v55  ;;  %v12605_v55 = vld [vmem:[%s13165_s14 + $0x864] sm:$0xf0] }
 0x2cd   : > { %v4074_v13 = vmax.f32 %v3388_v5, 0.0  ;;  %v10753_v4 = vor.u32 %v12605_v55, %v10752_v52  ;;  %v13543_v10 = vpop.f32.mrf.mxu2 }
 0x2cf   : > { %v4389_v14 = vpack.c.bf16 %v4074_v13, %v4074_v13  ;;  %3088 = vmatmul.bf16.gmra.mxu2 %v10753_v4 }
 0x2d0   : > { %v2591_v17 = vpop.f32.mrf.mxu0 }
 0x2d1   : > { %v3389_v19 = vpop.f32.mrf.mxu1  ;;  %v4792_v22 = vunpack.c.l.b16 %v4389_v14  ;;  %v2592_v24 = vadd.f32 %v13393_v60, %v2591_v17 }
 0x2d3   : > { %v13530_v25 = vadd.f32 %v3389_v19, %v2592_v24  ;;  %v13533_v33 = vpack.c.b16 %v4792_v22, %v4791_v20  ;;  %v10032_v24 = vld [vmem:[%s13165_s14 + $0x2c0] sm:$0xf] }
 0x2d5   : > { %17457 = vst [vmem:[#allocation10_spill] sm:$0xff] %v13530_v25  ;;  %v13550_v46 = vpop.f32.mrf.mxu2 }
 0x2d6   : > { %17458 = vst [vmem:[#allocation11_spill] sm:$0xff] %v13533_v33 }
 0x2d8   : > { %v2594_v61 = vpop.f32.mrf.mxu0 }
 0x2d9   : > { %v3392_v62 = vpop.f32.mrf.mxu1  ;;  %v2595_v5 = vadd.f32 %v13393_v60, %v2594_v61  ;;  %v10033_v61 = vor.u32 %v12425_v28, %v10032_v24 }
 0x2db   : > { %2633 = vmatmul.bf16.gmra.mxu0 %v10025_v56  ;;  %v3393_v13 = vadd.f32 %v3392_v62, %v2595_v5  ;;  %v10760_v56 = vld [vmem:[%s13165_s14 + $0x870] sm:$0xf] }
 0x2dc   : > { %3431 = vmatmul.bf16.gmra.mxu1 %v10029_v59  ;;  %v12607_v59 = vld [vmem:[%s13165_s14 + $0x874] sm:$0xf0] }
 0x2dd   : > { %v4076_v19 = vmax.f32 %v3393_v13, 0.0  ;;  %v10761_v62 = vor.u32 %v12607_v59, %v10760_v56  ;;  %v12427_v56 = vld [vmem:[%s13165_s14 + $0x2d4] sm:$0xf0]  ;;  %v12426_v59 = vld [vmem:[%s13165_s14 + $0x2d4] sm:$0xf] }
 0x2df   : > { %v4391_v52 = vpack.c.bf16 %v4076_v19, %v4076_v19  ;;  %3093 = vmatmul.bf16.gmra.mxu2 %v10761_v62 }
 0x2e0   : > { %v2596_v14 = vpop.f32.mrf.mxu0 }
 0x2e1   : > { %v3394_v17 = vpop.f32.mrf.mxu1  ;;  %v2597_v20 = vadd.f32 %v13393_v60, %v2596_v14  ;;  %v4883_v13 = vunpack.c.l.b16 %v4391_v52 }
 0x2e3   : > { %v3395_v22 = vadd.f32 %v3394_v17, %v2597_v20  ;;  %v13555_v20 = vpop.f32.mrf.mxu2 }
 0x2e5   : > { %v4077_v55 = vmax.f32 %v3395_v22, 0.0 }
 0x2e7   : > { %v4392_v4 = vpack.c.bf16 %v4077_v55, %v4077_v55  ;;  %v10040_v55 = vld [vmem:[%s13165_s14 + $0x2d0] sm:$0xf] }
 0x2e8   : > { %v2599_v5 = vpop.f32.mrf.mxu0 }
 0x2e9   : > { %v3397_v34 = vpop.f32.mrf.mxu1  ;;  %v4884_v14 = vunpack.c.l.b16 %v4392_v4  ;;  %v2600_v17 = vadd.f32 %v13393_v60, %v2599_v5  ;;  %v10042_v4 = vld [vmem:[%s13165_s14 + $0x2d8] sm:$0xf0]  ;;  %v12609_v5 = vld [vmem:[%s13165_s14 + $0x884] sm:$0xf0] }
 0x2eb   : > { %2638 = vmatmul.bf16.gmra.mxu0 %v10033_v61  ;;  %v4918_v19 = vpack.c.b16 %v4884_v14, %v4883_v13  ;;  %v3398_v22 = vadd.f32 %v3397_v34, %v2600_v17  ;;  %v10768_v34 = vld [vmem:[%s13165_s14 + $0x880] sm:$0xf]  ;;  %v10041_v14 = vor.u32 %v12427_v56, %v10040_v55  ;;  %v10045_v17 = vor.u32 %v12426_v59, %v10042_v4 }
 0x2ec   : > { %3436 = vmatmul.bf16.gmra.mxu1 %v10037_v36  ;;  %v13563_v36 = vpop.f32.mrf.mxu2 }
 0x2ed   : > { %4936 = vrot.lane.b32.xlu0 %v4918_v19, %s13043_s26  ;;  %v4078_v37 = vmax.f32 %v3398_v22, 0.0  ;;  %v10769_v19 = vor.u32 %v12609_v5, %v10768_v34  ;;  %v12428_v34 = vld [vmem:[%s13165_s14 + $0x2e4] sm:$0xf]  ;;  %v10050_v5 = vld [vmem:[%s13165_s14 + $0x2e8] sm:$0xf0] }
 0x2ef   : > { %v4393_v61 = vpack.c.bf16 %v4078_v37, %v4078_v37  ;;  %3098 = vmatmul.bf16.gmra.mxu2 %v10769_v19  ;;  %v10776_v19 = vld [vmem:[%s13165_s14 + $0x890] sm:$0xf] }
 0x2f0   : > { %v2601_v24 = vpop.f32.mrf.mxu0 }
 0x2f1   : > { %v3399_v28 = vpop.f32.mrf.mxu1  ;;  %v2602_v41 = vadd.f32 %v13393_v60, %v2601_v24 }
 0x2f3   : > { %v3400_v52 = vadd.f32 %v3399_v28, %v2602_v41  ;;  %v4885_v28 = vunpack.c.l.b16 %v4393_v61 }
 0x2f5   : > { %v4079_v62 = vmax.f32 %v3400_v52, 0.0  ;;  %4816 = vrot.lane.b32.xlu0 %v13376_v1, %s13042_s23  ;;  %v13570_v52 = vpop.f32.mrf.mxu2 }
 0x2f7   : > { %v4394_v13 = vpack.c.bf16 %v4079_v62, %v4079_v62  ;;  %v10048_v62 = vld [vmem:[%s13165_s14 + $0x2e0] sm:$0xf] }
 0x2f8   : > { %v2604_v22 = vpop.f32.mrf.mxu0 }
 0x2f9   : > { %v3402_v24 = vpop.f32.mrf.mxu1  ;;  %v4886_v41 = vunpack.c.l.b16 %v4394_v13  ;;  %v2605_v6 = vadd.f32 %v13393_v60, %v2604_v22  ;;  %v12611_v22 = vld [vmem:[%s13165_s14 + $0x894] sm:$0xf0] }
 0x2fb   : > { %v3403_v37 = vadd.f32 %v3402_v24, %v2605_v6  ;;  %2643 = vmatmul.bf16.gmra.mxu0 %v10041_v14  ;;  %v4919_v1 = vpack.c.b16 %v4886_v41, %v4885_v28  ;;  %v12429_v6 = vld [vmem:[%s13165_s14 + $0x2e4] sm:$0xf0]  ;;  %v10053_v28 = vor.u32 %v12428_v34, %v10050_v5  ;;  %v10777_v41 = vor.u32 %v12611_v22, %v10776_v19  ;;  %v12431_v19 = vld [vmem:[%s13165_s14 + $0x2f4] sm:$0xf0]  ;;  %v12430_v22 = vld [vmem:[%s13165_s14 + $0x2f4] sm:$0xf] }
 0x2fc   : > { %3441 = vmatmul.bf16.gmra.mxu1 %v10045_v17  ;;  %v10049_v24 = vor.u32 %v12429_v6, %v10048_v62 }
 0x2fd   : > { %4938 = vrot.lane.b32.xlu2 %v4919_v1, %s13043_s26  ;;  %4818 = vrot.lane.b32.xlu0 %v13384_v32, %s13042_s23  ;;  %v4080_v59 = vmax.f32 %v3403_v37, 0.0  ;;  %v13580_v13 = vpop.f32.mrf.mxu2 }
 0x2ff   : > { %v4395_v14 = vpack.c.bf16 %v4080_v59, %v4080_v59  ;;  %3103 = vmatmul.bf16.gmra.mxu2 %v10777_v41 }
 0x300   : > { %v2606_v55 = vpop.f32.mrf.mxu0 }
 0x301   : > { %v3404_v56 = vpop.f32.mrf.mxu1  ;;  %v2607_v4 = vadd.f32 %v13393_v60, %v2606_v55  ;;  %v4887_v55 = vunpack.c.l.b16 %v4395_v14 }
 0x303   : > { %v3405_v61 = vadd.f32 %v3404_v56, %v2607_v4 }
 0x305   : > { %v4081_v17 = vmax.f32 %v3405_v61, 0.0  ;;  %4820 = vrot.lane.b32.xlu0 %v13397_v63, %s13042_s23  ;;  %v13589_v61 = vpop.f32.mrf.mxu2 }
 0x307   : > { %v4396_v32 = vpack.c.bf16 %v4081_v17, %v4081_v17  ;;  %v10056_v17 = vld [vmem:[%s13165_s14 + $0x2f0] sm:$0xf] }
 0x308   : > { %v2609_v37 = vpop.f32.mrf.mxu0 }
 0x309   : > { %v3407_v1 = vpop.f32.mrf.mxu1  ;;  %v4888_v56 = vunpack.c.l.b16 %v4396_v32  ;;  %v2610_v4 = vadd.f32 %v13393_v60, %v2609_v37  ;;  %v10058_v32 = vld [vmem:[%s13165_s14 + $0x2f8] sm:$0xf0]  ;;  %v10784_v37 = vld [vmem:[%s13165_s14 + $0x8a0] sm:$0xf] }
 0x30b   : > { %v3408_v59 = vadd.f32 %v3407_v1, %v2610_v4  ;;  %2648 = vmatmul.bf16.gmra.mxu0 %v10049_v24  ;;  %v13587_v63 = vpack.c.b16 %v4888_v56, %v4887_v55  ;;  %v12613_v1 = vld [vmem:[%s13165_s14 + $0x8a4] sm:$0xf0]  ;;  %v10057_v55 = vor.u32 %v12431_v19, %v10056_v17  ;;  %v10061_v56 = vor.u32 %v12430_v22, %v10058_v32 }
 0x30c   : > { %3446 = vmatmul.bf16.gmra.mxu1 %v10053_v28  ;;  %v10785_v4 = vor.u32 %v12613_v1, %v10784_v37  ;;  %v12433_v37 = vld [vmem:[%s13165_s14 + $0x304] sm:$0xf0]  ;;  %v10066_v1 = vld [vmem:[%s13165_s14 + $0x308] sm:$0xf0] }
 0x30d   : > { %4822 = vrot.lane.b32.xlu0 %v13407_v39, %s13042_s23  ;;  %v4082_v34 = vmax.f32 %v3408_v59, 0.0  ;;  %v13598_v24 = vpop.f32.mrf.mxu2 }
 0x30f   : > { %v4397_v28 = vpack.c.bf16 %v4082_v34, %v4082_v34  ;;  %3108 = vmatmul.bf16.gmra.mxu2 %v10785_v4  ;;  %v10792_v4 = vld [vmem:[%s13165_s14 + $0x8b0] sm:$0xf] }
 0x310   : > { %v2611_v62 = vpop.f32.mrf.mxu0 }
 0x311   : > { %v3409_v6 = vpop.f32.mrf.mxu1  ;;  %v2612_v5 = vadd.f32 %v13393_v60, %v2611_v62 }
 0x313   : > { %v3410_v14 = vadd.f32 %v3409_v6, %v2612_v5  ;;  %v4889_v6 = vunpack.c.l.b16 %v4397_v28 }
 0x315   : > { %v4083_v41 = vmax.f32 %v3410_v14, 0.0  ;;  %4824 = vrot.lane.b32.xlu0 %v13417_v11, %s13042_s23  ;;  %v13607_v14 = vpop.f32.mrf.mxu2 }
 0x317   : > { %v4398_v39 = vpack.c.bf16 %v4083_v41, %v4083_v41  ;;  %v10064_v41 = vld [vmem:[%s13165_s14 + $0x300] sm:$0xf] }
 0x318   : > { %v2614_v59 = vpop.f32.mrf.mxu0 }
 0x319   : > { %v3412_v62 = vpop.f32.mrf.mxu1  ;;  %v4890_v5 = vunpack.c.l.b16 %v4398_v39  ;;  %v2615_v43 = vadd.f32 %v13393_v60, %v2614_v59  ;;  %v12615_v59 = vld [vmem:[%s13165_s14 + $0x8b4] sm:$0xf0] }
 0x31b   : > { %v3413_v34 = vadd.f32 %v3412_v62, %v2615_v43  ;;  %2653 = vmatmul.bf16.gmra.mxu0 %v10057_v55  ;;  %v13605_v11 = vpack.c.b16 %v4890_v5, %v4889_v6  ;;  %v12432_v43 = vld [vmem:[%s13165_s14 + $0x304] sm:$0xf]  ;;  %v10065_v62 = vor.u32 %v12433_v37, %v10064_v41  ;;  %v10793_v5 = vor.u32 %v12615_v59, %v10792_v4  ;;  %v12435_v4 = vld [vmem:[%s13165_s14 + $0x314] sm:$0xf0]  ;;  %v10074_v59 = vld [vmem:[%s13165_s14 + $0x318] sm:$0xf0] }
 0x31c   : > { %3451 = vmatmul.bf16.gmra.mxu1 %v10061_v56  ;;  %v10069_v6 = vor.u32 %v12432_v43, %v10066_v1 }
 0x31d   : > { %4826 = vrot.lane.b32.xlu0 %v13427_v49, %s13042_s23  ;;  %v4084_v22 = vmax.f32 %v3413_v34, 0.0  ;;  %v13616_v39 = vpop.f32.mrf.mxu2 }
 0x31f   : > { %v4399_v55 = vpack.c.bf16 %v4084_v22, %v4084_v22  ;;  %3113 = vmatmul.bf16.gmra.mxu2 %v10793_v5  ;;  %v10800_v5 = vld [vmem:[%s13165_s14 + $0x8c0] sm:$0xf] }
 0x320   : > { %v2616_v17 = vpop.f32.mrf.mxu0 }
 0x321   : > { %v3414_v19 = vpop.f32.mrf.mxu1  ;;  %v2617_v32 = vadd.f32 %v13393_v60, %v2616_v17 }
 0x323   : > { %v3415_v28 = vadd.f32 %v3414_v19, %v2617_v32  ;;  %v4891_v19 = vunpack.c.l.b16 %v4399_v55 }
 0x325   : > { %v4085_v56 = vmax.f32 %v3415_v28, 0.0  ;;  %4828 = vrot.lane.b32.xlu0 %v13437_v23, %s13042_s23  ;;  %v13625_v28 = vpop.f32.mrf.mxu2 }
 0x326   : > { %17459 = vst [vmem:[#allocation12_spill] sm:$0xff] %v13625_v28 }
 0x327   : > { %v4400_v49 = vpack.c.bf16 %v4085_v56, %v4085_v56  ;;  %v10072_v56 = vld [vmem:[%s13165_s14 + $0x310] sm:$0xf] }
 0x328   : > { %v2619_v34 = vpop.f32.mrf.mxu0 }
 0x329   : > { %v3417_v17 = vpop.f32.mrf.mxu1  ;;  %v4892_v32 = vunpack.c.l.b16 %v4400_v49  ;;  %v2620_v16 = vadd.f32 %v13393_v60, %v2619_v34  ;;  %v12617_v34 = vld [vmem:[%s13165_s14 + $0x8c4] sm:$0xf0] }
 0x32b   : > { %v3418_v22 = vadd.f32 %v3417_v17, %v2620_v16  ;;  %2658 = vmatmul.bf16.gmra.mxu0 %v10065_v62  ;;  %v13623_v23 = vpack.c.b16 %v4892_v32, %v4891_v19  ;;  %v12434_v16 = vld [vmem:[%s13165_s14 + $0x314] sm:$0xf]  ;;  %v10073_v17 = vor.u32 %v12435_v4, %v10072_v56  ;;  %v10801_v32 = vor.u32 %v12617_v34, %v10800_v5  ;;  %v10080_v5 = vld [vmem:[%s13165_s14 + $0x320] sm:$0xf]  ;;  %v12437_v34 = vld [vmem:[%s13165_s14 + $0x324] sm:$0xf0] }
 0x32c   : > { %3456 = vmatmul.bf16.gmra.mxu1 %v10069_v6  ;;  %v10077_v19 = vor.u32 %v12434_v16, %v10074_v59 }
 0x32d   : > { %4830 = vrot.lane.b32.xlu0 %v13447_v0, %s13042_s23  ;;  %v4086_v43 = vmax.f32 %v3418_v22, 0.0  ;;  %v13634_v49 = vpop.f32.mrf.mxu2 }
 0x32e   : > { %17460 = vst [vmem:[#allocation13_spill] sm:$0xff] %v13634_v49 }
 0x32f   : > { %v4401_v62 = vpack.c.bf16 %v4086_v43, %v4086_v43  ;;  %v13643_v43 = vld [vmem:[%s17439_s2] ss:$0 sm:$0xff]  ;;  %3118 = vmatmul.bf16.gmra.mxu2 %v10801_v32 }
 0x330   : > { %v2621_v41 = vpop.f32.mrf.mxu0 }
 0x331   : > { %v3419_v37 = vpop.f32.mrf.mxu1  ;;  %v2622_v1 = vadd.f32 %v13393_v60, %v2621_v41  ;;  %v4893_v41 = vunpack.c.l.b16 %v4401_v62 }
 0x333   : > { %v3420_v55 = vadd.f32 %v3419_v37, %v2622_v1 }
 0x335   : > { %v4087_v6 = vmax.f32 %v3420_v55, 0.0  ;;  %4832 = vrot.lane.b32.xlu0 %v13457_v45, %s13042_s23  ;;  %v13648_v56 = vpop.f32.mrf.mxu2 }
 0x336   : > { %17461 = vst [vmem:[#allocation14_spill] sm:$0xff] %v13648_v56 }
 0x337   : > { %v4402_v0 = vpack.c.bf16 %v4087_v6, %v4087_v6 }
 0x338   : > { %v2624_v22 = vpop.f32.mrf.mxu0 }
 0x339   : > { %v3422_v60 = vpop.f32.mrf.mxu1  ;;  %v4894_v37 = vunpack.c.l.b16 %v4402_v0  ;;  %v2625_v45 = vadd.f32 %v13643_v43, %v2624_v22  ;;  %v12436_v0 = vld [vmem:[%s13165_s14 + $0x324] sm:$0xf] }
 0x33b   : > { %v3423_v1 = vadd.f32 %v3422_v60, %v2625_v45  ;;  %2663 = vmatmul.bf16.gmra.mxu0 %v10073_v17  ;;  %v13646_v55 = vpack.c.b16 %v4894_v37, %v4893_v41  ;;  %v10082_v17 = vld [vmem:[%s13165_s14 + $0x328] sm:$0xf0]  ;;  %v10808_v60 = vld [vmem:[%s13165_s14 + $0x8d0] sm:$0xf]  ;;  %v12619_v41 = vld [vmem:[%s13165_s14 + $0x8d4] sm:$0xf0]  ;;  %v10081_v37 = vor.u32 %v12437_v34, %v10080_v5 }
 0x33c   : > { %3461 = vmatmul.bf16.gmra.mxu1 %v10077_v19  ;;  %v10085_v45 = vor.u32 %v12436_v0, %v10082_v17 }
 0x33d   : > { %4834 = vrot.lane.b32.xlu0 %v13467_v21, %s13042_s23  ;;  %v4088_v59 = vmax.f32 %v3423_v1, 0.0  ;;  %v13657_v19 = vpop.f32.mrf.mxu2  ;;  %v10809_v1 = vor.u32 %v12619_v41, %v10808_v60  ;;  %v10088_v60 = vld [vmem:[%s13165_s14 + $0x330] sm:$0xf]  ;;  %v12439_v41 = vld [vmem:[%s13165_s14 + $0x334] sm:$0xf0] }
 0x33e   : > { %17462 = vst [vmem:[#allocation15_spill] sm:$0xff] %v13657_v19 }
 0x33f   : > { %v4403_v32 = vpack.c.bf16 %v4088_v59, %v4088_v59  ;;  %3123 = vmatmul.bf16.gmra.mxu2 %v10809_v1 }
 0x340   : > { %v2626_v4 = vpop.f32.mrf.mxu0 }
 0x341   : > { %v3424_v16 = vpop.f32.mrf.mxu1  ;;  %v2627_v62 = vadd.f32 %v13643_v43, %v2626_v4 }
 0x343   : > { %v3425_v6 = vadd.f32 %v3424_v16, %v2627_v62  ;;  %v4895_v16 = vunpack.c.l.b16 %v4403_v32 }
 0x345   : > { %v4089_v22 = vmax.f32 %v3425_v6, 0.0  ;;  %4836 = vrot.lane.b32.xlu0 %v13477_v3, %s13042_s23  ;;  %v13666_v5 = vpop.f32.mrf.mxu2 }
 0x346   : > { %17463 = vst [vmem:[#allocation16_spill] sm:$0xff] %v13666_v5 }
 0x347   : > { %v4404_v21 = vpack.c.bf16 %v4089_v22, %v4089_v22 }
 0x348   : > { %v2629_v25 = vpop.f32.mrf.mxu0 }
 0x349   : > { %v3427_v4 = vpop.f32.mrf.mxu1  ;;  %v4896_v62 = vunpack.c.l.b16 %v4404_v21  ;;  %v2630_v59 = vadd.f32 %v13643_v43, %v2629_v25  ;;  %v12438_v21 = vld [vmem:[%s13165_s14 + $0x334] sm:$0xf]  ;;  %v10090_v25 = vld [vmem:[%s13165_s14 + $0x338] sm:$0xf0] }
 0x34a   : > { %v10093_v33 = vor.u32 %v12438_v21, %v10090_v25 }
 0x34b   : > { %v3428_v6 = vadd.f32 %v3427_v4, %v2630_v59  ;;  %2668 = vmatmul.bf16.gmra.mxu0 %v10081_v37  ;;  %v13664_v3 = vpack.c.b16 %v4896_v62, %v4895_v16  ;;  %v12621_v59 = vld [vmem:[%s13165_s14 + $0x8e4] sm:$0xf0]  ;;  %v10089_v62 = vor.u32 %v12439_v41, %v10088_v60 }
 0x34c   : > { %3466 = vmatmul.bf16.gmra.mxu1 %v10085_v45  ;;  %v10816_v45 = vld [vmem:[%s13165_s14 + $0x8e0] sm:$0xf] }
 0x34d   : > { %v4090_v17 = vmax.f32 %v3428_v6, 0.0  ;;  %v13673_v1 = vpop.f32.mrf.mxu2  ;;  %v10817_v29 = vor.u32 %v12621_v59, %v10816_v45  ;;  %v12441_v45 = vld [vmem:[%s13165_s14 + $0x344] sm:$0xf0]  ;;  %v12440_v59 = vld [vmem:[%s13165_s14 + $0x344] sm:$0xf] }
 0x34e   : > { %17464 = vst [vmem:[#allocation17_spill] sm:$0xff] %v13673_v1 }
 0x34f   : > { %v4405_v37 = vpack.c.bf16 %v4090_v17, %v4090_v17  ;;  %3128 = vmatmul.bf16.gmra.mxu2 %v10817_v29 }
 0x350   : > { %v2631_v34 = vpop.f32.mrf.mxu0 }
 0x351   : > { %v3429_v0 = vpop.f32.mrf.mxu1  ;;  %v2632_v32 = vadd.f32 %v13643_v43, %v2631_v34  ;;  %v4897_v34 = vunpack.c.l.b16 %v4405_v37 }
 0x353   : > { %v3430_v22 = vadd.f32 %v3429_v0, %v2632_v32 }
 0x355   : > { %v4091_v4 = vmax.f32 %v3430_v22, 0.0  ;;  %v13680_v22 = vpop.f32.mrf.mxu2 }
 0x356   : > { %17465 = vst [vmem:[#allocation18_spill] sm:$0xff] %v13680_v22 }
 0x357   : > { %v4406_v16 = vpack.c.bf16 %v4091_v4, %v4091_v4  ;;  %v10096_v4 = vld [vmem:[%s13165_s14 + $0x340] sm:$0xf] }
 0x358   : > { %v2634_v40 = vpop.f32.mrf.mxu0 }
 0x359   : > { %v3432_v6 = vpop.f32.mrf.mxu1  ;;  %v4898_v0 = vunpack.c.l.b16 %v4406_v16  ;;  %v2635_v32 = vadd.f32 %v13643_v43, %v2634_v40  ;;  %v10098_v40 = vld [vmem:[%s13165_s14 + $0x348] sm:$0xf0] }
 0x35b   : > { %v3433_v50 = vadd.f32 %v3432_v6, %v2635_v32  ;;  %2673 = vmatmul.bf16.gmra.mxu0 %v10089_v62  ;;  %v13678_v17 = vpack.c.b16 %v4898_v0, %v4897_v34  ;;  %v12623_v6 = vld [vmem:[%s13165_s14 + $0x8f4] sm:$0xf0]  ;;  %v10097_v0 = vor.u32 %v12441_v45, %v10096_v4  ;;  %v10101_v32 = vor.u32 %v12440_v59, %v10098_v40 }
 0x35c   : > { %3471 = vmatmul.bf16.gmra.mxu1 %v10093_v33  ;;  %v10824_v33 = vld [vmem:[%s13165_s14 + $0x8f0] sm:$0xf] }
 0x35d   : > { %v4092_v21 = vmax.f32 %v3433_v50, 0.0  ;;  %v13687_v29 = vpop.f32.mrf.mxu2  ;;  %v10825_v22 = vor.u32 %v12623_v6, %v10824_v33  ;;  %v12443_v33 = vld [vmem:[%s13165_s14 + $0x354] sm:$0xf0]  ;;  %v12442_v6 = vld [vmem:[%s13165_s14 + $0x354] sm:$0xf] }
 0x35e   : > { %17466 = vst [vmem:[#allocation19_spill] sm:$0xff] %v13687_v29 }
 0x35f   : > { %v4407_v16 = vpack.c.bf16 %v4092_v21, %v4092_v21  ;;  %3133 = vmatmul.bf16.gmra.mxu2 %v10825_v22 }
 0x360   : > { %v2636_v60 = vpop.f32.mrf.mxu0 }
 0x361   : > { %v3434_v41 = vpop.f32.mrf.mxu1  ;;  %v2637_v25 = vadd.f32 %v13643_v43, %v2636_v60  ;;  %v4899_v60 = vunpack.c.l.b16 %v4407_v16 }
 0x363   : > { %v3435_v37 = vadd.f32 %v3434_v41, %v2637_v25 }
 0x365   : > { %v4093_v62 = vmax.f32 %v3435_v37, 0.0  ;;  %v13694_v37 = vpop.f32.mrf.mxu2 }
 0x366   : > { %17467 = vst [vmem:[#allocation20_spill] sm:$0xff] %v13694_v37 }
 0x367   : > { %v4408_v34 = vpack.c.bf16 %v4093_v62, %v4093_v62  ;;  %v10104_v62 = vld [vmem:[%s13165_s14 + $0x350] sm:$0xf] }
 0x368   : > { %v2639_v1 = vpop.f32.mrf.mxu0 }
 0x369   : > { %v3437_v50 = vpop.f32.mrf.mxu1  ;;  %v4900_v41 = vunpack.c.l.b16 %v4408_v34  ;;  %v2640_v25 = vadd.f32 %v13643_v43, %v2639_v1  ;;  %v10106_v1 = vld [vmem:[%s13165_s14 + $0x358] sm:$0xf0] }
 0x36b   : > { %v3438_v29 = vadd.f32 %v3437_v50, %v2640_v25  ;;  %2678 = vmatmul.bf16.gmra.mxu0 %v10097_v0  ;;  %v13692_v21 = vpack.c.b16 %v4900_v41, %v4899_v60  ;;  %v12625_v50 = vld [vmem:[%s13165_s14 + $0x904] sm:$0xf0]  ;;  %v10105_v41 = vor.u32 %v12443_v33, %v10104_v62  ;;  %v10109_v25 = vor.u32 %v12442_v6, %v10106_v1 }
 0x36c   : > { %3476 = vmatmul.bf16.gmra.mxu1 %v10101_v32  ;;  %v10832_v32 = vld [vmem:[%s13165_s14 + $0x900] sm:$0xf] }
 0x36d   : > { %v4094_v59 = vmax.f32 %v3438_v29, 0.0  ;;  %v13701_v22 = vpop.f32.mrf.mxu2  ;;  %v10833_v37 = vor.u32 %v12625_v50, %v10832_v32  ;;  %v12445_v32 = vld [vmem:[%s13165_s14 + $0x364] sm:$0xf0]  ;;  %v12444_v50 = vld [vmem:[%s13165_s14 + $0x364] sm:$0xf] }
 0x36e   : > { %17468 = vst [vmem:[#allocation21_spill] sm:$0xff] %v13701_v22 }
 0x36f   : > { %v4409_v34 = vpack.c.bf16 %v4094_v59, %v4094_v59  ;;  %3138 = vmatmul.bf16.gmra.mxu2 %v10833_v37 }
 0x370   : > { %v2641_v4 = vpop.f32.mrf.mxu0 }
 0x371   : > { %v3439_v45 = vpop.f32.mrf.mxu1  ;;  %v2642_v40 = vadd.f32 %v13643_v43, %v2641_v4  ;;  %v4901_v4 = vunpack.c.l.b16 %v4409_v34 }
 0x373   : > { %v3440_v16 = vadd.f32 %v3439_v45, %v2642_v40 }
 0x375   : > { %v4095_v0 = vmax.f32 %v3440_v16, 0.0  ;;  %v13708_v16 = vpop.f32.mrf.mxu2 }
 0x376   : > { %17469 = vst [vmem:[#allocation22_spill] sm:$0xff] %v13708_v16 }
 0x377   : > { %v4410_v60 = vpack.c.bf16 %v4095_v0, %v4095_v0  ;;  %v10112_v0 = vld [vmem:[%s13165_s14 + $0x360] sm:$0xf] }
 0x378   : > { %v2644_v5 = vpop.f32.mrf.mxu0 }
 0x379   : > { %v3442_v29 = vpop.f32.mrf.mxu1  ;;  %v4902_v45 = vunpack.c.l.b16 %v4410_v60  ;;  %v2645_v40 = vadd.f32 %v13643_v43, %v2644_v5  ;;  %v10114_v5 = vld [vmem:[%s13165_s14 + $0x368] sm:$0xf0] }
 0x37b   : > { %v3443_v22 = vadd.f32 %v3442_v29, %v2645_v40  ;;  %2683 = vmatmul.bf16.gmra.mxu0 %v10105_v41  ;;  %v13706_v59 = vpack.c.b16 %v4902_v45, %v4901_v4  ;;  %v12627_v29 = vld [vmem:[%s13165_s14 + $0x914] sm:$0xf0]  ;;  %v10113_v45 = vor.u32 %v12445_v32, %v10112_v0  ;;  %v10117_v40 = vor.u32 %v12444_v50, %v10114_v5 }
 0x37c   : > { %3481 = vmatmul.bf16.gmra.mxu1 %v10109_v25  ;;  %v10840_v25 = vld [vmem:[%s13165_s14 + $0x910] sm:$0xf] }
 0x37d   : > { %v4096_v6 = vmax.f32 %v3443_v22, 0.0  ;;  %v13715_v37 = vpop.f32.mrf.mxu2  ;;  %v10841_v16 = vor.u32 %v12627_v29, %v10840_v25  ;;  %v12447_v25 = vld [vmem:[%s13165_s14 + $0x374] sm:$0xf0]  ;;  %v12446_v29 = vld [vmem:[%s13165_s14 + $0x374] sm:$0xf] }
 0x37e   : > { %17470 = vst [vmem:[#allocation23_spill] sm:$0xff] %v13715_v37 }
 0x37f   : > { %v4411_v60 = vpack.c.bf16 %v4096_v6, %v4096_v6  ;;  %3143 = vmatmul.bf16.gmra.mxu2 %v10841_v16 }
 0x380   : > { %v2646_v62 = vpop.f32.mrf.mxu0 }
 0x381   : > { %v3444_v33 = vpop.f32.mrf.mxu1  ;;  %v2647_v1 = vadd.f32 %v13643_v43, %v2646_v62  ;;  %v4903_v62 = vunpack.c.l.b16 %v4411_v60 }
 0x383   : > { %v3445_v34 = vadd.f32 %v3444_v33, %v2647_v1 }
 0x385   : > { %v4097_v41 = vmax.f32 %v3445_v34, 0.0  ;;  %v13722_v34 = vpop.f32.mrf.mxu2 }
 0x386   : > { %17471 = vst [vmem:[#allocation24_spill] sm:$0xff] %v13722_v34 }
 0x387   : > { %v4412_v4 = vpack.c.bf16 %v4097_v41, %v4097_v41  ;;  %v10120_v41 = vld [vmem:[%s13165_s14 + $0x370] sm:$0xf] }
 0x388   : > { %v2649_v19 = vpop.f32.mrf.mxu0 }
 0x389   : > { %v3447_v22 = vpop.f32.mrf.mxu1  ;;  %v4904_v33 = vunpack.c.l.b16 %v4412_v4  ;;  %v2650_v1 = vadd.f32 %v13643_v43, %v2649_v19  ;;  %v10122_v19 = vld [vmem:[%s13165_s14 + $0x378] sm:$0xf0] }
 0x38b   : > { %v3448_v37 = vadd.f32 %v3447_v22, %v2650_v1  ;;  %2688 = vmatmul.bf16.gmra.mxu0 %v10113_v45  ;;  %v13720_v6 = vpack.c.b16 %v4904_v33, %v4903_v62  ;;  %v12629_v22 = vld [vmem:[%s13165_s14 + $0x924] sm:$0xf0]  ;;  %v10121_v33 = vor.u32 %v12447_v25, %v10120_v41  ;;  %v10125_v1 = vor.u32 %v12446_v29, %v10122_v19 }
 0x38c   : > { %3486 = vmatmul.bf16.gmra.mxu1 %v10117_v40  ;;  %v10848_v40 = vld [vmem:[%s13165_s14 + $0x920] sm:$0xf] }
 0x38d   : > { %v4098_v50 = vmax.f32 %v3448_v37, 0.0  ;;  %v13729_v16 = vpop.f32.mrf.mxu2  ;;  %v10849_v34 = vor.u32 %v12629_v22, %v10848_v40  ;;  %v12449_v40 = vld [vmem:[%s13165_s14 + $0x384] sm:$0xf0]  ;;  %v12448_v22 = vld [vmem:[%s13165_s14 + $0x384] sm:$0xf] }
 0x38e   : > { %17472 = vst [vmem:[#allocation25_spill] sm:$0xff] %v13729_v16 }
 0x38f   : > { %v4413_v4 = vpack.c.bf16 %v4098_v50, %v4098_v50  ;;  %3148 = vmatmul.bf16.gmra.mxu2 %v10849_v34 }
 0x390   : > { %v2651_v0 = vpop.f32.mrf.mxu0 }
 0x391   : > { %v3449_v32 = vpop.f32.mrf.mxu1  ;;  %v2652_v5 = vadd.f32 %v13643_v43, %v2651_v0  ;;  %v4905_v0 = vunpack.c.l.b16 %v4413_v4 }
 0x393   : > { %v3450_v60 = vadd.f32 %v3449_v32, %v2652_v5 }
 0x395   : > { %v4099_v45 = vmax.f32 %v3450_v60, 0.0  ;;  %v13736_v60 = vpop.f32.mrf.mxu2 }
 0x396   : > { %17473 = vst [vmem:[#allocation26_spill] sm:$0xff] %v13736_v60 }
 0x397   : > { %v4414_v62 = vpack.c.bf16 %v4099_v45, %v4099_v45  ;;  %v10128_v45 = vld [vmem:[%s13165_s14 + $0x380] sm:$0xf] }
 0x398   : > { %v2654_v56 = vpop.f32.mrf.mxu0 }
 0x399   : > { %v3452_v37 = vpop.f32.mrf.mxu1  ;;  %v4906_v32 = vunpack.c.l.b16 %v4414_v62  ;;  %v2655_v5 = vadd.f32 %v13643_v43, %v2654_v56  ;;  %v10130_v56 = vld [vmem:[%s13165_s14 + $0x388] sm:$0xf0] }
 0x39b   : > { %v3453_v16 = vadd.f32 %v3452_v37, %v2655_v5  ;;  %2693 = vmatmul.bf16.gmra.mxu0 %v10121_v33  ;;  %v13734_v50 = vpack.c.b16 %v4906_v32, %v4905_v0  ;;  %v12631_v37 = vld [vmem:[%s13165_s14 + $0x934] sm:$0xf0]  ;;  %v10129_v32 = vor.u32 %v12449_v40, %v10128_v45  ;;  %v10133_v5 = vor.u32 %v12448_v22, %v10130_v56 }
 0x39c   : > { %3491 = vmatmul.bf16.gmra.mxu1 %v10125_v1  ;;  %v10856_v1 = vld [vmem:[%s13165_s14 + $0x930] sm:$0xf] }
 0x39d   : > { %v4100_v29 = vmax.f32 %v3453_v16, 0.0  ;;  %v13743_v34 = vpop.f32.mrf.mxu2  ;;  %v10857_v60 = vor.u32 %v12631_v37, %v10856_v1  ;;  %v12451_v1 = vld [vmem:[%s13165_s14 + $0x394] sm:$0xf0]  ;;  %v12450_v37 = vld [vmem:[%s13165_s14 + $0x394] sm:$0xf] }
 0x39e   : > { %17474 = vst [vmem:[#allocation27_spill] sm:$0xff] %v13743_v34 }
 0x39f   : > { %v4415_v62 = vpack.c.bf16 %v4100_v29, %v4100_v29  ;;  %3153 = vmatmul.bf16.gmra.mxu2 %v10857_v60 }
 0x3a0   : > { %v2656_v41 = vpop.f32.mrf.mxu0 }
 0x3a1   : > { %v3454_v25 = vpop.f32.mrf.mxu1  ;;  %v2657_v19 = vadd.f32 %v13643_v43, %v2656_v41  ;;  %v4907_v41 = vunpack.c.l.b16 %v4415_v62 }
 0x3a3   : > { %v3455_v4 = vadd.f32 %v3454_v25, %v2657_v19 }
 0x3a5   : > { %v4101_v33 = vmax.f32 %v3455_v4, 0.0  ;;  %v13750_v4 = vpop.f32.mrf.mxu2 }
 0x3a6   : > { %17475 = vst [vmem:[#allocation28_spill] sm:$0xff] %v13750_v4 }
 0x3a7   : > { %v4416_v0 = vpack.c.bf16 %v4101_v33, %v4101_v33  ;;  %v10136_v33 = vld [vmem:[%s13165_s14 + $0x390] sm:$0xf] }
 0x3a8   : > { %v2659_v49 = vpop.f32.mrf.mxu0 }
 0x3a9   : > { %v3457_v16 = vpop.f32.mrf.mxu1  ;;  %v4908_v25 = vunpack.c.l.b16 %v4416_v0  ;;  %v2660_v19 = vadd.f32 %v13643_v43, %v2659_v49  ;;  %v10138_v49 = vld [vmem:[%s13165_s14 + $0x398] sm:$0xf0] }
 0x3ab   : > { %v3458_v34 = vadd.f32 %v3457_v16, %v2660_v19  ;;  %2698 = vmatmul.bf16.gmra.mxu0 %v10129_v32  ;;  %v13748_v29 = vpack.c.b16 %v4908_v25, %v4907_v41  ;;  %v12633_v16 = vld [vmem:[%s13165_s14 + $0x944] sm:$0xf0]  ;;  %v10137_v25 = vor.u32 %v12451_v1, %v10136_v33  ;;  %v10141_v19 = vor.u32 %v12450_v37, %v10138_v49 }
 0x3ac   : > { %3496 = vmatmul.bf16.gmra.mxu1 %v10133_v5  ;;  %v10864_v5 = vld [vmem:[%s13165_s14 + $0x940] sm:$0xf] }
 0x3ad   : > { %v4102_v22 = vmax.f32 %v3458_v34, 0.0  ;;  %v13757_v60 = vpop.f32.mrf.mxu2  ;;  %v10865_v4 = vor.u32 %v12633_v16, %v10864_v5  ;;  %v12453_v5 = vld [vmem:[%s13165_s14 + $0x3a4] sm:$0xf0]  ;;  %v12452_v16 = vld [vmem:[%s13165_s14 + $0x3a4] sm:$0xf] }
 0x3ae   : > { %17476 = vst [vmem:[#allocation29_spill] sm:$0xff] %v13757_v60 }
 0x3af   : > { %v4417_v0 = vpack.c.bf16 %v4102_v22, %v4102_v22  ;;  %3158 = vmatmul.bf16.gmra.mxu2 %v10865_v4 }
 0x3b0   : > { %v2661_v45 = vpop.f32.mrf.mxu0 }
 0x3b1   : > { %v3459_v40 = vpop.f32.mrf.mxu1  ;;  %v2662_v56 = vadd.f32 %v13643_v43, %v2661_v45  ;;  %v4909_v45 = vunpack.c.l.b16 %v4417_v0 }
 0x3b3   : > { %v3460_v62 = vadd.f32 %v3459_v40, %v2662_v56 }
 0x3b5   : > { %v4103_v32 = vmax.f32 %v3460_v62, 0.0  ;;  %v13764_v62 = vpop.f32.mrf.mxu2 }
 0x3b6   : > { %17478 = vst [vmem:[#allocation31_spill] sm:$0xff] %v13764_v62 }
 0x3b7   : > { %v4418_v41 = vpack.c.bf16 %v4103_v32, %v4103_v32  ;;  %v10144_v32 = vld [vmem:[%s13165_s14 + $0x3a0] sm:$0xf] }
 0x3b8   : > { %v2664_v28 = vpop.f32.mrf.mxu0 }
 0x3b9   : > { %v3462_v34 = vpop.f32.mrf.mxu1  ;;  %v4910_v40 = vunpack.c.l.b16 %v4418_v41  ;;  %v2665_v56 = vadd.f32 %v13643_v43, %v2664_v28  ;;  %v10146_v28 = vld [vmem:[%s13165_s14 + $0x3a8] sm:$0xf0] }
 0x3bb   : > { %v3463_v60 = vadd.f32 %v3462_v34, %v2665_v56  ;;  %2703 = vmatmul.bf16.gmra.mxu0 %v10137_v25  ;;  %v13762_v22 = vpack.c.b16 %v4910_v40, %v4909_v45  ;;  %v12635_v34 = vld [vmem:[%s13165_s14 + $0x954] sm:$0xf0]  ;;  %v10145_v40 = vor.u32 %v12453_v5, %v10144_v32  ;;  %v10149_v56 = vor.u32 %v12452_v16, %v10146_v28 }
 0x3bc   : > { %3501 = vmatmul.bf16.gmra.mxu1 %v10141_v19  ;;  %v10872_v19 = vld [vmem:[%s13165_s14 + $0x950] sm:$0xf] }
 0x3bd   : > { %17477 = vst [vmem:[#allocation30_spill] sm:$0xff] %v13762_v22  ;;  %v4104_v37 = vmax.f32 %v3463_v60, 0.0  ;;  %v13771_v4 = vpop.f32.mrf.mxu2  ;;  %v10873_v22 = vor.u32 %v12635_v34, %v10872_v19  ;;  %v12455_v19 = vld [vmem:[%s13165_s14 + $0x3b4] sm:$0xf0]  ;;  %v12454_v34 = vld [vmem:[%s13165_s14 + $0x3b4] sm:$0xf] }
 0x3be   : > { %17479 = vst [vmem:[#allocation32_spill] sm:$0xff] %v13771_v4 }
 0x3bf   : > { %v4419_v41 = vpack.c.bf16 %v4104_v37, %v4104_v37  ;;  %3163 = vmatmul.bf16.gmra.mxu2 %v10873_v22 }
 0x3c0   : > { %v2666_v33 = vpop.f32.mrf.mxu0 }
 0x3c1   : > { %v3464_v1 = vpop.f32.mrf.mxu1  ;;  %v2667_v49 = vadd.f32 %v13643_v43, %v2666_v33  ;;  %v4911_v33 = vunpack.c.l.b16 %v4419_v41 }
 0x3c3   : > { %v3465_v0 = vadd.f32 %v3464_v1, %v2667_v49 }
 0x3c5   : > { %v4105_v25 = vmax.f32 %v3465_v0, 0.0  ;;  %v13778_v0 = vpop.f32.mrf.mxu2 }
 0x3c6   : > { %17481 = vst [vmem:[#allocation34_spill] sm:$0xff] %v13778_v0 }
 0x3c7   : > { %v4420_v45 = vpack.c.bf16 %v4105_v25, %v4105_v25  ;;  %v10152_v25 = vld [vmem:[%s13165_s14 + $0x3b0] sm:$0xf] }
 0x3c8   : > { %v2669_v62 = vpop.f32.mrf.mxu0 }
 0x3c9   : > { %v3467_v60 = vpop.f32.mrf.mxu1  ;;  %v4912_v1 = vunpack.c.l.b16 %v4420_v45  ;;  %v2670_v49 = vadd.f32 %v13643_v43, %v2669_v62  ;;  %v10154_v62 = vld [vmem:[%s13165_s14 + $0x3b8] sm:$0xf0] }
 0x3cb   : > { %v3468_v4 = vadd.f32 %v3467_v60, %v2670_v49  ;;  %2708 = vmatmul.bf16.gmra.mxu0 %v10145_v40  ;;  %v13776_v37 = vpack.c.b16 %v4912_v1, %v4911_v33  ;;  %v12637_v60 = vld [vmem:[%s13165_s14 + $0x964] sm:$0xf0]  ;;  %v10153_v1 = vor.u32 %v12455_v19, %v10152_v25  ;;  %v10157_v49 = vor.u32 %v12454_v34, %v10154_v62 }
 0x3cc   : > { %3506 = vmatmul.bf16.gmra.mxu1 %v10149_v56  ;;  %v10880_v56 = vld [vmem:[%s13165_s14 + $0x960] sm:$0xf] }
 0x3cd   : > { %17480 = vst [vmem:[#allocation33_spill] sm:$0xff] %v13776_v37  ;;  %v4106_v16 = vmax.f32 %v3468_v4, 0.0  ;;  %v13785_v22 = vpop.f32.mrf.mxu2  ;;  %v10881_v37 = vor.u32 %v12637_v60, %v10880_v56  ;;  %v12457_v56 = vld [vmem:[%s13165_s14 + $0x3c4] sm:$0xf0]  ;;  %v12456_v60 = vld [vmem:[%s13165_s14 + $0x3c4] sm:$0xf] }
 0x3ce   : > { %17482 = vst [vmem:[#allocation35_spill] sm:$0xff] %v13785_v22 }
 0x3cf   : > { %v4421_v45 = vpack.c.bf16 %v4106_v16, %v4106_v16  ;;  %3168 = vmatmul.bf16.gmra.mxu2 %v10881_v37 }
 0x3d0   : > { %v2671_v32 = vpop.f32.mrf.mxu0 }
 0x3d1   : > { %v3469_v5 = vpop.f32.mrf.mxu1  ;;  %v2672_v28 = vadd.f32 %v13643_v43, %v2671_v32  ;;  %v4913_v32 = vunpack.c.l.b16 %v4421_v45 }
 0x3d3   : > { %v3470_v41 = vadd.f32 %v3469_v5, %v2672_v28 }
 0x3d5   : > { %v4107_v40 = vmax.f32 %v3470_v41, 0.0  ;;  %v13792_v41 = vpop.f32.mrf.mxu2 }
 0x3d6   : > { %17484 = vst [vmem:[#allocation37_spill] sm:$0xff] %v13792_v41 }
 0x3d7   : > { %v4422_v33 = vpack.c.bf16 %v4107_v40, %v4107_v40  ;;  %v10160_v40 = vld [vmem:[%s13165_s14 + $0x3c0] sm:$0xf] }
 0x3d8   : > { %v2674_v0 = vpop.f32.mrf.mxu0 }
 0x3d9   : > { %v3472_v4 = vpop.f32.mrf.mxu1  ;;  %v4914_v5 = vunpack.c.l.b16 %v4422_v33  ;;  %v2675_v28 = vadd.f32 %v13643_v43, %v2674_v0  ;;  %v10162_v0 = vld [vmem:[%s13165_s14 + $0x3c8] sm:$0xf0] }
 0x3db   : > { %v3473_v22 = vadd.f32 %v3472_v4, %v2675_v28  ;;  %2713 = vmatmul.bf16.gmra.mxu0 %v10153_v1  ;;  %v13790_v16 = vpack.c.b16 %v4914_v5, %v4913_v32  ;;  %v12639_v4 = vld [vmem:[%s13165_s14 + $0x974] sm:$0xf0]  ;;  %v10161_v5 = vor.u32 %v12457_v56, %v10160_v40  ;;  %v10165_v28 = vor.u32 %v12456_v60, %v10162_v0 }
 0x3dc   : > { %3511 = vmatmul.bf16.gmra.mxu1 %v10157_v49  ;;  %v10888_v49 = vld [vmem:[%s13165_s14 + $0x970] sm:$0xf] }
 0x3dd   : > { %17483 = vst [vmem:[#allocation36_spill] sm:$0xff] %v13790_v16  ;;  %v4108_v34 = vmax.f32 %v3473_v22, 0.0  ;;  %v13799_v37 = vpop.f32.mrf.mxu2  ;;  %v10889_v16 = vor.u32 %v12639_v4, %v10888_v49  ;;  %v12458_v49 = vld [vmem:[%s13165_s14 + $0x3d4] sm:$0xf]  ;;  %v10170_v4 = vld [vmem:[%s13165_s14 + $0x3d8] sm:$0xf0] }
 0x3df   : > { %v4423_v33 = vpack.c.bf16 %v4108_v34, %v4108_v34  ;;  %3173 = vmatmul.bf16.gmra.mxu2 %v10889_v16 }
 0x3e0   : > { %v2676_v25 = vpop.f32.mrf.mxu0 }
 0x3e1   : > { %v3474_v19 = vpop.f32.mrf.mxu1  ;;  %v2677_v62 = vadd.f32 %v13643_v43, %v2676_v25 }
 0x3e3   : > { %v3475_v45 = vadd.f32 %v3474_v19, %v2677_v62  ;;  %v4915_v19 = vunpack.c.l.b16 %v4423_v33  ;;  %v12459_v33 = vld [vmem:[%s13165_s14 + $0x3d4] sm:$0xf0] }
 0x3e5   : > { %v4109_v1 = vmax.f32 %v3475_v45, 0.0  ;;  %v13808_v40 = vpop.f32.mrf.mxu2 }
 0x3e6   : > { %17487 = vst [vmem:[#allocation40_spill] sm:$0xff] %v13808_v40 }
 0x3e7   : > { %v4424_v32 = vpack.c.bf16 %v4109_v1, %v4109_v1  ;;  %v10168_v1 = vld [vmem:[%s13165_s14 + $0x3d0] sm:$0xf] }
 0x3e8   : > { %v2679_v22 = vpop.f32.mrf.mxu0 }
 0x3e9   : > { %v3477_v25 = vpop.f32.mrf.mxu1  ;;  %v4916_v62 = vunpack.c.l.b16 %v4424_v32  ;;  %v2680_v41 = vadd.f32 %v13643_v43, %v2679_v22  ;;  %v10896_v22 = vld [vmem:[%s13165_s14 + $0x980] sm:$0xf] }
 0x3eb   : > { %v13804_v34 = vadd.f32 %v3477_v25, %v2680_v41  ;;  %2718 = vmatmul.bf16.gmra.mxu0 %v10161_v5  ;;  %v13806_v45 = vpack.c.b16 %v4916_v62, %v4915_v19  ;;  %v12641_v41 = vld [vmem:[%s13165_s14 + $0x984] sm:$0xf0]  ;;  %v10169_v25 = vor.u32 %v12459_v33, %v10168_v1  ;;  %v10173_v5 = vor.u32 %v12458_v49, %v10170_v4 }
 0x3ec   : > { %3516 = vmatmul.bf16.gmra.mxu1 %v10165_v28  ;;  %v10897_v28 = vor.u32 %v12641_v41, %v10896_v22 }
 0x3ed   : > { %17485 = vst [vmem:[#allocation38_spill] sm:$0xff] %v13804_v34  ;;  %v13815_v32 = vpop.f32.mrf.mxu2 }
 0x3ee   : > { %17486 = vst [vmem:[#allocation39_spill] sm:$0xff] %v13806_v45 }
 0x3ef   : > { %17488 = vst [vmem:[#allocation41_spill] sm:$0xff] %v13815_v32  ;;  %3178 = vmatmul.bf16.gmra.mxu2 %v10897_v28  ;;  %v10176_v28 = vld [vmem:[%s13165_s14 + $0x3e0] sm:$0xf] }
 0x3f0   : > { %v2681_v56 = vpop.f32.mrf.mxu0 }
 0x3f1   : > { %v3479_v60 = vpop.f32.mrf.mxu1  ;;  %v2682_v0 = vadd.f32 %v13643_v43, %v2681_v56 }
 0x3f3   : > { %v3480_v16 = vadd.f32 %v3479_v60, %v2682_v0 }
 0x3f5   : > { %v4111_v34 = vmax.f32 %v3480_v16, 0.0  ;;  %v13820_v32 = vpop.f32.mrf.mxu2 }
 0x3f6   : > { %17489 = vst [vmem:[#allocation42_spill] sm:$0xff] %v13820_v32 }
 0x3f7   : > { %v4426_v60 = vpack.c.bf16 %v4111_v34, %v4111_v34  ;;  %v10904_v34 = vld [vmem:[%s13165_s14 + $0x990] sm:$0xf] }
 0x3f8   : > { %v2684_v19 = vpop.f32.mrf.mxu0 }
 0x3f9   : > { %v3482_v62 = vpop.f32.mrf.mxu1  ;;  %v2685_v45 = vadd.f32 %v13643_v43, %v2684_v19  ;;  %v5007_v4 = vunpack.c.l.b16 %v4426_v60  ;;  %v12461_v19 = vld [vmem:[%s13165_s14 + $0x3e4] sm:$0xf0] }
 0x3fb   : > { %v3483_v56 = vadd.f32 %v3482_v62, %v2685_v45  ;;  %2723 = vmatmul.bf16.gmra.mxu0 %v10169_v25  ;;  %v12460_v45 = vld [vmem:[%s13165_s14 + $0x3e4] sm:$0xf]  ;;  %v10178_v62 = vld [vmem:[%s13165_s14 + $0x3e8] sm:$0xf0] }
 0x3fc   : > { %3521 = vmatmul.bf16.gmra.mxu1 %v10173_v5  ;;  %v10181_v60 = vor.u32 %v12460_v45, %v10178_v62 }
 0x3fd   : > { %v4112_v0 = vmax.f32 %v3483_v56, 0.0  ;;  %v13827_v25 = vpop.f32.mrf.mxu2  ;;  %v12643_v56 = vld [vmem:[%s13165_s14 + $0x994] sm:$0xf0] }
 0x3ff   : > { %v4427_v1 = vpack.c.bf16 %v4112_v0, %v4112_v0  ;;  %v10177_v0 = vor.u32 %v12461_v19, %v10176_v28 }
 0x400   : > { %v2686_v33 = vpop.f32.mrf.mxu0 }
 0x401   : > { %v3484_v49 = vpop.f32.mrf.mxu1  ;;  %v5008_v16 = vunpack.c.l.b16 %v4427_v1  ;;  %v2687_v22 = vadd.f32 %v13643_v43, %v2686_v33  ;;  %v10905_v1 = vor.u32 %v12643_v56, %v10904_v34 }
 0x403   : > { %v5042_v41 = vpack.c.b16 %v5008_v16, %v5007_v4  ;;  %v3485_v5 = vadd.f32 %v3484_v49, %v2687_v22  ;;  %3183 = vmatmul.bf16.gmra.mxu2 %v10905_v1  ;;  %v12580_v22 = vld [vmem:[%s13165_s14 + $0x7a4] sm:$0xf]  ;;  %v10184_v1 = vld [vmem:[%s13165_s14 + $0x3f0] sm:$0xf] }
 0x405   : > { %5060 = vrot.lane.b32.xlu1 %v5042_v41, %s13044_s29  ;;  %v4113_v4 = vmax.f32 %v3485_v5, 0.0  ;;  %v13833_v49 = vpop.f32.mrf.mxu2  ;;  %v10658_v41 = vld [vmem:[%s13165_s14 + $0x7a8] sm:$0xf0] }
 0x406   : > { %17490 = vst [vmem:[#allocation43_spill] sm:$0xff] %v13833_v49  ;;  %v10661_v45 = vor.u32 %v12580_v22, %v10658_v41  ;;  %v12645_v22 = vld [vmem:[%s13165_s14 + $0x9a4] sm:$0xf0] }
 0x407   : > { %v4428_v28 = vpack.c.bf16 %v4113_v4, %v4113_v4  ;;  %v10186_v4 = vld [vmem:[%s13165_s14 + $0x3f8] sm:$0xf0] }
 0x408   : > { %v2689_v32 = vpop.f32.mrf.mxu0  ;;  %3826 = vmatmul.bf16.vlgmr.msra.gmra.mxu3 %v10661_v45 }
 0x409   : > { %v3487_v33 = vpop.f32.mrf.mxu1  ;;  %v2690_v16 = vadd.f32 %v13643_v43, %v2689_v32  ;;  %v5009_v34 = vunpack.c.l.b16 %v4428_v28 }
 0x40b   : > { %v3488_v40 = vadd.f32 %v3487_v33, %v2690_v16  ;;  %2728 = vmatmul.bf16.gmra.mxu0 %v10177_v0  ;;  %v12463_v33 = vld [vmem:[%s13165_s14 + $0x3f4] sm:$0xf0]  ;;  %v12462_v16 = vld [vmem:[%s13165_s14 + $0x3f4] sm:$0xf] }
 0x40c   : > { %3526 = vmatmul.bf16.gmra.mxu1 %v10181_v60  ;;  %v10185_v41 = vor.u32 %v12463_v33, %v10184_v1  ;;  %v10189_v28 = vor.u32 %v12462_v16, %v10186_v4 }
 0x40d   : > { %v4114_v19 = vmax.f32 %v3488_v40, 0.0  ;;  %4814 = vrot.lane.b32.xlu1 %v13368_v38, %s13042_s23  ;;  %v13844_v40 = vpop.f32.mrf.mxu2  ;;  %v10912_v38 = vld [vmem:[%s13165_s14 + $0x9a0] sm:$0xf] }
 0x40f   : > { %v4429_v62 = vpack.c.bf16 %v4114_v19, %v4114_v19  ;;  %v10913_v19 = vor.u32 %v12645_v22, %v10912_v38 }
 0x410   : > { %v2691_v32 = vpop.f32.mrf.mxu0 }
 0x411   : > { %v3489_v5 = vpop.f32.mrf.mxu1  ;;  %v5010_v56 = vunpack.c.l.b16 %v4429_v62  ;;  %v2692_v0 = vadd.f32 %v13643_v43, %v2691_v32 }
 0x413   : > { %v5043_v60 = vpack.c.b16 %v5010_v56, %v5009_v34  ;;  %v3490_v49 = vadd.f32 %v3489_v5, %v2692_v0  ;;  %3188 = vmatmul.bf16.gmra.mxu2 %v10913_v19  ;;  %v10666_v0 = vld [vmem:[%s13165_s14 + $0x7b8] sm:$0xf0]  ;;  %v10192_v19 = vld [vmem:[%s13165_s14 + $0x400] sm:$0xf] }
 0x415   : > { %5062 = vrot.lane.b32.xlu2 %v5043_v60, %s13044_s29  ;;  %4940 = vrot.lane.b32.xlu1 %v13587_v63, %s13043_s26  ;;  %v4115_v32 = vmax.f32 %v3490_v49, 0.0  ;;  %v13852_v5 = vpop.f32.mrf.mxu2  ;;  %v12582_v63 = vld [vmem:[%s13165_s14 + $0x7b4] sm:$0xf] }
 0x416   : > { %v10669_v49 = vor.u32 %v12582_v63, %v10666_v0  ;;  %v12647_v63 = vld [vmem:[%s13165_s14 + $0x9b4] sm:$0xf0] }
 0x417   : > { %v4430_v60 = vpack.c.bf16 %v4115_v32, %v4115_v32  ;;  %v10194_v32 = vld [vmem:[%s13165_s14 + $0x408] sm:$0xf0] }
 0x418   : > { %v2694_v45 = vpop.f32.mrf.mxu0  ;;  %3831 = vmatmul.bf16.gmra.mxu3 %v10669_v49 }
 0x419   : > { %v3492_v62 = vpop.f32.mrf.mxu1  ;;  %v2695_v34 = vadd.f32 %v13643_v43, %v2694_v45  ;;  %v5011_v38 = vunpack.c.l.b16 %v4430_v60  ;;  %v12465_v45 = vld [vmem:[%s13165_s14 + $0x404] sm:$0xf0] }
 0x41a   : > { %v10193_v0 = vor.u32 %v12465_v45, %v10192_v19 }
 0x41b   : > { %v3493_v56 = vadd.f32 %v3492_v62, %v2695_v34  ;;  %2733 = vmatmul.bf16.gmra.mxu0 %v10185_v41  ;;  %v12464_v62 = vld [vmem:[%s13165_s14 + $0x404] sm:$0xf] }
 0x41c   : > { %3531 = vmatmul.bf16.gmra.mxu1 %v10189_v28  ;;  %v10197_v60 = vor.u32 %v12464_v62, %v10194_v32 }
 0x41d   : > { %v4116_v1 = vmax.f32 %v3493_v56, 0.0  ;;  %4942 = vrot.lane.b32.xlu1 %v13605_v11, %s13043_s26  ;;  %v13863_v34 = vpop.f32.mrf.mxu2  ;;  %v10920_v11 = vld [vmem:[%s13165_s14 + $0x9b0] sm:$0xf] }
 0x41e   : > { %17491 = vst [vmem:[#allocation44_spill] sm:$0xff] %v13863_v34 }
 0x41f   : > { %v4431_v33 = vpack.c.bf16 %v4116_v1, %v4116_v1  ;;  %v10921_v1 = vor.u32 %v12647_v63, %v10920_v11 }
 0x420   : > { %v2696_v16 = vpop.f32.mrf.mxu0 }
 0x421   : > { %v3494_v4 = vpop.f32.mrf.mxu1  ;;  %v5012_v22 = vunpack.c.l.b16 %v4431_v33  ;;  %v2697_v41 = vadd.f32 %v13643_v43, %v2696_v16 }
 0x423   : > { %v5044_v28 = vpack.c.b16 %v5012_v22, %v5011_v38  ;;  %v3495_v56 = vadd.f32 %v3494_v4, %v2697_v41  ;;  %3193 = vmatmul.bf16.gmra.mxu2 %v10921_v1  ;;  %v10674_v41 = vld [vmem:[%s13165_s14 + $0x7c8] sm:$0xf0]  ;;  %v10200_v1 = vld [vmem:[%s13165_s14 + $0x410] sm:$0xf] }
 0x425   : > { %5064 = vrot.lane.b32.xlu2 %v5044_v28, %s13044_s29  ;;  %4944 = vrot.lane.b32.xlu1 %v13623_v23, %s13043_s26  ;;  %v4117_v16 = vmax.f32 %v3495_v56, 0.0  ;;  %v13871_v4 = vpop.f32.mrf.mxu2  ;;  %v12584_v23 = vld [vmem:[%s13165_s14 + $0x7c4] sm:$0xf] }
 0x426   : > { %v10677_v45 = vor.u32 %v12584_v23, %v10674_v41  ;;  %v12649_v23 = vld [vmem:[%s13165_s14 + $0x9c4] sm:$0xf0] }
 0x427   : > { %v4432_v28 = vpack.c.bf16 %v4117_v16, %v4117_v16  ;;  %v10202_v16 = vld [vmem:[%s13165_s14 + $0x418] sm:$0xf0] }
 0x428   : > { %v2699_v49 = vpop.f32.mrf.mxu0  ;;  %3836 = vmatmul.bf16.gmra.mxu3 %v10677_v45 }
 0x429   : > { %v3497_v33 = vpop.f32.mrf.mxu1  ;;  %v2700_v38 = vadd.f32 %v13643_v43, %v2699_v49  ;;  %v5013_v11 = vunpack.c.l.b16 %v4432_v28  ;;  %v12467_v49 = vld [vmem:[%s13165_s14 + $0x414] sm:$0xf0] }
 0x42a   : > { %v10201_v41 = vor.u32 %v12467_v49, %v10200_v1  ;;  %v10682_v1 = vld [vmem:[%s13165_s14 + $0x7d8] sm:$0xf0] }
 0x42b   : > { %v3498_v22 = vadd.f32 %v3497_v33, %v2700_v38  ;;  %2738 = vmatmul.bf16.gmra.mxu0 %v10193_v0  ;;  %v12466_v33 = vld [vmem:[%s13165_s14 + $0x414] sm:$0xf] }
 0x42c   : > { %3536 = vmatmul.bf16.gmra.mxu1 %v10197_v60  ;;  %v10205_v28 = vor.u32 %v12466_v33, %v10202_v16 }
 0x42d   : > { %v4118_v19 = vmax.f32 %v3498_v22, 0.0  ;;  %4946 = vrot.lane.b32.xlu1 %v13646_v55, %s13043_s26  ;;  %v13882_v38 = vpop.f32.mrf.mxu2  ;;  %v10928_v55 = vld [vmem:[%s13165_s14 + $0x9c0] sm:$0xf] }
 0x42e   : > { %17492 = vst [vmem:[#allocation45_spill] sm:$0xff] %v13882_v38 }
 0x42f   : > { %v4433_v62 = vpack.c.bf16 %v4118_v19, %v4118_v19  ;;  %v10929_v19 = vor.u32 %v12649_v23, %v10928_v55 }
 0x430   : > { %v2701_v32 = vpop.f32.mrf.mxu0 }
 0x431   : > { %v3499_v56 = vpop.f32.mrf.mxu1  ;;  %v5014_v63 = vunpack.c.l.b16 %v4433_v62  ;;  %v2702_v0 = vadd.f32 %v13643_v43, %v2701_v32  ;;  %v12673_v32 = vld [vmem:[%s17440_s3 + $0x38] sm:$0xff] }
 0x432   : > { %6137 = vmatpush.bf16.msrb.mxu2 %v12673_v32  ;;  %v10208_v32 = vld [vmem:[%s13165_s14 + $0x420] sm:$0xf] }
 0x433   : > { %v5045_v60 = vpack.c.b16 %v5014_v63, %v5013_v11  ;;  %v3500_v22 = vadd.f32 %v3499_v56, %v2702_v0  ;;  %3198 = vmatmul.bf16.gmra.mxu2 %v10929_v19  ;;  %v12672_v0 = vld [vmem:[%s17440_s3 + $0x30] sm:$0xff] }
 0x435   : > { %5066 = vrot.lane.b32.xlu2 %v5045_v60, %s13044_s29  ;;  %4948 = vrot.lane.b32.xlu1 %v13664_v3, %s13043_s26  ;;  %v4119_v11 = vmax.f32 %v3500_v22, 0.0  ;;  %v13893_v3 = vpop.f32.mrf.mxu2  ;;  %v12586_v60 = vld [vmem:[%s13165_s14 + $0x7d4] sm:$0xf] }
 0x436   : > { %v10685_v16 = vor.u32 %v12586_v60, %v10682_v1  ;;  %6138 = vmatpush.bf16.msrb.mxu2 %v12672_v0  ;;  %v12670_v0 = vld [vmem:[%s17440_s3 + $0x20] sm:$0xff]  ;;  %v700_v60 = vld [vmem:[%s13165_s14 + $0x9d0] sm:$0xff] }
 0x437   : > { %v4434_v49 = vpack.c.bf16 %v4119_v11, %v4119_v11  ;;  %v12468_v11 = vld [vmem:[%s13165_s14 + $0x424] sm:$0xf] }
 0x438   : > { %v2704_v45 = vpop.f32.mrf.mxu0  ;;  %3841 = vmatmul.bf16.gmra.mxu3 %v10685_v16 }
 0x439   : > { %v3502_v62 = vpop.f32.mrf.mxu1  ;;  %v2705_v56 = vadd.f32 %v13643_v43, %v2704_v45 }
 0x43b   : > { %v3503_v63 = vadd.f32 %v3502_v62, %v2705_v56  ;;  %2743 = vmatmul.bf16.gmra.mxu0 %v10201_v41  ;;  %v12671_v41 = vld [vmem:[%s17440_s3 + $0x28] sm:$0xff] }
 0x43c   : > { %3541 = vmatmul.bf16.gmra.mxu1 %v10205_v28  ;;  %v5015_v28 = vunpack.c.l.b16 %v4434_v49  ;;  %6139 = vmatpush.bf16.msrb.mxu2 %v12671_v41  ;;  %v10210_v56 = vld [vmem:[%s13165_s14 + $0x428] sm:$0xf0]  ;;  %v12669_v41 = vld [vmem:[%s17440_s3 + $0x18] sm:$0xff] }
 0x43d   : > { %v4120_v33 = vmax.f32 %v3503_v63, 0.0  ;;  %4950 = vrot.lane.b32.xlu1 %v13678_v17, %s13043_s26  ;;  %v12469_v17 = vld [vmem:[%s13165_s14 + $0x424] sm:$0xf0]  ;;  %v13910_v63 = vpop.f32.mrf.mxu2 }
 0x43e   : > { %17493 = vst [vmem:[#allocation46_spill] sm:$0xff] %v13910_v63  ;;  %v10209_v49 = vor.u32 %v12469_v17, %v10208_v32  ;;  %v12588_v32 = vld [vmem:[%s13165_s14 + $0x7e4] sm:$0xf]  ;;  %v10690_v17 = vld [vmem:[%s13165_s14 + $0x7e8] sm:$0xf0] }
 0x43f   : > { %v4435_v22 = vpack.c.bf16 %v4120_v33, %v4120_v33  ;;  %v10213_v33 = vor.u32 %v12468_v11, %v10210_v56 }
 0x440   : > { %v2706_v55 = vpop.f32.mrf.mxu0  ;;  %6140 = vmatpush.bf16.msrb.mxu2 %v12670_v0  ;;  %v10693_v0 = vor.u32 %v12588_v32, %v10690_v17 }
 0x441   : > { %v3504_v23 = vpop.f32.mrf.mxu1  ;;  %v5016_v19 = vunpack.c.l.b16 %v4435_v22  ;;  %v2707_v45 = vadd.f32 %v13643_v43, %v2706_v55  ;;  %v1680_v43 = vunpack.c.l.b16 %v700_v60 }
 0x443   : > { %v5046_v62 = vpack.c.b16 %v5016_v19, %v5015_v28  ;;  %v3505_v1 = vadd.f32 %v3504_v23, %v2707_v45  ;;  %v1996_v16 = vpack.c.b16 %v1680_v43, %v1680_v43  ;;  %v13925_v23 = vld [vmem:[%s17439_s2] ss:$0 sm:$0xff] }
 0x444   : > { %6141 = vmatpush.bf16.msrb.mxu2 %v12669_v41  ;;  %v10216_v41 = vld [vmem:[%s13165_s14 + $0x430] sm:$0xf] }
 0x445   : > { %5068 = vrot.lane.b32.xlu2 %v5046_v62, %s13044_s29  ;;  %4952 = vrot.lane.b32.xlu1 %v13692_v21, %s13043_s26  ;;  %v4121_v28 = vmax.f32 %v3505_v1, 0.0  ;;  %v13928_v45 = vpop.f32.mrf.mxu2  ;;  %v12668_v62 = vld [vmem:[%s17440_s3 + $0x10] sm:$0xff] }
 0x446   : > { %3203 = vmatmul.bf16.gmra.mxu2 %v1996_v16 }
 0x447   : > { %v4436_v11 = vpack.c.bf16 %v4121_v28, %v4121_v28  ;;  %v12471_v28 = vld [vmem:[%s13165_s14 + $0x434] sm:$0xf0] }
 0x448   : > { %v2709_v22 = vpop.f32.mrf.mxu0  ;;  %6142 = vmatpush.bf16.msrb.mxu2 %v12668_v62  ;;  %3846 = vmatmul.bf16.gmra.mxu3 %v10693_v0  ;;  %v12666_v62 = vld [vmem:[%s17440_s3] sm:$0xff]  ;;  %v10217_v17 = vor.u32 %v12471_v28, %v10216_v41 }
 0x449   : > { %v3507_v55 = vpop.f32.mrf.mxu1  ;;  %v2710_v21 = vadd.f32 %v13925_v23, %v2709_v22 }
 0x44b   : > { %v3508_v19 = vadd.f32 %v3507_v55, %v2710_v21  ;;  %2748 = vmatmul.bf16.gmra.mxu0 %v10209_v49  ;;  %v12667_v49 = vld [vmem:[%s17440_s3 + $0x8] sm:$0xff]  ;;  %v10218_v21 = vld [vmem:[%s13165_s14 + $0x438] sm:$0xf0] }
 0x44c   : > { %3546 = vmatmul.bf16.gmra.mxu1 %v10213_v33  ;;  %v5017_v33 = vunpack.c.l.b16 %v4436_v11  ;;  %6143 = vmatpush.bf16.msrb.mxu2 %v12667_v49 }
 0x44d   : > { %v4122_v56 = vmax.f32 %v3508_v19, 0.0  ;;  %4954 = vrot.lane.b32.xlu1 %v13706_v59, %s13043_s26  ;;  %v12470_v59 = vld [vmem:[%s13165_s14 + $0x434] sm:$0xf]  ;;  %v13945_v19 = vpop.f32.mrf.mxu2 }
 0x44e   : > { %17494 = vst [vmem:[#allocation47_spill] sm:$0xff] %v13945_v19  ;;  %v10221_v11 = vor.u32 %v12470_v59, %v10218_v21 }
 0x44f   : > { %v4437_v60 = vpack.c.bf16 %v4122_v56, %v4122_v56 }
 0x450   : > { %v2711_v1 = vpop.f32.mrf.mxu0  ;;  %6144 = vmatpush.bf16.msrb.mxu2 %v12666_v62 }
 0x451   : > { %v3509_v43 = vpop.f32.mrf.mxu1  ;;  %v5018_v16 = vunpack.c.l.b16 %v4437_v60  ;;  %v2712_v22 = vadd.f32 %v13925_v23, %v2711_v1 }
 0x453   : > { %v5047_v55 = vpack.c.b16 %v5018_v16, %v5017_v33  ;;  %v3510_v32 = vadd.f32 %v3509_v43, %v2712_v22  ;;  %v12590_v43 = vld [vmem:[%s13165_s14 + $0x7f4] sm:$0xf]  ;;  %v10698_v16 = vld [vmem:[%s13165_s14 + $0x7f8] sm:$0xf0] }
 0x455   : > { %5070 = vrot.lane.b32.xlu2 %v5047_v55, %s13044_s29  ;;  %4956 = vrot.lane.b32.xlu1 %v13720_v6, %s13043_s26  ;;  %v4123_v60 = vmax.f32 %v3510_v32, 0.0  ;;  %v13954_v33 = vpop.f32.mrf.mxu2  ;;  %v10701_v55 = vor.u32 %v12590_v43, %v10698_v16 }
 0x457   : > { %v4438_v6 = vpack.c.bf16 %v4123_v60, %v4123_v60 }
 0x458   : > { %v2714_v56 = vpop.f32.mrf.mxu0  ;;  %3851 = vmatmul.bf16.gmra.mxu3 %v10701_v55 }
 0x459   : > { %v3512_v0 = vpop.f32.mrf.mxu1  ;;  %v2715_v1 = vadd.f32 %v13925_v23, %v2714_v56  ;;  %v5019_v21 = vunpack.c.l.b16 %v4438_v6  ;;  %v12473_v56 = vld [vmem:[%s13165_s14 + $0x444] sm:$0xf0] }
 0x45b   : > { %v3513_v49 = vadd.f32 %v3512_v0, %v2715_v1  ;;  %2753 = vmatmul.bf16.gmra.mxu0 %v10217_v17  ;;  %v12472_v0 = vld [vmem:[%s13165_s14 + $0x444] sm:$0xf]  ;;  %v10226_v1 = vld [vmem:[%s13165_s14 + $0x448] sm:$0xf0] }
 0x45c   : > { %3551 = vmatmul.bf16.gmra.mxu1 %v10221_v11  ;;  %v10224_v11 = vld [vmem:[%s13165_s14 + $0x440] sm:$0xf] }
 0x45d   : > { %v4124_v22 = vmax.f32 %v3513_v49, 0.0  ;;  %4958 = vrot.lane.b32.xlu1 %v13734_v50, %s13043_s26  ;;  %v13965_v19 = vpop.f32.mrf.mxu2  ;;  %v10225_v50 = vor.u32 %v12473_v56, %v10224_v11  ;;  %v10229_v49 = vor.u32 %v12472_v0, %v10226_v1  ;;  %v10232_v1 = vld [vmem:[%s13165_s14 + $0x450] sm:$0xf] }
 0x45e   : > { %17495 = vst [vmem:[#allocation48_spill] sm:$0xff] %v13965_v19 }
 0x45f   : > { %v4439_v41 = vpack.c.bf16 %v4124_v22, %v4124_v22 }
 0x460   : > { %v2716_v28 = vpop.f32.mrf.mxu0 }
 0x461   : > { %v3514_v59 = vpop.f32.mrf.mxu1  ;;  %v5020_v62 = vunpack.c.l.b16 %v4439_v41  ;;  %v2717_v32 = vadd.f32 %v13925_v23, %v2716_v28  ;;  %v4813_v41 = vpop.permute.xlu0 %4812 }
 0x463   : > { %v5048_v17 = vpack.c.b16 %v5020_v62, %v5019_v21  ;;  %v3515_v60 = vadd.f32 %v3514_v59, %v2717_v32 }
 0x465   : > { %5072 = vrot.lane.b32.xlu2 %v5048_v17, %s13044_s29  ;;  %4960 = vrot.lane.b32.xlu1 %v13748_v29, %s13043_s26  ;;  %v4125_v6 = vmax.f32 %v3515_v60, 0.0  ;;  %v13971_v28 = vpop.f32.mrf.mxu2 }
 0x467   : > { %v4440_v59 = vpack.c.bf16 %v4125_v6, %v4125_v6  ;;  %v5647_v6 = vsel %vm5644_vm0, %v13221_v30, %v4813_v41 }
 0x468   : > { %v2719_v43 = vpop.f32.mrf.mxu0 }
 0x469   : > { %v3517_v16 = vpop.f32.mrf.mxu1  ;;  %v2720_v22 = vadd.f32 %v13925_v23, %v2719_v43  ;;  %v5021_v17 = vunpack.c.l.b16 %v4440_v59  ;;  %v4937_v60 = vpop.permute.xlu0 %4936  ;;  %v10234_v43 = vld [vmem:[%s13165_s14 + $0x458] sm:$0xf0] }
 0x46b   : > { %v3518_v55 = vadd.f32 %v3517_v16, %v2720_v22  ;;  %2758 = vmatmul.bf16.gmra.mxu0 %v10225_v50  ;;  %v12475_v50 = vld [vmem:[%s13165_s14 + $0x454] sm:$0xf0] }
 0x46c   : > { %3556 = vmatmul.bf16.gmra.mxu1 %v10229_v49  ;;  %v12474_v49 = vld [vmem:[%s13165_s14 + $0x454] sm:$0xf] }
 0x46d   : > { %v4126_v21 = vmax.f32 %v3518_v55, 0.0  ;;  %v13978_v16 = vpop.f32.mrf.mxu2  ;;  %v5701_v55 = vsel %vm5699_vm1, %v5647_v6, %v4937_v60 }
 0x46e   : > { %17496 = vst [vmem:[#allocation49_spill] sm:$0xff] %v13978_v16 }
 0x46f   : > { %v4441_v29 = vpack.c.bf16 %v4126_v21, %v4126_v21  ;;  %v10233_v21 = vor.u32 %v12475_v50, %v10232_v1 }
 0x470   : > { %v2721_v62 = vpop.f32.mrf.mxu0 }
 0x471   : > { %v3519_v32 = vpop.f32.mrf.mxu1  ;;  %v5022_v11 = vunpack.c.l.b16 %v4441_v29  ;;  %v2722_v56 = vadd.f32 %v13925_v23, %v2721_v62  ;;  %v10237_v29 = vor.u32 %v12474_v49, %v10234_v43 }
 0x473   : > { %v5049_v0 = vpack.c.b16 %v5022_v11, %v5021_v17  ;;  %v3520_v22 = vadd.f32 %v3519_v32, %v2722_v56 }
 0x475   : > { %5074 = vrot.lane.b32.xlu2 %v5049_v0, %s13044_s29  ;;  %v4127_v19 = vmax.f32 %v3520_v22, 0.0  ;;  %v13986_v30 = vpop.f32.mrf.mxu2  ;;  %v4939_v0 = vpop.permute.xlu2 %4938 }
 0x477   : > { %v5061_v59 = vpop.permute.xlu1 %5060  ;;  %v4442_v41 = vpack.c.bf16 %v4127_v19, %v4127_v19 }
 0x478   : > { %v5738_v62 = vsel %vm5736_vm2, %v5701_v55, %v5061_v59  ;;  %v2724_v17 = vpop.f32.mrf.mxu0  ;;  %v10240_v59 = vld [vmem:[%s13165_s14 + $0x460] sm:$0xf] }
 0x479   : > { %v3522_v11 = vpop.f32.mrf.mxu1  ;;  %v2725_v63 = vadd.f32 %v13925_v23, %v2724_v17  ;;  %6145 = vmatmul.bf16.vlgmr.msrb.gmra.mxu2 %v5738_v62  ;;  %v5023_v43 = vunpack.c.l.b16 %v4442_v41  ;;  %v10242_v62 = vld [vmem:[%s13165_s14 + $0x468] sm:$0xf0] }
 0x47b   : > { %v3523_v32 = vadd.f32 %v3522_v11, %v2725_v63  ;;  %2763 = vmatmul.bf16.gmra.mxu0 %v10233_v21  ;;  %v12477_v21 = vld [vmem:[%s13165_s14 + $0x464] sm:$0xf0] }
 0x47c   : > { %3561 = vmatmul.bf16.gmra.mxu1 %v10237_v29  ;;  %v12476_v29 = vld [vmem:[%s13165_s14 + $0x464] sm:$0xf]  ;;  %v10241_v41 = vor.u32 %v12477_v21, %v10240_v59  ;;  %v4817_v59 = vpop.permute.xlu0 %4816 }
 0x47d   : > { %v4128_v56 = vmax.f32 %v3523_v32, 0.0  ;;  %v13995_v17 = vpop.f32.mrf.mxu2  ;;  %v5063_v32 = vpop.permute.xlu2 %5062 }
 0x47e   : > { %17497 = vst [vmem:[#allocation50_spill] sm:$0xff] %v13995_v17 }
 0x47f   : > { %v4443_v1 = vpack.c.bf16 %v4128_v56, %v4128_v56  ;;  %v4815_v60 = vpop.permute.xlu1 %4814  ;;  %v10245_v56 = vor.u32 %v12476_v29, %v10242_v62 }
 0x480   : > { %v2726_v50 = vpop.f32.mrf.mxu0  ;;  %v5650_v63 = vsel %vm5644_vm0, %v13229_v51, %v4815_v60 }
 0x481   : > { %v3524_v49 = vpop.f32.mrf.mxu1  ;;  %v5024_v22 = vunpack.c.l.b16 %v4443_v1  ;;  %v2727_v6 = vadd.f32 %v13925_v23, %v2726_v50  ;;  %v5703_v11 = vsel %vm5699_vm1, %v5650_v63, %v4939_v0 }
 0x482   : > { %v5741_v16 = vsel %vm5736_vm2, %v5703_v11, %v5063_v32  ;;  %v10248_v32 = vld [vmem:[%s13165_s14 + $0x470] sm:$0xf] }
 0x483   : > { %v5050_v55 = vpack.c.b16 %v5024_v22, %v5023_v43  ;;  %v3525_v19 = vadd.f32 %v3524_v49, %v2727_v6 }
 0x485   : > { %5076 = vrot.lane.b32.xlu2 %v5050_v55, %s13044_s29  ;;  %v4129_v51 = vmax.f32 %v3525_v19, 0.0 }
 0x486   : > { %v14001_v49 = vpop.f32.mrf.mxu2 }
 0x487   : > { %v4444_v0 = vpack.c.bf16 %v4129_v51, %v4129_v51 }
 0x488   : > { %v2729_v1 = vpop.f32.mrf.mxu0 }
 0x489   : > { %v3527_v50 = vpop.f32.mrf.mxu1  ;;  %v2730_v60 = vadd.f32 %v13925_v23, %v2729_v1  ;;  %6150 = vmatmul.bf16.gmra.mxu2 %v5741_v16  ;;  %v5025_v21 = vunpack.c.l.b16 %v4444_v0  ;;  %v4941_v16 = vpop.permute.xlu1 %4940  ;;  %v12478_v1 = vld [vmem:[%s13165_s14 + $0x474] sm:$0xf] }
 0x48b   : > { %v3528_v43 = vadd.f32 %v3527_v50, %v2730_v60  ;;  %2768 = vmatmul.bf16.gmra.mxu0 %v10241_v41  ;;  %v3827_v19 = vpop.f32.mrf.mxu3  ;;  %v5653_v41 = vsel %vm5644_vm0, %v13237_v9, %v4817_v59  ;;  %v10250_v50 = vld [vmem:[%s13165_s14 + $0x478] sm:$0xf0]  ;;  %v3030_v60 = vadd.f32 %v13925_v23, %v13485_v26 }
 0x48c   : > { %3566 = vmatmul.bf16.gmra.mxu1 %v10245_v56  ;;  %v12479_v56 = vld [vmem:[%s13165_s14 + $0x474] sm:$0xf0] }
 0x48d   : > { %v4130_v22 = vmax.f32 %v3528_v43, 0.0  ;;  %v5705_v43 = vsel %vm5699_vm1, %v5653_v41, %v4941_v16 }
 0x48e   : > { %v14010_v51 = vpop.f32.mrf.mxu2 }
 0x48f   : > { %v4445_v6 = vpack.c.bf16 %v4130_v22, %v4130_v22  ;;  %17498 = vst [vmem:[#allocation51_spill] sm:$0xff] %v14010_v51  ;;  %v5065_v22 = vpop.permute.xlu2 %5064  ;;  %v14018_v51 = vadd.f32 %v3827_v19, %v3030_v60 }
 0x490   : > { %v2731_v63 = vpop.f32.mrf.mxu0  ;;  %v5744_v9 = vsel %vm5736_vm2, %v5705_v43, %v5065_v22 }
 0x491   : > { %v3529_v55 = vpop.f32.mrf.mxu1  ;;  %v5026_v29 = vunpack.c.l.b16 %v4445_v6  ;;  %v2732_v62 = vadd.f32 %v13925_v23, %v2731_v63  ;;  %v10249_v6 = vor.u32 %v12479_v56, %v10248_v32  ;;  %v10253_v63 = vor.u32 %v12478_v1, %v10250_v50  ;;  %17499 = vst [vmem:[#allocation52_spill] sm:$0xff] %v14018_v51 }
 0x492   : > { %v3035_v32 = vadd.f32 %v13925_v23, %v13499_v15 }
 0x493   : > { %v5051_v11 = vpack.c.b16 %v5026_v29, %v5025_v21  ;;  %v3530_v0 = vadd.f32 %v3529_v55, %v2732_v62  ;;  %v3829_v38 = vpop.f32.mrf.mxu3  ;;  %v3032_v62 = vadd.f32 %v13925_v23, %v13494_v57 }
 0x495   : > { %5078 = vrot.lane.b32.xlu2 %v5051_v11, %s13044_s29  ;;  %v4131_v59 = vmax.f32 %v3530_v0, 0.0  ;;  %v3830_v43 = vadd.f32 %v3829_v38, %v3032_v62  ;;  %v4943_v0 = vpop.permute.xlu1 %4942 }
 0x496   : > { %v14020_v55 = vpop.f32.mrf.mxu2 }
 0x497   : > { %v4446_v16 = vpack.c.bf16 %v4131_v59, %v4131_v59  ;;  %v10258_v59 = vld [vmem:[%s13165_s14 + $0x488] sm:$0xf0] }
 0x498   : > { %v2734_v21 = vpop.f32.mrf.mxu0 }
 0x499   : > { %v3532_v29 = vpop.f32.mrf.mxu1  ;;  %v2735_v17 = vadd.f32 %v13925_v23, %v2734_v21  ;;  %6155 = vmatmul.bf16.gmra.mxu2 %v5744_v9  ;;  %v5027_v1 = vunpack.c.l.b16 %v4446_v16  ;;  %v12480_v9 = vld [vmem:[%s13165_s14 + $0x484] sm:$0xf] }
 0x49b   : > { %v3533_v26 = vadd.f32 %v3532_v29, %v2735_v17  ;;  %2773 = vmatmul.bf16.gmra.mxu0 %v10249_v6  ;;  %v4819_v17 = vpop.permute.xlu0 %4818  ;;  %v3832_v22 = vpop.f32.mrf.mxu3  ;;  %v10256_v6 = vld [vmem:[%s13165_s14 + $0x480] sm:$0xf]  ;;  %v12481_v29 = vld [vmem:[%s13165_s14 + $0x484] sm:$0xf0] }
 0x49c   : > { %3571 = vmatmul.bf16.gmra.mxu1 %v10253_v63  ;;  %v4251_v63 = vmax.f32 %v3830_v43, 0.0  ;;  %v3833_v21 = vadd.f32 %v3832_v22, %v3035_v32  ;;  %v5656_v15 = vsel %vm5644_vm0, %v13245_v31, %v4819_v17 }
 0x49d   : > { %v4132_v11 = vmax.f32 %v3533_v26, 0.0  ;;  %v5707_v16 = vsel %vm5699_vm1, %v5656_v15, %v4943_v0 }
 0x49e   : > { %v14033_v26 = vpop.f32.mrf.mxu2  ;;  %v4566_v38 = vpack.c.bf16 %v4251_v63, %v4251_v63  ;;  %v4252_v62 = vmax.f32 %v3833_v21, 0.0  ;;  %v3040_v21 = vadd.f32 %v13925_v23, %v13513_v8  ;;  %v10266_v8 = vld [vmem:[%s13165_s14 + $0x498] sm:$0xf0] }
 0x49f   : > { %v4447_v41 = vpack.c.bf16 %v4132_v11, %v4132_v11  ;;  %17500 = vst [vmem:[#allocation53_spill] sm:$0xff] %v14033_v26  ;;  %v5067_v11 = vpop.permute.xlu2 %5066 }
 0x4a0   : > { %v2736_v19 = vpop.f32.mrf.mxu0  ;;  %v4567_v32 = vpack.c.bf16 %v4252_v62, %v4252_v62  ;;  %v5747_v31 = vsel %vm5736_vm2, %v5707_v16, %v5067_v11  ;;  %v10264_v62 = vld [vmem:[%s13165_s14 + $0x490] sm:$0xf] }
 0x4a1   : > { %v3534_v56 = vpop.f32.mrf.mxu1  ;;  %v5028_v50 = vunpack.c.l.b16 %v4447_v41  ;;  %v2737_v60 = vadd.f32 %v13925_v23, %v2736_v19  ;;  %v10257_v19 = vor.u32 %v12481_v29, %v10256_v6 }
 0x4a2   : > { %v5468_v26 = vunpack.c.l.b16 %v4567_v32  ;;  %v12482_v32 = vld [vmem:[%s13165_s14 + $0x494] sm:$0xf] }
 0x4a3   : > { %v5052_v57 = vpack.c.b16 %v5028_v50, %v5027_v1  ;;  %v3535_v41 = vadd.f32 %v3534_v56, %v2737_v60  ;;  %v10261_v1 = vor.u32 %v12480_v9, %v10258_v59  ;;  %v5467_v50 = vunpack.c.l.b16 %v4566_v38  ;;  %v3834_v51 = vpop.f32.mrf.mxu3  ;;  %v4821_v16 = vpop.permute.xlu0 %4820 }
 0x4a4   : > { %v4945_v38 = vpop.permute.xlu1 %4944 }
 0x4a5   : > { %5080 = vrot.lane.b32.xlu2 %v5052_v57, %s13044_s29  ;;  %v4133_v17 = vmax.f32 %v3535_v41, 0.0  ;;  %v14039_v56 = vpack.c.b16 %v5468_v26, %v5467_v50  ;;  %v3037_v57 = vadd.f32 %v13925_v23, %v13508_v47  ;;  %v12483_v50 = vld [vmem:[%s13165_s14 + $0x494] sm:$0xf0] }
 0x4a6   : > { %v14041_v60 = vpop.f32.mrf.mxu2 }
 0x4a7   : > { %v4448_v6 = vpack.c.bf16 %v4133_v17, %v4133_v17  ;;  %v3835_v11 = vadd.f32 %v3834_v51, %v3037_v57 }
 0x4a8   : > { %v2739_v43 = vpop.f32.mrf.mxu0 }
 0x4a9   : > { %v3537_v22 = vpop.f32.mrf.mxu1  ;;  %v2740_v34 = vadd.f32 %v13925_v23, %v2739_v43  ;;  %6160 = vmatmul.bf16.gmra.mxu2 %v5747_v31  ;;  %v5029_v9 = vunpack.c.l.b16 %v4448_v6  ;;  %v5069_v31 = vpop.permute.xlu2 %5068  ;;  %v10265_v6 = vor.u32 %v12483_v50, %v10264_v62 }
 0x4ab   : > { %v3538_v0 = vadd.f32 %v3537_v22, %v2740_v34  ;;  %2778 = vmatmul.bf16.gmra.mxu0 %v10257_v19  ;;  %v3837_v41 = vpop.f32.mrf.mxu3  ;;  %v4253_v19 = vmax.f32 %v3835_v11, 0.0  ;;  %v5659_v22 = vsel %vm5644_vm0, %v13253_v53, %v4821_v16 }
 0x4ac   : > { %3576 = vmatmul.bf16.gmra.mxu1 %v10261_v1  ;;  %v3838_v1 = vadd.f32 %v3837_v41, %v3040_v21  ;;  %v5709_v57 = vsel %vm5699_vm1, %v5659_v22, %v4945_v38 }
 0x4ad   : > { %v4134_v63 = vmax.f32 %v3538_v0, 0.0  ;;  %v4568_v51 = vpack.c.bf16 %v4253_v19, %v4253_v19 }
 0x4ae   : > { %v14052_v43 = vpop.f32.mrf.mxu2  ;;  %v4254_v0 = vmax.f32 %v3838_v1, 0.0  ;;  %v3045_v1 = vadd.f32 %v13925_v23, %v13527_v7  ;;  %v10274_v7 = vld [vmem:[%s13165_s14 + $0x4a8] sm:$0xf0] }
 0x4af   : > { %v4449_v15 = vpack.c.bf16 %v4134_v63, %v4134_v63  ;;  %17501 = vst [vmem:[#allocation54_spill] sm:$0xff] %v14052_v43  ;;  %v10269_v63 = vor.u32 %v12482_v32, %v10266_v8  ;;  %v17535_v43 = vld [vmem:[#allocation42_spill] sm:$0xff] }
 0x4b0   : > { %v2741_v34 = vpop.f32.mrf.mxu0  ;;  %v4569_v21 = vpack.c.bf16 %v4254_v0, %v4254_v0  ;;  %v4823_v0 = vpop.permute.xlu0 %4822 }
 0x4b1   : > { %v3539_v29 = vpop.f32.mrf.mxu1  ;;  %v5030_v59 = vunpack.c.l.b16 %v4449_v15  ;;  %v2742_v26 = vadd.f32 %v13925_v23, %v2741_v34  ;;  %v5469_v15 = vunpack.c.l.b16 %v4568_v51 }
 0x4b2   : > { %v5470_v53 = vunpack.c.l.b16 %v4569_v21 }
 0x4b3   : > { %v5053_v47 = vpack.c.b16 %v5030_v59, %v5029_v9  ;;  %v3540_v17 = vadd.f32 %v3539_v29, %v2742_v26  ;;  %v5750_v59 = vsel %vm5736_vm2, %v5709_v57, %v5069_v31  ;;  %v3839_v29 = vpop.f32.mrf.mxu3 }
 0x4b4   : > { %v14060_v16 = vpack.c.b16 %v5470_v53, %v5469_v15 }
 0x4b5   : > { %5082 = vrot.lane.b32.xlu2 %v5053_v47, %s13044_s29  ;;  %v4135_v11 = vmax.f32 %v3540_v17, 0.0  ;;  %v3042_v47 = vadd.f32 %v13925_v23, %v13522_v44 }
 0x4b6   : > { %v14062_v38 = vpop.f32.mrf.mxu2 }
 0x4b7   : > { %v4450_v62 = vpack.c.bf16 %v4135_v11, %v4135_v11  ;;  %v3840_v51 = vadd.f32 %v3839_v29, %v3042_v47  ;;  %v5662_v11 = vsel %vm5644_vm0, %v13261_v12, %v4823_v0 }
 0x4b8   : > { %v2744_v34 = vpop.f32.mrf.mxu0 }
 0x4b9   : > { %v3542_v9 = vpop.f32.mrf.mxu1  ;;  %v2745_v41 = vadd.f32 %v13925_v23, %v2744_v34  ;;  %6165 = vmatmul.bf16.gmra.mxu2 %v5750_v59  ;;  %v5031_v22 = vunpack.c.l.b16 %v4450_v62  ;;  %v4255_v15 = vmax.f32 %v3840_v51, 0.0  ;;  %v12485_v34 = vld [vmem:[%s13165_s14 + $0x4a4] sm:$0xf0] }
 0x4bb   : > { %v3543_v26 = vadd.f32 %v3542_v9, %v2745_v41  ;;  %2783 = vmatmul.bf16.gmra.mxu0 %v10265_v6  ;;  %v3842_v57 = vpop.f32.mrf.mxu3  ;;  %v4947_v6 = vpop.permute.xlu1 %4946  ;;  %v12484_v9 = vld [vmem:[%s13165_s14 + $0x4a4] sm:$0xf]  ;;  %v4570_v29 = vpack.c.bf16 %v4255_v15, %v4255_v15 }
 0x4bc   : > { %3581 = vmatmul.bf16.gmra.mxu1 %v10269_v63  ;;  %v10272_v63 = vld [vmem:[%s13165_s14 + $0x4a0] sm:$0xf]  ;;  %v3843_v21 = vadd.f32 %v3842_v57, %v3045_v1  ;;  %v5071_v41 = vpop.permute.xlu2 %5070  ;;  %v5711_v47 = vsel %vm5699_vm1, %v5662_v11, %v4947_v6 }
 0x4bd   : > { %v4136_v19 = vmax.f32 %v3543_v26, 0.0  ;;  %v10273_v62 = vor.u32 %v12485_v34, %v10272_v63 }
 0x4be   : > { %v14073_v59 = vpop.f32.mrf.mxu2  ;;  %v4256_v26 = vmax.f32 %v3843_v21, 0.0  ;;  %v3050_v21 = vadd.f32 %v13925_v23, %v13543_v10  ;;  %v10282_v10 = vld [vmem:[%s13165_s14 + $0x4b8] sm:$0xf0] }
 0x4bf   : > { %v4451_v50 = vpack.c.bf16 %v4136_v19, %v4136_v19  ;;  %17502 = vst [vmem:[#allocation55_spill] sm:$0xff] %v14073_v59  ;;  %v10277_v19 = vor.u32 %v12484_v9, %v10274_v7 }
 0x4c0   : > { %v2746_v32 = vpop.f32.mrf.mxu0  ;;  %v4571_v1 = vpack.c.bf16 %v4256_v26, %v4256_v26 }
 0x4c1   : > { %v3544_v8 = vpop.f32.mrf.mxu1  ;;  %v5032_v31 = vunpack.c.l.b16 %v4451_v50  ;;  %v2747_v17 = vadd.f32 %v13925_v23, %v2746_v32  ;;  %v5471_v50 = vunpack.c.l.b16 %v4570_v29  ;;  %v4825_v29 = vpop.permute.xlu0 %4824 }
 0x4c2   : > { %v5472_v12 = vunpack.c.l.b16 %v4571_v1  ;;  %v12487_v1 = vld [vmem:[%s13165_s14 + $0x4b4] sm:$0xf0] }
 0x4c3   : > { %v5054_v44 = vpack.c.b16 %v5032_v31, %v5031_v22  ;;  %v3545_v53 = vadd.f32 %v3544_v8, %v2747_v17  ;;  %v5753_v31 = vsel %vm5736_vm2, %v5711_v47, %v5071_v41  ;;  %v3844_v8 = vpop.f32.mrf.mxu3  ;;  %v4949_v47 = vpop.permute.xlu1 %4948 }
 0x4c4   : > { %v14081_v0 = vpack.c.b16 %v5472_v12, %v5471_v50 }
 0x4c5   : > { %5084 = vrot.lane.b32.xlu2 %v5054_v44, %s13044_s29  ;;  %v4137_v51 = vmax.f32 %v3545_v53, 0.0  ;;  %v3047_v44 = vadd.f32 %v13925_v23, %v13538_v48 }
 0x4c7   : > { %v4452_v63 = vpack.c.bf16 %v4137_v51, %v4137_v51  ;;  %v3845_v48 = vadd.f32 %v3844_v8, %v3047_v44  ;;  %v5073_v51 = vpop.permute.xlu2 %5072 }
 0x4c8   : > { %v2749_v32 = vpop.f32.mrf.mxu0 }
 0x4c9   : > { %v3547_v22 = vpop.f32.mrf.mxu1  ;;  %v2750_v57 = vadd.f32 %v13925_v23, %v2749_v32  ;;  %6170 = vmatmul.bf16.gmra.mxu2 %v5753_v31  ;;  %v14083_v6 = vpop.f32.mrf.mxu2  ;;  %v5033_v11 = vunpack.c.l.b16 %v4452_v63  ;;  %v12486_v32 = vld [vmem:[%s13165_s14 + $0x4b4] sm:$0xf]  ;;  %v5665_v31 = vsel %vm5644_vm0, %v13269_v35, %v4825_v29 }
 0x4ca   : > { %v10285_v63 = vor.u32 %v12486_v32, %v10282_v10 }
 0x4cb   : > { %v3548_v17 = vadd.f32 %v3547_v22, %v2750_v57  ;;  %2788 = vmatmul.bf16.gmra.mxu0 %v10273_v62  ;;  %v3847_v26 = vpop.f32.mrf.mxu3 }
 0x4cc   : > { %3586 = vmatmul.bf16.gmra.mxu1 %v10277_v19  ;;  %v10280_v19 = vld [vmem:[%s13165_s14 + $0x4b0] sm:$0xf]  ;;  %v3848_v50 = vadd.f32 %v3847_v26, %v3050_v21  ;;  %v3052_v26 = vadd.f32 %v13925_v23, %v13550_v46 }
 0x4cd   : > { %v4138_v15 = vmax.f32 %v3548_v17, 0.0  ;;  %5520 = vrot.lane.b32.xlu2 %v14039_v56, %s13044_s29  ;;  %v4257_v56 = vmax.f32 %v3845_v48, 0.0  ;;  %v5713_v17 = vsel %vm5699_vm1, %v5665_v31, %v4949_v47  ;;  %v10281_v44 = vor.u32 %v12487_v1, %v10280_v19  ;;  %v4827_v31 = vpop.permute.xlu0 %4826 }
 0x4ce   : > { %v4258_v8 = vmax.f32 %v3848_v50, 0.0  ;;  %v3055_v19 = vadd.f32 %v13925_v23, %v13555_v20  ;;  %v10290_v20 = vld [vmem:[%s13165_s14 + $0x4c8] sm:$0xf0] }
 0x4cf   : > { %v4453_v34 = vpack.c.bf16 %v4138_v15, %v4138_v15  ;;  %v4572_v12 = vpack.c.bf16 %v4257_v56, %v4257_v56 }
 0x4d0   : > { %v2751_v9 = vpop.f32.mrf.mxu0 }
 0x4d1   : > { %v3549_v7 = vpop.f32.mrf.mxu1  ;;  %v5034_v41 = vunpack.c.l.b16 %v4453_v34  ;;  %v2752_v53 = vadd.f32 %v13925_v23, %v2751_v9  ;;  %v3206_v22 = vpop.f32.mrf.mxu2  ;;  %v5473_v15 = vunpack.c.l.b16 %v4572_v12  ;;  %v4573_v34 = vpack.c.bf16 %v4258_v8, %v4258_v8  ;;  %v10288_v8 = vld [vmem:[%s13165_s14 + $0x4c0] sm:$0xf] }
 0x4d3   : > { %v5055_v62 = vpack.c.b16 %v5034_v41, %v5033_v11  ;;  %v3550_v57 = vadd.f32 %v3549_v7, %v2752_v53  ;;  %v5756_v11 = vsel %vm5736_vm2, %v5713_v17, %v5073_v51  ;;  %v5474_v35 = vunpack.c.l.b16 %v4573_v34  ;;  %v3849_v7 = vpop.f32.mrf.mxu3  ;;  %v5075_v34 = vpop.permute.xlu2 %5074 }
 0x4d4   : > { %v3850_v46 = vadd.f32 %v3849_v7, %v3052_v26 }
 0x4d5   : > { %5086 = vrot.lane.b32.xlu2 %v5055_v62, %s13044_s29  ;;  %v4139_v41 = vmax.f32 %v3550_v57, 0.0  ;;  %v14102_v29 = vpack.c.b16 %v5474_v35, %v5473_v15  ;;  %v4951_v57 = vpop.permute.xlu1 %4950  ;;  %v5668_v15 = vsel %vm5644_vm0, %v13277_v58, %v4827_v31 }
 0x4d7   : > { %v4454_v47 = vpack.c.bf16 %v4139_v41, %v4139_v41  ;;  %v5715_v41 = vsel %vm5699_vm1, %v5668_v15, %v4951_v57 }
 0x4d8   : > { %v2754_v21 = vpop.f32.mrf.mxu0 }
 0x4d9   : > { %v3552_v9 = vpop.f32.mrf.mxu1  ;;  %v2755_v48 = vadd.f32 %v13925_v23, %v2754_v21  ;;  %6175 = vmatmul.bf16.gmra.mxu2 %v5756_v11  ;;  %v5035_v32 = vunpack.c.l.b16 %v4454_v47 }
 0x4db   : > { %v3553_v53 = vadd.f32 %v3552_v9, %v2755_v48  ;;  %2793 = vmatmul.bf16.gmra.mxu0 %v10281_v44  ;;  %v3852_v51 = vpop.f32.mrf.mxu3  ;;  %v12489_v44 = vld [vmem:[%s13165_s14 + $0x4c4] sm:$0xf0] }
 0x4dc   : > { %3591 = vmatmul.bf16.gmra.mxu1 %v10285_v63  ;;  %v3853_v17 = vadd.f32 %v3852_v51, %v3055_v19  ;;  %v12488_v63 = vld [vmem:[%s13165_s14 + $0x4c4] sm:$0xf]  ;;  %v10289_v48 = vor.u32 %v12489_v44, %v10288_v8  ;;  %v4829_v44 = vpop.permute.xlu0 %4828 }
 0x4dd   : > { %v4140_v62 = vmax.f32 %v3553_v53, 0.0  ;;  %5522 = vrot.lane.b32.xlu2 %v14060_v16, %s13044_s29  ;;  %v4259_v16 = vmax.f32 %v3850_v46, 0.0  ;;  %v10293_v35 = vor.u32 %v12488_v63, %v10290_v20  ;;  %v10296_v20 = vld [vmem:[%s13165_s14 + $0x4d0] sm:$0xf]  ;;  %v4953_v15 = vpop.permute.xlu1 %4952 }
 0x4de   : > { %v4260_v11 = vmax.f32 %v3853_v17, 0.0 }
 0x4df   : > { %v4455_v56 = vpack.c.bf16 %v4140_v62, %v4140_v62  ;;  %v4574_v9 = vpack.c.bf16 %v4259_v16, %v4259_v16  ;;  %v5759_v62 = vsel %vm5736_vm2, %v5715_v41, %v5075_v34  ;;  %v12491_v34 = vld [vmem:[%s13165_s14 + $0x4d4] sm:$0xf0] }
 0x4e0   : > { %v2756_v50 = vpop.f32.mrf.mxu0  ;;  %v4575_v53 = vpack.c.bf16 %v4260_v11, %v4260_v11  ;;  %v5077_v11 = vpop.permute.xlu2 %5076 }
 0x4e1   : > { %v3554_v1 = vpop.f32.mrf.mxu1  ;;  %v5036_v10 = vunpack.c.l.b16 %v4455_v56  ;;  %v2757_v22 = vadd.f32 %v13925_v23, %v2756_v50  ;;  %v5475_v7 = vunpack.c.l.b16 %v4574_v9  ;;  %v12592_v50 = vld [vmem:[%s13165_s14 + $0x804] sm:$0xf]  ;;  %v10298_v9 = vld [vmem:[%s13165_s14 + $0x4d8] sm:$0xf0] }
 0x4e2   : > { %v5476_v56 = vunpack.c.l.b16 %v4575_v53 }
 0x4e3   : > { %v5056_v12 = vpack.c.b16 %v5036_v10, %v5035_v32  ;;  %v3555_v21 = vadd.f32 %v3554_v1, %v2757_v22  ;;  %v10706_v1 = vld [vmem:[%s13165_s14 + $0x808] sm:$0xf0] }
 0x4e4   : > { %v10709_v32 = vor.u32 %v12592_v50, %v10706_v1  ;;  %v14123_v22 = vpack.c.b16 %v5476_v56, %v5475_v7  ;;  %v10714_v56 = vld [vmem:[%s13165_s14 + $0x818] sm:$0xf0] }
 0x4e5   : > { %5088 = vrot.lane.b32.xlu2 %v5056_v12, %s13044_s29  ;;  %v4141_v19 = vmax.f32 %v3555_v21, 0.0  ;;  %v12490_v21 = vld [vmem:[%s13165_s14 + $0x4d4] sm:$0xf] }
 0x4e6   : > { %3856 = vmatmul.bf16.gmra.mxu3 %v10709_v32  ;;  %v10301_v7 = vor.u32 %v12490_v21, %v10298_v9 }
 0x4e7   : > { %v4456_v46 = vpack.c.bf16 %v4141_v19, %v4141_v19 }
 0x4e8   : > { %v2759_v26 = vpop.f32.mrf.mxu0 }
 0x4e9   : > { %v3557_v47 = vpop.f32.mrf.mxu1  ;;  %v2760_v58 = vadd.f32 %v13925_v23, %v2759_v26  ;;  %6180 = vmatmul.bf16.gmra.mxu2 %v5759_v62  ;;  %v5037_v8 = vunpack.c.l.b16 %v4456_v46 }
 0x4eb   : > { %v3558_v10 = vadd.f32 %v3557_v47, %v2760_v58  ;;  %2798 = vmatmul.bf16.gmra.mxu0 %v10289_v48  ;;  %v12594_v58 = vld [vmem:[%s13165_s14 + $0x814] sm:$0xf] }
 0x4ec   : > { %3596 = vmatmul.bf16.gmra.mxu1 %v10293_v35  ;;  %v10297_v35 = vor.u32 %v12491_v34, %v10296_v20  ;;  %v10717_v50 = vor.u32 %v12594_v58, %v10714_v56  ;;  %v12493_v20 = vld [vmem:[%s13165_s14 + $0x4e4] sm:$0xf0]  ;;  %v10306_v34 = vld [vmem:[%s13165_s14 + $0x4e8] sm:$0xf0] }
 0x4ed   : > { %v4142_v31 = vmax.f32 %v3558_v10, 0.0  ;;  %5524 = vrot.lane.b32.xlu2 %v14081_v0, %s13044_s29  ;;  %v5671_v0 = vsel %vm5644_vm0, %v13285_v18, %v4829_v44  ;;  %v10304_v44 = vld [vmem:[%s13165_s14 + $0x4e0] sm:$0xf] }
 0x4ee   : > { %v5717_v48 = vsel %vm5699_vm1, %v5671_v0, %v4953_v15  ;;  %v12492_v15 = vld [vmem:[%s13165_s14 + $0x4e4] sm:$0xf] }
 0x4ef   : > { %v4457_v51 = vpack.c.bf16 %v4142_v31, %v4142_v31  ;;  %v5762_v47 = vsel %vm5736_vm2, %v5717_v48, %v5077_v11  ;;  %v5079_v21 = vpop.permute.xlu2 %5078  ;;  %v10309_v0 = vor.u32 %v12492_v15, %v10306_v34 }
 0x4f0   : > { %v2761_v57 = vpop.f32.mrf.mxu0 }
 0x4f1   : > { %v3559_v12 = vpop.f32.mrf.mxu1  ;;  %v5038_v16 = vunpack.c.l.b16 %v4457_v51  ;;  %v2762_v17 = vadd.f32 %v13925_v23, %v2761_v57 }
 0x4f3   : > { %v5057_v63 = vpack.c.b16 %v5038_v16, %v5037_v8  ;;  %v3560_v41 = vadd.f32 %v3559_v12, %v2762_v17  ;;  %v4831_v8 = vpop.permute.xlu0 %4830 }
 0x4f5   : > { %5090 = vrot.lane.b32.xlu2 %v5057_v63, %s13044_s29  ;;  %v4143_v62 = vmax.f32 %v3560_v41, 0.0  ;;  %v4955_v63 = vpop.permute.xlu1 %4954  ;;  %v10305_v41 = vor.u32 %v12493_v20, %v10304_v44 }
 0x4f6   : > { %3861 = vmatmul.bf16.gmra.mxu3 %v10717_v50 }
 0x4f7   : > { %v4458_v18 = vpack.c.bf16 %v4143_v62, %v4143_v62 }
 0x4f8   : > { %v2764_v53 = vpop.f32.mrf.mxu0 }
 0x4f9   : > { %v3562_v26 = vpop.f32.mrf.mxu1  ;;  %v2765_v19 = vadd.f32 %v13925_v23, %v2764_v53  ;;  %6185 = vmatmul.bf16.gmra.mxu2 %v5762_v47  ;;  %v5039_v51 = vunpack.c.l.b16 %v4458_v18  ;;  %v10722_v47 = vld [vmem:[%s13165_s14 + $0x828] sm:$0xf0] }
 0x4fb   : > { %v3563_v1 = vadd.f32 %v3562_v26, %v2765_v19  ;;  %2803 = vmatmul.bf16.gmra.mxu0 %v10297_v35  ;;  %v12596_v26 = vld [vmem:[%s13165_s14 + $0x824] sm:$0xf] }
 0x4fc   : > { %3601 = vmatmul.bf16.gmra.mxu1 %v10301_v7  ;;  %v10725_v62 = vor.u32 %v12596_v26, %v10722_v47 }
 0x4fd   : > { %v4144_v32 = vmax.f32 %v3563_v1, 0.0  ;;  %5526 = vrot.lane.b32.xlu2 %v14102_v29, %s13044_s29  ;;  %v5674_v29 = vsel %vm5644_vm0, %v13293_v42, %v4831_v8  ;;  %v10314_v8 = vld [vmem:[%s13165_s14 + $0x4f8] sm:$0xf0] }
 0x4fe   : > { %v5719_v9 = vsel %vm5699_vm1, %v5674_v29, %v4955_v63 }
 0x4ff   : > { %v4459_v10 = vpack.c.bf16 %v4144_v32, %v4144_v32  ;;  %v5765_v7 = vsel %vm5736_vm2, %v5719_v9, %v5079_v21  ;;  %v4833_v32 = vpop.permute.xlu0 %4832 }
 0x500   : > { %v2766_v46 = vpop.f32.mrf.mxu0 }
 0x501   : > { %v3564_v31 = vpop.f32.mrf.mxu1  ;;  %v5040_v57 = vunpack.c.l.b16 %v4459_v10  ;;  %v2767_v12 = vadd.f32 %v13925_v23, %v2766_v46 }
 0x503   : > { %v3565_v16 = vadd.f32 %v3564_v31, %v2767_v12  ;;  %v5058_v17 = vpack.c.b16 %v5040_v57, %v5039_v51  ;;  %v10312_v31 = vld [vmem:[%s13165_s14 + $0x4f0] sm:$0xf]  ;;  %v4957_v51 = vpop.permute.xlu1 %4956  ;;  %v12495_v57 = vld [vmem:[%s13165_s14 + $0x4f4] sm:$0xf0]  ;;  %v12494_v12 = vld [vmem:[%s13165_s14 + $0x4f4] sm:$0xf] }
 0x504   : > { %v10313_v20 = vor.u32 %v12495_v57, %v10312_v31  ;;  %v10317_v15 = vor.u32 %v12494_v12, %v10314_v8 }
 0x505   : > { %5092 = vrot.lane.b32.xlu2 %v5058_v17, %s13044_s29  ;;  %v4145_v11 = vmax.f32 %v3565_v16, 0.0  ;;  %v5081_v16 = vpop.permute.xlu2 %5080 }
 0x506   : > { %3866 = vmatmul.bf16.gmra.mxu3 %v10725_v62 }
 0x507   : > { %v4460_v19 = vpack.c.bf16 %v4145_v11, %v4145_v11 }
 0x508   : > { %v2769_v48 = vpop.f32.mrf.mxu0 }
 0x509   : > { %v3567_v35 = vpop.f32.mrf.mxu1  ;;  %v2770_v53 = vadd.f32 %v13925_v23, %v2769_v48  ;;  %6190 = vmatmul.bf16.gmra.mxu2 %v5765_v7  ;;  %v5041_v42 = vunpack.c.l.b16 %v4460_v19  ;;  %v10730_v48 = vld [vmem:[%s13165_s14 + $0x838] sm:$0xf0] }
 0x50b   : > { %v3568_v58 = vadd.f32 %v3567_v35, %v2770_v53  ;;  %2808 = vmatmul.bf16.gmra.mxu0 %v10305_v41  ;;  %v5059_v10 = vpack.c.b16 %v5041_v42, %v5041_v42  ;;  %v14170_v41 = vld [vmem:[%s17439_s2] ss:$0 sm:$0xff] }
 0x50c   : > { %3606 = vmatmul.bf16.gmra.mxu1 %v10309_v0 }
 0x50d   : > { %5528 = vrot.lane.b32.xlu2 %v14123_v22, %s13044_s29  ;;  %v4146_v1 = vmax.f32 %v3568_v58, 0.0  ;;  %v5677_v22 = vsel %vm5644_vm0, %v13301_v2, %v4833_v32  ;;  %v12598_v2 = vld [vmem:[%s13165_s14 + $0x834] sm:$0xf]  ;;  %v4835_v58 = vpop.permute.xlu0 %4834  ;;  %v10322_v32 = vld [vmem:[%s13165_s14 + $0x508] sm:$0xf0] }
 0x50e   : > { %v10733_v35 = vor.u32 %v12598_v2, %v10730_v48 }
 0x50f   : > { %v4461_v17 = vpack.c.bf16 %v4146_v1, %v4146_v1  ;;  %v12497_v1 = vld [vmem:[%s13165_s14 + $0x504] sm:$0xf0] }
 0x510   : > { %v2771_v56 = vpop.f32.mrf.mxu0 }
 0x511   : > { %v3569_v50 = vpop.f32.mrf.mxu1  ;;  %v2772_v18 = vadd.f32 %v13925_v23, %v2771_v56  ;;  %v5721_v23 = vsel %vm5699_vm1, %v5677_v22, %v4957_v51  ;;  %v5131_v9 = vunpack.c.l.b16 %v4461_v17  ;;  %v10320_v56 = vld [vmem:[%s13165_s14 + $0x500] sm:$0xf]  ;;  %v5680_v51 = vsel %vm5644_vm0, %v13309_v27, %v4835_v58  ;;  %v10330_v58 = vld [vmem:[%s13165_s14 + $0x518] sm:$0xf0] }
 0x512   : > { %v5768_v29 = vsel %vm5736_vm2, %v5721_v23, %v5081_v16  ;;  %v10321_v8 = vor.u32 %v12497_v1, %v10320_v56 }
 0x513   : > { %v3570_v46 = vadd.f32 %v3569_v50, %v2772_v18  ;;  %v4959_v50 = vpop.permute.xlu1 %4958  ;;  %v12496_v18 = vld [vmem:[%s13165_s14 + $0x504] sm:$0xf] }
 0x514   : > { %v5723_v57 = vsel %vm5699_vm1, %v5680_v51, %v4959_v50  ;;  %v10325_v16 = vor.u32 %v12496_v18, %v10322_v32 }
 0x515   : > { %v4147_v44 = vmax.f32 %v3570_v46, 0.0  ;;  %5094 = vrot.lane.b32.xlu2 %v5059_v10, %s13044_s29  ;;  %v5083_v10 = vpop.permute.xlu2 %5082 }
 0x516   : > { %3871 = vmatmul.bf16.gmra.mxu3 %v10733_v35  ;;  %v5771_v22 = vsel %vm5736_vm2, %v5723_v57, %v5083_v10  ;;  %v4837_v35 = vpop.permute.xlu0 %4836 }
 0x517   : > { %v4462_v63 = vpack.c.bf16 %v4147_v44, %v4147_v44  ;;  %v5683_v1 = vsel %vm5644_vm0, %v13317_v54, %v4837_v35  ;;  %v12602_v54 = vld [vmem:[%s13165_s14 + $0x854] sm:$0xf] }
 0x518   : > { %v2774_v34 = vpop.f32.mrf.mxu0 }
 0x519   : > { %v3572_v21 = vpop.f32.mrf.mxu1  ;;  %v5132_v11 = vunpack.c.l.b16 %v4462_v63  ;;  %v2775_v0 = vadd.f32 %v14170_v41, %v2774_v34  ;;  %6195 = vmatmul.bf16.gmra.mxu2 %v5768_v29  ;;  %v10738_v34 = vld [vmem:[%s13165_s14 + $0x848] sm:$0xf0] }
 0x51b   : > { %v14175_v7 = vpack.c.b16 %v5132_v11, %v5131_v9  ;;  %v3573_v53 = vadd.f32 %v3572_v21, %v2775_v0  ;;  %2813 = vmatmul.bf16.gmra.mxu0 %v10313_v20  ;;  %v14191_v9 = vpop.f32.mrf.mxu2 }
 0x51c   : > { %3611 = vmatmul.bf16.gmra.mxu1 %v10317_v15  ;;  %v12600_v15 = vld [vmem:[%s13165_s14 + $0x844] sm:$0xf] }
 0x51d   : > { %v4148_v62 = vmax.f32 %v3573_v53, 0.0  ;;  %v10741_v21 = vor.u32 %v12600_v15, %v10738_v34 }
 0x51f   : > { %v4463_v46 = vpack.c.bf16 %v4148_v62, %v4148_v62  ;;  %v12499_v62 = vld [vmem:[%s13165_s14 + $0x514] sm:$0xf0] }
 0x520   : > { %v2776_v26 = vpop.f32.mrf.mxu0 }
 0x521   : > { %v3574_v47 = vpop.f32.mrf.mxu1  ;;  %v2777_v19 = vadd.f32 %v14170_v41, %v2776_v26  ;;  %v5133_v23 = vunpack.c.l.b16 %v4463_v46  ;;  %v10328_v26 = vld [vmem:[%s13165_s14 + $0x510] sm:$0xf] }
 0x522   : > { %v10329_v10 = vor.u32 %v12499_v62, %v10328_v26 }
 0x523   : > { %v3575_v42 = vadd.f32 %v3574_v47, %v2777_v19  ;;  %v4961_v47 = vpop.permute.xlu1 %4960  ;;  %v12498_v19 = vld [vmem:[%s13165_s14 + $0x514] sm:$0xf] }
 0x524   : > { %v5725_v18 = vsel %vm5699_vm1, %v5683_v1, %v4961_v47  ;;  %v10333_v46 = vor.u32 %v12498_v19, %v10330_v58  ;;  %v12604_v1 = vld [vmem:[%s13165_s14 + $0x864] sm:$0xf] }
 0x525   : > { %v4149_v31 = vmax.f32 %v3575_v42, 0.0  ;;  %v5085_v42 = vpop.permute.xlu2 %5084 }
 0x526   : > { %3876 = vmatmul.bf16.gmra.mxu3 %v10741_v21  ;;  %v5774_v57 = vsel %vm5736_vm2, %v5725_v18, %v5085_v42  ;;  %v10754_v18 = vld [vmem:[%s13165_s14 + $0x868] sm:$0xf0] }
 0x527   : > { %v4464_v12 = vpack.c.bf16 %v4149_v31, %v4149_v31 }
 0x528   : > { %v2779_v17 = vpop.f32.mrf.mxu0 }
 0x529   : > { %v3577_v44 = vpop.f32.mrf.mxu1  ;;  %v5134_v63 = vunpack.c.l.b16 %v4464_v12  ;;  %v2780_v20 = vadd.f32 %v14170_v41, %v2779_v17  ;;  %6200 = vmatmul.bf16.gmra.mxu2 %v5771_v22  ;;  %v14202_v12 = vpop.f32.mrf.mxu2 }
 0x52b   : > { %v14189_v27 = vpack.c.b16 %v5134_v63, %v5133_v23  ;;  %v3578_v29 = vadd.f32 %v3577_v44, %v2780_v20  ;;  %2818 = vmatmul.bf16.gmra.mxu0 %v10321_v8  ;;  %v10746_v44 = vld [vmem:[%s13165_s14 + $0x858] sm:$0xf0] }
 0x52c   : > { %3616 = vmatmul.bf16.gmra.mxu1 %v10325_v16  ;;  %v10749_v22 = vor.u32 %v12602_v54, %v10746_v44  ;;  %v12503_v54 = vld [vmem:[%s13165_s14 + $0x534] sm:$0xf0]  ;;  %v12502_v44 = vld [vmem:[%s13165_s14 + $0x534] sm:$0xf] }
 0x52d   : > { %v4150_v2 = vmax.f32 %v3578_v29, 0.0 }
 0x52f   : > { %v4465_v56 = vpack.c.bf16 %v4150_v2, %v4150_v2  ;;  %v12500_v2 = vld [vmem:[%s13165_s14 + $0x524] sm:$0xf] }
 0x530   : > { %v2781_v11 = vpop.f32.mrf.mxu0 }
 0x531   : > { %v3579_v0 = vpop.f32.mrf.mxu1  ;;  %v2782_v48 = vadd.f32 %v14170_v41, %v2781_v11  ;;  %v5135_v8 = vunpack.c.l.b16 %v4465_v56  ;;  %v10336_v11 = vld [vmem:[%s13165_s14 + $0x520] sm:$0xf] }
 0x533   : > { %v3580_v53 = vadd.f32 %v3579_v0, %v2782_v48  ;;  %v12501_v0 = vld [vmem:[%s13165_s14 + $0x524] sm:$0xf0]  ;;  %v10338_v48 = vld [vmem:[%s13165_s14 + $0x528] sm:$0xf0] }
 0x534   : > { %v10337_v47 = vor.u32 %v12501_v0, %v10336_v11  ;;  %v10341_v62 = vor.u32 %v12500_v2, %v10338_v48 }
 0x535   : > { %v4151_v50 = vmax.f32 %v3580_v53, 0.0 }
 0x536   : > { %3881 = vmatmul.bf16.gmra.mxu3 %v10749_v22  ;;  %v10346_v22 = vld [vmem:[%s13165_s14 + $0x538] sm:$0xf0] }
 0x537   : > { %v4466_v32 = vpack.c.bf16 %v4151_v50, %v4151_v50 }
 0x538   : > { %v2784_v31 = vpop.f32.mrf.mxu0 }
 0x539   : > { %v3582_v51 = vpop.f32.mrf.mxu1  ;;  %v5136_v16 = vunpack.c.l.b16 %v4466_v32  ;;  %v2785_v17 = vadd.f32 %v14170_v41, %v2784_v31  ;;  %6205 = vmatmul.bf16.gmra.mxu2 %v5774_v57  ;;  %v10757_v32 = vor.u32 %v12604_v1, %v10754_v18  ;;  %v10352_v1 = vld [vmem:[%s13165_s14 + $0x540] sm:$0xf]  ;;  %v12505_v18 = vld [vmem:[%s13165_s14 + $0x544] sm:$0xf0] }
 0x53b   : > { %v14207_v23 = vpack.c.b16 %v5136_v16, %v5135_v8  ;;  %v3583_v63 = vadd.f32 %v3582_v51, %v2785_v17  ;;  %2823 = vmatmul.bf16.gmra.mxu0 %v10329_v10  ;;  %v10344_v17 = vld [vmem:[%s13165_s14 + $0x530] sm:$0xf] }
 0x53c   : > { %3621 = vmatmul.bf16.gmra.mxu1 %v10333_v46 }
 0x53d   : > { %v4152_v34 = vmax.f32 %v3583_v63, 0.0 }
 0x53f   : > { %v4467_v35 = vpack.c.bf16 %v4152_v34, %v4152_v34  ;;  %v10345_v34 = vor.u32 %v12503_v54, %v10344_v17  ;;  %v3854_v54 = vpop.f32.mrf.mxu3 }
 0x540   : > { %v2786_v20 = vpop.f32.mrf.mxu0 }
 0x541   : > { %v3584_v15 = vpop.f32.mrf.mxu1  ;;  %v2787_v21 = vadd.f32 %v14170_v41, %v2786_v20  ;;  %v5137_v42 = vunpack.c.l.b16 %v4467_v35  ;;  %v12606_v35 = vld [vmem:[%s13165_s14 + $0x874] sm:$0xf] }
 0x543   : > { %v3585_v29 = vadd.f32 %v3584_v15, %v2787_v21  ;;  %v10349_v21 = vor.u32 %v12502_v44, %v10346_v22 }
 0x545   : > { %v4153_v53 = vmax.f32 %v3585_v29, 0.0 }
 0x546   : > { %3886 = vmatmul.bf16.gmra.mxu3 %v10757_v32  ;;  %v12504_v32 = vld [vmem:[%s13165_s14 + $0x544] sm:$0xf] }
 0x547   : > { %v4468_v26 = vpack.c.bf16 %v4153_v53, %v4153_v53  ;;  %v10762_v53 = vld [vmem:[%s13165_s14 + $0x878] sm:$0xf0] }
 0x548   : > { %v2789_v19 = vpop.f32.mrf.mxu0 }
 0x549   : > { %v3587_v58 = vpop.f32.mrf.mxu1  ;;  %v5138_v56 = vunpack.c.l.b16 %v4468_v26  ;;  %v2790_v50 = vadd.f32 %v14170_v41, %v2789_v19  ;;  %v10765_v26 = vor.u32 %v12606_v35, %v10762_v53 }
 0x54b   : > { %v14217_v10 = vpack.c.b16 %v5138_v56, %v5137_v42  ;;  %v3588_v46 = vadd.f32 %v3587_v58, %v2790_v50  ;;  %2828 = vmatmul.bf16.gmra.mxu0 %v10337_v47 }
 0x54c   : > { %3626 = vmatmul.bf16.gmra.mxu1 %v10341_v62 }
 0x54d   : > { %v4154_v57 = vmax.f32 %v3588_v46, 0.0  ;;  %v10354_v46 = vld [vmem:[%s13165_s14 + $0x548] sm:$0xf0] }
 0x54e   : > { %v10357_v17 = vor.u32 %v12504_v32, %v10354_v46  ;;  %v12506_v32 = vld [vmem:[%s13165_s14 + $0x554] sm:$0xf]  ;;  %v10362_v46 = vld [vmem:[%s13165_s14 + $0x558] sm:$0xf0] }
 0x54f   : > { %v4469_v63 = vpack.c.bf16 %v4154_v57, %v4154_v57  ;;  %v3057_v57 = vadd.f32 %v14170_v41, %v13563_v36 }
 0x550   : > { %v2791_v31 = vpop.f32.mrf.mxu0 }
 0x551   : > { %v3589_v51 = vpop.f32.mrf.mxu1  ;;  %v2792_v8 = vadd.f32 %v14170_v41, %v2791_v31  ;;  %v5139_v0 = vunpack.c.l.b16 %v4469_v63  ;;  %v3855_v36 = vadd.f32 %v3854_v54, %v3057_v57 }
 0x553   : > { %v3590_v16 = vadd.f32 %v3589_v51, %v2792_v8 }
 0x555   : > { %v4155_v20 = vmax.f32 %v3590_v16, 0.0  ;;  %v10353_v16 = vor.u32 %v12505_v18, %v10352_v1  ;;  %v10360_v1 = vld [vmem:[%s13165_s14 + $0x550] sm:$0xf]  ;;  %v12507_v18 = vld [vmem:[%s13165_s14 + $0x554] sm:$0xf0] }
 0x556   : > { %3891 = vmatmul.bf16.gmra.mxu3 %v10765_v26  ;;  %v10361_v54 = vor.u32 %v12507_v18, %v10360_v1 }
 0x557   : > { %v4470_v15 = vpack.c.bf16 %v4155_v20, %v4155_v20 }
 0x558   : > { %v2794_v29 = vpop.f32.mrf.mxu0 }
 0x559   : > { %v3592_v11 = vpop.f32.mrf.mxu1  ;;  %v5140_v2 = vunpack.c.l.b16 %v4470_v15  ;;  %v2795_v48 = vadd.f32 %v14170_v41, %v2794_v29 }
 0x55b   : > { %v14227_v47 = vpack.c.b16 %v5140_v2, %v5139_v0  ;;  %v3593_v62 = vadd.f32 %v3592_v11, %v2795_v48  ;;  %2833 = vmatmul.bf16.gmra.mxu0 %v10345_v34  ;;  %v12608_v34 = vld [vmem:[%s13165_s14 + $0x884] sm:$0xf]  ;;  %v3060_v2 = vadd.f32 %v14170_v41, %v13570_v52  ;;  %v4261_v48 = vmax.f32 %v3855_v36, 0.0  ;;  %v10778_v36 = vld [vmem:[%s13165_s14 + $0x898] sm:$0xf0] }
 0x55c   : > { %3631 = vmatmul.bf16.gmra.mxu1 %v10349_v21  ;;  %v10770_v21 = vld [vmem:[%s13165_s14 + $0x888] sm:$0xf0] }
 0x55d   : > { %v4156_v42 = vmax.f32 %v3593_v62, 0.0  ;;  %v10773_v29 = vor.u32 %v12608_v34, %v10770_v21  ;;  %v4576_v62 = vpack.c.bf16 %v4261_v48, %v4261_v48 }
 0x55f   : > { %v4471_v31 = vpack.c.bf16 %v4156_v42, %v4156_v42 }
 0x560   : > { %v2796_v19 = vpop.f32.mrf.mxu0 }
 0x561   : > { %v3594_v58 = vpop.f32.mrf.mxu1  ;;  %v2797_v56 = vadd.f32 %v14170_v41, %v2796_v19  ;;  %v5141_v63 = vunpack.c.l.b16 %v4471_v31  ;;  %v5477_v31 = vunpack.c.l.b16 %v4576_v62 }
 0x563   : > { %v3595_v50 = vadd.f32 %v3594_v58, %v2797_v56 }
 0x565   : > { %v4157_v51 = vmax.f32 %v3595_v50, 0.0 }
 0x566   : > { %3896 = vmatmul.bf16.gmra.mxu3 %v10773_v29 }
 0x567   : > { %v4472_v8 = vpack.c.bf16 %v4157_v51, %v4157_v51 }
 0x568   : > { %v2799_v44 = vpop.f32.mrf.mxu0 }
 0x569   : > { %v3597_v22 = vpop.f32.mrf.mxu1  ;;  %v5142_v20 = vunpack.c.l.b16 %v4472_v8  ;;  %v2800_v15 = vadd.f32 %v14170_v41, %v2799_v44  ;;  %v3857_v35 = vpop.f32.mrf.mxu3  ;;  %v10365_v44 = vor.u32 %v12506_v32, %v10362_v46  ;;  %v10368_v46 = vld [vmem:[%s13165_s14 + $0x560] sm:$0xf] }
 0x56a   : > { %v3858_v19 = vadd.f32 %v3857_v35, %v3060_v2 }
 0x56b   : > { %v14239_v11 = vpack.c.b16 %v5142_v20, %v5141_v63  ;;  %v3598_v0 = vadd.f32 %v3597_v22, %v2800_v15  ;;  %2838 = vmatmul.bf16.gmra.mxu0 %v10353_v16  ;;  %v3062_v16 = vadd.f32 %v14170_v41, %v13580_v13 }
 0x56c   : > { %3636 = vmatmul.bf16.gmra.mxu1 %v10357_v17  ;;  %v4262_v56 = vmax.f32 %v3858_v19, 0.0 }
 0x56d   : > { %v4158_v58 = vmax.f32 %v3598_v0, 0.0  ;;  %v12610_v0 = vld [vmem:[%s13165_s14 + $0x894] sm:$0xf] }
 0x56e   : > { %v4577_v51 = vpack.c.bf16 %v4262_v56, %v4262_v56  ;;  %v10781_v2 = vor.u32 %v12610_v0, %v10778_v36 }
 0x56f   : > { %v4473_v52 = vpack.c.bf16 %v4158_v58, %v4158_v58 }
 0x570   : > { %v2801_v53 = vpop.f32.mrf.mxu0  ;;  %v5478_v8 = vunpack.c.l.b16 %v4577_v51  ;;  %v12508_v51 = vld [vmem:[%s13165_s14 + $0x564] sm:$0xf] }
 0x571   : > { %v3599_v26 = vpop.f32.mrf.mxu1  ;;  %v2802_v42 = vadd.f32 %v14170_v41, %v2801_v53  ;;  %v3859_v22 = vpop.f32.mrf.mxu3  ;;  %v5143_v34 = vunpack.c.l.b16 %v4473_v52  ;;  %v3065_v53 = vadd.f32 %v14170_v41, %v13589_v61  ;;  %v10370_v52 = vld [vmem:[%s13165_s14 + $0x568] sm:$0xf0] }
 0x572   : > { %v5507_v15 = vpack.c.b16 %v5478_v8, %v5477_v31  ;;  %v3860_v13 = vadd.f32 %v3859_v22, %v3062_v16  ;;  %v12509_v31 = vld [vmem:[%s13165_s14 + $0x564] sm:$0xf0] }
 0x573   : > { %v3600_v50 = vadd.f32 %v3599_v26, %v2802_v42  ;;  %v10369_v22 = vor.u32 %v12509_v31, %v10368_v46 }
 0x574   : > { %5530 = vrot.lane.b32.xlu2 %v5507_v15, %s13044_s29  ;;  %v4263_v26 = vmax.f32 %v3860_v13, 0.0 }
 0x575   : > { %v4159_v57 = vmax.f32 %v3600_v50, 0.0 }
 0x576   : > { %3901 = vmatmul.bf16.gmra.mxu3 %v10781_v2  ;;  %v4578_v42 = vpack.c.bf16 %v4263_v26, %v4263_v26  ;;  %v12612_v2 = vld [vmem:[%s13165_s14 + $0x8a4] sm:$0xf] }
 0x577   : > { %v4474_v17 = vpack.c.bf16 %v4159_v57, %v4159_v57 }
 0x578   : > { %v2804_v63 = vpop.f32.mrf.mxu0  ;;  %v5479_v57 = vunpack.c.l.b16 %v4578_v42 }
 0x579   : > { %v3602_v20 = vpop.f32.mrf.mxu1  ;;  %v5144_v21 = vunpack.c.l.b16 %v4474_v17  ;;  %v2805_v29 = vadd.f32 %v14170_v41, %v2804_v63  ;;  %v3862_v62 = vpop.f32.mrf.mxu3  ;;  %v10373_v63 = vor.u32 %v12508_v51, %v10370_v52  ;;  %v10376_v51 = vld [vmem:[%s13165_s14 + $0x570] sm:$0xf]  ;;  %v12511_v52 = vld [vmem:[%s13165_s14 + $0x574] sm:$0xf0] }
 0x57a   : > { %v3863_v56 = vadd.f32 %v3862_v62, %v3065_v53  ;;  %v3070_v62 = vadd.f32 %v14170_v41, %v13607_v14 }
 0x57b   : > { %v14254_v48 = vpack.c.b16 %v5144_v21, %v5143_v34  ;;  %v3603_v35 = vadd.f32 %v3602_v20, %v2805_v29  ;;  %2843 = vmatmul.bf16.gmra.mxu0 %v10361_v54  ;;  %v3067_v54 = vadd.f32 %v14170_v41, %v13598_v24 }
 0x57c   : > { %3641 = vmatmul.bf16.gmra.mxu1 %v10365_v44  ;;  %v4264_v18 = vmax.f32 %v3863_v56, 0.0 }
 0x57d   : > { %v4160_v50 = vmax.f32 %v3603_v35, 0.0  ;;  %v10786_v35 = vld [vmem:[%s13165_s14 + $0x8a8] sm:$0xf0] }
 0x57e   : > { %v4579_v8 = vpack.c.bf16 %v4264_v18, %v4264_v18  ;;  %v10789_v13 = vor.u32 %v12612_v2, %v10786_v35  ;;  %v12614_v35 = vld [vmem:[%s13165_s14 + $0x8b4] sm:$0xf] }
 0x57f   : > { %v4475_v61 = vpack.c.bf16 %v4160_v50, %v4160_v50 }
 0x580   : > { %v2806_v19 = vpop.f32.mrf.mxu0  ;;  %v5480_v17 = vunpack.c.l.b16 %v4579_v8  ;;  %v10378_v8 = vld [vmem:[%s13165_s14 + $0x578] sm:$0xf0] }
 0x581   : > { %v3604_v58 = vpop.f32.mrf.mxu1  ;;  %v2807_v1 = vadd.f32 %v14170_v41, %v2806_v19  ;;  %v3864_v20 = vpop.f32.mrf.mxu3  ;;  %v5145_v29 = vunpack.c.l.b16 %v4475_v61 }
 0x582   : > { %v5508_v21 = vpack.c.b16 %v5480_v17, %v5479_v57  ;;  %v3865_v24 = vadd.f32 %v3864_v20, %v3067_v54  ;;  %v12510_v57 = vld [vmem:[%s13165_s14 + $0x574] sm:$0xf] }
 0x583   : > { %v3605_v32 = vadd.f32 %v3604_v58, %v2807_v1  ;;  %v10381_v20 = vor.u32 %v12510_v57, %v10378_v8  ;;  %v10384_v57 = vld [vmem:[%s13165_s14 + $0x580] sm:$0xf]  ;;  %v12513_v8 = vld [vmem:[%s13165_s14 + $0x584] sm:$0xf0] }
 0x584   : > { %5532 = vrot.lane.b32.xlu2 %v5508_v21, %s13044_s29  ;;  %v4265_v19 = vmax.f32 %v3865_v24, 0.0 }
 0x585   : > { %v4161_v16 = vmax.f32 %v3605_v32, 0.0 }
 0x586   : > { %3906 = vmatmul.bf16.gmra.mxu3 %v10789_v13  ;;  %v4580_v50 = vpack.c.bf16 %v4265_v19, %v4265_v19  ;;  %v10794_v13 = vld [vmem:[%s13165_s14 + $0x8b8] sm:$0xf0]  ;;  %v17503_v19 = vld [vmem:[#allocation12_spill] sm:$0xff] }
 0x587   : > { %v4476_v44 = vpack.c.bf16 %v4161_v16, %v4161_v16 }
 0x588   : > { %v2809_v15 = vpop.f32.mrf.mxu0  ;;  %v5481_v61 = vunpack.c.l.b16 %v4580_v50 }
 0x589   : > { %v3607_v34 = vpop.f32.mrf.mxu1  ;;  %v5146_v0 = vunpack.c.l.b16 %v4476_v44  ;;  %v2810_v36 = vadd.f32 %v14170_v41, %v2809_v15  ;;  %v3867_v58 = vpop.f32.mrf.mxu3  ;;  %v3072_v44 = vadd.f32 %v14170_v41, %v13616_v39 }
 0x58a   : > { %v3868_v1 = vadd.f32 %v3867_v58, %v3070_v62  ;;  %v3075_v58 = vadd.f32 %v14170_v41, %v17503_v19 }
 0x58b   : > { %v14269_v53 = vpack.c.b16 %v5146_v0, %v5145_v29  ;;  %v3608_v26 = vadd.f32 %v3607_v34, %v2810_v36  ;;  %2848 = vmatmul.bf16.gmra.mxu0 %v10369_v22 }
 0x58c   : > { %3646 = vmatmul.bf16.gmra.mxu1 %v10373_v63  ;;  %v4266_v46 = vmax.f32 %v3868_v1, 0.0  ;;  %v10377_v63 = vor.u32 %v12511_v52, %v10376_v51 }
 0x58d   : > { %v4162_v18 = vmax.f32 %v3608_v26, 0.0  ;;  %v10797_v26 = vor.u32 %v12614_v35, %v10794_v13 }
 0x58e   : > { %v4581_v16 = vpack.c.bf16 %v4266_v46, %v4266_v46 }
 0x58f   : > { %v4477_v14 = vpack.c.bf16 %v4162_v18, %v4162_v18 }
 0x590   : > { %v2811_v42 = vpop.f32.mrf.mxu0  ;;  %v5482_v54 = vunpack.c.l.b16 %v4581_v16  ;;  %v10386_v16 = vld [vmem:[%s13165_s14 + $0x588] sm:$0xf0] }
 0x591   : > { %v3609_v56 = vpop.f32.mrf.mxu1  ;;  %v2812_v32 = vadd.f32 %v14170_v41, %v2811_v42  ;;  %v3869_v15 = vpop.f32.mrf.mxu3  ;;  %v5147_v0 = vunpack.c.l.b16 %v4477_v14 }
 0x592   : > { %v5509_v29 = vpack.c.b16 %v5482_v54, %v5481_v61  ;;  %v3870_v39 = vadd.f32 %v3869_v15, %v3072_v44  ;;  %v12512_v61 = vld [vmem:[%s13165_s14 + $0x584] sm:$0xf] }
 0x593   : > { %v3610_v31 = vadd.f32 %v3609_v56, %v2812_v32 }
 0x594   : > { %5534 = vrot.lane.b32.xlu2 %v5509_v29, %s13044_s29  ;;  %v4267_v42 = vmax.f32 %v3870_v39, 0.0 }
 0x595   : > { %v4163_v17 = vmax.f32 %v3610_v31, 0.0 }
 0x596   : > { %3911 = vmatmul.bf16.gmra.mxu3 %v10797_v26  ;;  %v4582_v18 = vpack.c.bf16 %v4267_v42, %v4267_v42 }
 0x597   : > { %v4478_v22 = vpack.c.bf16 %v4163_v17, %v4163_v17 }
 0x598   : > { %v2814_v34 = vpop.f32.mrf.mxu0  ;;  %v5483_v14 = vunpack.c.l.b16 %v4582_v18 }
 0x599   : > { %v3612_v21 = vpop.f32.mrf.mxu1  ;;  %v5148_v36 = vunpack.c.l.b16 %v4478_v22  ;;  %v2815_v2 = vadd.f32 %v14170_v41, %v2814_v34  ;;  %v3872_v56 = vpop.f32.mrf.mxu3  ;;  %v10385_v34 = vor.u32 %v12513_v8, %v10384_v57  ;;  %v10802_v57 = vld [vmem:[%s13165_s14 + $0x8c8] sm:$0xf0] }
 0x59a   : > { %v3873_v32 = vadd.f32 %v3872_v56, %v3075_v58  ;;  %v17505_v58 = vld [vmem:[#allocation14_spill] sm:$0xff] }
 0x59b   : > { %v14284_v24 = vpack.c.b16 %v5148_v36, %v5147_v0  ;;  %v3613_v62 = vadd.f32 %v3612_v21, %v2815_v2  ;;  %2853 = vmatmul.bf16.gmra.mxu0 %v10377_v63  ;;  %v17504_v63 = vld [vmem:[#allocation13_spill] sm:$0xff]  ;;  %v10389_v21 = vor.u32 %v12512_v61, %v10386_v16  ;;  %v3080_v42 = vadd.f32 %v14170_v41, %v17505_v58 }
 0x59c   : > { %3651 = vmatmul.bf16.gmra.mxu1 %v10381_v20  ;;  %v4268_v51 = vmax.f32 %v3873_v32, 0.0  ;;  %v3077_v20 = vadd.f32 %v14170_v41, %v17504_v63 }
 0x59d   : > { %v4164_v46 = vmax.f32 %v3613_v62, 0.0 }
 0x59e   : > { %v4583_v17 = vpack.c.bf16 %v4268_v51, %v4268_v51 }
 0x59f   : > { %v4479_v54 = vpack.c.bf16 %v4164_v46, %v4164_v46 }
 0x5a0   : > { %v2816_v50 = vpop.f32.mrf.mxu0  ;;  %v5484_v22 = vunpack.c.l.b16 %v4583_v17  ;;  %v12515_v17 = vld [vmem:[%s13165_s14 + $0x594] sm:$0xf0] }
 0x5a1   : > { %v3614_v1 = vpop.f32.mrf.mxu1  ;;  %v2817_v31 = vadd.f32 %v14170_v41, %v2816_v50  ;;  %v3874_v29 = vpop.f32.mrf.mxu3  ;;  %v5149_v35 = vunpack.c.l.b16 %v4479_v54  ;;  %v12514_v54 = vld [vmem:[%s13165_s14 + $0x594] sm:$0xf] }
 0x5a2   : > { %v5510_v2 = vpack.c.b16 %v5484_v22, %v5483_v14  ;;  %v3875_v19 = vadd.f32 %v3874_v29, %v3077_v20  ;;  %v10392_v14 = vld [vmem:[%s13165_s14 + $0x590] sm:$0xf] }
 0x5a3   : > { %v3615_v52 = vadd.f32 %v3614_v1, %v2817_v31 }
 0x5a4   : > { %5536 = vrot.lane.b32.xlu2 %v5510_v2, %s13044_s29  ;;  %v4269_v56 = vmax.f32 %v3875_v19, 0.0 }
 0x5a5   : > { %v4165_v44 = vmax.f32 %v3615_v52, 0.0  ;;  %v12616_v52 = vld [vmem:[%s13165_s14 + $0x8c4] sm:$0xf] }
 0x5a6   : > { %v4584_v32 = vpack.c.bf16 %v4269_v56, %v4269_v56  ;;  %v10805_v61 = vor.u32 %v12616_v52, %v10802_v57 }
 0x5a7   : > { %v4480_v15 = vpack.c.bf16 %v4165_v44, %v4165_v44  ;;  %v10394_v44 = vld [vmem:[%s13165_s14 + $0x598] sm:$0xf0] }
 0x5a8   : > { %v2819_v0 = vpop.f32.mrf.mxu0  ;;  %v5485_v22 = vunpack.c.l.b16 %v4584_v32  ;;  %3916 = vmatmul.bf16.gmra.mxu3 %v10805_v61  ;;  %v10397_v2 = vor.u32 %v12514_v54, %v10394_v44 }
 0x5a9   : > { %v3617_v36 = vpop.f32.mrf.mxu1  ;;  %v5150_v13 = vunpack.c.l.b16 %v4480_v15  ;;  %v2820_v26 = vadd.f32 %v14170_v41, %v2819_v0  ;;  %v3877_v50 = vpop.f32.mrf.mxu3 }
 0x5aa   : > { %v3878_v46 = vadd.f32 %v3877_v50, %v3080_v42 }
 0x5ab   : > { %v14297_v62 = vpack.c.b16 %v5150_v13, %v5149_v35  ;;  %v3618_v39 = vadd.f32 %v3617_v36, %v2820_v26  ;;  %2858 = vmatmul.bf16.gmra.mxu0 %v10385_v34  ;;  %v10393_v36 = vor.u32 %v12515_v17, %v10392_v14  ;;  %v12618_v14 = vld [vmem:[%s13165_s14 + $0x8d4] sm:$0xf]  ;;  %v10810_v17 = vld [vmem:[%s13165_s14 + $0x8d8] sm:$0xf0] }
 0x5ac   : > { %3656 = vmatmul.bf16.gmra.mxu1 %v10389_v21  ;;  %v4270_v8 = vmax.f32 %v3878_v46, 0.0  ;;  %v17506_v21 = vld [vmem:[#allocation15_spill] sm:$0xff]  ;;  %v10813_v44 = vor.u32 %v12618_v14, %v10810_v17 }
 0x5ad   : > { %v4166_v31 = vmax.f32 %v3618_v39, 0.0  ;;  %v3082_v29 = vadd.f32 %v14170_v41, %v17506_v21 }
 0x5ae   : > { %v4585_v63 = vpack.c.bf16 %v4270_v8, %v4270_v8 }
 0x5af   : > { %v4481_v20 = vpack.c.bf16 %v4166_v31, %v4166_v31 }
 0x5b0   : > { %v2821_v1 = vpop.f32.mrf.mxu0  ;;  %v5486_v34 = vunpack.c.l.b16 %v4585_v63  ;;  %v10400_v63 = vld [vmem:[%s13165_s14 + $0x5a0] sm:$0xf] }
 0x5b1   : > { %v3619_v18 = vpop.f32.mrf.mxu1  ;;  %v2822_v51 = vadd.f32 %v14170_v41, %v2821_v1  ;;  %v3879_v35 = vpop.f32.mrf.mxu3  ;;  %v5151_v19 = vunpack.c.l.b16 %v4481_v20  ;;  %v12517_v20 = vld [vmem:[%s13165_s14 + $0x5a4] sm:$0xf0] }
 0x5b2   : > { %v5511_v39 = vpack.c.b16 %v5486_v34, %v5485_v22  ;;  %v3880_v1 = vadd.f32 %v3879_v35, %v3082_v29  ;;  %v10402_v34 = vld [vmem:[%s13165_s14 + $0x5a8] sm:$0xf0]  ;;  %v17508_v35 = vld [vmem:[#allocation17_spill] sm:$0xff] }
 0x5b3   : > { %v3620_v16 = vadd.f32 %v3619_v18, %v2822_v51  ;;  %v17507_v18 = vld [vmem:[#allocation16_spill] sm:$0xff] }
 0x5b4   : > { %5538 = vrot.lane.b32.xlu2 %v5511_v39, %s13044_s29  ;;  %v3085_v32 = vadd.f32 %v14170_v41, %v17507_v18  ;;  %v4271_v46 = vmax.f32 %v3880_v1, 0.0  ;;  %v10401_v39 = vor.u32 %v12517_v20, %v10400_v63  ;;  %v12620_v20 = vld [vmem:[%s13165_s14 + $0x8e4] sm:$0xf] }
 0x5b5   : > { %v4167_v15 = vmax.f32 %v3620_v16, 0.0 }
 0x5b6   : > { %v4586_v57 = vpack.c.bf16 %v4271_v46, %v4271_v46 }
 0x5b7   : > { %v4482_v0 = vpack.c.bf16 %v4167_v15, %v4167_v15  ;;  %v12516_v15 = vld [vmem:[%s13165_s14 + $0x5a4] sm:$0xf] }
 0x5b8   : > { %v2824_v13 = vpop.f32.mrf.mxu0  ;;  %v5487_v21 = vunpack.c.l.b16 %v4586_v57  ;;  %3921 = vmatmul.bf16.gmra.mxu3 %v10813_v44  ;;  %v17509_v57 = vld [vmem:[#allocation18_spill] sm:$0xff] }
 0x5b9   : > { %v3622_v26 = vpop.f32.mrf.mxu1  ;;  %v5152_v58 = vunpack.c.l.b16 %v4482_v0  ;;  %v2825_v42 = vadd.f32 %v14170_v41, %v2824_v13  ;;  %v3882_v31 = vpop.f32.mrf.mxu3  ;;  %v3087_v13 = vadd.f32 %v14170_v41, %v17508_v35  ;;  %v10410_v35 = vld [vmem:[%s13165_s14 + $0x5b8] sm:$0xf0] }
 0x5ba   : > { %v3883_v8 = vadd.f32 %v3882_v31, %v3085_v32 }
 0x5bb   : > { %v14312_v56 = vpack.c.b16 %v5152_v58, %v5151_v19  ;;  %v3623_v50 = vadd.f32 %v3622_v26, %v2825_v42  ;;  %2863 = vmatmul.bf16.gmra.mxu0 %v10393_v36  ;;  %v10405_v19 = vor.u32 %v12516_v15, %v10402_v34  ;;  %v10818_v15 = vld [vmem:[%s13165_s14 + $0x8e8] sm:$0xf0] }
 0x5bc   : > { %3661 = vmatmul.bf16.gmra.mxu1 %v10397_v2  ;;  %v4272_v54 = vmax.f32 %v3883_v8, 0.0  ;;  %v3090_v8 = vadd.f32 %v14170_v41, %v17509_v57 }
 0x5bd   : > { %v4168_v61 = vmax.f32 %v3623_v50, 0.0 }
 0x5be   : > { %v4587_v29 = vpack.c.bf16 %v4272_v54, %v4272_v54 }
 0x5bf   : > { %v4483_v0 = vpack.c.bf16 %v4168_v61, %v4168_v61 }
 0x5c0   : > { %v2826_v51 = vpop.f32.mrf.mxu0  ;;  %v5488_v2 = vunpack.c.l.b16 %v4587_v29 }
 0x5c1   : > { %v3624_v52 = vpop.f32.mrf.mxu1  ;;  %v2827_v16 = vadd.f32 %v14170_v41, %v2826_v51  ;;  %v3884_v58 = vpop.f32.mrf.mxu3  ;;  %v5153_v18 = vunpack.c.l.b16 %v4483_v0  ;;  %v10408_v0 = vld [vmem:[%s13165_s14 + $0x5b0] sm:$0xf] }
 0x5c2   : > { %v5512_v1 = vpack.c.b16 %v5488_v2, %v5487_v21  ;;  %v10821_v21 = vor.u32 %v12620_v20, %v10818_v15  ;;  %v12518_v2 = vld [vmem:[%s13165_s14 + $0x5b4] sm:$0xf] }
 0x5c3   : > { %v3625_v22 = vadd.f32 %v3624_v52, %v2827_v16  ;;  %v3885_v52 = vadd.f32 %v3884_v58, %v3087_v13 }
 0x5c4   : > { %5540 = vrot.lane.b32.xlu2 %v5512_v1, %s13044_s29 }
 0x5c5   : > { %v4169_v36 = vmax.f32 %v3625_v22, 0.0  ;;  %v4273_v61 = vmax.f32 %v3885_v52, 0.0 }
 0x5c7   : > { %v4484_v26 = vpack.c.bf16 %v4169_v36, %v4169_v36  ;;  %v4588_v54 = vpack.c.bf16 %v4273_v61, %v4273_v61  ;;  %v12519_v36 = vld [vmem:[%s13165_s14 + $0x5b4] sm:$0xf0] }
 0x5c8   : > { %v2829_v42 = vpop.f32.mrf.mxu0  ;;  %3926 = vmatmul.bf16.gmra.mxu3 %v10821_v21 }
 0x5c9   : > { %v3627_v50 = vpop.f32.mrf.mxu1  ;;  %v5154_v32 = vunpack.c.l.b16 %v4484_v26  ;;  %v2830_v46 = vadd.f32 %v14170_v41, %v2829_v42  ;;  %v3887_v16 = vpop.f32.mrf.mxu3  ;;  %v5489_v13 = vunpack.c.l.b16 %v4588_v54  ;;  %v17510_v42 = vld [vmem:[#allocation19_spill] sm:$0xff] }
 0x5ca   : > { %v3888_v44 = vadd.f32 %v3887_v16, %v3090_v8 }
 0x5cb   : > { %v14327_v31 = vpack.c.b16 %v5154_v32, %v5153_v18  ;;  %v3628_v51 = vadd.f32 %v3627_v50, %v2830_v46  ;;  %2868 = vmatmul.bf16.gmra.mxu0 %v10401_v39  ;;  %v3092_v50 = vadd.f32 %v14170_v41, %v17510_v42  ;;  %v10409_v18 = vor.u32 %v12519_v36, %v10408_v0  ;;  %v12520_v42 = vld [vmem:[%s13165_s14 + $0x5c4] sm:$0xf] }
 0x5cc   : > { %3666 = vmatmul.bf16.gmra.mxu1 %v10405_v19  ;;  %v4274_v34 = vmax.f32 %v3888_v44, 0.0  ;;  %v10413_v32 = vor.u32 %v12518_v2, %v10410_v35  ;;  %v17511_v44 = vld [vmem:[#allocation20_spill] sm:$0xff]  ;;  %v10826_v35 = vld [vmem:[%s13165_s14 + $0x8f8] sm:$0xf0] }
 0x5cd   : > { %v4170_v22 = vmax.f32 %v3628_v51, 0.0  ;;  %v12622_v2 = vld [vmem:[%s13165_s14 + $0x8f4] sm:$0xf] }
 0x5ce   : > { %v4589_v26 = vpack.c.bf16 %v4274_v34, %v4274_v34 }
 0x5cf   : > { %v4485_v39 = vpack.c.bf16 %v4170_v22, %v4170_v22  ;;  %v3095_v22 = vadd.f32 %v14170_v41, %v17511_v44 }
 0x5d0   : > { %v2831_v14 = vpop.f32.mrf.mxu0  ;;  %v5490_v58 = vunpack.c.l.b16 %v4589_v26  ;;  %v10829_v26 = vor.u32 %v12622_v2, %v10826_v35 }
 0x5d1   : > { %v3629_v17 = vpop.f32.mrf.mxu1  ;;  %v2832_v63 = vadd.f32 %v14170_v41, %v2831_v14  ;;  %v3889_v46 = vpop.f32.mrf.mxu3  ;;  %v5155_v8 = vunpack.c.l.b16 %v4485_v39 }
 0x5d2   : > { %v5513_v57 = vpack.c.b16 %v5490_v58, %v5489_v13  ;;  %v3890_v54 = vadd.f32 %v3889_v46, %v3092_v50  ;;  %v12521_v58 = vld [vmem:[%s13165_s14 + $0x5c4] sm:$0xf0]  ;;  %v10418_v50 = vld [vmem:[%s13165_s14 + $0x5c8] sm:$0xf0] }
 0x5d3   : > { %v3630_v29 = vadd.f32 %v3629_v17, %v2832_v63 }
 0x5d4   : > { %5542 = vrot.lane.b32.xlu2 %v5513_v57, %s13044_s29  ;;  %v4275_v63 = vmax.f32 %v3890_v54, 0.0 }
 0x5d5   : > { %v4171_v19 = vmax.f32 %v3630_v29, 0.0 }
 0x5d6   : > { %v4590_v21 = vpack.c.bf16 %v4275_v63, %v4275_v63 }
 0x5d7   : > { %v4486_v1 = vpack.c.bf16 %v4171_v19, %v4171_v19  ;;  %v10416_v19 = vld [vmem:[%s13165_s14 + $0x5c0] sm:$0xf] }
 0x5d8   : > { %v2834_v51 = vpop.f32.mrf.mxu0  ;;  %3931 = vmatmul.bf16.gmra.mxu3 %v10829_v26 }
 0x5d9   : > { %v3632_v52 = vpop.f32.mrf.mxu1  ;;  %v5156_v61 = vunpack.c.l.b16 %v4486_v1  ;;  %v2835_v16 = vadd.f32 %v14170_v41, %v2834_v51  ;;  %v3892_v20 = vpop.f32.mrf.mxu3  ;;  %v5491_v1 = vunpack.c.l.b16 %v4590_v21 }
 0x5da   : > { %v3893_v29 = vadd.f32 %v3892_v20, %v3095_v22 }
 0x5db   : > { %v14342_v14 = vpack.c.b16 %v5156_v61, %v5155_v8  ;;  %v3633_v17 = vadd.f32 %v3632_v52, %v2835_v16  ;;  %2873 = vmatmul.bf16.gmra.mxu0 %v10409_v18  ;;  %v17512_v52 = vld [vmem:[#allocation21_spill] sm:$0xff]  ;;  %v10417_v61 = vor.u32 %v12521_v58, %v10416_v19  ;;  %v10421_v16 = vor.u32 %v12520_v42, %v10418_v50  ;;  %v12624_v50 = vld [vmem:[%s13165_s14 + $0x904] sm:$0xf] }
 0x5dc   : > { %3671 = vmatmul.bf16.gmra.mxu1 %v10413_v32  ;;  %v4276_v13 = vmax.f32 %v3893_v29, 0.0  ;;  %v3097_v57 = vadd.f32 %v14170_v41, %v17512_v52  ;;  %v12523_v52 = vld [vmem:[%s13165_s14 + $0x5d4] sm:$0xf0] }
 0x5dd   : > { %v4172_v0 = vmax.f32 %v3633_v17, 0.0 }
 0x5de   : > { %v4591_v18 = vpack.c.bf16 %v4276_v13, %v4276_v13 }
 0x5df   : > { %v4487_v32 = vpack.c.bf16 %v4172_v0, %v4172_v0  ;;  %v17513_v0 = vld [vmem:[#allocation22_spill] sm:$0xff] }
 0x5e0   : > { %v2836_v15 = vpop.f32.mrf.mxu0  ;;  %v5492_v51 = vunpack.c.l.b16 %v4591_v18 }
 0x5e1   : > { %v3634_v34 = vpop.f32.mrf.mxu1  ;;  %v2837_v36 = vadd.f32 %v14170_v41, %v2836_v15  ;;  %v3894_v17 = vpop.f32.mrf.mxu3  ;;  %v5157_v63 = vunpack.c.l.b16 %v4487_v32 }
 0x5e2   : > { %v5514_v22 = vpack.c.b16 %v5492_v51, %v5491_v1  ;;  %v3895_v29 = vadd.f32 %v3894_v17, %v3097_v57  ;;  %v10834_v1 = vld [vmem:[%s13165_s14 + $0x908] sm:$0xf0]  ;;  %v10424_v51 = vld [vmem:[%s13165_s14 + $0x5d0] sm:$0xf]  ;;  %v12522_v57 = vld [vmem:[%s13165_s14 + $0x5d4] sm:$0xf] }
 0x5e3   : > { %v3635_v39 = vadd.f32 %v3634_v34, %v2837_v36  ;;  %v3100_v36 = vadd.f32 %v14170_v41, %v17513_v0  ;;  %v10837_v32 = vor.u32 %v12624_v50, %v10834_v1 }
 0x5e4   : > { %5544 = vrot.lane.b32.xlu2 %v5514_v22, %s13044_s29  ;;  %v4277_v2 = vmax.f32 %v3895_v29, 0.0  ;;  %v14371_v22 = vld [vmem:[%s17439_s2] ss:$0 sm:$0xff] }
 0x5e5   : > { %v4173_v46 = vmax.f32 %v3635_v39, 0.0 }
 0x5e6   : > { %v4592_v39 = vpack.c.bf16 %v4277_v2, %v4277_v2 }
 0x5e7   : > { %v4488_v8 = vpack.c.bf16 %v4173_v46, %v4173_v46 }
 0x5e8   : > { %v2839_v54 = vpop.f32.mrf.mxu0  ;;  %3936 = vmatmul.bf16.gmra.mxu3 %v10837_v32 }
 0x5e9   : > { %v3637_v44 = vpop.f32.mrf.mxu1  ;;  %v5158_v20 = vunpack.c.l.b16 %v4488_v8  ;;  %v2840_v15 = vadd.f32 %v14170_v41, %v2839_v54  ;;  %v3897_v35 = vpop.f32.mrf.mxu3  ;;  %v10426_v8 = vld [vmem:[%s13165_s14 + $0x5d8] sm:$0xf0] }
 0x5ea   : > { %v3898_v19 = vadd.f32 %v3897_v35, %v3100_v36 }
 0x5eb   : > { %v14357_v34 = vpack.c.b16 %v5158_v20, %v5157_v63  ;;  %v3638_v21 = vadd.f32 %v3637_v44, %v2840_v15  ;;  %2878 = vmatmul.bf16.gmra.mxu0 %v10417_v61  ;;  %v5493_v61 = vunpack.c.l.b16 %v4592_v39  ;;  %v10425_v15 = vor.u32 %v12523_v52, %v10424_v51 }
 0x5ec   : > { %3676 = vmatmul.bf16.gmra.mxu1 %v10421_v16  ;;  %v4278_v18 = vmax.f32 %v3898_v19, 0.0 }
 0x5ed   : > { %v4174_v58 = vmax.f32 %v3638_v21, 0.0  ;;  %v10429_v21 = vor.u32 %v12522_v57, %v10426_v8 }
 0x5ee   : > { %v4593_v16 = vpack.c.bf16 %v4278_v18, %v4278_v18 }
 0x5ef   : > { %v4489_v17 = vpack.c.bf16 %v4174_v58, %v4174_v58 }
 0x5f0   : > { %v2841_v13 = vpop.f32.mrf.mxu0  ;;  %v5494_v44 = vunpack.c.l.b16 %v4593_v16  ;;  %v10842_v16 = vld [vmem:[%s13165_s14 + $0x918] sm:$0xf0] }
 0x5f1   : > { %v3639_v26 = vpop.f32.mrf.mxu1  ;;  %v2842_v42 = vadd.f32 %v14170_v41, %v2841_v13  ;;  %v17514_v41 = vld [vmem:[#allocation23_spill] sm:$0xff]  ;;  %v3899_v29 = vpop.f32.mrf.mxu3  ;;  %v5159_v35 = vunpack.c.l.b16 %v4489_v17 }
 0x5f2   : > { %v3102_v63 = vadd.f32 %v14371_v22, %v17514_v41  ;;  %v5515_v2 = vpack.c.b16 %v5494_v44, %v5493_v61  ;;  %v12626_v61 = vld [vmem:[%s13165_s14 + $0x914] sm:$0xf]  ;;  %v10432_v41 = vld [vmem:[%s13165_s14 + $0x5e0] sm:$0xf] }
 0x5f3   : > { %v3640_v46 = vadd.f32 %v3639_v26, %v2842_v42  ;;  %v17515_v42 = vld [vmem:[#allocation24_spill] sm:$0xff] }
 0x5f4   : > { %5546 = vrot.lane.b32.xlu2 %v5515_v2, %s13044_s29  ;;  %v3900_v58 = vadd.f32 %v3899_v29, %v3102_v63  ;;  %v3105_v50 = vadd.f32 %v14371_v22, %v17515_v42  ;;  %v12525_v63 = vld [vmem:[%s13165_s14 + $0x5e4] sm:$0xf0] }
 0x5f5   : > { %v4175_v54 = vmax.f32 %v3640_v46, 0.0 }
 0x5f6   : > { %v4279_v1 = vmax.f32 %v3900_v58, 0.0 }
 0x5f7   : > { %v4490_v20 = vpack.c.bf16 %v4175_v54, %v4175_v54  ;;  %v10845_v54 = vor.u32 %v12626_v61, %v10842_v16  ;;  %v17517_v61 = vld [vmem:[#allocation26_spill] sm:$0xff] }
 0x5f8   : > { %v2844_v0 = vpop.f32.mrf.mxu0  ;;  %v4594_v51 = vpack.c.bf16 %v4279_v1, %v4279_v1  ;;  %v3110_v16 = vadd.f32 %v14371_v22, %v17517_v61 }
 0x5f9   : > { %v3642_v36 = vpop.f32.mrf.mxu1  ;;  %v5160_v13 = vunpack.c.l.b16 %v4490_v20  ;;  %v2845_v26 = vadd.f32 %v14371_v22, %v2844_v0  ;;  %v3902_v18 = vpop.f32.mrf.mxu3  ;;  %v12524_v20 = vld [vmem:[%s13165_s14 + $0x5e4] sm:$0xf]  ;;  %3941 = vmatmul.bf16.gmra.mxu3 %v10845_v54  ;;  %v17516_v0 = vld [vmem:[#allocation25_spill] sm:$0xff] }
 0x5fa   : > { %v3903_v52 = vadd.f32 %v3902_v18, %v3105_v50 }
 0x5fb   : > { %v14377_v39 = vpack.c.b16 %v5160_v13, %v5159_v35  ;;  %v3643_v19 = vadd.f32 %v3642_v36, %v2845_v26  ;;  %2883 = vmatmul.bf16.gmra.mxu0 %v10425_v15  ;;  %v10434_v15 = vld [vmem:[%s13165_s14 + $0x5e8] sm:$0xf0]  ;;  %v3107_v36 = vadd.f32 %v14371_v22, %v17516_v0 }
 0x5fc   : > { %3681 = vmatmul.bf16.gmra.mxu1 %v10429_v21  ;;  %v4280_v17 = vmax.f32 %v3903_v52, 0.0  ;;  %v5495_v21 = vunpack.c.l.b16 %v4594_v51  ;;  %v10437_v58 = vor.u32 %v12524_v20, %v10434_v15  ;;  %v10850_v0 = vld [vmem:[%s13165_s14 + $0x928] sm:$0xf0] }
 0x5fd   : > { %v4176_v57 = vmax.f32 %v3643_v19, 0.0  ;;  %v10433_v19 = vor.u32 %v12525_v63, %v10432_v41 }
 0x5fe   : > { %v4595_v29 = vpack.c.bf16 %v4280_v17, %v4280_v17 }
 0x5ff   : > { %v4491_v2 = vpack.c.bf16 %v4176_v57, %v4176_v57 }
 0x600   : > { %v2846_v32 = vpop.f32.mrf.mxu0  ;;  %v5496_v13 = vunpack.c.l.b16 %v4595_v29  ;;  %v12628_v29 = vld [vmem:[%s13165_s14 + $0x924] sm:$0xf] }
 0x601   : > { %v3644_v46 = vpop.f32.mrf.mxu1  ;;  %v2847_v8 = vadd.f32 %v14371_v22, %v2846_v32  ;;  %v3904_v42 = vpop.f32.mrf.mxu3  ;;  %v5161_v32 = vunpack.c.l.b16 %v4491_v2  ;;  %v10853_v2 = vor.u32 %v12628_v29, %v10850_v0  ;;  %v17521_v0 = vld [vmem:[#allocation28_spill] sm:$0xff] }
 0x602   : > { %v5516_v18 = vpack.c.b16 %v5496_v13, %v5495_v21  ;;  %v3905_v51 = vadd.f32 %v3904_v42, %v3107_v36  ;;  %v10440_v13 = vld [vmem:[%s13165_s14 + $0x5f0] sm:$0xf] }
 0x603   : > { %v3645_v44 = vadd.f32 %v3644_v46, %v2847_v8 }
 0x604   : > { %5548 = vrot.lane.b32.xlu2 %v5516_v18, %s13044_s29  ;;  %v4281_v17 = vmax.f32 %v3905_v51, 0.0 }
 0x605   : > { %v4177_v35 = vmax.f32 %v3645_v44, 0.0 }
 0x606   : > { %v4596_v63 = vpack.c.bf16 %v4281_v17, %v4281_v17 }
 0x607   : > { %v4492_v26 = vpack.c.bf16 %v4177_v35, %v4177_v35 }
 0x608   : > { %v2849_v50 = vpop.f32.mrf.mxu0  ;;  %v5497_v42 = vunpack.c.l.b16 %v4596_v63 }
 0x609   : > { %v3647_v1 = vpop.f32.mrf.mxu1  ;;  %v5162_v46 = vunpack.c.l.b16 %v4492_v26  ;;  %v2850_v52 = vadd.f32 %v14371_v22, %v2849_v50  ;;  %v3907_v54 = vpop.f32.mrf.mxu3  ;;  %v12527_v26 = vld [vmem:[%s13165_s14 + $0x5f4] sm:$0xf0]  ;;  %3946 = vmatmul.bf16.gmra.mxu3 %v10853_v2 }
 0x60a   : > { %v3908_v20 = vadd.f32 %v3907_v54, %v3110_v16 }
 0x60b   : > { %v14392_v8 = vpack.c.b16 %v5162_v46, %v5161_v32  ;;  %v3648_v57 = vadd.f32 %v3647_v1, %v2850_v52  ;;  %2888 = vmatmul.bf16.gmra.mxu0 %v10433_v19  ;;  %v12526_v19 = vld [vmem:[%s13165_s14 + $0x5f4] sm:$0xf]  ;;  %v17518_v1 = vld [vmem:[#allocation27_spill] sm:$0xff] }
 0x60c   : > { %3686 = vmatmul.bf16.gmra.mxu1 %v10437_v58  ;;  %v4282_v36 = vmax.f32 %v3908_v20, 0.0  ;;  %v10442_v58 = vld [vmem:[%s13165_s14 + $0x5f8] sm:$0xf0]  ;;  %v3112_v18 = vadd.f32 %v14371_v22, %v17518_v1 }
 0x60d   : > { %v4178_v15 = vmax.f32 %v3648_v57, 0.0  ;;  %v10441_v57 = vor.u32 %v12527_v26, %v10440_v13  ;;  %v10445_v61 = vor.u32 %v12526_v19, %v10442_v58  ;;  %v10858_v1 = vld [vmem:[%s13165_s14 + $0x938] sm:$0xf0] }
 0x60e   : > { %v4597_v50 = vpack.c.bf16 %v4282_v36, %v4282_v36  ;;  %v3115_v36 = vadd.f32 %v14371_v22, %v17521_v0 }
 0x60f   : > { %v4493_v32 = vpack.c.bf16 %v4178_v15, %v4178_v15 }
 0x610   : > { %v2851_v44 = vpop.f32.mrf.mxu0  ;;  %v5498_v52 = vunpack.c.l.b16 %v4597_v50  ;;  %v12630_v50 = vld [vmem:[%s13165_s14 + $0x934] sm:$0xf] }
 0x611   : > { %v3649_v41 = vpop.f32.mrf.mxu1  ;;  %v2852_v21 = vadd.f32 %v14371_v22, %v2851_v44  ;;  %v3909_v16 = vpop.f32.mrf.mxu3 }
 0x612   : > { %v5517_v44 = vpack.c.b16 %v5498_v52, %v5497_v42  ;;  %v12529_v52 = vld [vmem:[%s13165_s14 + $0x604] sm:$0xf0] }
 0x613   : > { %v3650_v35 = vadd.f32 %v3649_v41, %v2852_v21  ;;  %v5163_v41 = vunpack.c.l.b16 %v4493_v32  ;;  %v3910_v21 = vadd.f32 %v3909_v16, %v3112_v18  ;;  %v10861_v32 = vor.u32 %v12630_v50, %v10858_v1 }
 0x614   : > { %5550 = vrot.lane.b32.xlu2 %v5517_v44, %s13044_s29 }
 0x615   : > { %v4179_v46 = vmax.f32 %v3650_v35, 0.0  ;;  %v4283_v2 = vmax.f32 %v3910_v21, 0.0 }
 0x617   : > { %v4494_v51 = vpack.c.bf16 %v4179_v46, %v4179_v46  ;;  %v4598_v19 = vpack.c.bf16 %v4283_v2, %v4283_v2  ;;  %v10448_v46 = vld [vmem:[%s13165_s14 + $0x600] sm:$0xf] }
 0x618   : > { %v2854_v17 = vpop.f32.mrf.mxu0  ;;  %v10449_v44 = vor.u32 %v12529_v52, %v10448_v46 }
 0x619   : > { %v3652_v54 = vpop.f32.mrf.mxu1  ;;  %v5164_v20 = vunpack.c.l.b16 %v4494_v51  ;;  %v2855_v63 = vadd.f32 %v14371_v22, %v2854_v17  ;;  %v3912_v35 = vpop.f32.mrf.mxu3  ;;  %v12528_v51 = vld [vmem:[%s13165_s14 + $0x604] sm:$0xf]  ;;  %3951 = vmatmul.bf16.gmra.mxu3 %v10861_v32 }
 0x61a   : > { %v3913_v58 = vadd.f32 %v3912_v35, %v3115_v36  ;;  %v17522_v35 = vld [vmem:[#allocation29_spill] sm:$0xff] }
 0x61b   : > { %v14407_v29 = vpack.c.b16 %v5164_v20, %v5163_v41  ;;  %v14409_v15 = vadd.f32 %v3652_v54, %v2855_v63  ;;  %2893 = vmatmul.bf16.gmra.mxu0 %v10441_v57  ;;  %v10450_v57 = vld [vmem:[%s13165_s14 + $0x608] sm:$0xf0] }
 0x61c   : > { %3691 = vmatmul.bf16.gmra.mxu1 %v10445_v61  ;;  %v4284_v18 = vmax.f32 %v3913_v58, 0.0  ;;  %v5499_v61 = vunpack.c.l.b16 %v4598_v19  ;;  %v10453_v41 = vor.u32 %v12528_v51, %v10450_v57  ;;  %v12681_v51 = vld [vmem:[%s17440_s3 + $0x78] sm:$0xff]  ;;  %v12632_v57 = vld [vmem:[%s13165_s14 + $0x944] sm:$0xf] }
 0x61d   : > { %17519 = vst [vmem:[#allocation12_spill] sm:$0xff] %v14407_v29  ;;  %6235 = vmatpush.bf16.msrb.mxu3 %v12681_v51 }
 0x61e   : > { %17520 = vst [vmem:[#allocation13_spill] sm:$0xff] %v14409_v15  ;;  %v4599_v16 = vpack.c.bf16 %v4284_v18, %v4284_v18 }
 0x620   : > { %v2856_v13 = vpop.f32.mrf.mxu0  ;;  %v5500_v54 = vunpack.c.l.b16 %v4599_v16 }
 0x621   : > { %v3654_v26 = vpop.f32.mrf.mxu1  ;;  %v2857_v42 = vadd.f32 %v14371_v22, %v2856_v13  ;;  %v3117_v13 = vadd.f32 %v14371_v22, %v17522_v35 }
 0x622   : > { %v5518_v21 = vpack.c.b16 %v5500_v54, %v5499_v61  ;;  %v10866_v61 = vld [vmem:[%s13165_s14 + $0x948] sm:$0xf0] }
 0x623   : > { %v3655_v17 = vadd.f32 %v3654_v26, %v2857_v42  ;;  %v3914_v42 = vpop.f32.mrf.mxu3 }
 0x624   : > { %5552 = vrot.lane.b32.xlu2 %v5518_v21, %s13044_s29  ;;  %v3915_v18 = vadd.f32 %v3914_v42, %v3117_v13 }
 0x625   : > { %v4181_v0 = vmax.f32 %v3655_v17, 0.0  ;;  %v10869_v17 = vor.u32 %v12632_v57, %v10866_v61 }
 0x626   : > { %v4285_v16 = vmax.f32 %v3915_v18, 0.0 }
 0x627   : > { %v4496_v26 = vpack.c.bf16 %v4181_v0, %v4181_v0  ;;  %v17523_v0 = vld [vmem:[#allocation31_spill] sm:$0xff] }
 0x628   : > { %v2859_v20 = vpop.f32.mrf.mxu0  ;;  %v4600_v21 = vpack.c.bf16 %v4285_v16, %v4285_v16 }
 0x629   : > { %v3657_v63 = vpop.f32.mrf.mxu1  ;;  %v2860_v36 = vadd.f32 %v14371_v22, %v2859_v20  ;;  %v5219_v32 = vunpack.c.l.b16 %v4496_v26  ;;  %v12530_v20 = vld [vmem:[%s13165_s14 + $0x614] sm:$0xf]  ;;  %3956 = vmatmul.bf16.gmra.mxu3 %v10869_v17  ;;  %v17525_v17 = vld [vmem:[#allocation7_spill] sm:$0xff] }
 0x62a   : > { %v5501_v35 = vunpack.c.l.b16 %v4600_v21 }
 0x62b   : > { %v3658_v2 = vadd.f32 %v3657_v63, %v2860_v36  ;;  %2898 = vmatmul.bf16.gmra.mxu0 %v10449_v44  ;;  %v10456_v44 = vld [vmem:[%s13165_s14 + $0x610] sm:$0xf]  ;;  %v10458_v63 = vld [vmem:[%s13165_s14 + $0x618] sm:$0xf0]  ;;  %v3120_v36 = vadd.f32 %v14371_v22, %v17523_v0 }
 0x62c   : > { %3696 = vmatmul.bf16.gmra.mxu1 %v10453_v41  ;;  %v12531_v41 = vld [vmem:[%s13165_s14 + $0x614] sm:$0xf0]  ;;  %v10461_v26 = vor.u32 %v12530_v20, %v10458_v63 }
 0x62d   : > { %v4182_v19 = vmax.f32 %v3658_v2, 0.0  ;;  %v10457_v13 = vor.u32 %v12531_v41, %v10456_v44 }
 0x62f   : > { %v4497_v58 = vpack.c.bf16 %v4182_v19, %v4182_v19  ;;  %v3917_v19 = vpop.f32.mrf.mxu3 }
 0x630   : > { %v2861_v50 = vpop.f32.mrf.mxu0 }
 0x631   : > { %v3659_v1 = vpop.f32.mrf.mxu1  ;;  %v5220_v46 = vunpack.c.l.b16 %v4497_v58  ;;  %v2862_v52 = vadd.f32 %v14371_v22, %v2861_v50  ;;  %v5519_v50 = vpack.c.b16 %v5501_v35, %v5501_v35  ;;  %v12634_v35 = vld [vmem:[%s13165_s14 + $0x954] sm:$0xf] }
 0x633   : > { %v5254_v54 = vpack.c.b16 %v5220_v46, %v5219_v32  ;;  %v3660_v2 = vadd.f32 %v3659_v1, %v2862_v52  ;;  %v3918_v46 = vadd.f32 %v3917_v19, %v3120_v36  ;;  %5554 = vrot.lane.b32.xlu2 %v5519_v50, %s13044_s29  ;;  %v17524_v1 = vld [vmem:[#allocation32_spill] sm:$0xff]  ;;  %v12533_v50 = vld [vmem:[%s13165_s14 + $0x624] sm:$0xf0] }
 0x634   : > { %v3122_v52 = vadd.f32 %v14371_v22, %v17524_v1  ;;  %v17526_v1 = vld [vmem:[#allocation34_spill] sm:$0xff] }
 0x635   : > { %5272 = vrot.lane.b32.xlu0 %v5254_v54, %s13042_s23  ;;  %v4183_v18 = vmax.f32 %v3660_v2, 0.0  ;;  %v4286_v57 = vmax.f32 %v3918_v46, 0.0 }
 0x637   : > { %v4498_v61 = vpack.c.bf16 %v4183_v18, %v4183_v18  ;;  %v3919_v44 = vpop.f32.mrf.mxu3  ;;  %v4601_v63 = vpack.c.bf16 %v4286_v57, %v4286_v57  ;;  %v12532_v18 = vld [vmem:[%s13165_s14 + $0x624] sm:$0xf]  ;;  %v3125_v57 = vadd.f32 %v14371_v22, %v17526_v1 }
 0x638   : > { %v2864_v58 = vpop.f32.mrf.mxu0  ;;  %v3920_v21 = vadd.f32 %v3919_v44, %v3122_v52 }
 0x639   : > { %v3662_v42 = vpop.f32.mrf.mxu1  ;;  %v2865_v32 = vadd.f32 %v14371_v22, %v2864_v58  ;;  %v5221_v0 = vunpack.c.l.b16 %v4498_v61  ;;  %v5591_v46 = vunpack.c.l.b16 %v4601_v63 }
 0x63b   : > { %v3663_v51 = vadd.f32 %v3662_v42, %v2865_v32  ;;  %2903 = vmatmul.bf16.gmra.mxu0 %v10457_v13  ;;  %v10874_v13 = vld [vmem:[%s13165_s14 + $0x958] sm:$0xf0]  ;;  %v10464_v42 = vld [vmem:[%s13165_s14 + $0x620] sm:$0xf]  ;;  %v10466_v32 = vld [vmem:[%s13165_s14 + $0x628] sm:$0xf0] }
 0x63c   : > { %3701 = vmatmul.bf16.gmra.mxu1 %v10461_v26  ;;  %v4287_v26 = vmax.f32 %v3920_v21, 0.0  ;;  %v10877_v19 = vor.u32 %v12634_v35, %v10874_v13  ;;  %v17527_v13 = vld [vmem:[#allocation35_spill] sm:$0xff] }
 0x63d   : > { %v4184_v16 = vmax.f32 %v3663_v51, 0.0  ;;  %4838 = vrot.lane.b32.xlu0 %v17525_v17, %s13042_s23  ;;  %v10469_v17 = vor.u32 %v12532_v18, %v10466_v32 }
 0x63e   : > { %v4602_v51 = vpack.c.bf16 %v4287_v26, %v4287_v26  ;;  %3961 = vmatmul.bf16.gmra.mxu3 %v10877_v19 }
 0x63f   : > { %v4499_v54 = vpack.c.bf16 %v4184_v16, %v4184_v16  ;;  %v10465_v16 = vor.u32 %v12533_v50, %v10464_v42 }
 0x640   : > { %v2866_v41 = vpop.f32.mrf.mxu0  ;;  %v5592_v61 = vunpack.c.l.b16 %v4602_v51 }
 0x641   : > { %v3664_v20 = vpop.f32.mrf.mxu1  ;;  %v5222_v36 = vunpack.c.l.b16 %v4499_v54  ;;  %v2867_v2 = vadd.f32 %v14371_v22, %v2866_v41  ;;  %v3922_v54 = vpop.f32.mrf.mxu3 }
 0x642   : > { %v14453_v21 = vpack.c.b16 %v5592_v61, %v5591_v46  ;;  %v3923_v63 = vadd.f32 %v3922_v54, %v3125_v57  ;;  %v12636_v61 = vld [vmem:[%s13165_s14 + $0x964] sm:$0xf] }
 0x643   : > { %v5255_v58 = vpack.c.b16 %v5222_v36, %v5221_v0  ;;  %v3665_v52 = vadd.f32 %v3664_v20, %v2867_v2  ;;  %v3127_v20 = vadd.f32 %v14371_v22, %v17527_v13 }
 0x644   : > { %v4288_v2 = vmax.f32 %v3923_v63, 0.0  ;;  %v10474_v63 = vld [vmem:[%s13165_s14 + $0x638] sm:$0xf0] }
 0x645   : > { %5274 = vrot.lane.b32.xlu0 %v5255_v58, %s13042_s23  ;;  %v4185_v0 = vmax.f32 %v3665_v52, 0.0  ;;  %v17528_v58 = vld [vmem:[#allocation8_spill] sm:$0xff] }
 0x646   : > { %v4603_v46 = vpack.c.bf16 %v4288_v2, %v4288_v2 }
 0x647   : > { %v4500_v26 = vpack.c.bf16 %v4185_v0, %v4185_v0  ;;  %v12535_v0 = vld [vmem:[%s13165_s14 + $0x634] sm:$0xf0] }
 0x648   : > { %v2869_v44 = vpop.f32.mrf.mxu0 }
 0x649   : > { %v3667_v41 = vpop.f32.mrf.mxu1  ;;  %v2870_v36 = vadd.f32 %v14371_v22, %v2869_v44  ;;  %v3924_v50 = vpop.f32.mrf.mxu3  ;;  %v5223_v1 = vunpack.c.l.b16 %v4500_v26 }
 0x64a   : > { %v3925_v51 = vadd.f32 %v3924_v50, %v3127_v20 }
 0x64b   : > { %v3668_v35 = vadd.f32 %v3667_v41, %v2870_v36  ;;  %2908 = vmatmul.bf16.gmra.mxu0 %v10465_v16  ;;  %v10882_v16 = vld [vmem:[%s13165_s14 + $0x968] sm:$0xf0]  ;;  %v10472_v41 = vld [vmem:[%s13165_s14 + $0x630] sm:$0xf]  ;;  %v12534_v36 = vld [vmem:[%s13165_s14 + $0x634] sm:$0xf] }
 0x64c   : > { %3706 = vmatmul.bf16.gmra.mxu1 %v10469_v17  ;;  %v4289_v17 = vmax.f32 %v3925_v51, 0.0  ;;  %v10885_v54 = vor.u32 %v12636_v61, %v10882_v16 }
 0x64d   : > { %v4186_v19 = vmax.f32 %v3668_v35, 0.0  ;;  %4840 = vrot.lane.b32.xlu0 %v17528_v58, %s13042_s23  ;;  %v5593_v35 = vunpack.c.l.b16 %v4603_v46  ;;  %v10473_v58 = vor.u32 %v12535_v0, %v10472_v41 }
 0x64e   : > { %v4604_v13 = vpack.c.bf16 %v4289_v17, %v4289_v17  ;;  %3966 = vmatmul.bf16.gmra.mxu3 %v10885_v54 }
 0x64f   : > { %v4501_v42 = vpack.c.bf16 %v4186_v19, %v4186_v19  ;;  %v17529_v19 = vld [vmem:[#allocation37_spill] sm:$0xff] }
 0x650   : > { %v2871_v18 = vpop.f32.mrf.mxu0  ;;  %v3130_v2 = vadd.f32 %v14371_v22, %v17529_v19  ;;  %v5594_v26 = vunpack.c.l.b16 %v4604_v13 }
 0x651   : > { %v3669_v32 = vpop.f32.mrf.mxu1  ;;  %v5224_v57 = vunpack.c.l.b16 %v4501_v42  ;;  %v2872_v52 = vadd.f32 %v14371_v22, %v2871_v18  ;;  %v10477_v42 = vor.u32 %v12534_v36, %v10474_v63  ;;  %v3927_v50 = vpop.f32.mrf.mxu3 }
 0x652   : > { %v3928_v46 = vadd.f32 %v3927_v50, %v3130_v2 }
 0x653   : > { %v5256_v44 = vpack.c.b16 %v5224_v57, %v5223_v1  ;;  %v3670_v20 = vadd.f32 %v3669_v32, %v2872_v52  ;;  %v14470_v1 = vpack.c.b16 %v5594_v26, %v5593_v35  ;;  %v3132_v32 = vadd.f32 %v14371_v22, %v13799_v37  ;;  %v10890_v26 = vld [vmem:[%s13165_s14 + $0x978] sm:$0xf0] }
 0x654   : > { %v4290_v52 = vmax.f32 %v3928_v46, 0.0 }
 0x655   : > { %5276 = vrot.lane.b32.xlu0 %v5256_v44, %s13042_s23  ;;  %v4187_v57 = vmax.f32 %v3670_v20, 0.0  ;;  %v17530_v44 = vld [vmem:[#allocation9_spill] sm:$0xff]  ;;  %v12638_v20 = vld [vmem:[%s13165_s14 + $0x974] sm:$0xf] }
 0x656   : > { %v4605_v35 = vpack.c.bf16 %v4290_v52, %v4290_v52 }
 0x657   : > { %v4502_v17 = vpack.c.bf16 %v4187_v57, %v4187_v57  ;;  %v12536_v57 = vld [vmem:[%s13165_s14 + $0x644] sm:$0xf] }
 0x658   : > { %v2874_v18 = vpop.f32.mrf.mxu0  ;;  %v5595_v46 = vunpack.c.l.b16 %v4605_v35 }
 0x659   : > { %v3672_v51 = vpop.f32.mrf.mxu1  ;;  %v2875_v61 = vadd.f32 %v14371_v22, %v2874_v18  ;;  %v3929_v0 = vpop.f32.mrf.mxu3  ;;  %v5225_v19 = vunpack.c.l.b16 %v4502_v17  ;;  %v10480_v18 = vld [vmem:[%s13165_s14 + $0x640] sm:$0xf] }
 0x65a   : > { %v3930_v13 = vadd.f32 %v3929_v0, %v3132_v32 }
 0x65b   : > { %v3673_v16 = vadd.f32 %v3672_v51, %v2875_v61  ;;  %2913 = vmatmul.bf16.gmra.mxu0 %v10473_v58  ;;  %v12537_v51 = vld [vmem:[%s13165_s14 + $0x644] sm:$0xf0]  ;;  %v10482_v61 = vld [vmem:[%s13165_s14 + $0x648] sm:$0xf0] }
 0x65c   : > { %3711 = vmatmul.bf16.gmra.mxu1 %v10477_v42  ;;  %v4291_v58 = vmax.f32 %v3930_v13, 0.0  ;;  %v10893_v42 = vor.u32 %v12638_v20, %v10890_v26 }
 0x65d   : > { %v4188_v54 = vmax.f32 %v3673_v16, 0.0  ;;  %4842 = vrot.lane.b32.xlu0 %v17530_v44, %s13042_s23  ;;  %v10481_v44 = vor.u32 %v12537_v51, %v10480_v18  ;;  %v17533_v18 = vld [vmem:[#allocation11_spill] sm:$0xff]  ;;  %v17534_v51 = vld [vmem:[#allocation10_spill] sm:$0xff] }
 0x65e   : > { %v4606_v16 = vpack.c.bf16 %v4291_v58, %v4291_v58  ;;  %3971 = vmatmul.bf16.gmra.mxu3 %v10893_v42  ;;  %v17532_v58 = vld [vmem:[#allocation41_spill] sm:$0xff] }
 0x65f   : > { %v4503_v41 = vpack.c.bf16 %v4188_v54, %v4188_v54  ;;  %v17531_v54 = vld [vmem:[#allocation40_spill] sm:$0xff] }
 0x660   : > { %v2876_v36 = vpop.f32.mrf.mxu0  ;;  %v3135_v52 = vadd.f32 %v14371_v22, %v17531_v54  ;;  %v5596_v17 = vunpack.c.l.b16 %v4606_v16 }
 0x661   : > { %v3674_v63 = vpop.f32.mrf.mxu1  ;;  %v5226_v2 = vunpack.c.l.b16 %v4503_v41  ;;  %v2877_v37 = vadd.f32 %v14371_v22, %v2876_v36  ;;  %v10485_v41 = vor.u32 %v12536_v57, %v10482_v61  ;;  %v3932_v0 = vpop.f32.mrf.mxu3  ;;  %v4075_v57 = vmax.f32 %v17534_v51, 0.0 }
 0x662   : > { %v3933_v35 = vadd.f32 %v3932_v0, %v3135_v52  ;;  %v12640_v0 = vld [vmem:[%s13165_s14 + $0x984] sm:$0xf] }
 0x663   : > { %v5257_v50 = vpack.c.b16 %v5226_v2, %v5225_v19  ;;  %v3675_v32 = vadd.f32 %v3674_v63, %v2877_v37  ;;  %v14487_v19 = vpack.c.b16 %v5596_v17, %v5595_v46  ;;  %v3137_v63 = vadd.f32 %v14371_v22, %v17532_v58  ;;  %v12539_v58 = vld [vmem:[%s13165_s14 + $0x654] sm:$0xf0] }
 0x664   : > { %v4292_v37 = vmax.f32 %v3933_v35, 0.0 }
 0x665   : > { %5278 = vrot.lane.b32.xlu0 %v5257_v50, %s13042_s23  ;;  %v4189_v2 = vmax.f32 %v3675_v32, 0.0 }
 0x666   : > { %v4607_v52 = vpack.c.bf16 %v4292_v37, %v4292_v37 }
 0x667   : > { %v4504_v42 = vpack.c.bf16 %v4189_v2, %v4189_v2 }
 0x668   : > { %v2879_v36 = vpop.f32.mrf.mxu0  ;;  %v5597_v51 = vunpack.c.l.b16 %v4607_v52 }
 0x669   : > { %v3677_v13 = vpop.f32.mrf.mxu1  ;;  %v2880_v20 = vadd.f32 %v14371_v22, %v2879_v36  ;;  %v3934_v46 = vpop.f32.mrf.mxu3  ;;  %v5227_v17 = vunpack.c.l.b16 %v4504_v42  ;;  %v10898_v36 = vld [vmem:[%s13165_s14 + $0x988] sm:$0xf0] }
 0x66a   : > { %v3935_v32 = vadd.f32 %v3934_v46, %v3137_v63  ;;  %v10901_v2 = vor.u32 %v12640_v0, %v10898_v36  ;;  %v3140_v63 = vadd.f32 %v14371_v22, %v17535_v43  ;;  %v12680_v36 = vld [vmem:[%s17440_s3 + $0x70] sm:$0xff] }
 0x66b   : > { %v3678_v26 = vadd.f32 %v3677_v13, %v2880_v20  ;;  %2918 = vmatmul.bf16.gmra.mxu0 %v10481_v44  ;;  %v4390_v20 = vpack.c.bf16 %v4075_v57, %v4075_v57  ;;  %6236 = vmatpush.bf16.msrb.mxu3 %v12680_v36 }
 0x66c   : > { %3716 = vmatmul.bf16.gmra.mxu1 %v10485_v41  ;;  %v4293_v13 = vmax.f32 %v3935_v32, 0.0 }
 0x66d   : > { %v4190_v50 = vmax.f32 %v3678_v26, 0.0  ;;  %4844 = vrot.lane.b32.xlu0 %v17533_v18, %s13042_s23  ;;  %v10488_v26 = vld [vmem:[%s13165_s14 + $0x650] sm:$0xf]  ;;  %v10490_v18 = vld [vmem:[%s13165_s14 + $0x658] sm:$0xf0] }
 0x66e   : > { %v4608_v59 = vpack.c.bf16 %v4293_v13, %v4293_v13  ;;  %3976 = vmatmul.bf16.gmra.mxu3 %v10901_v2  ;;  %v10489_v46 = vor.u32 %v12539_v58, %v10488_v26 }
 0x66f   : > { %v4505_v61 = vpack.c.bf16 %v4190_v50, %v4190_v50  ;;  %v12538_v50 = vld [vmem:[%s13165_s14 + $0x654] sm:$0xf] }
 0x670   : > { %v2881_v16 = vpop.f32.mrf.mxu0  ;;  %v5598_v42 = vunpack.c.l.b16 %v4608_v59  ;;  %v3142_v59 = vadd.f32 %v14371_v22, %v13827_v25 }
 0x671   : > { %v3679_v54 = vpop.f32.mrf.mxu1  ;;  %v5228_v44 = vunpack.c.l.b16 %v4505_v61  ;;  %v2882_v41 = vadd.f32 %v14371_v22, %v2881_v16  ;;  %v4793_v61 = vunpack.c.l.b16 %v4390_v20  ;;  %v10493_v16 = vor.u32 %v12538_v50, %v10490_v18  ;;  %v3937_v32 = vpop.f32.mrf.mxu3 }
 0x672   : > { %v3938_v43 = vadd.f32 %v3937_v32, %v3140_v63 }
 0x673   : > { %v5258_v35 = vpack.c.b16 %v5228_v44, %v5227_v17  ;;  %v3680_v37 = vadd.f32 %v3679_v54, %v2882_v41  ;;  %v14505_v44 = vpack.c.b16 %v5598_v42, %v5597_v51  ;;  %v4811_v54 = vpack.c.b16 %v4793_v61, %v4793_v61  ;;  %v12642_v42 = vld [vmem:[%s13165_s14 + $0x994] sm:$0xf]  ;;  %v10906_v61 = vld [vmem:[%s13165_s14 + $0x998] sm:$0xf0] }
 0x674   : > { %v4294_v13 = vmax.f32 %v3938_v43, 0.0 }
 0x675   : > { %5280 = vrot.lane.b32.xlu0 %v5258_v35, %s13042_s23  ;;  %v4191_v0 = vmax.f32 %v3680_v37, 0.0 }
 0x676   : > { %v4609_v18 = vpack.c.bf16 %v4294_v13, %v4294_v13 }
 0x677   : > { %v4506_v2 = vpack.c.bf16 %v4191_v0, %v4191_v0  ;;  %v12540_v0 = vld [vmem:[%s13165_s14 + $0x664] sm:$0xf] }
 0x678   : > { %v2884_v57 = vpop.f32.mrf.mxu0  ;;  %v5599_v36 = vunpack.c.l.b16 %v4609_v18 }
 0x679   : > { %v3682_v17 = vpop.f32.mrf.mxu1  ;;  %v2885_v52 = vadd.f32 %v14371_v22, %v2884_v57  ;;  %v3939_v26 = vpop.f32.mrf.mxu3  ;;  %v5229_v63 = vunpack.c.l.b16 %v4506_v2  ;;  %v10496_v57 = vld [vmem:[%s13165_s14 + $0x660] sm:$0xf] }
 0x67a   : > { %v3940_v51 = vadd.f32 %v3939_v26, %v3142_v59 }
 0x67b   : > { %v3683_v41 = vadd.f32 %v3682_v17, %v2885_v52  ;;  %2923 = vmatmul.bf16.gmra.mxu0 %v10489_v46  ;;  %v12541_v17 = vld [vmem:[%s13165_s14 + $0x664] sm:$0xf0]  ;;  %v10498_v52 = vld [vmem:[%s13165_s14 + $0x668] sm:$0xf0] }
 0x67c   : > { %3721 = vmatmul.bf16.gmra.mxu1 %v10493_v16  ;;  %v4295_v46 = vmax.f32 %v3940_v51, 0.0  ;;  %v10909_v16 = vor.u32 %v12642_v42, %v10906_v61  ;;  %v10497_v2 = vor.u32 %v12541_v17, %v10496_v57 }
 0x67d   : > { %v4192_v20 = vmax.f32 %v3683_v41, 0.0  ;;  %4846 = vrot.lane.b32.xlu0 %v4811_v54, %s13042_s23  ;;  %v17536_v54 = vld [vmem:[#allocation43_spill] sm:$0xff] }
 0x67e   : > { %v4610_v43 = vpack.c.bf16 %v4295_v46, %v4295_v46  ;;  %3981 = vmatmul.bf16.gmra.mxu3 %v10909_v16  ;;  %v3145_v41 = vadd.f32 %v14371_v22, %v17536_v54 }
 0x67f   : > { %v4507_v35 = vpack.c.bf16 %v4192_v20, %v4192_v20  ;;  %v10501_v20 = vor.u32 %v12540_v0, %v10498_v52 }
 0x680   : > { %v2886_v58 = vpop.f32.mrf.mxu0  ;;  %v5600_v13 = vunpack.c.l.b16 %v4610_v43 }
 0x681   : > { %v3684_v50 = vpop.f32.mrf.mxu1  ;;  %v5230_v37 = vunpack.c.l.b16 %v4507_v35  ;;  %v2887_v25 = vadd.f32 %v14371_v22, %v2886_v58  ;;  %v3942_v35 = vpop.f32.mrf.mxu3 }
 0x682   : > { %v14524_v51 = vpack.c.b16 %v5600_v13, %v5599_v36  ;;  %v3943_v18 = vadd.f32 %v3942_v35, %v3145_v41  ;;  %v12644_v41 = vld [vmem:[%s13165_s14 + $0x9a4] sm:$0xf]  ;;  %v12543_v35 = vld [vmem:[%s13165_s14 + $0x674] sm:$0xf0] }
 0x683   : > { %v5259_v32 = vpack.c.b16 %v5230_v37, %v5229_v63  ;;  %v3685_v59 = vadd.f32 %v3684_v50, %v2887_v25  ;;  %v3147_v50 = vadd.f32 %v14371_v22, %v13844_v40 }
 0x684   : > { %v4296_v25 = vmax.f32 %v3943_v18, 0.0  ;;  %v3150_v18 = vadd.f32 %v14371_v22, %v13852_v5 }
 0x685   : > { %5282 = vrot.lane.b32.xlu0 %v5259_v32, %s13042_s23  ;;  %v4193_v63 = vmax.f32 %v3685_v59, 0.0  ;;  %v10914_v59 = vld [vmem:[%s13165_s14 + $0x9a8] sm:$0xf0] }
 0x686   : > { %v4611_v0 = vpack.c.bf16 %v4296_v25, %v4296_v25  ;;  %v10917_v13 = vor.u32 %v12644_v41, %v10914_v59 }
 0x687   : > { %v4508_v61 = vpack.c.bf16 %v4193_v63, %v4193_v63 }
 0x688   : > { %v2889_v26 = vpop.f32.mrf.mxu0  ;;  %v5601_v63 = vunpack.c.l.b16 %v4611_v0 }
 0x689   : > { %v3687_v58 = vpop.f32.mrf.mxu1  ;;  %v2890_v37 = vadd.f32 %v14371_v22, %v2889_v26  ;;  %v3944_v32 = vpop.f32.mrf.mxu3  ;;  %v5231_v36 = vunpack.c.l.b16 %v4508_v61  ;;  %v12542_v26 = vld [vmem:[%s13165_s14 + $0x674] sm:$0xf] }
 0x68a   : > { %v3945_v52 = vadd.f32 %v3944_v32, %v3147_v50 }
 0x68b   : > { %v3688_v42 = vadd.f32 %v3687_v58, %v2890_v37  ;;  %2928 = vmatmul.bf16.gmra.mxu0 %v10497_v2  ;;  %v10506_v58 = vld [vmem:[%s13165_s14 + $0x678] sm:$0xf0] }
 0x68c   : > { %3726 = vmatmul.bf16.gmra.mxu1 %v10501_v20  ;;  %v4297_v40 = vmax.f32 %v3945_v52, 0.0  ;;  %v10504_v20 = vld [vmem:[%s13165_s14 + $0x670] sm:$0xf]  ;;  %v10509_v61 = vor.u32 %v12542_v26, %v10506_v58  ;;  %v10922_v26 = vld [vmem:[%s13165_s14 + $0x9b8] sm:$0xf0] }
 0x68d   : > { %v4194_v46 = vmax.f32 %v3688_v42, 0.0  ;;  %v10505_v25 = vor.u32 %v12543_v35, %v10504_v20  ;;  %v12646_v35 = vld [vmem:[%s13165_s14 + $0x9b4] sm:$0xf] }
 0x68e   : > { %v4612_v37 = vpack.c.bf16 %v4297_v40, %v4297_v40  ;;  %3986 = vmatmul.bf16.gmra.mxu3 %v10917_v13  ;;  %v10925_v58 = vor.u32 %v12646_v35, %v10922_v26 }
 0x68f   : > { %v4509_v16 = vpack.c.bf16 %v4194_v46, %v4194_v46 }
 0x690   : > { %v2891_v57 = vpop.f32.mrf.mxu0  ;;  %v5602_v50 = vunpack.c.l.b16 %v4612_v37  ;;  %v10512_v37 = vld [vmem:[%s13165_s14 + $0x680] sm:$0xf] }
 0x691   : > { %v3689_v17 = vpop.f32.mrf.mxu1  ;;  %v5232_v43 = vunpack.c.l.b16 %v4509_v16  ;;  %v2892_v54 = vadd.f32 %v14371_v22, %v2891_v57  ;;  %v3947_v46 = vpop.f32.mrf.mxu3 }
 0x692   : > { %v14539_v57 = vpack.c.b16 %v5602_v50, %v5601_v63  ;;  %v10514_v50 = vld [vmem:[%s13165_s14 + $0x688] sm:$0xf0] }
 0x693   : > { %v5260_v2 = vpack.c.b16 %v5232_v43, %v5231_v36  ;;  %v3690_v42 = vadd.f32 %v3689_v17, %v2892_v54  ;;  %v14542_v36 = vadd.f32 %v3947_v46, %v3150_v18  ;;  %v12545_v18 = vld [vmem:[%s13165_s14 + $0x684] sm:$0xf0] }
 0x694   : > { %v10513_v46 = vor.u32 %v12545_v18, %v10512_v37  ;;  %v10930_v37 = vld [vmem:[%s13165_s14 + $0x9c8] sm:$0xf0] }
 0x695   : > { %5284 = vrot.lane.b32.xlu0 %v5260_v2, %s13042_s23  ;;  %v4195_v52 = vmax.f32 %v3690_v42, 0.0  ;;  %v12544_v42 = vld [vmem:[%s13165_s14 + $0x684] sm:$0xf] }
 0x697   : > { %v4510_v5 = vpack.c.bf16 %v4195_v52, %v4195_v52 }
 0x698   : > { %v2894_v16 = vpop.f32.mrf.mxu0 }
 0x699   : > { %v3692_v32 = vpop.f32.mrf.mxu1  ;;  %v2895_v0 = vadd.f32 %v14371_v22, %v2894_v16  ;;  %v14544_v41 = vpop.f32.mrf.mxu3  ;;  %v5233_v13 = vunpack.c.l.b16 %v4510_v5  ;;  %v10517_v16 = vor.u32 %v12544_v42, %v10514_v50  ;;  %v10520_v50 = vld [vmem:[%s13165_s14 + $0x690] sm:$0xf] }
 0x69b   : > { %v3693_v43 = vadd.f32 %v3692_v32, %v2895_v0  ;;  %2933 = vmatmul.bf16.gmra.mxu0 %v10505_v25  ;;  %v3155_v25 = vadd.f32 %v14371_v22, %v13871_v4 }
 0x69c   : > { %3731 = vmatmul.bf16.gmra.mxu1 %v10509_v61 }
 0x69d   : > { %v4196_v17 = vmax.f32 %v3693_v43, 0.0 }
 0x69e   : > { %3991 = vmatmul.bf16.gmra.mxu3 %v10925_v58 }
 0x69f   : > { %v4511_v54 = vpack.c.bf16 %v4196_v17, %v4196_v17 }
 0x6a0   : > { %v2896_v59 = vpop.f32.mrf.mxu0 }
 0x6a1   : > { %v3694_v40 = vpop.f32.mrf.mxu1  ;;  %v5234_v2 = vunpack.c.l.b16 %v4511_v54  ;;  %v2897_v20 = vadd.f32 %v14371_v22, %v2896_v59  ;;  %v3952_v32 = vpop.f32.mrf.mxu3 }
 0x6a2   : > { %v14557_v17 = vadd.f32 %v3952_v32, %v3155_v25  ;;  %v12547_v25 = vld [vmem:[%s13165_s14 + $0x694] sm:$0xf0] }
 0x6a3   : > { %v5261_v63 = vpack.c.b16 %v5234_v2, %v5233_v13  ;;  %v3695_v61 = vadd.f32 %v3694_v40, %v2897_v20 }
 0x6a5   : > { %5286 = vrot.lane.b32.xlu0 %v5261_v63, %s13042_s23  ;;  %v4197_v43 = vmax.f32 %v3695_v61, 0.0  ;;  %v12648_v63 = vld [vmem:[%s13165_s14 + $0x9c4] sm:$0xf]  ;;  %v12546_v61 = vld [vmem:[%s13165_s14 + $0x694] sm:$0xf] }
 0x6a6   : > { %v10933_v18 = vor.u32 %v12648_v63, %v10930_v37 }
 0x6a7   : > { %v4512_v4 = vpack.c.bf16 %v4197_v43, %v4197_v43 }
 0x6a8   : > { %v2899_v52 = vpop.f32.mrf.mxu0 }
 0x6a9   : > { %v3697_v0 = vpop.f32.mrf.mxu1  ;;  %v2900_v5 = vadd.f32 %v14371_v22, %v2899_v52  ;;  %v14559_v13 = vpop.f32.mrf.mxu3  ;;  %v5235_v35 = vunpack.c.l.b16 %v4512_v4  ;;  %v10521_v52 = vor.u32 %v12547_v25, %v10520_v50  ;;  %v12679_v50 = vld [vmem:[%s17440_s3 + $0x68] sm:$0xff] }
 0x6aa   : > { %6237 = vmatpush.bf16.msrb.mxu3 %v12679_v50 }
 0x6ab   : > { %v3698_v54 = vadd.f32 %v3697_v0, %v2900_v5  ;;  %2938 = vmatmul.bf16.gmra.mxu0 %v10513_v46  ;;  %v10522_v46 = vld [vmem:[%s13165_s14 + $0x698] sm:$0xf0] }
 0x6ac   : > { %3736 = vmatmul.bf16.gmra.mxu1 %v10517_v16  ;;  %v3160_v16 = vadd.f32 %v14371_v22, %v13893_v3  ;;  %v10525_v0 = vor.u32 %v12546_v61, %v10522_v46  ;;  %v10528_v61 = vld [vmem:[%s13165_s14 + $0x6a0] sm:$0xf]  ;;  %v12549_v46 = vld [vmem:[%s13165_s14 + $0x6a4] sm:$0xf0] }
 0x6ad   : > { %v4198_v59 = vmax.f32 %v3698_v54, 0.0 }
 0x6ae   : > { %3996 = vmatmul.bf16.gmra.mxu3 %v10933_v18 }
 0x6af   : > { %v4513_v40 = vpack.c.bf16 %v4198_v59, %v4198_v59 }
 0x6b0   : > { %v2901_v2 = vpop.f32.mrf.mxu0 }
 0x6b1   : > { %v3699_v20 = vpop.f32.mrf.mxu1  ;;  %v5236_v26 = vunpack.c.l.b16 %v4513_v40  ;;  %v2902_v58 = vadd.f32 %v14371_v22, %v2901_v2  ;;  %v3957_v43 = vpop.f32.mrf.mxu3 }
 0x6b2   : > { %v14572_v40 = vadd.f32 %v3957_v43, %v3160_v16  ;;  %v12548_v16 = vld [vmem:[%s13165_s14 + $0x6a4] sm:$0xf]  ;;  %v10529_v43 = vor.u32 %v12549_v46, %v10528_v61 }
 0x6b3   : > { %v5262_v42 = vpack.c.b16 %v5236_v26, %v5235_v35  ;;  %v3700_v32 = vadd.f32 %v3699_v20, %v2902_v58 }
 0x6b5   : > { %5288 = vrot.lane.b32.xlu0 %v5262_v42, %s13042_s23  ;;  %v4199_v4 = vmax.f32 %v3700_v32, 0.0  ;;  %v10530_v32 = vld [vmem:[%s13165_s14 + $0x6a8] sm:$0xf0] }
 0x6b7   : > { %v4514_v3 = vpack.c.bf16 %v4199_v4, %v4199_v4 }
 0x6b8   : > { %v2904_v5 = vpop.f32.mrf.mxu0 }
 0x6b9   : > { %v3702_v54 = vpop.f32.mrf.mxu1  ;;  %v2905_v59 = vadd.f32 %v14371_v22, %v2904_v5  ;;  %v14574_v26 = vpop.f32.mrf.mxu3  ;;  %v5237_v37 = vunpack.c.l.b16 %v4514_v3  ;;  %v10533_v5 = vor.u32 %v12548_v16, %v10530_v32 }
 0x6bb   : > { %v3703_v2 = vadd.f32 %v3702_v54, %v2905_v59  ;;  %2943 = vmatmul.bf16.gmra.mxu0 %v10521_v52  ;;  %v3165_v52 = vadd.f32 %v14371_v22, %v13928_v45 }
 0x6bc   : > { %3741 = vmatmul.bf16.gmra.mxu1 %v10525_v0 }
 0x6bd   : > { %v4200_v20 = vmax.f32 %v3703_v2, 0.0  ;;  %v13029_v2 = vld [vmem:[%s13165_s14 + $0x9d0] sm:$0xff] }
 0x6be   : > { %v1681_v3 = vunpack.c.h.b16 %v13029_v2 }
 0x6bf   : > { %v4515_v35 = vpack.c.bf16 %v4200_v20, %v4200_v20 }
 0x6c0   : > { %v2906_v58 = vpop.f32.mrf.mxu0  ;;  %v1997_v45 = vpack.c.b16 %v1681_v3, %v1681_v3 }
 0x6c1   : > { %v3704_v63 = vpop.f32.mrf.mxu1  ;;  %v5238_v18 = vunpack.c.l.b16 %v4515_v35  ;;  %v2907_v42 = vadd.f32 %v14371_v22, %v2906_v58  ;;  %v3962_v54 = vpop.f32.mrf.mxu3  ;;  %v14591_v35 = vld [vmem:[%s17439_s2] ss:$0 sm:$0xff] }
 0x6c2   : > { %4001 = vmatmul.bf16.gmra.mxu3 %v1997_v45 }
 0x6c3   : > { %v5263_v25 = vpack.c.b16 %v5238_v18, %v5237_v37  ;;  %v3705_v0 = vadd.f32 %v3704_v63, %v2907_v42  ;;  %v14594_v37 = vadd.f32 %v3962_v54, %v3165_v52  ;;  %v12551_v54 = vld [vmem:[%s13165_s14 + $0x6b4] sm:$0xf0] }
 0x6c5   : > { %5290 = vrot.lane.b32.xlu0 %v5263_v25, %s13042_s23  ;;  %v4201_v20 = vmax.f32 %v3705_v0, 0.0  ;;  %v10536_v0 = vld [vmem:[%s13165_s14 + $0x6b0] sm:$0xf] }
 0x6c6   : > { %v10537_v2 = vor.u32 %v12551_v54, %v10536_v0 }
 0x6c7   : > { %v4516_v63 = vpack.c.bf16 %v4201_v20, %v4201_v20 }
 0x6c8   : > { %v2909_v4 = vpop.f32.mrf.mxu0 }
 0x6c9   : > { %v3707_v59 = vpop.f32.mrf.mxu1  ;;  %v2910_v58 = vadd.f32 %v14591_v35, %v2909_v4  ;;  %v14596_v50 = vpop.f32.mrf.mxu3  ;;  %v5239_v46 = vunpack.c.l.b16 %v4516_v63  ;;  %v12550_v4 = vld [vmem:[%s13165_s14 + $0x6b4] sm:$0xf] }
 0x6cb   : > { %v3708_v22 = vadd.f32 %v3707_v59, %v2910_v58  ;;  %2948 = vmatmul.bf16.gmra.mxu0 %v10529_v43  ;;  %v10538_v59 = vld [vmem:[%s13165_s14 + $0x6b8] sm:$0xf0]  ;;  %v3170_v43 = vadd.f32 %v14591_v35, %v13954_v33 }
 0x6cc   : > { %3746 = vmatmul.bf16.gmra.mxu1 %v10533_v5  ;;  %v10541_v3 = vor.u32 %v12550_v4, %v10538_v59  ;;  %v10544_v59 = vld [vmem:[%s13165_s14 + $0x6c0] sm:$0xf] }
 0x6cd   : > { %v4202_v18 = vmax.f32 %v3708_v22, 0.0 }
 0x6cf   : > { %v4517_v42 = vpack.c.bf16 %v4202_v18, %v4202_v18 }
 0x6d0   : > { %v2911_v25 = vpop.f32.mrf.mxu0 }
 0x6d1   : > { %v3709_v61 = vpop.f32.mrf.mxu1  ;;  %v5240_v16 = vunpack.c.l.b16 %v4517_v42  ;;  %v2912_v32 = vadd.f32 %v14591_v35, %v2911_v25  ;;  %v3967_v20 = vpop.f32.mrf.mxu3 }
 0x6d2   : > { %v14607_v18 = vadd.f32 %v3967_v20, %v3170_v43  ;;  %v12553_v43 = vld [vmem:[%s13165_s14 + $0x6c4] sm:$0xf0]  ;;  %v10546_v20 = vld [vmem:[%s13165_s14 + $0x6c8] sm:$0xf0] }
 0x6d3   : > { %v5264_v52 = vpack.c.b16 %v5240_v16, %v5239_v46  ;;  %v3710_v5 = vadd.f32 %v3709_v61, %v2912_v32 }
 0x6d5   : > { %5292 = vrot.lane.b32.xlu0 %v5264_v52, %s13042_s23  ;;  %v4203_v22 = vmax.f32 %v3710_v5, 0.0  ;;  %v12552_v5 = vld [vmem:[%s13165_s14 + $0x6c4] sm:$0xf] }
 0x6d7   : > { %v4518_v33 = vpack.c.bf16 %v4203_v22, %v4203_v22 }
 0x6d8   : > { %v2914_v58 = vpop.f32.mrf.mxu0 }
 0x6d9   : > { %v3712_v45 = vpop.f32.mrf.mxu1  ;;  %v2915_v63 = vadd.f32 %v14591_v35, %v2914_v58  ;;  %v14609_v46 = vpop.f32.mrf.mxu3  ;;  %v5241_v52 = vunpack.c.l.b16 %v4518_v33  ;;  %v10545_v58 = vor.u32 %v12553_v43, %v10544_v59 }
 0x6db   : > { %v3713_v42 = vadd.f32 %v3712_v45, %v2915_v63  ;;  %2953 = vmatmul.bf16.gmra.mxu0 %v10537_v2  ;;  %v3175_v2 = vadd.f32 %v14591_v35, %v13971_v28  ;;  %v10549_v45 = vor.u32 %v12552_v5, %v10546_v20 }
 0x6dc   : > { %3751 = vmatmul.bf16.gmra.mxu1 %v10541_v3 }
 0x6dd   : > { %v4204_v25 = vmax.f32 %v3713_v42, 0.0 }
 0x6df   : > { %v4519_v61 = vpack.c.bf16 %v4204_v25, %v4204_v25 }
 0x6e0   : > { %v2916_v16 = vpop.f32.mrf.mxu0 }
 0x6e1   : > { %v3714_v32 = vpop.f32.mrf.mxu1  ;;  %v5242_v0 = vunpack.c.l.b16 %v4519_v61  ;;  %v2917_v54 = vadd.f32 %v14591_v35, %v2916_v16  ;;  %v3972_v22 = vpop.f32.mrf.mxu3 }
 0x6e2   : > { %v14620_v61 = vadd.f32 %v3972_v22, %v3175_v2  ;;  %v12555_v2 = vld [vmem:[%s13165_s14 + $0x6d4] sm:$0xf0]  ;;  %v12554_v22 = vld [vmem:[%s13165_s14 + $0x6d4] sm:$0xf] }
 0x6e3   : > { %v5265_v4 = vpack.c.b16 %v5242_v0, %v5241_v52  ;;  %v3715_v3 = vadd.f32 %v3714_v32, %v2917_v54 }
 0x6e4   : > { %17537 = vst [vmem:[#allocation14_spill] sm:$0xff] %v14620_v61 }
 0x6e5   : > { %5294 = vrot.lane.b32.xlu0 %v5265_v4, %s13042_s23  ;;  %v4205_v33 = vmax.f32 %v3715_v3, 0.0  ;;  %v10552_v3 = vld [vmem:[%s13165_s14 + $0x6d0] sm:$0xf] }
 0x6e7   : > { %v4520_v28 = vpack.c.bf16 %v4205_v33, %v4205_v33 }
 0x6e8   : > { %v2919_v63 = vpop.f32.mrf.mxu0 }
 0x6e9   : > { %v3717_v42 = vpop.f32.mrf.mxu1  ;;  %v2920_v25 = vadd.f32 %v14591_v35, %v2919_v63  ;;  %v14622_v0 = vpop.f32.mrf.mxu3  ;;  %v5243_v59 = vunpack.c.l.b16 %v4520_v28  ;;  %v10554_v63 = vld [vmem:[%s13165_s14 + $0x6d8] sm:$0xf0] }
 0x6ea   : > { %17538 = vst [vmem:[#allocation15_spill] sm:$0xff] %v14622_v0  ;;  %v10557_v33 = vor.u32 %v12554_v22, %v10554_v63 }
 0x6eb   : > { %v3718_v16 = vadd.f32 %v3717_v42, %v2920_v25  ;;  %2958 = vmatmul.bf16.gmra.mxu0 %v10545_v58  ;;  %v3180_v58 = vadd.f32 %v14591_v35, %v13986_v30  ;;  %v10553_v42 = vor.u32 %v12555_v2, %v10552_v3 }
 0x6ec   : > { %3756 = vmatmul.bf16.gmra.mxu1 %v10549_v45 }
 0x6ed   : > { %v4206_v32 = vmax.f32 %v3718_v16, 0.0 }
 0x6ef   : > { %v4521_v52 = vpack.c.bf16 %v4206_v32, %v4206_v32 }
 0x6f0   : > { %v2921_v54 = vpop.f32.mrf.mxu0 }
 0x6f1   : > { %v3719_v4 = vpop.f32.mrf.mxu1  ;;  %v5244_v43 = vunpack.c.l.b16 %v4521_v52  ;;  %v2922_v5 = vadd.f32 %v14591_v35, %v2921_v54  ;;  %v3977_v25 = vpop.f32.mrf.mxu3 }
 0x6f2   : > { %v14633_v54 = vadd.f32 %v3977_v25, %v3180_v58  ;;  %v12557_v58 = vld [vmem:[%s13165_s14 + $0x6e4] sm:$0xf0]  ;;  %v12556_v25 = vld [vmem:[%s13165_s14 + $0x6e4] sm:$0xf] }
 0x6f3   : > { %v5266_v20 = vpack.c.b16 %v5244_v43, %v5243_v59  ;;  %v3720_v45 = vadd.f32 %v3719_v4, %v2922_v5 }
 0x6f4   : > { %17539 = vst [vmem:[#allocation16_spill] sm:$0xff] %v14633_v54  ;;  %v10562_v54 = vld [vmem:[%s13165_s14 + $0x6e8] sm:$0xf0] }
 0x6f5   : > { %5296 = vrot.lane.b32.xlu0 %v5266_v20, %s13042_s23  ;;  %v4207_v28 = vmax.f32 %v3720_v45, 0.0 }
 0x6f7   : > { %v4522_v30 = vpack.c.bf16 %v4207_v28, %v4207_v28  ;;  %v10565_v28 = vor.u32 %v12556_v25, %v10562_v54 }
 0x6f8   : > { %v2924_v16 = vpop.f32.mrf.mxu0 }
 0x6f9   : > { %v3722_v32 = vpop.f32.mrf.mxu1  ;;  %v2925_v52 = vadd.f32 %v14591_v35, %v2924_v16  ;;  %v14635_v5 = vpop.f32.mrf.mxu3  ;;  %v5245_v2 = vunpack.c.l.b16 %v4522_v30  ;;  %v10560_v16 = vld [vmem:[%s13165_s14 + $0x6e0] sm:$0xf] }
 0x6fa   : > { %17540 = vst [vmem:[#allocation17_spill] sm:$0xff] %v14635_v5 }
 0x6fb   : > { %v3723_v59 = vadd.f32 %v3722_v32, %v2925_v52  ;;  %2963 = vmatmul.bf16.gmra.mxu0 %v10553_v42  ;;  %v3185_v42 = vadd.f32 %v14591_v35, %v14001_v49  ;;  %v10561_v32 = vor.u32 %v12557_v58, %v10560_v16 }
 0x6fc   : > { %3761 = vmatmul.bf16.gmra.mxu1 %v10557_v33 }
 0x6fd   : > { %v4208_v4 = vmax.f32 %v3723_v59, 0.0 }
 0x6ff   : > { %v4523_v43 = vpack.c.bf16 %v4208_v4, %v4208_v4 }
 0x700   : > { %v2926_v20 = vpop.f32.mrf.mxu0 }
 0x701   : > { %v3724_v3 = vpop.f32.mrf.mxu1  ;;  %v5246_v22 = vunpack.c.l.b16 %v4523_v43  ;;  %v2927_v63 = vadd.f32 %v14591_v35, %v2926_v20  ;;  %v3982_v52 = vpop.f32.mrf.mxu3  ;;  %v12678_v20 = vld [vmem:[%s17440_s3 + $0x60] sm:$0xff] }
 0x702   : > { %6238 = vmatpush.bf16.msrb.mxu3 %v12678_v20 }
 0x703   : > { %v5267_v45 = vpack.c.b16 %v5246_v22, %v5245_v2  ;;  %v3725_v33 = vadd.f32 %v3724_v3, %v2927_v63  ;;  %v14649_v2 = vadd.f32 %v3982_v52, %v3185_v42  ;;  %v10568_v52 = vld [vmem:[%s13165_s14 + $0x6f0] sm:$0xf] }
 0x705   : > { %5298 = vrot.lane.b32.xlu0 %v5267_v45, %s13042_s23  ;;  %v4209_v30 = vmax.f32 %v3725_v33, 0.0  ;;  %17541 = vst [vmem:[#allocation18_spill] sm:$0xff] %v14649_v2 }
 0x707   : > { %v4524_v54 = vpack.c.bf16 %v4209_v30, %v4209_v30 }
 0x708   : > { %v2929_v59 = vpop.f32.mrf.mxu0 }
 0x709   : > { %v3727_v4 = vpop.f32.mrf.mxu1  ;;  %v2930_v43 = vadd.f32 %v14591_v35, %v2929_v59  ;;  %v14651_v63 = vpop.f32.mrf.mxu3  ;;  %v5247_v58 = vunpack.c.l.b16 %v4524_v54  ;;  %v12559_v59 = vld [vmem:[%s13165_s14 + $0x6f4] sm:$0xf0] }
 0x70a   : > { %17542 = vst [vmem:[#allocation19_spill] sm:$0xff] %v14651_v63  ;;  %v10569_v30 = vor.u32 %v12559_v59, %v10568_v52 }
 0x70b   : > { %v3728_v49 = vadd.f32 %v3727_v4, %v2930_v43  ;;  %2968 = vmatmul.bf16.gmra.mxu0 %v10561_v32  ;;  %v12558_v4 = vld [vmem:[%s13165_s14 + $0x6f4] sm:$0xf]  ;;  %v10570_v43 = vld [vmem:[%s13165_s14 + $0x6f8] sm:$0xf0] }
 0x70c   : > { %3766 = vmatmul.bf16.gmra.mxu1 %v10565_v28  ;;  %v3190_v28 = vadd.f32 %v14591_v35, %v14020_v55  ;;  %v10573_v20 = vor.u32 %v12558_v4, %v10570_v43 }
 0x70d   : > { %v4210_v3 = vmax.f32 %v3728_v49, 0.0 }
 0x70f   : > { %v4525_v22 = vpack.c.bf16 %v4210_v3, %v4210_v3 }
 0x710   : > { %v2931_v45 = vpop.f32.mrf.mxu0 }
 0x711   : > { %v3729_v16 = vpop.f32.mrf.mxu1  ;;  %v5248_v25 = vunpack.c.l.b16 %v4525_v22  ;;  %v2932_v33 = vadd.f32 %v14591_v35, %v2931_v45  ;;  %v3987_v49 = vpop.f32.mrf.mxu3 }
 0x713   : > { %v5268_v42 = vpack.c.b16 %v5248_v25, %v5247_v58  ;;  %v3730_v32 = vadd.f32 %v3729_v16, %v2932_v33  ;;  %v14662_v16 = vadd.f32 %v3987_v49, %v3190_v28  ;;  %v3195_v28 = vadd.f32 %v14591_v35, %v14041_v60 }
 0x715   : > { %5300 = vrot.lane.b32.xlu0 %v5268_v42, %s13042_s23  ;;  %v4211_v54 = vmax.f32 %v3730_v32, 0.0  ;;  %17543 = vst [vmem:[#allocation20_spill] sm:$0xff] %v14662_v16 }
 0x717   : > { %v4526_v58 = vpack.c.bf16 %v4211_v54, %v4211_v54 }
 0x718   : > { %v2934_v3 = vpop.f32.mrf.mxu0 }
 0x719   : > { %v3732_v2 = vpop.f32.mrf.mxu1  ;;  %v2935_v22 = vadd.f32 %v14591_v35, %v2934_v3  ;;  %v14664_v33 = vpop.f32.mrf.mxu3  ;;  %v5249_v59 = vunpack.c.l.b16 %v4526_v58  ;;  %v10576_v3 = vld [vmem:[%s13165_s14 + $0x700] sm:$0xf] }
 0x71a   : > { %17544 = vst [vmem:[#allocation21_spill] sm:$0xff] %v14664_v33 }
 0x71b   : > { %v3733_v45 = vadd.f32 %v3732_v2, %v2935_v22  ;;  %2973 = vmatmul.bf16.gmra.mxu0 %v10569_v30  ;;  %v12561_v2 = vld [vmem:[%s13165_s14 + $0x704] sm:$0xf0]  ;;  %v12560_v22 = vld [vmem:[%s13165_s14 + $0x704] sm:$0xf]  ;;  %v10578_v30 = vld [vmem:[%s13165_s14 + $0x708] sm:$0xf0] }
 0x71c   : > { %3771 = vmatmul.bf16.gmra.mxu1 %v10573_v20  ;;  %v10577_v49 = vor.u32 %v12561_v2, %v10576_v3  ;;  %v10581_v54 = vor.u32 %v12560_v22, %v10578_v30 }
 0x71d   : > { %v4212_v25 = vmax.f32 %v3733_v45, 0.0 }
 0x71f   : > { %v4527_v55 = vpack.c.bf16 %v4212_v25, %v4212_v25 }
 0x720   : > { %v2936_v42 = vpop.f32.mrf.mxu0 }
 0x721   : > { %v3734_v52 = vpop.f32.mrf.mxu1  ;;  %v5250_v4 = vunpack.c.l.b16 %v4527_v55  ;;  %v2937_v43 = vadd.f32 %v14591_v35, %v2936_v42  ;;  %v3992_v45 = vpop.f32.mrf.mxu3 }
 0x722   : > { %v14675_v42 = vadd.f32 %v3992_v45, %v3195_v28  ;;  %v10584_v45 = vld [vmem:[%s13165_s14 + $0x710] sm:$0xf] }
 0x723   : > { %v5269_v32 = vpack.c.b16 %v5250_v4, %v5249_v59  ;;  %v3735_v20 = vadd.f32 %v3734_v52, %v2937_v43 }
 0x724   : > { %17545 = vst [vmem:[#allocation22_spill] sm:$0xff] %v14675_v42 }
 0x725   : > { %5302 = vrot.lane.b32.xlu0 %v5269_v32, %s13042_s23  ;;  %v4213_v58 = vmax.f32 %v3735_v20, 0.0 }
 0x727   : > { %v4528_v60 = vpack.c.bf16 %v4213_v58, %v4213_v58 }
 0x728   : > { %v2939_v25 = vpop.f32.mrf.mxu0 }
 0x729   : > { %v3737_v16 = vpop.f32.mrf.mxu1  ;;  %v2940_v55 = vadd.f32 %v14591_v35, %v2939_v25  ;;  %v14677_v43 = vpop.f32.mrf.mxu3  ;;  %v5251_v2 = vunpack.c.l.b16 %v4528_v60  ;;  %v12563_v25 = vld [vmem:[%s13165_s14 + $0x714] sm:$0xf0] }
 0x72a   : > { %17546 = vst [vmem:[#allocation23_spill] sm:$0xff] %v14677_v43 }
 0x72b   : > { %v3738_v59 = vadd.f32 %v3737_v16, %v2940_v55  ;;  %2978 = vmatmul.bf16.gmra.mxu0 %v10577_v49  ;;  %v12562_v16 = vld [vmem:[%s13165_s14 + $0x714] sm:$0xf]  ;;  %v10586_v55 = vld [vmem:[%s13165_s14 + $0x718] sm:$0xf0]  ;;  %v3200_v49 = vadd.f32 %v14591_v35, %v14062_v38 }
 0x72c   : > { %3776 = vmatmul.bf16.gmra.mxu1 %v10581_v54 }
 0x72d   : > { %v4214_v52 = vmax.f32 %v3738_v59, 0.0  ;;  %v10585_v59 = vor.u32 %v12563_v25, %v10584_v45 }
 0x72f   : > { %v4529_v4 = vpack.c.bf16 %v4214_v52, %v4214_v52  ;;  %v10589_v52 = vor.u32 %v12562_v16, %v10586_v55  ;;  %v10592_v16 = vld [vmem:[%s13165_s14 + $0x720] sm:$0xf]  ;;  %v12565_v55 = vld [vmem:[%s13165_s14 + $0x724] sm:$0xf0] }
 0x730   : > { %v2941_v32 = vpop.f32.mrf.mxu0 }
 0x731   : > { %v3739_v3 = vpop.f32.mrf.mxu1  ;;  %v5252_v22 = vunpack.c.l.b16 %v4529_v4  ;;  %v2942_v30 = vadd.f32 %v14591_v35, %v2941_v32  ;;  %v3997_v42 = vpop.f32.mrf.mxu3 }
 0x733   : > { %v3740_v20 = vadd.f32 %v3739_v3, %v2942_v30  ;;  %v5270_v28 = vpack.c.b16 %v5252_v22, %v5251_v2  ;;  %v14688_v2 = vadd.f32 %v3997_v42, %v3200_v49  ;;  %v10593_v49 = vor.u32 %v12565_v55, %v10592_v16 }
 0x735   : > { %v4215_v54 = vmax.f32 %v3740_v20, 0.0  ;;  %5304 = vrot.lane.b32.xlu0 %v5270_v28, %s13042_s23  ;;  %17547 = vst [vmem:[#allocation24_spill] sm:$0xff] %v14688_v2  ;;  %v10618_v2 = vld [vmem:[%s13165_s14 + $0x758] sm:$0xf0] }
 0x737   : > { %v4530_v58 = vpack.c.bf16 %v4215_v54, %v4215_v54  ;;  %v12564_v54 = vld [vmem:[%s13165_s14 + $0x724] sm:$0xf] }
 0x738   : > { %v2944_v60 = vpop.f32.mrf.mxu0 }
 0x739   : > { %v3742_v4 = vpop.f32.mrf.mxu1  ;;  %v5253_v32 = vunpack.c.l.b16 %v4530_v58  ;;  %v2945_v3 = vadd.f32 %v14591_v35, %v2944_v60  ;;  %v10594_v58 = vld [vmem:[%s13165_s14 + $0x728] sm:$0xf0] }
 0x73b   : > { %v5271_v22 = vpack.c.b16 %v5253_v32, %v5253_v32  ;;  %2983 = vmatmul.bf16.gmra.mxu0 %v10585_v59  ;;  %v3743_v38 = vadd.f32 %v3742_v4, %v2945_v3  ;;  %v10597_v32 = vor.u32 %v12564_v54, %v10594_v58  ;;  %v14696_v59 = vpop.f32.mrf.mxu3  ;;  %v12677_v58 = vld [vmem:[%s17440_s3 + $0x58] sm:$0xff] }
 0x73c   : > { %3781 = vmatmul.bf16.gmra.mxu1 %v10589_v52  ;;  %17548 = vst [vmem:[#allocation25_spill] sm:$0xff] %v14696_v59  ;;  %6239 = vmatpush.bf16.msrb.mxu3 %v12677_v58  ;;  %v14716_v58 = vpop.f32.mrf.mxu2 }
 0x73d   : > { %5306 = vrot.lane.b32.xlu0 %v5271_v22, %s13042_s23  ;;  %v4216_v28 = vmax.f32 %v3743_v38, 0.0  ;;  %s384_s23 = scalar_lea.vmem %s17448_s11, %s9677_s13 }
 0x73f   : > { %v4531_v43 = vpack.c.bf16 %v4216_v28, %v4216_v28 }
 0x740   : > { %v2946_v30 = vpop.f32.mrf.mxu0 }
 0x741   : > { %v3744_v20 = vpop.f32.mrf.mxu1  ;;  %v2947_v45 = vadd.f32 %v14591_v35, %v2946_v30  ;;  %v5343_v3 = vunpack.c.l.b16 %v4531_v43 }
 0x743   : > { %v3745_v25 = vadd.f32 %v3744_v20, %v2947_v45  ;;  %v3205_v20 = vadd.f32 %v14591_v35, %v14083_v6  ;;  %v12566_v6 = vld [vmem:[%s13165_s14 + $0x734] sm:$0xf] }
 0x745   : > { %v4217_v60 = vmax.f32 %v3745_v25, 0.0  ;;  %v4002_v45 = vpop.f32.mrf.mxu3 }
 0x746   : > { %v14702_v43 = vadd.f32 %v4002_v45, %v3205_v20 }
 0x747   : > { %v4532_v42 = vpack.c.bf16 %v4217_v60, %v4217_v60 }
 0x748   : > { %v2949_v52 = vpop.f32.mrf.mxu0  ;;  %17549 = vst [vmem:[#allocation26_spill] sm:$0xff] %v14702_v43 }
 0x749   : > { %v3747_v4 = vpop.f32.mrf.mxu1  ;;  %v5344_v22 = vunpack.c.l.b16 %v4532_v42  ;;  %v2950_v38 = vadd.f32 %v14591_v35, %v2949_v52  ;;  %v10600_v42 = vld [vmem:[%s13165_s14 + $0x730] sm:$0xf] }
 0x74b   : > { %2988 = vmatmul.bf16.gmra.mxu0 %v10593_v49  ;;  %v5378_v30 = vpack.c.b16 %v5344_v22, %v5343_v3  ;;  %v3748_v28 = vadd.f32 %v3747_v4, %v2950_v38  ;;  %v12567_v49 = vld [vmem:[%s13165_s14 + $0x734] sm:$0xf0]  ;;  %v17550_v3 = vld [vmem:[#allocation30_spill] sm:$0xff] }
 0x74c   : > { %3786 = vmatmul.bf16.gmra.mxu1 %v10597_v32  ;;  %v10602_v32 = vld [vmem:[%s13165_s14 + $0x738] sm:$0xf0]  ;;  %v10601_v38 = vor.u32 %v12567_v49, %v10600_v42 }
 0x74d   : > { %5396 = vrot.lane.b32.xlu1 %v5378_v30, %s13043_s26  ;;  %v4218_v55 = vmax.f32 %v3748_v28, 0.0  ;;  %v10605_v30 = vor.u32 %v12566_v6, %v10602_v32  ;;  %v4004_v20 = vpop.f32.mrf.mxu3  ;;  %v12683_v32 = vld [vmem:[%s17440_s3 + $0x88] sm:$0xff] }
 0x74e   : > { %6339 = vmatpush.bf16.msra.mxu2 %v12683_v32  ;;  %v17551_v20 = vld [vmem:[#allocation33_spill] sm:$0xff] }
 0x74f   : > { %v4533_v52 = vpack.c.bf16 %v4218_v55, %v4218_v55 }
 0x750   : > { %v2951_v25 = vpop.f32.mrf.mxu0 }
 0x751   : > { %v3749_v16 = vpop.f32.mrf.mxu1  ;;  %v2952_v54 = vadd.f32 %v14591_v35, %v2951_v25  ;;  %v5345_v25 = vunpack.c.l.b16 %v4533_v52 }
 0x753   : > { %v3750_v60 = vadd.f32 %v3749_v16, %v2952_v54 }
 0x755   : > { %v4219_v4 = vmax.f32 %v3750_v60, 0.0  ;;  %4962 = vrot.lane.b32.xlu1 %v17550_v3, %s13043_s26  ;;  %v12569_v3 = vld [vmem:[%s13165_s14 + $0x744] sm:$0xf0] }
 0x757   : > { %v4534_v22 = vpack.c.bf16 %v4219_v4, %v4219_v4  ;;  %v10608_v4 = vld [vmem:[%s13165_s14 + $0x740] sm:$0xf] }
 0x758   : > { %v2954_v28 = vpop.f32.mrf.mxu0 }
 0x759   : > { %v3752_v45 = vpop.f32.mrf.mxu1  ;;  %v5346_v43 = vunpack.c.l.b16 %v4534_v22  ;;  %v2955_v16 = vadd.f32 %v14591_v35, %v2954_v28  ;;  %v12568_v22 = vld [vmem:[%s13165_s14 + $0x744] sm:$0xf] }
 0x75b   : > { %2993 = vmatmul.bf16.gmra.mxu0 %v10601_v38  ;;  %v5379_v55 = vpack.c.b16 %v5346_v43, %v5345_v25  ;;  %v3753_v54 = vadd.f32 %v3752_v45, %v2955_v16  ;;  %v10610_v43 = vld [vmem:[%s13165_s14 + $0x748] sm:$0xf0]  ;;  %v10609_v45 = vor.u32 %v12569_v3, %v10608_v4 }
 0x75c   : > { %3791 = vmatmul.bf16.gmra.mxu1 %v10605_v30  ;;  %v10613_v25 = vor.u32 %v12568_v22, %v10610_v43 }
 0x75d   : > { %5398 = vrot.lane.b32.xlu1 %v5379_v55, %s13043_s26  ;;  %v4220_v49 = vmax.f32 %v3753_v54, 0.0  ;;  %v14728_v54 = vpop.f32.mrf.mxu2 }
 0x75e   : > { %17552 = vst [vmem:[#allocation27_spill] sm:$0xff] %v14728_v54 }
 0x75f   : > { %v4535_v38 = vpack.c.bf16 %v4220_v49, %v4220_v49 }
 0x760   : > { %v2956_v60 = vpop.f32.mrf.mxu0 }
 0x761   : > { %v3754_v42 = vpop.f32.mrf.mxu1  ;;  %v2957_v6 = vadd.f32 %v14591_v35, %v2956_v60  ;;  %v5347_v60 = vunpack.c.l.b16 %v4535_v38  ;;  %v10616_v38 = vld [vmem:[%s13165_s14 + $0x750] sm:$0xf] }
 0x763   : > { %v3755_v52 = vadd.f32 %v3754_v42, %v2957_v6 }
 0x765   : > { %v4221_v30 = vmax.f32 %v3755_v52, 0.0  ;;  %4964 = vrot.lane.b32.xlu1 %v17551_v20, %s13043_s26  ;;  %v14733_v43 = vpop.f32.mrf.mxu2  ;;  %v12571_v20 = vld [vmem:[%s13165_s14 + $0x754] sm:$0xf0] }
 0x767   : > { %v4536_v28 = vpack.c.bf16 %v4221_v30, %v4221_v30 }
 0x768   : > { %v2959_v16 = vpop.f32.mrf.mxu0 }
 0x769   : > { %v3757_v55 = vpop.f32.mrf.mxu1  ;;  %v5348_v42 = vunpack.c.l.b16 %v4536_v28  ;;  %v2960_v6 = vadd.f32 %v14591_v35, %v2959_v16  ;;  %v12570_v28 = vld [vmem:[%s13165_s14 + $0x754] sm:$0xf] }
 0x76b   : > { %2998 = vmatmul.bf16.gmra.mxu0 %v10609_v45  ;;  %v5380_v49 = vpack.c.b16 %v5348_v42, %v5347_v60  ;;  %v3758_v32 = vadd.f32 %v3757_v55, %v2960_v6  ;;  %v17553_v45 = vld [vmem:[#allocation36_spill] sm:$0xff]  ;;  %v10617_v55 = vor.u32 %v12571_v20, %v10616_v38  ;;  %v10621_v60 = vor.u32 %v12570_v28, %v10618_v2 }
 0x76c   : > { %3796 = vmatmul.bf16.gmra.mxu1 %v10613_v25 }
 0x76d   : > { %5400 = vrot.lane.b32.xlu1 %v5380_v49, %s13043_s26  ;;  %v4222_v3 = vmax.f32 %v3758_v32, 0.0 }
 0x76f   : > { %v4537_v59 = vpack.c.bf16 %v4222_v3, %v4222_v3  ;;  %v14742_v3 = vpop.f32.mrf.mxu2 }
 0x770   : > { %v2961_v52 = vpop.f32.mrf.mxu0  ;;  %17554 = vst [vmem:[#allocation28_spill] sm:$0xff] %v14742_v3 }
 0x771   : > { %v3759_v4 = vpop.f32.mrf.mxu1  ;;  %v2962_v22 = vadd.f32 %v14591_v35, %v2961_v52  ;;  %v5349_v49 = vunpack.c.l.b16 %v4537_v59  ;;  %v10624_v59 = vld [vmem:[%s13165_s14 + $0x760] sm:$0xf] }
 0x773   : > { %v3760_v30 = vadd.f32 %v3759_v4, %v2962_v22 }
 0x775   : > { %v4223_v16 = vmax.f32 %v3760_v30, 0.0  ;;  %4966 = vrot.lane.b32.xlu1 %v17553_v45, %s13043_s26  ;;  %v12572_v45 = vld [vmem:[%s13165_s14 + $0x764] sm:$0xf] }
 0x777   : > { %v4538_v25 = vpack.c.bf16 %v4223_v16, %v4223_v16  ;;  %v12573_v16 = vld [vmem:[%s13165_s14 + $0x764] sm:$0xf0] }
 0x778   : > { %v2964_v42 = vpop.f32.mrf.mxu0 }
 0x779   : > { %v3762_v6 = vpop.f32.mrf.mxu1  ;;  %v5350_v32 = vunpack.c.l.b16 %v4538_v25  ;;  %v2965_v52 = vadd.f32 %v14591_v35, %v2964_v42  ;;  %v10626_v25 = vld [vmem:[%s13165_s14 + $0x768] sm:$0xf0] }
 0x77b   : > { %3003 = vmatmul.bf16.gmra.mxu0 %v10617_v55  ;;  %v5381_v4 = vpack.c.b16 %v5350_v32, %v5349_v49  ;;  %v3763_v22 = vadd.f32 %v3762_v6, %v2965_v52  ;;  %v17555_v55 = vld [vmem:[#allocation39_spill] sm:$0xff]  ;;  %v14753_v6 = vpop.f32.mrf.mxu2  ;;  %v10625_v52 = vor.u32 %v12573_v16, %v10624_v59 }
 0x77c   : > { %3801 = vmatmul.bf16.gmra.mxu1 %v10621_v60  ;;  %v17556_v60 = vld [vmem:[#allocation38_spill] sm:$0xff] }
 0x77d   : > { %5402 = vrot.lane.b32.xlu1 %v5381_v4, %s13043_s26  ;;  %v4224_v38 = vmax.f32 %v3763_v22, 0.0  ;;  %v4110_v49 = vmax.f32 %v17556_v60, 0.0  ;;  %v10629_v4 = vor.u32 %v12572_v45, %v10626_v25 }
 0x77f   : > { %v4539_v33 = vpack.c.bf16 %v4224_v38, %v4224_v38  ;;  %v4425_v5 = vpack.c.bf16 %v4110_v49, %v4110_v49 }
 0x780   : > { %v2966_v30 = vpop.f32.mrf.mxu0 }
 0x781   : > { %v3764_v2 = vpop.f32.mrf.mxu1  ;;  %v2967_v20 = vadd.f32 %v14591_v35, %v2966_v30  ;;  %v5351_v30 = vunpack.c.l.b16 %v4539_v33 }
 0x783   : > { %v3765_v28 = vadd.f32 %v3764_v2, %v2967_v20  ;;  %v14757_v25 = vpop.f32.mrf.mxu2 }
 0x784   : > { %17557 = vst [vmem:[#allocation29_spill] sm:$0xff] %v14757_v25 }
 0x785   : > { %v4225_v42 = vmax.f32 %v3765_v28, 0.0  ;;  %4968 = vrot.lane.b32.xlu1 %v17555_v55, %s13043_s26 }
 0x787   : > { %v4540_v32 = vpack.c.bf16 %v4225_v42, %v4225_v42  ;;  %v4917_v42 = vunpack.c.l.b16 %v4425_v5  ;;  %v12676_v5 = vld [vmem:[%s17440_s3 + $0x50] sm:$0xff] }
 0x788   : > { %v2969_v22 = vpop.f32.mrf.mxu0  ;;  %6240 = vmatpush.bf16.msrb.mxu3 %v12676_v5 }
 0x789   : > { %v3767_v63 = vpop.f32.mrf.mxu1  ;;  %v5352_v2 = vunpack.c.l.b16 %v4540_v32  ;;  %v2970_v20 = vadd.f32 %v14591_v35, %v2969_v22  ;;  %v4935_v55 = vpack.c.b16 %v4917_v42, %v4917_v42  ;;  %v10632_v32 = vld [vmem:[%s13165_s14 + $0x770] sm:$0xf]  ;;  %v12574_v22 = vld [vmem:[%s13165_s14 + $0x774] sm:$0xf] }
 0x78b   : > { %v3768_v38 = vadd.f32 %v3767_v63, %v2970_v20  ;;  %3008 = vmatmul.bf16.gmra.mxu0 %v10625_v52  ;;  %v5382_v28 = vpack.c.b16 %v5352_v2, %v5351_v30  ;;  %v12575_v63 = vld [vmem:[%s13165_s14 + $0x774] sm:$0xf0]  ;;  %v10634_v52 = vld [vmem:[%s13165_s14 + $0x778] sm:$0xf0] }
 0x78c   : > { %3806 = vmatmul.bf16.gmra.mxu1 %v10629_v4  ;;  %v10633_v2 = vor.u32 %v12575_v63, %v10632_v32 }
 0x78d   : > { %5404 = vrot.lane.b32.xlu1 %v5382_v28, %s13043_s26  ;;  %v4226_v59 = vmax.f32 %v3768_v38, 0.0  ;;  %v10637_v38 = vor.u32 %v12574_v22, %v10634_v52 }
 0x78f   : > { %v4541_v60 = vpack.c.bf16 %v4226_v59, %v4226_v59 }
 0x790   : > { %v2971_v16 = vpop.f32.mrf.mxu0 }
 0x791   : > { %v3769_v45 = vpop.f32.mrf.mxu1  ;;  %v2972_v33 = vadd.f32 %v14591_v35, %v2971_v16  ;;  %v5353_v4 = vunpack.c.l.b16 %v4541_v60 }
 0x793   : > { %v3770_v49 = vadd.f32 %v3769_v45, %v2972_v33  ;;  %v12675_v45 = vld [vmem:[%s17440_s3 + $0x48] sm:$0xff]  ;;  %v14772_v33 = vpop.f32.mrf.mxu2 }
 0x794   : > { %6241 = vmatpush.bf16.msrb.mxu3 %v12675_v45 }
 0x795   : > { %v4227_v20 = vmax.f32 %v3770_v49, 0.0  ;;  %4970 = vrot.lane.b32.xlu1 %v4935_v55, %s13043_s26  ;;  %v12674_v49 = vld [vmem:[%s17440_s3 + $0x40] sm:$0xff] }
 0x797   : > { %v4542_v30 = vpack.c.bf16 %v4227_v20, %v4227_v20 }
 0x798   : > { %v2974_v28 = vpop.f32.mrf.mxu0  ;;  %6242 = vmatpush.bf16.msrb.mxu3 %v12674_v49 }
 0x799   : > { %v3772_v42 = vpop.f32.mrf.mxu1  ;;  %v5354_v59 = vunpack.c.l.b16 %v4542_v30  ;;  %v2975_v16 = vadd.f32 %v14591_v35, %v2974_v28  ;;  %v10640_v30 = vld [vmem:[%s13165_s14 + $0x780] sm:$0xf]  ;;  %v12576_v28 = vld [vmem:[%s13165_s14 + $0x784] sm:$0xf] }
 0x79b   : > { %v3773_v55 = vadd.f32 %v3772_v42, %v2975_v16  ;;  %3013 = vmatmul.bf16.gmra.mxu0 %v10633_v2  ;;  %v5383_v60 = vpack.c.b16 %v5354_v59, %v5353_v4  ;;  %v12577_v2 = vld [vmem:[%s13165_s14 + $0x784] sm:$0xf0]  ;;  %v14783_v4 = vpop.f32.mrf.mxu2  ;;  %v5273_v59 = vpop.permute.xlu0 %5272 }
 0x79c   : > { %3811 = vmatmul.bf16.gmra.mxu1 %v10637_v38  ;;  %v10642_v38 = vld [vmem:[%s13165_s14 + $0x788] sm:$0xf0]  ;;  %17558 = vst [vmem:[#allocation31_spill] sm:$0xff] %v14783_v4 }
 0x79d   : > { %5406 = vrot.lane.b32.xlu1 %v5383_v60, %s13043_s26  ;;  %v4228_v32 = vmax.f32 %v3773_v55, 0.0  ;;  %v10641_v60 = vor.u32 %v12577_v2, %v10640_v30  ;;  %v10645_v25 = vor.u32 %v12576_v28, %v10642_v38 }
 0x79f   : > { %v4543_v20 = vpack.c.bf16 %v4228_v32, %v4228_v32 }
 0x7a0   : > { %v2976_v63 = vpop.f32.mrf.mxu0 }
 0x7a1   : > { %v3774_v22 = vpop.f32.mrf.mxu1  ;;  %v2977_v52 = vadd.f32 %v14591_v35, %v2976_v63  ;;  %v5355_v16 = vunpack.c.l.b16 %v4543_v20 }
 0x7a3   : > { %v3775_v5 = vadd.f32 %v3774_v22, %v2977_v52  ;;  %v5521_v22 = vpop.permute.xlu2 %5520  ;;  %v14787_v52 = vpop.f32.mrf.mxu2 }
 0x7a4   : > { %v4839_v2 = vpop.permute.xlu0 %4838 }
 0x7a5   : > { %v4229_v42 = vmax.f32 %v3775_v5, 0.0 }
 0x7a7   : > { %v4544_v45 = vpack.c.bf16 %v4229_v42, %v4229_v42 }
 0x7a8   : > { %v2979_v55 = vpop.f32.mrf.mxu0 }
 0x7a9   : > { %v3777_v3 = vpop.f32.mrf.mxu1  ;;  %v5356_v29 = vunpack.c.l.b16 %v4544_v45  ;;  %v2980_v49 = vadd.f32 %v14591_v35, %v2979_v55  ;;  %v10648_v45 = vld [vmem:[%s13165_s14 + $0x790] sm:$0xf]  ;;  %v12578_v55 = vld [vmem:[%s13165_s14 + $0x794] sm:$0xf] }
 0x7ab   : > { %v3778_v32 = vadd.f32 %v3777_v3, %v2980_v49  ;;  %3018 = vmatmul.bf16.gmra.mxu0 %v10641_v60  ;;  %v5384_v63 = vpack.c.b16 %v5356_v29, %v5355_v16  ;;  %v12579_v3 = vld [vmem:[%s13165_s14 + $0x794] sm:$0xf0]  ;;  %v10650_v60 = vld [vmem:[%s13165_s14 + $0x798] sm:$0xf0] }
 0x7ac   : > { %3816 = vmatmul.bf16.gmra.mxu1 %v10645_v25  ;;  %v5087_v25 = vpop.permute.xlu2 %5086  ;;  %v10649_v4 = vor.u32 %v12579_v3, %v10648_v45 }
 0x7ad   : > { %5408 = vrot.lane.b32.xlu1 %v5384_v63, %s13043_s26  ;;  %v4230_v20 = vmax.f32 %v3778_v32, 0.0  ;;  %v10653_v63 = vor.u32 %v12578_v55, %v10650_v60  ;;  %v14794_v32 = vpop.f32.mrf.mxu2 }
 0x7af   : > { %v4545_v38 = vpack.c.bf16 %v4230_v20, %v4230_v20 }
 0x7b0   : > { %v2981_v5 = vpop.f32.mrf.mxu0 }
 0x7b1   : > { %v3779_v30 = vpop.f32.mrf.mxu1  ;;  %v2982_v28 = vadd.f32 %v14591_v35, %v2981_v5  ;;  %v5357_v29 = vunpack.c.l.b16 %v4545_v38  ;;  %v5275_v5 = vpop.permute.xlu0 %5274 }
 0x7b3   : > { %v3780_v42 = vadd.f32 %v3779_v30, %v2982_v28  ;;  %v5793_v28 = vsel %vm5644_vm0, %v14175_v7, %v5273_v59 }
 0x7b4   : > { %v5523_v60 = vpop.permute.xlu2 %5522 }
 0x7b5   : > { %v4231_v49 = vmax.f32 %v3780_v42, 0.0 }
 0x7b7   : > { %v4546_v16 = vpack.c.bf16 %v4231_v49, %v4231_v49 }
 0x7b8   : > { %v2984_v15 = vpop.f32.mrf.mxu0 }
 0x7b9   : > { %v3782_v61 = vpop.f32.mrf.mxu1  ;;  %v5358_v0 = vunpack.c.l.b16 %v4546_v16  ;;  %v2985_v54 = vadd.f32 %v14591_v35, %v2984_v15  ;;  %v17559_v16 = vld [vmem:[#allocation2_spill] sm:$0xff] }
 0x7ba   : > { %v5686_v7 = vsel %vm5644_vm0, %v17559_v16, %v4839_v2  ;;  %v5796_v2 = vsel %vm5644_vm0, %v14189_v27, %v5275_v5 }
 0x7bb   : > { %v3783_v20 = vadd.f32 %v3782_v61, %v2985_v54  ;;  %3023 = vmatmul.bf16.gmra.mxu0 %v10649_v4  ;;  %v5385_v30 = vpack.c.b16 %v5358_v0, %v5357_v29  ;;  %v14803_v61 = vpop.f32.mrf.mxu2  ;;  %v4841_v4 = vpop.permute.xlu0 %4840 }
 0x7bc   : > { %3821 = vmatmul.bf16.gmra.mxu1 %v10653_v63 }
 0x7bd   : > { %5410 = vrot.lane.b32.xlu1 %v5385_v30, %s13043_s26  ;;  %v4232_v38 = vmax.f32 %v3783_v20, 0.0 }
 0x7bf   : > { %v5397_v42 = vpop.permute.xlu1 %5396  ;;  %v4547_v0 = vpack.c.bf16 %v4232_v38, %v4232_v38  ;;  %v5089_v38 = vpop.permute.xlu2 %5088 }
 0x7c0   : > { %v5846_v45 = vsel %vm5699_vm1, %v5793_v28, %v5397_v42  ;;  %v2986_v3 = vpop.f32.mrf.mxu0 }
 0x7c1   : > { %v3784_v55 = vpop.f32.mrf.mxu1  ;;  %v2987_v49 = vadd.f32 %v14591_v35, %v2986_v3  ;;  %v5882_v15 = vsel %vm5736_vm2, %v5846_v45, %v5521_v22  ;;  %v5359_v59 = vunpack.c.l.b16 %v4547_v0 }
 0x7c2   : > { %6243 = vmatmul.bf16.vlgmr.msrb.gmra.mxu3 %v5882_v15 }
 0x7c3   : > { %v3785_v54 = vadd.f32 %v3784_v55, %v2987_v49  ;;  %v14810_v15 = vpop.f32.mrf.mxu2  ;;  %v5277_v0 = vpop.permute.xlu0 %5276 }
 0x7c4   : > { %17560 = vst [vmem:[#allocation32_spill] sm:$0xff] %v14810_v15 }
 0x7c5   : > { %v4233_v29 = vmax.f32 %v3785_v54, 0.0 }
 0x7c7   : > { %v4548_v63 = vpack.c.bf16 %v4233_v29, %v4233_v29  ;;  %v4963_v20 = vpop.permute.xlu1 %4962 }
 0x7c8   : > { %v5727_v30 = vsel %vm5699_vm1, %v5686_v7, %v4963_v20  ;;  %v2989_v28 = vpop.f32.mrf.mxu0 }
 0x7c9   : > { %v3787_v42 = vpop.f32.mrf.mxu1  ;;  %v5360_v3 = vunpack.c.l.b16 %v4548_v63  ;;  %v2990_v22 = vadd.f32 %v14591_v35, %v2989_v28  ;;  %v5777_v45 = vsel %vm5736_vm2, %v5727_v30, %v5087_v25  ;;  %v5525_v28 = vpop.permute.xlu2 %5524 }
 0x7ca   : > { %6210 = vmatmul.bf16.gmra.mxu2 %v5777_v45 }
 0x7cb   : > { %v3788_v55 = vadd.f32 %v3787_v42, %v2990_v22  ;;  %v5386_v49 = vpack.c.b16 %v5360_v3, %v5359_v59  ;;  %v14818_v3 = vpop.f32.mrf.mxu2  ;;  %v17561_v22 = vld [vmem:[#allocation3_spill] sm:$0xff] }
 0x7cc   : > { %v5689_v27 = vsel %vm5644_vm0, %v17561_v22, %v4841_v4  ;;  %v5799_v4 = vsel %vm5644_vm0, %v14207_v23, %v5277_v0 }
 0x7cd   : > { %5412 = vrot.lane.b32.xlu1 %v5386_v49, %s13043_s26  ;;  %v4234_v54 = vmax.f32 %v3788_v55, 0.0 }
 0x7cf   : > { %v5399_v29 = vpop.permute.xlu1 %5398  ;;  %v4549_v59 = vpack.c.bf16 %v4234_v54, %v4234_v54 }
 0x7d0   : > { %v5848_v16 = vsel %vm5699_vm1, %v5796_v2, %v5399_v29  ;;  %v2991_v7 = vpop.f32.mrf.mxu0 }
 0x7d1   : > { %v3789_v63 = vpop.f32.mrf.mxu1  ;;  %v2992_v25 = vadd.f32 %v14591_v35, %v2991_v7  ;;  %v5885_v20 = vsel %vm5736_vm2, %v5848_v16, %v5523_v60  ;;  %v5361_v5 = vunpack.c.l.b16 %v4549_v59  ;;  %v4843_v7 = vpop.permute.xlu0 %4842 }
 0x7d2   : > { %6248 = vmatmul.bf16.gmra.mxu3 %v5885_v20 }
 0x7d3   : > { %v3790_v30 = vadd.f32 %v3789_v63, %v2992_v25  ;;  %v5091_v25 = vpop.permute.xlu2 %5090 }
 0x7d5   : > { %v4235_v42 = vmax.f32 %v3790_v30, 0.0 }
 0x7d7   : > { %v4550_v45 = vpack.c.bf16 %v4235_v42, %v4235_v42  ;;  %v4965_v55 = vpop.permute.xlu1 %4964 }
 0x7d8   : > { %v5729_v49 = vsel %vm5699_vm1, %v5689_v27, %v4965_v55  ;;  %v2994_v2 = vpop.f32.mrf.mxu0  ;;  %v14829_v27 = vpop.f32.mrf.mxu2 }
 0x7d9   : > { %v3792_v29 = vpop.f32.mrf.mxu1  ;;  %v5362_v15 = vunpack.c.l.b16 %v4550_v45  ;;  %v2995_v60 = vadd.f32 %v14591_v35, %v2994_v2  ;;  %v5780_v54 = vsel %vm5736_vm2, %v5729_v49, %v5089_v38  ;;  %v17562_v2 = vld [vmem:[#allocation4_spill] sm:$0xff] }
 0x7da   : > { %6215 = vmatmul.bf16.gmra.mxu2 %v5780_v54  ;;  %v5692_v23 = vsel %vm5644_vm0, %v17562_v2, %v4843_v7  ;;  %v12682_v7 = vld [vmem:[%s17440_s3 + $0x80] sm:$0xff] }
 0x7db   : > { %v3793_v16 = vadd.f32 %v3792_v29, %v2995_v60  ;;  %v5387_v63 = vpack.c.b16 %v5362_v15, %v5361_v5  ;;  %v5279_v15 = vpop.permute.xlu0 %5278  ;;  %6340 = vmatpush.bf16.msra.mxu2 %v12682_v7 }
 0x7dd   : > { %5414 = vrot.lane.b32.xlu1 %v5387_v63, %s13043_s26  ;;  %v4236_v20 = vmax.f32 %v3793_v16, 0.0 }
 0x7df   : > { %v5401_v59 = vpop.permute.xlu1 %5400  ;;  %v4551_v5 = vpack.c.bf16 %v4236_v20, %v4236_v20 }
 0x7e0   : > { %v5850_v30 = vsel %vm5699_vm1, %v5799_v4, %v5401_v59  ;;  %v2996_v42 = vpop.f32.mrf.mxu0  ;;  %v5527_v4 = vpop.permute.xlu2 %5526 }
 0x7e1   : > { %v3794_v22 = vpop.f32.mrf.mxu1  ;;  %v2997_v45 = vadd.f32 %v14591_v35, %v2996_v42  ;;  %v5888_v38 = vsel %vm5736_vm2, %v5850_v30, %v5525_v28  ;;  %v5363_v0 = vunpack.c.l.b16 %v4551_v5  ;;  %v14839_v35 = vld [vmem:[%s17439_s2] ss:$0 sm:$0xff]  ;;  %v14846_v30 = vpop.f32.mrf.mxu2 }
 0x7e2   : > { %6253 = vmatmul.bf16.gmra.mxu3 %v5888_v38  ;;  %v5802_v38 = vsel %vm5644_vm0, %v14217_v10, %v5279_v15 }
 0x7e3   : > { %v3795_v55 = vadd.f32 %v3794_v22, %v2997_v45  ;;  %v4845_v45 = vpop.permute.xlu0 %4844 }
 0x7e5   : > { %v4237_v49 = vmax.f32 %v3795_v55, 0.0 }
 0x7e7   : > { %v4552_v29 = vpack.c.bf16 %v4237_v49, %v4237_v49  ;;  %v4967_v60 = vpop.permute.xlu1 %4966 }
 0x7e8   : > { %v5731_v54 = vsel %vm5699_vm1, %v5692_v23, %v4967_v60  ;;  %v2999_v16 = vpop.f32.mrf.mxu0  ;;  %v5093_v60 = vpop.permute.xlu2 %5092 }
 0x7e9   : > { %v3797_v63 = vpop.f32.mrf.mxu1  ;;  %v5364_v59 = vunpack.c.l.b16 %v4552_v29  ;;  %v3000_v28 = vadd.f32 %v14839_v35, %v2999_v16  ;;  %v5783_v20 = vsel %vm5736_vm2, %v5731_v54, %v5091_v25  ;;  %v14854_v16 = vpop.f32.mrf.mxu2 }
 0x7ea   : > { %6220 = vmatmul.bf16.gmra.mxu2 %v5783_v20 }
 0x7eb   : > { %v3798_v42 = vadd.f32 %v3797_v63, %v3000_v28  ;;  %v5388_v22 = vpack.c.b16 %v5364_v59, %v5363_v0  ;;  %v17563_v59 = vld [vmem:[#allocation5_spill] sm:$0xff]  ;;  %v5281_v15 = vpop.permute.xlu0 %5280 }
 0x7ec   : > { %v5695_v10 = vsel %vm5644_vm0, %v17563_v59, %v4845_v45 }
 0x7ed   : > { %5416 = vrot.lane.b32.xlu1 %v5388_v22, %s13043_s26  ;;  %v4238_v5 = vmax.f32 %v3798_v42, 0.0 }
 0x7ef   : > { %v5403_v55 = vpop.permute.xlu1 %5402  ;;  %v4553_v0 = vpack.c.bf16 %v4238_v5, %v4238_v5 }
 0x7f0   : > { %v5852_v25 = vsel %vm5699_vm1, %v5802_v38, %v5403_v55  ;;  %v3001_v49 = vpop.f32.mrf.mxu0  ;;  %v17564_v55 = vld [vmem:[#allocation6_spill] sm:$0xff]  ;;  %v5529_v45 = vpop.permute.xlu2 %5528 }
 0x7f1   : > { %v3799_v2 = vpop.f32.mrf.mxu1  ;;  %v3002_v23 = vadd.f32 %v14839_v35, %v3001_v49  ;;  %v5891_v29 = vsel %vm5736_vm2, %v5852_v25, %v5527_v4  ;;  %v5365_v28 = vunpack.c.l.b16 %v4553_v0  ;;  %v4040_v4 = vmax.f32 %v17564_v55, 0.0  ;;  %v14863_v0 = vpop.f32.mrf.mxu2 }
 0x7f2   : > { %6258 = vmatmul.bf16.gmra.mxu3 %v5891_v29 }
 0x7f3   : > { %v3800_v54 = vadd.f32 %v3799_v2, %v3002_v23  ;;  %v4355_v29 = vpack.c.bf16 %v4040_v4, %v4040_v4 }
 0x7f5   : > { %v4239_v63 = vmax.f32 %v3800_v54, 0.0  ;;  %v5805_v54 = vsel %vm5644_vm0, %v14227_v47, %v5281_v15 }
 0x7f7   : > { %v4554_v20 = vpack.c.bf16 %v4239_v63, %v4239_v63  ;;  %v4969_v7 = vpop.permute.xlu1 %4968 }
 0x7f8   : > { %v5733_v42 = vsel %vm5699_vm1, %v5695_v10, %v4969_v7  ;;  %v3004_v22 = vpop.f32.mrf.mxu0 }
 0x7f9   : > { %v3802_v38 = vpop.f32.mrf.mxu1  ;;  %v5366_v25 = vunpack.c.l.b16 %v4554_v20  ;;  %v3005_v5 = vadd.f32 %v14839_v35, %v3004_v22  ;;  %v5786_v49 = vsel %vm5736_vm2, %v5733_v42, %v5093_v60  ;;  %v4705_v22 = vunpack.c.l.b16 %v4355_v29  ;;  %v4847_v42 = vpop.permute.xlu0 %4846 }
 0x7fa   : > { %6225 = vmatmul.bf16.gmra.mxu2 %v5786_v49 }
 0x7fb   : > { %v3803_v2 = vadd.f32 %v3802_v38, %v3005_v5  ;;  %v5389_v23 = vpack.c.b16 %v5366_v25, %v5365_v28  ;;  %v4723_v4 = vpack.c.b16 %v4705_v22, %v4705_v22  ;;  %v5095_v5 = vpop.permute.xlu2 %5094 }
 0x7fd   : > { %5418 = vrot.lane.b32.xlu1 %v5389_v23, %s13043_s26  ;;  %v4240_v63 = vmax.f32 %v3803_v2, 0.0  ;;  %v5698_v47 = vsel %vm5644_vm0, %v4723_v4, %v4847_v42 }
 0x7ff   : > { %v5405_v59 = vpop.permute.xlu1 %5404  ;;  %v4555_v38 = vpack.c.bf16 %v4240_v63, %v4240_v63 }
 0x800   : > { %v5854_v10 = vsel %vm5699_vm1, %v5805_v54, %v5405_v59  ;;  %v3006_v20 = vpop.f32.mrf.mxu0  ;;  %v14872_v59 = vpop.f32.mrf.mxu2 }
 0x801   : > { %v3804_v7 = vpop.f32.mrf.mxu1  ;;  %v3007_v60 = vadd.f32 %v14839_v35, %v3006_v20  ;;  %v5894_v28 = vsel %vm5736_vm2, %v5854_v10, %v5529_v45  ;;  %v5367_v15 = vunpack.c.l.b16 %v4555_v38  ;;  %v5283_v22 = vpop.permute.xlu0 %5282 }
 0x802   : > { %6263 = vmatmul.bf16.gmra.mxu3 %v5894_v28  ;;  %v5808_v28 = vsel %vm5644_vm0, %v14239_v11, %v5283_v22 }
 0x803   : > { %v3805_v55 = vadd.f32 %v3804_v7, %v3007_v60  ;;  %v5531_v60 = vpop.permute.xlu2 %5530 }
 0x805   : > { %v4241_v25 = vmax.f32 %v3805_v55, 0.0 }
 0x807   : > { %v4556_v49 = vpack.c.bf16 %v4241_v25, %v4241_v25  ;;  %v4971_v2 = vpop.permute.xlu1 %4970 }
 0x808   : > { %v5735_v23 = vsel %vm5699_vm1, %v5698_v47, %v4971_v2  ;;  %v3009_v54 = vpop.f32.mrf.mxu0 }
 0x809   : > { %v3807_v29 = vpop.f32.mrf.mxu1  ;;  %v5368_v20 = vunpack.c.l.b16 %v4556_v49  ;;  %v3010_v45 = vadd.f32 %v14839_v35, %v3009_v54  ;;  %v5789_v63 = vsel %vm5736_vm2, %v5735_v23, %v5095_v5  ;;  %v14882_v49 = vpop.f32.mrf.mxu2 }
 0x80a   : > { %6230 = vmatmul.bf16.gmra.mxu2 %v5789_v63  ;;  %v5285_v22 = vpop.permute.xlu0 %5284 }
 0x80b   : > { %v3808_v10 = vadd.f32 %v3807_v29, %v3010_v45  ;;  %v5390_v7 = vpack.c.b16 %v5368_v20, %v5367_v15 }
 0x80d   : > { %5420 = vrot.lane.b32.xlu1 %v5390_v7, %s13043_s26  ;;  %v4242_v42 = vmax.f32 %v3808_v10, 0.0 }
 0x80f   : > { %v5407_v38 = vpop.permute.xlu1 %5406  ;;  %v4557_v15 = vpack.c.bf16 %v4242_v42, %v4242_v42  ;;  %v5811_v42 = vsel %vm5644_vm0, %v14254_v48, %v5285_v22 }
 0x810   : > { %v5856_v55 = vsel %vm5699_vm1, %v5808_v28, %v5407_v38  ;;  %v3011_v4 = vpop.f32.mrf.mxu0  ;;  %v5533_v28 = vpop.permute.xlu2 %5532 }
 0x811   : > { %v3809_v25 = vpop.f32.mrf.mxu1  ;;  %v3012_v47 = vadd.f32 %v14839_v35, %v3011_v4  ;;  %v5897_v5 = vsel %vm5736_vm2, %v5856_v55, %v5531_v60  ;;  %v5369_v54 = vunpack.c.l.b16 %v4557_v15  ;;  %v14887_v60 = vpop.f32.mrf.mxu2 }
 0x812   : > { %6268 = vmatmul.bf16.gmra.mxu3 %v5897_v5  ;;  %v5287_v22 = vpop.permute.xlu0 %5286 }
 0x813   : > { %v3810_v2 = vadd.f32 %v3809_v25, %v3012_v47 }
 0x815   : > { %v4243_v23 = vmax.f32 %v3810_v2, 0.0 }
 0x817   : > { %v4558_v29 = vpack.c.bf16 %v4243_v23, %v4243_v23 }
 0x818   : > { %v3014_v20 = vpop.f32.mrf.mxu0 }
 0x819   : > { %v3812_v11 = vpop.f32.mrf.mxu1  ;;  %v5370_v45 = vunpack.c.l.b16 %v4558_v29  ;;  %v3015_v63 = vadd.f32 %v14839_v35, %v3014_v20 }
 0x81a   : > { %11070 = vmatmul.msk.bf16.vlgmr.msra.gmra.mxu2 %vm5644_vm0, %v14453_v21 }
 0x81b   : > { %v3813_v10 = vadd.f32 %v3812_v11, %v3015_v63  ;;  %v5391_v7 = vpack.c.b16 %v5370_v45, %v5369_v54  ;;  %v14895_v54 = vpop.f32.mrf.mxu2 }
 0x81d   : > { %5422 = vrot.lane.b32.xlu1 %v5391_v7, %s13043_s26  ;;  %v4244_v38 = vmax.f32 %v3813_v10, 0.0 }
 0x81f   : > { %v5409_v55 = vpop.permute.xlu1 %5408  ;;  %v4559_v15 = vpack.c.bf16 %v4244_v38, %v4244_v38 }
 0x820   : > { %v5858_v4 = vsel %vm5699_vm1, %v5811_v42, %v5409_v55  ;;  %v3016_v25 = vpop.f32.mrf.mxu0  ;;  %v5814_v42 = vsel %vm5644_vm0, %v14269_v53, %v5287_v22  ;;  %v5289_v22 = vpop.permute.xlu0 %5288 }
 0x821   : > { %v3814_v47 = vpop.f32.mrf.mxu1  ;;  %v3017_v5 = vadd.f32 %v14839_v35, %v3016_v25  ;;  %v5900_v21 = vsel %vm5736_vm2, %v5858_v4, %v5533_v28  ;;  %v5371_v29 = vunpack.c.l.b16 %v4559_v15  ;;  %v5535_v28 = vpop.permute.xlu2 %5534 }
 0x822   : > { %6273 = vmatmul.bf16.gmra.mxu3 %v5900_v21 }
 0x823   : > { %v3815_v2 = vadd.f32 %v3814_v47, %v3017_v5  ;;  %v14904_v5 = vpop.f32.mrf.mxu2 }
 0x825   : > { %v4245_v23 = vmax.f32 %v3815_v2, 0.0 }
 0x827   : > { %v4560_v20 = vpack.c.bf16 %v4245_v23, %v4245_v23 }
 0x828   : > { %v3019_v11 = vpop.f32.mrf.mxu0 }
 0x829   : > { %v3817_v48 = vpop.f32.mrf.mxu1  ;;  %v5372_v45 = vunpack.c.l.b16 %v4560_v20  ;;  %v3020_v63 = vadd.f32 %v14839_v35, %v3019_v11 }
 0x82a   : > { %11071 = vmatmul.msk.bf16.gmra.mxu2 %vm5644_vm0, %v14470_v1 }
 0x82b   : > { %v3818_v10 = vadd.f32 %v3817_v48, %v3020_v63  ;;  %v5392_v7 = vpack.c.b16 %v5372_v45, %v5371_v29  ;;  %v14911_v63 = vpop.f32.mrf.mxu2 }
 0x82d   : > { %5424 = vrot.lane.b32.xlu1 %v5392_v7, %s13043_s26  ;;  %v4246_v38 = vmax.f32 %v3818_v10, 0.0 }
 0x82f   : > { %v5411_v55 = vpop.permute.xlu1 %5410  ;;  %v4561_v15 = vpack.c.bf16 %v4246_v38, %v4246_v38 }
 0x830   : > { %v5860_v4 = vsel %vm5699_vm1, %v5814_v42, %v5411_v55  ;;  %v3021_v25 = vpop.f32.mrf.mxu0  ;;  %v5817_v42 = vsel %vm5644_vm0, %v14284_v24, %v5289_v22 }
 0x831   : > { %v3819_v47 = vpop.f32.mrf.mxu1  ;;  %v3022_v21 = vadd.f32 %v14839_v35, %v3021_v25  ;;  %v5903_v1 = vsel %vm5736_vm2, %v5860_v4, %v5535_v28  ;;  %v5373_v29 = vunpack.c.l.b16 %v4561_v15  ;;  %v5537_v28 = vpop.permute.xlu2 %5536  ;;  %v14919_v4 = vld [vmem:[%s17441_s4] ss:$0 sm:$0xff] }
 0x832   : > { %6278 = vmatmul.bf16.gmra.mxu3 %v5903_v1  ;;  %v6147_v24 = vadd.f32 %v14919_v4, %v14191_v9  ;;  %v5291_v9 = vpop.permute.xlu0 %5290 }
 0x833   : > { %v3820_v2 = vadd.f32 %v3819_v47, %v3022_v21 }
 0x835   : > { %v4247_v23 = vmax.f32 %v3820_v2, 0.0 }
 0x837   : > { %v4562_v20 = vpack.c.bf16 %v4247_v23, %v4247_v23  ;;  %v14926_v23 = vpop.f32.mrf.mxu2 }
 0x838   : > { %v3024_v11 = vpop.f32.mrf.mxu0 }
 0x839   : > { %v3822_v53 = vpop.f32.mrf.mxu1  ;;  %v5374_v48 = vunpack.c.l.b16 %v4562_v20  ;;  %v3025_v45 = vadd.f32 %v14839_v35, %v3024_v11 }
 0x83a   : > { %11072 = vmatmul.msk.bf16.gmra.mxu2 %vm5644_vm0, %v14487_v19 }
 0x83b   : > { %v3823_v10 = vadd.f32 %v3822_v53, %v3025_v45  ;;  %v5393_v7 = vpack.c.b16 %v5374_v48, %v5373_v29  ;;  %v17565_v53 = vld [vmem:[#allocation52_spill] sm:$0xff] }
 0x83c   : > { %v4250_v48 = vmax.f32 %v17565_v53, 0.0 }
 0x83d   : > { %5426 = vrot.lane.b32.xlu1 %v5393_v7, %s13043_s26  ;;  %v4248_v38 = vmax.f32 %v3823_v10, 0.0 }
 0x83e   : > { %v4565_v22 = vpack.c.bf16 %v4250_v48, %v4250_v48 }
 0x83f   : > { %v5413_v55 = vpop.permute.xlu1 %5412  ;;  %v4563_v15 = vpack.c.bf16 %v4248_v38, %v4248_v38 }
 0x840   : > { %v5862_v19 = vsel %vm5699_vm1, %v5817_v42, %v5413_v55  ;;  %v3026_v25 = vpop.f32.mrf.mxu0  ;;  %v6149_v42 = vadd.f32 %v14919_v4, %v14202_v12 }
 0x841   : > { %v3824_v47 = vpop.f32.mrf.mxu1  ;;  %v3027_v21 = vadd.f32 %v14839_v35, %v3026_v25  ;;  %v5906_v1 = vsel %vm5736_vm2, %v5862_v19, %v5537_v28  ;;  %v5375_v45 = vunpack.c.l.b16 %v4563_v15  ;;  %v5377_v25 = vunpack.c.l.b16 %v4565_v22 }
 0x842   : > { %6283 = vmatmul.bf16.gmra.mxu3 %v5906_v1  ;;  %v5539_v1 = vpop.permute.xlu2 %5538 }
 0x843   : > { %v3825_v2 = vadd.f32 %v3824_v47, %v3027_v21  ;;  %v5820_v47 = vsel %vm5644_vm0, %v14297_v62, %v5291_v9  ;;  %v5395_v12 = vpack.c.b16 %v5377_v25, %v5377_v25  ;;  %v5293_v62 = vpop.permute.xlu0 %5292 }
 0x845   : > { %v4249_v29 = vmax.f32 %v3825_v2, 0.0  ;;  %v6244_v20 = vpop.f32.mrf.mxu3  ;;  %v6152_v2 = vadd.f32 %v14919_v4, %v14716_v58 }
 0x846   : > { %v14928_v11 = vadd.f32 %v6244_v20, %v6147_v24 }
 0x847   : > { %v4564_v10 = vpack.c.bf16 %v4249_v29, %v4249_v29 }
 0x849   : > { %v5376_v7 = vunpack.c.l.b16 %v4564_v10 }
 0x84a   : > { %11073 = vmatmul.msk.bf16.gmra.mxu2 %vm5644_vm0, %v14505_v44  ;;  %v5541_v58 = vpop.permute.xlu2 %5540 }
 0x84b   : > { %v5394_v28 = vpack.c.b16 %v5376_v7, %v5375_v45  ;;  %v5823_v45 = vsel %vm5644_vm0, %v14312_v56, %v5293_v62 }
 0x84d   : > { %5428 = vrot.lane.b32.xlu1 %v5394_v28, %s13043_s26  ;;  %v14936_v38 = vpop.f32.mrf.mxu2  ;;  %v6246_v55 = vpop.f32.mrf.mxu3  ;;  %v17566_v28 = vld [vmem:[#allocation44_spill] sm:$0xff] }
 0x84e   : > { %v14938_v19 = vadd.f32 %v6246_v55, %v6149_v42  ;;  %v3152_v42 = vadd.f32 %v14839_v35, %v17566_v28 }
 0x84f   : > { %v5415_v21 = vpop.permute.xlu1 %5414 }
 0x850   : > { %v5864_v44 = vsel %vm5699_vm1, %v5820_v47, %v5415_v21  ;;  %v3950_v56 = vadd.f32 %v14544_v41, %v3152_v42  ;;  %v12691_v47 = vld [vmem:[%s17442_s5 + $0x38] sm:$0xff]  ;;  %v4298_v21 = vmax.f32 %v14542_v36, 0.0 }
 0x851   : > { %v5909_v15 = vsel %vm5736_vm2, %v5864_v44, %v5539_v1  ;;  %v5295_v44 = vpop.permute.xlu0 %5294  ;;  %7065 = vmatpush.bf16.msra.mxu3 %v12691_v47  ;;  %v17567_v36 = vld [vmem:[#allocation45_spill] sm:$0xff] }
 0x852   : > { %6288 = vmatmul.bf16.gmra.mxu3 %v5909_v15  ;;  %v4299_v1 = vmax.f32 %v3950_v56, 0.0  ;;  %v4300_v56 = vmax.f32 %v14557_v17, 0.0 }
 0x855   : > { %5430 = vrot.lane.b32.xlu1 %v5395_v12, %s13043_s26  ;;  %v14947_v24 = vpop.f32.mrf.mxu2  ;;  %v6249_v29 = vpop.f32.mrf.mxu3  ;;  %v5826_v12 = vsel %vm5644_vm0, %v14327_v31, %v5295_v44 }
 0x856   : > { %v14949_v20 = vadd.f32 %v6249_v29, %v6152_v2  ;;  %v5543_v2 = vpop.permute.xlu2 %5542  ;;  %v4613_v29 = vpack.c.bf16 %v4298_v21, %v4298_v21 }
 0x859   : > { %v5297_v21 = vpop.permute.xlu0 %5296 }
 0x85a   : > { %11074 = vmatmul.msk.bf16.gmra.mxu2 %vm5644_vm0, %v14524_v51  ;;  %v6157_v51 = vadd.f32 %v14919_v4, %v14733_v43 }
 0x85d   : > { %v14953_v53 = vpop.f32.mrf.mxu2  ;;  %v14955_v48 = vpop.f32.mrf.mxu3 }
 0x85f   : > { %v5417_v10 = vpop.permute.xlu1 %5416 }
 0x860   : > { %v5866_v7 = vsel %vm5699_vm1, %v5823_v45, %v5417_v10  ;;  %v3157_v10 = vadd.f32 %v14839_v35, %v17567_v36 }
 0x861   : > { %v5912_v22 = vsel %vm5736_vm2, %v5866_v7, %v5541_v58  ;;  %v6162_v58 = vadd.f32 %v14919_v4, %v14753_v6  ;;  %v5603_v7 = vunpack.c.l.b16 %v4613_v29  ;;  %v5829_v6 = vsel %vm5644_vm0, %v14342_v14, %v5297_v21 }
 0x862   : > { %6293 = vmatmul.bf16.gmra.mxu3 %v5912_v22 }
 0x865   : > { %v14965_v9 = vpop.f32.mrf.mxu2  ;;  %v6254_v55 = vpop.f32.mrf.mxu3 }
 0x866   : > { %v14967_v25 = vadd.f32 %v6254_v55, %v6157_v51  ;;  %v3955_v55 = vadd.f32 %v14559_v13, %v3157_v10 }
 0x868   : > { %v4301_v47 = vmax.f32 %v3955_v55, 0.0 }
 0x86a   : > { %11075 = vmatmul.msk.bf16.gmra.mxu2 %vm5644_vm0, %v14539_v57  ;;  %v4614_v57 = vpack.c.bf16 %v4299_v1, %v4299_v1  ;;  %v4616_v29 = vpack.c.bf16 %v4301_v47, %v4301_v47 }
 0x86c   : > { %v5604_v22 = vunpack.c.l.b16 %v4614_v57  ;;  %v5606_v10 = vunpack.c.l.b16 %v4616_v29 }
 0x86d   : > { %v14976_v43 = vpop.f32.mrf.mxu2  ;;  %v14978_v15 = vpop.f32.mrf.mxu3 }
 0x86e   : > { %v5632_v51 = vpack.c.b16 %v5604_v22, %v5603_v7 }
 0x86f   : > { %v5419_v41 = vpop.permute.xlu1 %5418 }
 0x870   : > { %v5868_v62 = vsel %vm5699_vm1, %v5826_v12, %v5419_v41  ;;  %v5545_v41 = vpop.permute.xlu2 %5544 }
 0x871   : > { %v5915_v45 = vsel %vm5736_vm2, %v5868_v62, %v5543_v2  ;;  %v4615_v2 = vpack.c.bf16 %v4300_v56, %v4300_v56  ;;  %v17568_v62 = vld [vmem:[#allocation46_spill] sm:$0xff]  ;;  %v5299_v56 = vpop.permute.xlu0 %5298 }
 0x872   : > { %6298 = vmatmul.bf16.gmra.mxu3 %v5915_v45  ;;  %v3162_v17 = vadd.f32 %v14839_v35, %v17568_v62  ;;  %v6167_v45 = vadd.f32 %v14919_v4, %v14772_v33  ;;  %v5832_v33 = vsel %vm5644_vm0, %v14357_v34, %v5299_v56  ;;  %v12690_v34 = vld [vmem:[%s17442_s5 + $0x30] sm:$0xff] }
 0x873   : > { %v5605_v36 = vunpack.c.l.b16 %v4615_v2  ;;  %7066 = vmatpush.bf16.msra.mxu3 %v12690_v34 }
 0x875   : > { %v14988_v28 = vpop.f32.mrf.mxu2  ;;  %v6259_v31 = vpop.f32.mrf.mxu3  ;;  %v5633_v22 = vpack.c.b16 %v5606_v10, %v5605_v36 }
 0x876   : > { %v14990_v42 = vadd.f32 %v6259_v31, %v6162_v58  ;;  %v3960_v31 = vadd.f32 %v14574_v26, %v3162_v17 }
 0x878   : > { %v4303_v55 = vmax.f32 %v3960_v31, 0.0  ;;  %v4304_v31 = vmax.f32 %v14594_v37, 0.0  ;;  %v17570_v37 = vld [vmem:[#allocation48_spill] sm:$0xff] }
 0x87a   : > { %11076 = vmatmul.msk.bf16.gmra.mxu2 %vm5644_vm0, %v5632_v51  ;;  %v4302_v51 = vmax.f32 %v14572_v40, 0.0  ;;  %v4618_v2 = vpack.c.bf16 %v4303_v55, %v4303_v55 }
 0x87c   : > { %v5608_v17 = vunpack.c.l.b16 %v4618_v2  ;;  %v4619_v2 = vpack.c.bf16 %v4304_v31, %v4304_v31 }
 0x87d   : > { %v14995_v1 = vpop.f32.mrf.mxu2  ;;  %v14997_v44 = vpop.f32.mrf.mxu3 }
 0x87f   : > { %v5421_v12 = vpop.permute.xlu1 %5420 }
 0x880   : > { %v5870_v57 = vsel %vm5699_vm1, %v5829_v6, %v5421_v12  ;;  %v5547_v12 = vpop.permute.xlu2 %5546 }
 0x881   : > { %v5918_v13 = vsel %vm5736_vm2, %v5870_v57, %v5545_v41  ;;  %v4617_v41 = vpack.c.bf16 %v4302_v51, %v4302_v51  ;;  %v17569_v57 = vld [vmem:[#allocation47_spill] sm:$0xff] }
 0x882   : > { %6303 = vmatmul.bf16.gmra.mxu3 %v5918_v13  ;;  %v3167_v40 = vadd.f32 %v14839_v35, %v17569_v57  ;;  %v6172_v13 = vadd.f32 %v14919_v4, %v14787_v52  ;;  %v5301_v52 = vpop.permute.xlu0 %5300  ;;  %v3172_v57 = vadd.f32 %v14839_v35, %v17570_v37 }
 0x883   : > { %v5607_v62 = vunpack.c.l.b16 %v4617_v41 }
 0x885   : > { %v15007_v58 = vpop.f32.mrf.mxu2  ;;  %v6264_v14 = vpop.f32.mrf.mxu3 }
 0x886   : > { %v15009_v7 = vadd.f32 %v6264_v14, %v6167_v45  ;;  %v5634_v14 = vpack.c.b16 %v5608_v17, %v5607_v62 }
 0x888   : > { %v5549_v41 = vpop.permute.xlu2 %5548 }
 0x88a   : > { %11077 = vmatmul.msk.bf16.gmra.mxu2 %vm5644_vm0, %v5633_v22  ;;  %v3965_v22 = vadd.f32 %v14596_v50, %v3167_v40  ;;  %v6177_v40 = vadd.f32 %v14919_v4, %v14803_v61 }
 0x88c   : > { %v4305_v51 = vmax.f32 %v3965_v22, 0.0 }
 0x88d   : > { %v15014_v47 = vpop.f32.mrf.mxu2  ;;  %v15016_v21 = vpop.f32.mrf.mxu3 }
 0x88f   : > { %v5423_v6 = vpop.permute.xlu1 %5422 }
 0x890   : > { %v5872_v29 = vsel %vm5699_vm1, %v5832_v33, %v5423_v6  ;;  %v5835_v6 = vsel %vm5644_vm0, %v14377_v39, %v5301_v52  ;;  %v4306_v52 = vmax.f32 %v14607_v18, 0.0 }
 0x891   : > { %v5921_v26 = vsel %vm5736_vm2, %v5872_v29, %v5547_v12  ;;  %v4620_v29 = vpack.c.bf16 %v4305_v51, %v4305_v51 }
 0x892   : > { %6308 = vmatmul.bf16.gmra.mxu3 %v5921_v26 }
 0x895   : > { %v6233_v45 = vpop.f32.mrf.mxu2  ;;  %v6269_v36 = vpop.f32.mrf.mxu3 }
 0x896   : > { %v15029_v10 = vadd.f32 %v6269_v36, %v6172_v13  ;;  %v5609_v13 = vunpack.c.l.b16 %v4619_v2 }
 0x89a   : > { %11078 = vmatmul.msk.bf16.gmra.mxu2 %vm5644_vm0, %v5634_v14  ;;  %v3970_v14 = vadd.f32 %v14609_v46, %v3172_v57 }
 0x89c   : > { %v4307_v61 = vmax.f32 %v3970_v14, 0.0 }
 0x89d   : > { %v15034_v55 = vpop.f32.mrf.mxu3  ;;  %v6342_v56 = vpop.f32.mrf.mxu2 }
 0x89e   : > { %v6343_v33 = vadd.f32 %v6342_v56, %v14928_v11  ;;  %v5610_v11 = vunpack.c.l.b16 %v4620_v29  ;;  %v5303_v56 = vpop.permute.xlu0 %5302  ;;  %v4622_v37 = vpack.c.bf16 %v4307_v61, %v4307_v61 }
 0x89f   : > { %v5425_v12 = vpop.permute.xlu1 %5424  ;;  %v5838_v46 = vsel %vm5644_vm0, %v14392_v8, %v5303_v56  ;;  %v6182_v8 = vadd.f32 %v14919_v4, %v14818_v3 }
 0x8a0   : > { %v5874_v50 = vsel %vm5699_vm1, %v5835_v6, %v5425_v12  ;;  %v6431_v62 = vmax.f32 %v6343_v33, 0.0  ;;  %v5635_v36 = vpack.c.b16 %v5610_v11, %v5609_v13  ;;  %v17571_v13 = vld [vmem:[#allocation27_spill] sm:$0xff] }
 0x8a1   : > { %v5924_v26 = vsel %vm5736_vm2, %v5874_v50, %v5549_v41  ;;  %v5551_v50 = vpop.permute.xlu2 %5550  ;;  %v6154_v11 = vadd.f32 %v14919_v4, %v17571_v13  ;;  %v17575_v13 = vld [vmem:[#allocation13_spill] sm:$0xff] }
 0x8a2   : > { %6313 = vmatmul.bf16.gmra.mxu3 %v5924_v26  ;;  %v6466_v22 = vpack.c.bf16 %v6431_v62, %v6431_v62  ;;  %v4621_v26 = vpack.c.bf16 %v4306_v52, %v4306_v52 }
 0x8a4   : > { %v6520_v6 = vunpack.c.l.b16 %v6466_v22  ;;  %v12689_v22 = vld [vmem:[%s17442_s5 + $0x28] sm:$0xff] }
 0x8a5   : > { %v6274_v17 = vpop.f32.mrf.mxu3  ;;  %v6344_v39 = vpop.f32.mrf.mxu2  ;;  %7067 = vmatpush.bf16.msra.mxu3 %v12689_v22 }
 0x8a6   : > { %v15045_v34 = vadd.f32 %v6274_v17, %v6177_v40  ;;  %v6345_v45 = vadd.f32 %v6344_v39, %v14938_v19  ;;  %v17572_v17 = vld [vmem:[#allocation49_spill] sm:$0xff]  ;;  %v5611_v39 = vunpack.c.l.b16 %v4621_v26  ;;  %v5305_v26 = vpop.permute.xlu0 %5304 }
 0x8a8   : > { %v6432_v31 = vmax.f32 %v6345_v45, 0.0  ;;  %v5612_v45 = vunpack.c.l.b16 %v4622_v37 }
 0x8aa   : > { %v6467_v51 = vpack.c.bf16 %v6432_v31, %v6432_v31  ;;  %11079 = vmatmul.msk.bf16.gmra.mxu2 %vm5644_vm0, %v5635_v36  ;;  %v6252_v36 = vadd.f32 %v14955_v48, %v6154_v11  ;;  %v17574_v48 = vld [vmem:[#allocation14_spill] sm:$0xff]  ;;  %v4180_v11 = vmax.f32 %v17575_v13, 0.0 }
 0x8ac   : > { %v6521_v33 = vunpack.c.l.b16 %v6467_v51 }
 0x8ad   : > { %v15051_v12 = vpop.f32.mrf.mxu3  ;;  %v6347_v41 = vpop.f32.mrf.mxu2 }
 0x8ae   : > { %v15053_v2 = vpack.c.b16 %v6521_v33, %v6520_v6  ;;  %v6348_v19 = vadd.f32 %v6347_v41, %v14949_v20  ;;  %v3177_v20 = vadd.f32 %v14839_v35, %v17572_v17  ;;  %v5636_v6 = vpack.c.b16 %v5612_v45, %v5611_v39  ;;  %v17573_v41 = vld [vmem:[#allocation15_spill] sm:$0xff] }
 0x8af   : > { %v5427_v29 = vpop.permute.xlu1 %5426 }
 0x8b0   : > { %v6433_v57 = vmax.f32 %v6348_v19, 0.0  ;;  %v5876_v18 = vsel %vm5699_vm1, %v5838_v46, %v5427_v29  ;;  %v3975_v19 = vadd.f32 %v17573_v41, %v3177_v20  ;;  %v4308_v29 = vmax.f32 %v17574_v48, 0.0 }
 0x8b1   : > { %v5927_v40 = vsel %vm5736_vm2, %v5876_v18, %v5551_v50  ;;  %v4495_v41 = vpack.c.bf16 %v4180_v11, %v4180_v11 }
 0x8b2   : > { %v6468_v62 = vpack.c.bf16 %v6433_v57, %v6433_v57  ;;  %6318 = vmatmul.bf16.gmra.mxu3 %v5927_v40  ;;  %v4309_v50 = vmax.f32 %v3975_v19, 0.0  ;;  %v4623_v39 = vpack.c.bf16 %v4308_v29, %v4308_v29 }
 0x8b3   : > { %v5165_v13 = vunpack.c.l.b16 %v4495_v41 }
 0x8b4   : > { %v6522_v14 = vunpack.c.l.b16 %v6468_v62  ;;  %v17576_v62 = vld [vmem:[#allocation12_spill] sm:$0xff]  ;;  %v4624_v45 = vpack.c.bf16 %v4309_v50, %v4309_v50  ;;  %v5613_v19 = vunpack.c.l.b16 %v4623_v39 }
 0x8b5   : > { %v6279_v31 = vpop.f32.mrf.mxu3  ;;  %v6349_v51 = vpop.f32.mrf.mxu2  ;;  %v5841_v17 = vsel %vm5644_vm0, %v17576_v62, %v5305_v26  ;;  %v5183_v39 = vpack.c.b16 %v5165_v13, %v5165_v13 }
 0x8b6   : > { %v15070_v52 = vadd.f32 %v6279_v31, %v6182_v8  ;;  %v6350_v61 = vadd.f32 %v6349_v51, %v6252_v36  ;;  %v6551_v56 = vpack.c.b16 %v6522_v14, %v6521_v33  ;;  %v5553_v8 = vpop.permute.xlu2 %5552  ;;  %v17577_v51 = vld [vmem:[#allocation28_spill] sm:$0xff] }
 0x8b8   : > { %v6434_v3 = vmax.f32 %v6350_v61, 0.0  ;;  %6561 = vrot.lane.b32.xlu0 %v6551_v56, %s13043_s26 }
 0x8ba   : > { %v6469_v46 = vpack.c.bf16 %v6434_v3, %v6434_v3  ;;  %11080 = vmatmul.msk.bf16.gmra.mxu2 %vm5644_vm0, %v5636_v6  ;;  %v6187_v6 = vadd.f32 %v14919_v4, %v14846_v30  ;;  %v5614_v3 = vunpack.c.l.b16 %v4624_v45  ;;  %v5307_v30 = vpop.permute.xlu0 %5306  ;;  %v17580_v45 = vld [vmem:[#allocation16_spill] sm:$0xff] }
 0x8bc   : > { %v6523_v37 = vunpack.c.l.b16 %v6469_v46  ;;  %v5637_v62 = vpack.c.b16 %v5614_v3, %v5613_v19 }
 0x8bd   : > { %v15076_v57 = vpop.f32.mrf.mxu3  ;;  %v6352_v18 = vpop.f32.mrf.mxu2 }
 0x8be   : > { %v15078_v40 = vpack.c.b16 %v6523_v37, %v6522_v14  ;;  %v6353_v33 = vadd.f32 %v6352_v18, %v14967_v25  ;;  %v6159_v14 = vadd.f32 %v14919_v4, %v17577_v51  ;;  %v17578_v25 = vld [vmem:[#allocation50_spill] sm:$0xff]  ;;  %v5844_v51 = vsel %vm5644_vm0, %v5183_v39, %v5307_v30 }
 0x8bf   : > { %v5429_v20 = vpop.permute.xlu1 %5428  ;;  %v3182_v56 = vadd.f32 %v14839_v35, %v17578_v25 }
 0x8c0   : > { %v6435_v36 = vmax.f32 %v6353_v33, 0.0  ;;  %v5878_v22 = vsel %vm5699_vm1, %v5841_v17, %v5429_v20  ;;  %v6257_v46 = vadd.f32 %v14978_v15, %v6159_v14  ;;  %v17579_v17 = vld [vmem:[#allocation17_spill] sm:$0xff] }
 0x8c1   : > { %v5930_v31 = vsel %vm5736_vm2, %v5878_v22, %v5553_v8  ;;  %v3980_v20 = vadd.f32 %v17579_v17, %v3182_v56 }
 0x8c2   : > { %v6470_v61 = vpack.c.bf16 %v6435_v36, %v6435_v36  ;;  %6323 = vmatmul.bf16.gmra.mxu3 %v5930_v31  ;;  %v4310_v36 = vmax.f32 %v17580_v45, 0.0 }
 0x8c3   : > { %v4311_v22 = vmax.f32 %v3980_v20, 0.0 }
 0x8c4   : > { %v6524_v48 = vunpack.c.l.b16 %v6470_v61  ;;  %v4625_v41 = vpack.c.bf16 %v4310_v36, %v4310_v36  ;;  %v17583_v36 = vld [vmem:[#allocation19_spill] sm:$0xff] }
 0x8c5   : > { %v6284_v29 = vpop.f32.mrf.mxu3  ;;  %v6354_v50 = vpop.f32.mrf.mxu2  ;;  %v4626_v19 = vpack.c.bf16 %v4311_v22, %v4311_v22 }
 0x8c6   : > { %v15093_v26 = vadd.f32 %v6284_v29, %v6187_v6  ;;  %v6355_v18 = vadd.f32 %v6354_v50, %v6257_v46  ;;  %v6552_v33 = vpack.c.b16 %v6524_v48, %v6523_v37  ;;  %v5555_v6 = vpop.permute.xlu2 %5554  ;;  %v17581_v29 = vld [vmem:[#allocation29_spill] sm:$0xff] }
 0x8c7   : > { %v5431_v15 = vpop.permute.xlu1 %5430  ;;  %v6164_v50 = vadd.f32 %v14919_v4, %v17581_v29  ;;  %v5616_v17 = vunpack.c.l.b16 %v4626_v19 }
 0x8c8   : > { %v6436_v8 = vmax.f32 %v6355_v18, 0.0  ;;  %6563 = vrot.lane.b32.xlu1 %v6552_v33, %s13043_s26  ;;  %v5880_v25 = vsel %vm5699_vm1, %v5844_v51, %v5431_v15  ;;  %v17582_v33 = vld [vmem:[#allocation51_spill] sm:$0xff] }
 0x8c9   : > { %v5933_v46 = vsel %vm5736_vm2, %v5880_v25, %v5555_v6  ;;  %v3187_v13 = vadd.f32 %v14839_v35, %v17582_v33 }
 0x8ca   : > { %v6471_v11 = vpack.c.bf16 %v6436_v8, %v6436_v8  ;;  %11081 = vmatmul.msk.bf16.gmra.mxu2 %vm5644_vm0, %v5637_v62  ;;  %v5615_v62 = vunpack.c.l.b16 %v4625_v41 }
 0x8cb   : > { %v3985_v22 = vadd.f32 %v17583_v36, %v3187_v13 }
 0x8cc   : > { %v6525_v31 = vunpack.c.l.b16 %v6471_v11  ;;  %v5638_v45 = vpack.c.b16 %v5616_v17, %v5615_v62  ;;  %v6197_v17 = vadd.f32 %v14919_v4, %v14882_v49  ;;  %v17588_v49 = vld [vmem:[#allocation20_spill] sm:$0xff] }
 0x8cd   : > { %v15100_v37 = vpop.f32.mrf.mxu3  ;;  %v6357_v14 = vpop.f32.mrf.mxu2 }
 0x8ce   : > { %v15102_v61 = vpack.c.b16 %v6525_v31, %v6524_v48  ;;  %v6358_v56 = vadd.f32 %v6357_v14, %v14990_v42  ;;  %v6192_v48 = vadd.f32 %v14919_v4, %v14863_v0  ;;  %v6262_v42 = vadd.f32 %v14997_v44, %v6164_v50  ;;  %v17584_v0 = vld [vmem:[#allocation18_spill] sm:$0xff] }
 0x8cf   : > { %v4312_v25 = vmax.f32 %v17584_v0, 0.0 }
 0x8d0   : > { %v6437_v3 = vmax.f32 %v6358_v56, 0.0  ;;  %v4313_v56 = vmax.f32 %v3985_v22, 0.0 }
 0x8d2   : > { %v6472_v18 = vpack.c.bf16 %v6437_v3, %v6437_v3  ;;  %6328 = vmatmul.bf16.gmra.mxu3 %v5933_v46  ;;  %v12688_v3 = vld [vmem:[%s17442_s5 + $0x20] sm:$0xff]  ;;  %v4627_v46 = vpack.c.bf16 %v4312_v25, %v4312_v25  ;;  %v4628_v29 = vpack.c.bf16 %v4313_v56, %v4313_v56  ;;  %v4314_v56 = vmax.f32 %v17588_v49, 0.0 }
 0x8d3   : > { %7068 = vmatpush.bf16.msra.mxu3 %v12688_v3 }
 0x8d4   : > { %v6526_v20 = vunpack.c.l.b16 %v6472_v18  ;;  %v17585_v18 = vld [vmem:[#allocation31_spill] sm:$0xff] }
 0x8d5   : > { %v6289_v8 = vpop.f32.mrf.mxu3  ;;  %v6359_v30 = vpop.f32.mrf.mxu2  ;;  %v6169_v33 = vadd.f32 %v14919_v4, %v17585_v18 }
 0x8d6   : > { %v15114_v11 = vadd.f32 %v6289_v8, %v6192_v48  ;;  %v6360_v39 = vadd.f32 %v6359_v30, %v6262_v42  ;;  %v6553_v15 = vpack.c.b16 %v6526_v20, %v6525_v31  ;;  %v17586_v48 = vld [vmem:[#allocation53_spill] sm:$0xff]  ;;  %v5617_v42 = vunpack.c.l.b16 %v4627_v46 }
 0x8d7   : > { %v3192_v62 = vadd.f32 %v14839_v35, %v17586_v48  ;;  %v17589_v48 = vld [vmem:[#allocation54_spill] sm:$0xff] }
 0x8d8   : > { %v6438_v51 = vmax.f32 %v6360_v39, 0.0  ;;  %6565 = vrot.lane.b32.xlu2 %v6553_v15, %s13043_s26 }
 0x8da   : > { %v6473_v14 = vpack.c.bf16 %v6438_v51, %v6438_v51  ;;  %11082 = vmatmul.msk.bf16.gmra.mxu2 %vm5644_vm0, %v5638_v45  ;;  %v17587_v51 = vld [vmem:[#allocation21_spill] sm:$0xff] }
 0x8dc   : > { %v6527_v44 = vunpack.c.l.b16 %v6473_v14  ;;  %v3990_v14 = vadd.f32 %v17587_v51, %v3192_v62  ;;  %v3197_v62 = vadd.f32 %v14839_v35, %v17589_v48 }
 0x8dd   : > { %v15120_v6 = vpop.f32.mrf.mxu3  ;;  %v6362_v41 = vpop.f32.mrf.mxu2 }
 0x8de   : > { %v15122_v19 = vpack.c.b16 %v6527_v44, %v6526_v20  ;;  %v6363_v31 = vadd.f32 %v6362_v41, %v15009_v7  ;;  %v5618_v7 = vunpack.c.l.b16 %v4628_v29  ;;  %v6267_v20 = vadd.f32 %v15016_v21, %v6169_v33 }
 0x8df   : > { %v4315_v41 = vmax.f32 %v3990_v14, 0.0  ;;  %v4629_v29 = vpack.c.bf16 %v4314_v56, %v4314_v56  ;;  %v6174_v33 = vadd.f32 %v14919_v4, %v14794_v32  ;;  %v17590_v32 = vld [vmem:[#allocation23_spill] sm:$0xff] }
 0x8e0   : > { %v6439_v50 = vmax.f32 %v6363_v31, 0.0  ;;  %v5639_v22 = vpack.c.b16 %v5618_v7, %v5617_v42  ;;  %v3995_v51 = vadd.f32 %v17590_v32, %v3197_v62 }
 0x8e1   : > { %v5619_v42 = vunpack.c.l.b16 %v4629_v29  ;;  %v12686_v29 = vld [vmem:[%s17442_s5 + $0x10] sm:$0xff] }
 0x8e2   : > { %v6474_v13 = vpack.c.bf16 %v6439_v50, %v6439_v50  ;;  %v4630_v50 = vpack.c.bf16 %v4315_v41, %v4315_v41  ;;  %v4317_v49 = vmax.f32 %v3995_v51, 0.0 }
 0x8e4   : > { %v6528_v8 = vunpack.c.l.b16 %v6474_v13  ;;  %v5620_v7 = vunpack.c.l.b16 %v4630_v50 }
 0x8e5   : > { %v6294_v30 = vpop.f32.mrf.mxu3  ;;  %v6364_v39 = vpop.f32.mrf.mxu2 }
 0x8e6   : > { %v15135_v15 = vadd.f32 %v6294_v30, %v6197_v17  ;;  %v6365_v45 = vadd.f32 %v6364_v39, %v6267_v20  ;;  %v6554_v36 = vpack.c.b16 %v6528_v8, %v6527_v44  ;;  %v6202_v17 = vadd.f32 %v14919_v4, %v14895_v54  ;;  %v12687_v54 = vld [vmem:[%s17442_s5 + $0x18] sm:$0xff] }
 0x8e7   : > { %v6272_v20 = vadd.f32 %v15034_v55, %v6174_v33  ;;  %v17591_v55 = vld [vmem:[#allocation22_spill] sm:$0xff]  ;;  %7069 = vmatpush.bf16.msra.mxu3 %v12687_v54 }
 0x8e8   : > { %v6440_v0 = vmax.f32 %v6365_v45, 0.0  ;;  %6567 = vrot.lane.b32.xlu0 %v6554_v36, %s13043_s26 }
 0x8ea   : > { %v6475_v25 = vpack.c.bf16 %v6440_v0, %v6440_v0  ;;  %11083 = vmatmul.msk.bf16.gmra.mxu2 %vm5644_vm0, %v5639_v22  ;;  %v5640_v22 = vpack.c.b16 %v5620_v7, %v5619_v42  ;;  %v6207_v7 = vadd.f32 %v14919_v4, %v14911_v63 }
 0x8eb   : > { %7070 = vmatpush.bf16.msra.mxu3 %v12686_v29 }
 0x8ec   : > { %v6529_v21 = vunpack.c.l.b16 %v6475_v25  ;;  %v4316_v25 = vmax.f32 %v17591_v55, 0.0  ;;  %v17595_v55 = vld [vmem:[#allocation24_spill] sm:$0xff] }
 0x8ed   : > { %v15141_v31 = vpop.f32.mrf.mxu3  ;;  %v6367_v3 = vpop.f32.mrf.mxu2 }
 0x8ee   : > { %v15143_v46 = vpack.c.b16 %v6529_v21, %v6528_v8  ;;  %v6368_v44 = vadd.f32 %v6367_v3, %v15029_v10  ;;  %v4631_v50 = vpack.c.bf16 %v4316_v25, %v4316_v25  ;;  %v4318_v25 = vmax.f32 %v17595_v55, 0.0 }
 0x8f0   : > { %v6441_v18 = vmax.f32 %v6368_v44, 0.0 }
 0x8f2   : > { %v6476_v13 = vpack.c.bf16 %v6441_v18, %v6441_v18  ;;  %v4632_v18 = vpack.c.bf16 %v4317_v49, %v4317_v49 }
 0x8f4   : > { %v6530_v8 = vunpack.c.l.b16 %v6476_v13  ;;  %v17592_v13 = vld [vmem:[#allocation32_spill] sm:$0xff] }
 0x8f5   : > { %v6299_v30 = vpop.f32.mrf.mxu3  ;;  %v6369_v10 = vpop.f32.mrf.mxu2  ;;  %v6179_v48 = vadd.f32 %v14919_v4, %v17592_v13 }
 0x8f6   : > { %v15153_v39 = vadd.f32 %v6299_v30, %v6202_v17  ;;  %v6370_v45 = vadd.f32 %v6369_v10, %v6272_v20  ;;  %v6555_v36 = vpack.c.b16 %v6530_v8, %v6529_v21  ;;  %v17593_v17 = vld [vmem:[#allocation55_spill] sm:$0xff]  ;;  %v5621_v20 = vunpack.c.l.b16 %v4631_v50 }
 0x8f7   : > { %v3202_v42 = vadd.f32 %v14839_v35, %v17593_v17  ;;  %v6277_v30 = vadd.f32 %v15051_v12, %v6179_v48  ;;  %v12684_v35 = vld [vmem:[%s17442_s5] sm:$0xff] }
 0x8f8   : > { %v6442_v14 = vmax.f32 %v6370_v45, 0.0  ;;  %6569 = vrot.lane.b32.xlu1 %v6555_v36, %s13043_s26 }
 0x8fa   : > { %v6477_v0 = vpack.c.bf16 %v6442_v14, %v6442_v14  ;;  %11084 = vmatmul.msk.bf16.gmra.mxu2 %vm5644_vm0, %v5640_v22  ;;  %v17594_v14 = vld [vmem:[#allocation25_spill] sm:$0xff] }
 0x8fc   : > { %v6531_v56 = vunpack.c.l.b16 %v6477_v0  ;;  %v4000_v0 = vadd.f32 %v17594_v14, %v3202_v42 }
 0x8fd   : > { %v15162_v41 = vpop.f32.mrf.mxu3  ;;  %v6372_v21 = vpop.f32.mrf.mxu2 }
 0x8fe   : > { %v15164_v3 = vpack.c.b16 %v6531_v56, %v6530_v8  ;;  %v6373_v44 = vadd.f32 %v6372_v21, %v15045_v34  ;;  %v12685_v34 = vld [vmem:[%s17442_s5 + $0x8] sm:$0xff]  ;;  %v5622_v8 = vunpack.c.l.b16 %v4632_v18  ;;  %v4319_v49 = vmax.f32 %v4000_v0, 0.0  ;;  %v12707_v18 = vld [vmem:[%s17442_s5 + $0xb8] sm:$0xff] }
 0x8ff   : > { %7071 = vmatpush.bf16.msra.mxu3 %v12685_v34  ;;  %7173 = vmatpush.bf16.msrb.mxu2 %v12707_v18  ;;  %v6212_v34 = vadd.f32 %v14919_v4, %v14936_v38 }
 0x900   : > { %v6443_v33 = vmax.f32 %v6373_v44, 0.0  ;;  %v5641_v63 = vpack.c.b16 %v5622_v8, %v5621_v20  ;;  %v4634_v13 = vpack.c.bf16 %v4319_v49, %v4319_v49 }
 0x902   : > { %v6478_v62 = vpack.c.bf16 %v6443_v33, %v6443_v33  ;;  %v4633_v33 = vpack.c.bf16 %v4318_v25, %v4318_v25  ;;  %v6189_v25 = vadd.f32 %v14919_v4, %v14854_v16 }
 0x903   : > { %7072 = vmatpush.bf16.msra.mxu3 %v12684_v35  ;;  %v17596_v35 = vld [vmem:[#allocation26_spill] sm:$0xff] }
 0x904   : > { %v6532_v10 = vunpack.c.l.b16 %v6478_v62  ;;  %v6184_v62 = vadd.f32 %v14919_v4, %v14829_v27  ;;  %v5623_v42 = vunpack.c.l.b16 %v4633_v33 }
 0x905   : > { %v6304_v45 = vpop.f32.mrf.mxu3  ;;  %v6374_v36 = vpop.f32.mrf.mxu2 }
 0x906   : > { %v15180_v22 = vadd.f32 %v6304_v45, %v6207_v7  ;;  %v6375_v32 = vadd.f32 %v6374_v36, %v6277_v30  ;;  %v6556_v51 = vpack.c.b16 %v6532_v10, %v6531_v56  ;;  %v5624_v7 = vunpack.c.l.b16 %v4634_v13 }
 0x907   : > { %v6282_v20 = vadd.f32 %v15076_v57, %v6184_v62 }
 0x908   : > { %v6444_v54 = vmax.f32 %v6375_v32, 0.0  ;;  %6571 = vrot.lane.b32.xlu2 %v6556_v51, %s13043_s26  ;;  %v5642_v32 = vpack.c.b16 %v5624_v7, %v5623_v42 }
 0x90a   : > { %v6479_v12 = vpack.c.bf16 %v6444_v54, %v6444_v54  ;;  %11085 = vmatmul.msk.bf16.gmra.mxu2 %vm5644_vm0, %v5641_v63  ;;  %v4320_v63 = vmax.f32 %v17596_v35, 0.0 }
 0x90c   : > { %v6533_v21 = vunpack.c.l.b16 %v6479_v12  ;;  %v4635_v12 = vpack.c.bf16 %v4320_v63, %v4320_v63 }
 0x90d   : > { %v15189_v44 = vpop.f32.mrf.mxu3  ;;  %v6377_v56 = vpop.f32.mrf.mxu2 }
 0x90e   : > { %v15191_v29 = vpack.c.b16 %v6533_v21, %v6532_v10  ;;  %v6378_v50 = vadd.f32 %v6377_v56, %v15070_v52  ;;  %v6217_v56 = vadd.f32 %v14919_v4, %v14953_v53 }
 0x910   : > { %v6445_v48 = vmax.f32 %v6378_v50, 0.0  ;;  %v6287_v50 = vadd.f32 %v15100_v37, %v6189_v25  ;;  %v12703_v25 = vld [vmem:[%s17442_s5 + $0x98] sm:$0xff] }
 0x912   : > { %v6480_v17 = vpack.c.bf16 %v6445_v48, %v6445_v48 }
 0x914   : > { %v6534_v52 = vunpack.c.l.b16 %v6480_v17 }
 0x915   : > { %v6309_v8 = vpop.f32.mrf.mxu3  ;;  %v6379_v30 = vpop.f32.mrf.mxu2 }
 0x916   : > { %v15202_v10 = vadd.f32 %v6309_v8, %v6212_v34  ;;  %v6380_v45 = vadd.f32 %v6379_v30, %v6282_v20  ;;  %v6557_v36 = vpack.c.b16 %v6534_v52, %v6533_v21  ;;  %v5625_v21 = vunpack.c.l.b16 %v4635_v12  ;;  %v12706_v30 = vld [vmem:[%s17442_s5 + $0xb0] sm:$0xff] }
 0x917   : > { %7174 = vmatpush.bf16.msrb.mxu2 %v12706_v30  ;;  %v12700_v30 = vld [vmem:[%s17442_s5 + $0x80] sm:$0xff] }
 0x918   : > { %v6446_v51 = vmax.f32 %v6380_v45, 0.0  ;;  %6573 = vrot.lane.b32.xlu0 %v6557_v36, %s13043_s26  ;;  %v6194_v36 = vadd.f32 %v14919_v4, %v14872_v59 }
 0x91a   : > { %v6481_v27 = vpack.c.bf16 %v6446_v51, %v6446_v51  ;;  %11086 = vmatmul.msk.bf16.gmra.mxu2 %vm5644_vm0, %v5642_v32  ;;  %v6222_v51 = vadd.f32 %v14919_v4, %v14976_v43 }
 0x91c   : > { %v6535_v14 = vunpack.c.l.b16 %v6481_v27  ;;  %v6292_v27 = vadd.f32 %v15120_v6, %v6194_v36 }
 0x91d   : > { %v15207_v38 = vpop.f32.mrf.mxu3  ;;  %v6382_v57 = vpop.f32.mrf.mxu2 }
 0x91e   : > { %v15209_v0 = vpack.c.b16 %v6535_v14, %v6534_v52  ;;  %v6383_v54 = vadd.f32 %v6382_v57, %v15093_v26  ;;  %v5643_v26 = vpack.c.b16 %v5625_v21, %v5625_v21 }
 0x920   : > { %v6447_v55 = vmax.f32 %v6383_v54, 0.0  ;;  %v12704_v54 = vld [vmem:[%s17442_s5 + $0xa0] sm:$0xff] }
 0x922   : > { %v6482_v49 = vpack.c.bf16 %v6447_v55, %v6447_v55 }
 0x924   : > { %v6536_v18 = vunpack.c.l.b16 %v6482_v49 }
 0x925   : > { %v6314_v33 = vpop.f32.mrf.mxu3  ;;  %v6384_v13 = vpop.f32.mrf.mxu2 }
 0x926   : > { %v15217_v48 = vadd.f32 %v6314_v33, %v6217_v56  ;;  %v6385_v62 = vadd.f32 %v6384_v13, %v6287_v50  ;;  %v6558_v17 = vpack.c.b16 %v6536_v18, %v6535_v14  ;;  %v12702_v13 = vld [vmem:[%s17442_s5 + $0x90] sm:$0xff] }
 0x928   : > { %v6448_v42 = vmax.f32 %v6385_v62, 0.0  ;;  %6575 = vrot.lane.b32.xlu1 %v6558_v17, %s13043_s26  ;;  %v6199_v17 = vadd.f32 %v14919_v4, %v14887_v60 }
 0x92a   : > { %v6483_v7 = vpack.c.bf16 %v6448_v42, %v6448_v42  ;;  %11087 = vmatmul.msk.bf16.gmra.mxu2 %vm5644_vm0, %v5643_v26  ;;  %v6562_v16 = vpop.permute.xlu0 %6561  ;;  %v6227_v42 = vadd.f32 %v14919_v4, %v14995_v1 }
 0x92b   : > { %v6655_v53 = vsel %vm5699_vm1, %v15053_v2, %v6562_v16  ;;  %v12705_v2 = vld [vmem:[%s17442_s5 + $0xa8] sm:$0xff] }
 0x92c   : > { %v6537_v34 = vunpack.c.l.b16 %v6483_v7  ;;  %7073 = vmatmul.bf16.vlgmr.msra.gmra.mxu3 %v6655_v53  ;;  %7175 = vmatpush.bf16.msrb.mxu2 %v12705_v2  ;;  %v6297_v7 = vadd.f32 %v15141_v31, %v6199_v17 }
 0x92d   : > { %v15223_v37 = vpop.f32.mrf.mxu3  ;;  %v6387_v20 = vpop.f32.mrf.mxu2 }
 0x92e   : > { %v15225_v52 = vpack.c.b16 %v6537_v34, %v6536_v18  ;;  %v6388_v8 = vadd.f32 %v6387_v20, %v15114_v11 }
 0x930   : > { %v6449_v45 = vmax.f32 %v6388_v8, 0.0  ;;  %7176 = vmatpush.bf16.msrb.mxu2 %v12704_v54  ;;  %v6232_v54 = vadd.f32 %v14919_v4, %v15014_v47 }
 0x932   : > { %v6484_v32 = vpack.c.bf16 %v6449_v45, %v6449_v45  ;;  %v6566_v45 = vpop.permute.xlu2 %6565 }
 0x933   : > { %v6663_v31 = vsel %vm5699_vm1, %v15102_v61, %v6566_v45 }
 0x934   : > { %v15239_v11 = vunpack.c.l.b16 %v6484_v32  ;;  %7177 = vmatpush.bf16.msrb.mxu2 %v12703_v25 }
 0x935   : > { %v6319_v35 = vpop.f32.mrf.mxu3  ;;  %v6389_v63 = vpop.f32.mrf.mxu2 }
 0x936   : > { %v15241_v14 = vadd.f32 %v6319_v35, %v6222_v51  ;;  %v6390_v57 = vadd.f32 %v6389_v63, %v6292_v27  ;;  %v6559_v59 = vpack.c.b16 %v15239_v11, %v6537_v34 }
 0x938   : > { %v6450_v12 = vmax.f32 %v6390_v57, 0.0  ;;  %6577 = vrot.lane.b32.xlu2 %v6559_v59, %s13043_s26  ;;  %7178 = vmatpush.bf16.msrb.mxu2 %v12702_v13  ;;  %v6204_v57 = vadd.f32 %v14919_v4, %v14904_v5 }
 0x93a   : > { %v6485_v43 = vpack.c.bf16 %v6450_v12, %v6450_v12  ;;  %v6564_v6 = vpop.permute.xlu1 %6563  ;;  %v6302_v12 = vadd.f32 %v15162_v41, %v6204_v57 }
 0x93b   : > { %v6659_v55 = vsel %vm5699_vm1, %v15078_v40, %v6564_v6 }
 0x93c   : > { %v6550_v49 = vunpack.c.l.b16 %v6485_v43  ;;  %7078 = vmatmul.bf16.gmra.mxu3 %v6659_v55 }
 0x93d   : > { %v15253_v21 = vpop.f32.mrf.mxu3  ;;  %v6392_v56 = vpop.f32.mrf.mxu2 }
 0x93e   : > { %v6393_v50 = vadd.f32 %v6392_v56, %v15135_v15  ;;  %v6560_v18 = vpack.c.b16 %v6550_v49, %v6550_v49  ;;  %v15257_v33 = vpack.c.b16 %v6550_v49, %v15239_v11  ;;  %v12701_v15 = vld [vmem:[%s17442_s5 + $0x88] sm:$0xff] }
 0x93f   : > { %7179 = vmatpush.bf16.msrb.mxu2 %v12701_v15  ;;  %v15308_v15 = vld [vmem:[%s17441_s4] ss:$0 sm:$0xff] }
 0x940   : > { %v6451_v62 = vmax.f32 %v6393_v50, 0.0  ;;  %6579 = vrot.lane.b32.xlu0 %v6560_v18, %s13043_s26  ;;  %v6214_v57 = vadd.f32 %v15308_v15, %v14947_v24 }
 0x942   : > { %v6486_v26 = vpack.c.bf16 %v6451_v62, %v6451_v62 }
 0x943   : > { %7180 = vmatpush.bf16.msrb.mxu2 %v12700_v30 }
 0x944   : > { %v15271_v16 = vunpack.c.l.b16 %v6486_v26 }
 0x945   : > { %v6324_v53 = vpop.f32.mrf.mxu3  ;;  %v6394_v34 = vpop.f32.mrf.mxu2 }
 0x946   : > { %v15273_v20 = vadd.f32 %v6324_v53, %v6227_v42  ;;  %v6395_v8 = vadd.f32 %v6394_v34, %v6297_v7  ;;  %v6595_v60 = vpack.c.b16 %v15271_v16, %v6550_v49 }
 0x948   : > { %v6452_v36 = vmax.f32 %v6395_v8, 0.0  ;;  %6599 = vrot.lane.b32.xlu1 %v6595_v60, %s13043_s26 }
 0x94a   : > { %v6487_v1 = vpack.c.bf16 %v6452_v36, %v6452_v36 }
 0x94c   : > { %v6590_v32 = vunpack.c.l.b16 %v6487_v1  ;;  %7083 = vmatmul.bf16.gmra.mxu3 %v6663_v31 }
 0x94d   : > { %v15282_v2 = vpop.f32.mrf.mxu3  ;;  %v6397_v51 = vpop.f32.mrf.mxu2 }
 0x94e   : > { %v15285_v27 = vpack.c.b16 %v6590_v32, %v15271_v16  ;;  %v6398_v35 = vadd.f32 %v6397_v51, %v15153_v39 }
 0x950   : > { %v6453_v63 = vmax.f32 %v6398_v35, 0.0 }
 0x952   : > { %v6488_v59 = vpack.c.bf16 %v6453_v63, %v6453_v63 }
 0x954   : > { %v6591_v43 = vunpack.c.l.b16 %v6488_v59 }
 0x955   : > { %v6329_v6 = vpop.f32.mrf.mxu3  ;;  %v6399_v55 = vpop.f32.mrf.mxu2 }
 0x956   : > { %v15293_v25 = vadd.f32 %v6329_v6, %v6232_v54  ;;  %v6400_v49 = vadd.f32 %v6399_v55, %v6302_v12  ;;  %v6596_v56 = vpack.c.b16 %v6591_v43, %v6590_v32  ;;  %v6312_v54 = vadd.f32 %v15207_v38, %v6214_v57 }
 0x958   : > { %v6454_v50 = vmax.f32 %v6400_v49, 0.0  ;;  %6601 = vrot.lane.b32.xlu2 %v6596_v56, %s13043_s26 }
 0x95a   : > { %v6489_v39 = vpack.c.bf16 %v6454_v50, %v6454_v50  ;;  %v6568_v18 = vpop.permute.xlu0 %6567 }
 0x95b   : > { %v15298_v5 = vsel %vm5699_vm1, %v15078_v40, %v6568_v18  ;;  %v6667_v4 = vsel %vm5699_vm1, %v15122_v19, %v6568_v18  ;;  %v6209_v40 = vadd.f32 %v15308_v15, %v14926_v23 }
 0x95c   : > { %v6592_v47 = vunpack.c.l.b16 %v6489_v39  ;;  %7087 = vmatmul.bf16.gmra.mxu3 %v6667_v4  ;;  %v6219_v4 = vadd.f32 %v15308_v15, %v14965_v9 }
 0x95d   : > { %v6331_v41 = vpop.f32.mrf.mxu3  ;;  %v6402_v13 = vpop.f32.mrf.mxu2  ;;  %v6307_v34 = vadd.f32 %v15189_v44, %v6209_v40 }
 0x95e   : > { %v15302_v62 = vpack.c.b16 %v6592_v47, %v6591_v43  ;;  %v6403_v17 = vadd.f32 %v6402_v13, %v15180_v22  ;;  %v6317_v41 = vadd.f32 %v15223_v37, %v6219_v4 }
 0x960   : > { %v6455_v26 = vmax.f32 %v6403_v17, 0.0 }
 0x962   : > { %v6490_v42 = vpack.c.bf16 %v6455_v26, %v6455_v26  ;;  %v6572_v7 = vpop.permute.xlu2 %6571 }
 0x963   : > { %v15314_v53 = vsel %vm5699_vm1, %v15122_v19, %v6572_v7  ;;  %v6675_v49 = vsel %vm5699_vm1, %v15164_v3, %v6572_v7 }
 0x964   : > { %v6593_v8 = vunpack.c.l.b16 %v6490_v42 }
 0x965   : > { %v6404_v60 = vpop.f32.mrf.mxu2 }
 0x966   : > { %v6405_v22 = vadd.f32 %v6404_v60, %v6307_v34  ;;  %v6597_v30 = vpack.c.b16 %v6593_v8, %v6592_v47 }
 0x968   : > { %v6456_v45 = vmax.f32 %v6405_v22, 0.0  ;;  %6603 = vrot.lane.b32.xlu0 %v6597_v30, %s13043_s26 }
 0x96a   : > { %v6491_v36 = vpack.c.bf16 %v6456_v45, %v6456_v45  ;;  %v6570_v1 = vpop.permute.xlu1 %6569  ;;  %v12698_v45 = vld [vmem:[%s17442_s5 + $0x70] sm:$0xff] }
 0x96b   : > { %v6671_v23 = vsel %vm5699_vm1, %v15143_v46, %v6570_v1  ;;  %v15322_v31 = vsel %vm5699_vm1, %v15102_v61, %v6570_v1  ;;  %v6224_v1 = vadd.f32 %v15308_v15, %v14988_v28  ;;  %v12696_v28 = vld [vmem:[%s17442_s5 + $0x60] sm:$0xff] }
 0x96c   : > { %v6594_v19 = vunpack.c.l.b16 %v6491_v36  ;;  %7091 = vmatmul.bf16.gmra.mxu3 %v6671_v23  ;;  %7181 = vmatmul.bf16.vlgmr.msrb.gmra.mxu2 %v6671_v23 }
 0x96d   : > { %v6407_v44 = vpop.f32.mrf.mxu2 }
 0x96e   : > { %v6408_v32 = vadd.f32 %v6407_v44, %v15202_v10  ;;  %v6598_v51 = vpack.c.b16 %v6594_v19, %v6594_v19  ;;  %v15325_v35 = vpack.c.b16 %v6594_v19, %v6593_v8  ;;  %v12699_v8 = vld [vmem:[%s17442_s5 + $0x78] sm:$0xff] }
 0x96f   : > { %7119 = vmatpush.bf16.msrb.mxu3 %v12699_v8 }
 0x970   : > { %v6457_v63 = vmax.f32 %v6408_v32, 0.0  ;;  %6605 = vrot.lane.b32.xlu2 %v6598_v51, %s13043_s26 }
 0x972   : > { %v6492_v59 = vpack.c.bf16 %v6457_v63, %v6457_v63 }
 0x973   : > { %7120 = vmatpush.bf16.msrb.mxu3 %v12698_v45 }
 0x974   : > { %v15331_v61 = vunpack.c.l.b16 %v6492_v59 }
 0x975   : > { %v6409_v12 = vpop.f32.mrf.mxu2 }
 0x976   : > { %v6410_v43 = vadd.f32 %v6409_v12, %v6312_v54  ;;  %v6615_v6 = vpack.c.b16 %v15331_v61, %v6594_v19  ;;  %v12697_v19 = vld [vmem:[%s17442_s5 + $0x68] sm:$0xff] }
 0x977   : > { %7121 = vmatpush.bf16.msrb.mxu3 %v12697_v19 }
 0x978   : > { %v6458_v55 = vmax.f32 %v6410_v43, 0.0  ;;  %6617 = vrot.lane.b32.xlu1 %v6615_v6, %s13043_s26 }
 0x97a   : > { %v6493_v10 = vpack.c.bf16 %v6458_v55, %v6458_v55 }
 0x97b   : > { %7122 = vmatpush.bf16.msrb.mxu3 %v12696_v28 }
 0x97c   : > { %v6614_v56 = vunpack.c.l.b16 %v6493_v10  ;;  %7096 = vmatmul.bf16.gmra.mxu3 %v6675_v49  ;;  %7186 = vmatmul.bf16.gmra.mxu2 %v6675_v49 }
 0x97d   : > { %v6412_v24 = vpop.f32.mrf.mxu2 }
 0x97e   : > { %v6413_v50 = vadd.f32 %v6412_v24, %v15217_v48  ;;  %v6616_v38 = vpack.c.b16 %v6614_v56, %v6614_v56  ;;  %v15339_v39 = vpack.c.b16 %v6614_v56, %v15331_v61 }
 0x980   : > { %v6459_v18 = vmax.f32 %v6413_v50, 0.0  ;;  %6619 = vrot.lane.b32.xlu0 %v6616_v38, %s13043_s26  ;;  %v6229_v50 = vadd.f32 %v15308_v15, %v15007_v58 }
 0x982   : > { %v6494_v47 = vpack.c.bf16 %v6459_v18, %v6459_v18  ;;  %v6327_v18 = vadd.f32 %v15282_v2, %v6229_v50 }
 0x984   : > { %v6626_v13 = vunpack.c.l.b16 %v6494_v47 }
 0x985   : > { %v6414_v17 = vpop.f32.mrf.mxu2 }
 0x986   : > { %v6415_v26 = vadd.f32 %v6414_v17, %v6317_v41  ;;  %v6637_v40 = vpack.c.b16 %v6626_v13, %v6614_v56  ;;  %v12694_v56 = vld [vmem:[%s17442_s5 + $0x50] sm:$0xff] }
 0x988   : > { %v6460_v42 = vmax.f32 %v6415_v26, 0.0  ;;  %6641 = vrot.lane.b32.xlu1 %v6637_v40, %s13043_s26 }
 0x98a   : > { %v6495_v48 = vpack.c.bf16 %v6460_v42, %v6460_v42  ;;  %v6574_v7 = vpop.permute.xlu0 %6573 }
 0x98b   : > { %v6679_v34 = vsel %vm5699_vm1, %v15191_v29, %v6574_v7  ;;  %v15353_v9 = vsel %vm5699_vm1, %v15143_v46, %v6574_v7 }
 0x98c   : > { %v6627_v37 = vunpack.c.l.b16 %v6495_v48  ;;  %7101 = vmatmul.bf16.gmra.mxu3 %v6679_v34  ;;  %7191 = vmatmul.bf16.gmra.mxu2 %v6679_v34 }
 0x98d   : > { %v6417_v60 = vpop.f32.mrf.mxu2 }
 0x98e   : > { %v15355_v22 = vpack.c.b16 %v6627_v37, %v6626_v13  ;;  %v6418_v30 = vadd.f32 %v6417_v60, %v15241_v14  ;;  %v6322_v14 = vadd.f32 %v15253_v21, %v6224_v1  ;;  %v12695_v21 = vld [vmem:[%s17442_s5 + $0x58] sm:$0xff]  ;;  %v12692_v13 = vld [vmem:[%s17442_s5 + $0x40] sm:$0xff]  ;;  %v6548_v60 = vpack.c.b16 %v15239_v11, %v15239_v11 }
 0x98f   : > { %7123 = vmatpush.bf16.msrb.mxu3 %v12695_v21 }
 0x990   : > { %v6461_v36 = vmax.f32 %v6418_v30, 0.0 }
 0x992   : > { %v6496_v46 = vpack.c.bf16 %v6461_v36, %v6461_v36  ;;  %v6578_v23 = vpop.permute.xlu2 %6577 }
 0x993   : > { %v15368_v44 = vsel %vm5699_vm1, %v15191_v29, %v6578_v23  ;;  %7124 = vmatpush.bf16.msrb.mxu3 %v12694_v56  ;;  %v15409_v58 = vsel %vm5699_vm1, %v15225_v52, %v6578_v23  ;;  %v6612_v56 = vpack.c.b16 %v15331_v61, %v15331_v61 }
 0x994   : > { %v6628_v32 = vunpack.c.l.b16 %v6496_v46 }
 0x995   : > { %v6419_v51 = vpop.f32.mrf.mxu2 }
 0x996   : > { %v6420_v63 = vadd.f32 %v6419_v51, %v6322_v14  ;;  %v6638_v57 = vpack.c.b16 %v6628_v32, %v6627_v37  ;;  %v12719_v51 = vld [vmem:[%s17442_s5 + $0x118] sm:$0xff] }
 0x997   : > { %7285 = vmatpush.bf16.msra.mxu2 %v12719_v51 }
 0x998   : > { %v6462_v59 = vmax.f32 %v6420_v63, 0.0  ;;  %6643 = vrot.lane.b32.xlu2 %v6638_v57, %s13043_s26  ;;  %v12718_v63 = vld [vmem:[%s17442_s5 + $0x110] sm:$0xff]  ;;  %v12717_v57 = vld [vmem:[%s17442_s5 + $0x108] sm:$0xff] }
 0x99a   : > { %v6497_v54 = vpack.c.bf16 %v6462_v59, %v6462_v59  ;;  %v6576_v12 = vpop.permute.xlu1 %6575 }
 0x99b   : > { %v15377_v29 = vsel %vm5699_vm1, %v15209_v0, %v6576_v12  ;;  %v15384_v43 = vsel %vm5699_vm1, %v15164_v3, %v6576_v12  ;;  %v12693_v3 = vld [vmem:[%s17442_s5 + $0x48] sm:$0xff]  ;;  %7286 = vmatpush.bf16.msra.mxu2 %v12718_v63 }
 0x99c   : > { %v6629_v6 = vunpack.c.l.b16 %v6497_v54  ;;  %7104 = vmatmul.bf16.gmra.mxu3 %v15377_v29  ;;  %7195 = vmatmul.bf16.gmra.mxu2 %v15377_v29 }
 0x99d   : > { %v6422_v55 = vpop.f32.mrf.mxu2  ;;  %7125 = vmatpush.bf16.msrb.mxu3 %v12693_v3 }
 0x99e   : > { %v15388_v10 = vpack.c.b16 %v6629_v6, %v6628_v32  ;;  %v6423_v49 = vadd.f32 %v6422_v55, %v15273_v20 }
 0x99f   : > { %7287 = vmatpush.bf16.msra.mxu2 %v12717_v57 }
 0x9a0   : > { %v6463_v24 = vmax.f32 %v6423_v49, 0.0 }
 0x9a1   : > { %7126 = vmatpush.bf16.msrb.mxu3 %v12692_v13 }
 0x9a2   : > { %v6498_v38 = vpack.c.bf16 %v6463_v24, %v6463_v24 }
 0x9a4   : > { %v15400_v4 = vunpack.c.l.b16 %v6498_v38 }
 0x9a5   : > { %v6424_v47 = vpop.f32.mrf.mxu2 }
 0x9a6   : > { %v6425_v20 = vadd.f32 %v6424_v47, %v6327_v18  ;;  %v6639_v41 = vpack.c.b16 %v15400_v4, %v6629_v6 }
 0x9a8   : > { %v6464_v17 = vmax.f32 %v6425_v20, 0.0  ;;  %6645 = vrot.lane.b32.xlu0 %v6639_v41, %s13043_s26 }
 0x9aa   : > { %v6499_v26 = vpack.c.bf16 %v6464_v17, %v6464_v17 }
 0x9ac   : > { %v15411_v2 = vunpack.c.l.b16 %v6499_v26  ;;  %7109 = vmatmul.bf16.gmra.mxu3 %v15409_v58  ;;  %7199 = vmatmul.bf16.gmra.mxu2 %v15409_v58 }
 0x9ad   : > { %v6427_v15 = vpop.f32.mrf.mxu2 }
 0x9ae   : > { %v6651_v40 = vpack.c.b16 %v15411_v2, %v15400_v4  ;;  %v15418_v42 = vadd.f32 %v6427_v15, %v15293_v25  ;;  %v6640_v48 = vpack.c.b16 %v15411_v2, %v15411_v2  ;;  %v12714_v15 = vld [vmem:[%s17442_s5 + $0xf0] sm:$0xff] }
 0x9af   : > { %v15422_v7 = vpop.f32.mrf.mxu3 }
 0x9b0   : > { %6647 = vrot.lane.b32.xlu1 %v6640_v48, %s13043_s26  ;;  %v12713_v48 = vld [vmem:[%s17442_s5 + $0xe8] sm:$0xff] }
 0x9b2   : > { %v6580_v37 = vpop.permute.xlu0 %6579  ;;  %v15441_v23 = vpop.permute.xlu2 %6601 }
 0x9b3   : > { %v6691_v45 = vsel %vm5699_vm1, %v6548_v60, %v6580_v37  ;;  %v15446_v11 = vsel %vm5699_vm1, %v15285_v27, %v15441_v23  ;;  %v6709_v60 = vsel %vm5699_vm1, %v15225_v52, %v15441_v23 }
 0x9b5   : > { %v6429_v34 = vpop.f32.mrf.mxu2 }
 0x9b7   : > { %v15425_v8 = vpop.f32.mrf.mxu3 }
 0x9ba   : > { %v6600_v30 = vpop.permute.xlu1 %6599 }
 0x9bb   : > { %v15432_v25 = vsel %vm5699_vm1, %v15257_v33, %v6600_v30  ;;  %v6706_v36 = vsel %vm5699_vm1, %v15209_v0, %v6600_v30  ;;  %v12711_v30 = vld [vmem:[%s17442_s5 + $0xd8] sm:$0xff] }
 0x9bc   : > { %7114 = vmatmul.bf16.gmra.mxu3 %v6691_v45  ;;  %7204 = vmatmul.bf16.gmra.mxu2 %v15432_v25 }
 0x9bf   : > { %v15437_v1 = vpop.f32.mrf.mxu3 }
 0x9c7   : > { %v15439_v46 = vpop.f32.mrf.mxu3 }
 0x9cc   : > { %7127 = vmatmul.bf16.vlgmr.msrb.gmra.mxu3 %v15298_v5  ;;  %7209 = vmatmul.bf16.gmra.mxu2 %v15446_v11 }
 0x9cf   : > { %v15450_v19 = vpop.f32.mrf.mxu3 }
 0x9d7   : > { %v7086_v0 = vpop.f32.mrf.mxu3 }
 0x9d8   : > { %v12710_v0 = vld [vmem:[%s17442_s5 + $0xd0] sm:$0xff] }
 0x9da   : > { %v15452_v14 = vpop.permute.xlu0 %6603 }
 0x9db   : > { %v15457_v32 = vsel %vm5699_vm1, %v15302_v62, %v15452_v14  ;;  %v6713_v63 = vsel %vm5699_vm1, %v15257_v33, %v15452_v14 }
 0x9dc   : > { %7132 = vmatmul.bf16.gmra.mxu3 %v15322_v31  ;;  %7212 = vmatmul.bf16.gmra.mxu2 %v15457_v32  ;;  %v12716_v31 = vld [vmem:[%s17442_s5 + $0x100] sm:$0xff] }
 0x9dd   : > { %7288 = vmatpush.bf16.msra.mxu2 %v12716_v31 }
 0x9df   : > { %v7088_v5 = vpop.f32.mrf.mxu3 }
 0x9e0   : > { %v15563_v5 = vld [vmem:[%s17443_s6] ss:$0 sm:$0xff] }
 0x9e1   : > { %v7075_v57 = vadd.f32 %v15563_v5, %v15422_v7  ;;  %v7080_v7 = vadd.f32 %v15563_v5, %v15437_v1  ;;  %v7085_v1 = vadd.f32 %v15563_v5, %v15450_v19 }
 0x9e7   : > { %v15470_v28 = vpop.f32.mrf.mxu3 }
 0x9ea   : > { %v6618_v59 = vpop.permute.xlu1 %6617 }
 0x9eb   : > { %v15477_v54 = vsel %vm5699_vm1, %v15325_v35, %v6618_v59 }
 0x9ec   : > { %7137 = vmatmul.bf16.gmra.mxu3 %v15314_v53  ;;  %7217 = vmatmul.bf16.gmra.mxu2 %v15477_v54 }
 0x9ef   : > { %v15481_v12 = vpop.f32.mrf.mxu3  ;;  %v15483_v21 = vpop.f32.mrf.mxu2 }
 0x9f2   : > { %v6620_v49 = vpop.permute.xlu0 %6619 }
 0x9f3   : > { %v6733_v24 = vsel %vm5699_vm1, %v6612_v56, %v6620_v49  ;;  %v7077_v56 = vadd.f32 %v15563_v5, %v15425_v8 }
 0x9f7   : > { %v15485_v6 = vpop.f32.mrf.mxu3  ;;  %v15487_v55 = vpop.f32.mrf.mxu2 }
 0x9fc   : > { %7141 = vmatmul.bf16.gmra.mxu3 %v15353_v9  ;;  %7222 = vmatmul.bf16.gmra.mxu2 %v6733_v24 }
 0x9ff   : > { %v15493_v53 = vpop.f32.mrf.mxu3  ;;  %v15495_v3 = vpop.f32.mrf.mxu2 }
 0xa07   : > { %v15497_v50 = vpop.f32.mrf.mxu3  ;;  %v15499_v38 = vpop.f32.mrf.mxu2 }
 0xa0c   : > { %7145 = vmatmul.bf16.gmra.mxu3 %v15384_v43  ;;  %11232 = vmatmul.msk.bf16.vlgmr.msra.gmra.mxu2 %vm5699_vm1, %v15225_v52  ;;  %v12715_v43 = vld [vmem:[%s17442_s5 + $0xf8] sm:$0xff]  ;;  %v12709_v52 = vld [vmem:[%s17442_s5 + $0xc8] sm:$0xff] }
 0xa0d   : > { %7227 = vmatpush.bf16.msra.mxu3 %v12715_v43  ;;  %v7082_v43 = vadd.f32 %v15563_v5, %v15439_v46 }
 0xa0f   : > { %v7102_v18 = vpop.f32.mrf.mxu3  ;;  %v15504_v61 = vpop.f32.mrf.mxu2 }
 0xa11   : > { %7228 = vmatpush.bf16.msra.mxu3 %v12714_v15 }
 0xa15   : > { %7229 = vmatpush.bf16.msra.mxu3 %v12713_v48 }
 0xa17   : > { %v7103_v47 = vpop.f32.mrf.mxu3  ;;  %v7194_v20 = vpop.f32.mrf.mxu2 }
 0xa18   : > { %v6606_v47 = vpop.permute.xlu2 %6605 }
 0xa1c   : > { %7150 = vmatmul.bf16.gmra.mxu3 %v15368_v44  ;;  %11233 = vmatmul.msk.bf16.gmra.mxu2 %vm5699_vm1, %v15257_v33  ;;  %v6584_v33 = vpack.c.b16 %v15271_v16, %v15271_v16 }
 0xa1f   : > { %v15509_v9 = vpop.f32.mrf.mxu3  ;;  %v7196_v41 = vpop.f32.mrf.mxu2 }
 0xa27   : > { %v15511_v13 = vpop.f32.mrf.mxu3  ;;  %v15513_v17 = vpop.f32.mrf.mxu2 }
 0xa2c   : > { %7155 = vmatmul.bf16.gmra.mxu3 %v6706_v36  ;;  %11234 = vmatmul.msk.bf16.gmra.mxu2 %vm5699_vm1, %v15285_v27  ;;  %v12712_v27 = vld [vmem:[%s17442_s5 + $0xe0] sm:$0xff] }
 0xa2d   : > { %7230 = vmatpush.bf16.msra.mxu3 %v12712_v27 }
 0xa2f   : > { %v15520_v44 = vpop.f32.mrf.mxu3  ;;  %v15522_v26 = vpop.f32.mrf.mxu2 }
 0xa31   : > { %7231 = vmatpush.bf16.msra.mxu3 %v12711_v30 }
 0xa35   : > { %7232 = vmatpush.bf16.msra.mxu3 %v12710_v0 }
 0xa37   : > { %v15530_v34 = vpop.f32.mrf.mxu3  ;;  %v15532_v37 = vpop.f32.mrf.mxu2 }
 0xa39   : > { %7233 = vmatpush.bf16.msra.mxu3 %v12709_v52 }
 0xa3c   : > { %7158 = vmatmul.bf16.gmra.mxu3 %v6709_v60  ;;  %11235 = vmatmul.msk.bf16.gmra.mxu2 %vm5699_vm1, %v15302_v62  ;;  %v12708_v62 = vld [vmem:[%s17442_s5 + $0xc0] sm:$0xff] }
 0xa3d   : > { %7234 = vmatpush.bf16.msra.mxu3 %v12708_v62 }
 0xa3f   : > { %v15545_v45 = vpop.f32.mrf.mxu3  ;;  %v15547_v36 = vpop.f32.mrf.mxu2 }
 0xa47   : > { %v7117_v23 = vpop.f32.mrf.mxu3  ;;  %v15555_v51 = vpop.f32.mrf.mxu2 }
 0xa48   : > { %v7090_v23 = vadd.f32 %v15563_v5, %v15470_v28 }
 0xa4c   : > { %7163 = vmatmul.bf16.gmra.mxu3 %v6713_v63  ;;  %11236 = vmatmul.msk.bf16.gmra.mxu2 %vm5699_vm1, %v15325_v35  ;;  %v6717_v35 = vsel %vm5699_vm1, %v6584_v33, %v6606_v47 }
 0xa4f   : > { %v7128_v31 = vpop.f32.mrf.mxu3  ;;  %v7210_v59 = vpop.f32.mrf.mxu2 }
 0xa50   : > { %v15572_v49 = vadd.f32 %v7128_v31, %v7075_v57  ;;  %v7093_v57 = vadd.f32 %v15563_v5, %v15481_v12 }
 0xa57   : > { %v7130_v24 = vpop.f32.mrf.mxu3  ;;  %v7211_v18 = vpop.f32.mrf.mxu2 }
 0xa58   : > { %v15576_v20 = vadd.f32 %v7130_v24, %v7077_v56 }
 0xa5c   : > { %7168 = vmatmul.bf16.gmra.mxu3 %v6717_v35  ;;  %11237 = vmatmul.msk.bf16.gmra.mxu2 %vm5699_vm1, %v15339_v39 }
 0xa5f   : > { %v7133_v14 = vpop.f32.mrf.mxu3  ;;  %v15585_v41 = vpop.f32.mrf.mxu2 }
 0xa60   : > { %v15587_v8 = vadd.f32 %v7133_v14, %v7080_v7 }
 0xa67   : > { %v7135_v15 = vpop.f32.mrf.mxu3  ;;  %v15591_v48 = vpop.f32.mrf.mxu2 }
 0xa68   : > { %v15593_v16 = vadd.f32 %v7135_v15, %v7082_v43 }
 0xa6c   : > { %7235 = vmatmul.bf16.vlgmr.msra.gmra.mxu3 %v15377_v29  ;;  %11238 = vmatmul.msk.bf16.gmra.mxu2 %vm5699_vm1, %v15355_v22 }
 0xa6f   : > { %v7138_v27 = vpop.f32.mrf.mxu3  ;;  %v15600_v60 = vpop.f32.mrf.mxu2 }
 0xa70   : > { %v15602_v30 = vadd.f32 %v7138_v27, %v7085_v1  ;;  %v7106_v27 = vadd.f32 %v15563_v5, %v15509_v9 }
 0xa77   : > { %v7140_v0 = vpop.f32.mrf.mxu3  ;;  %v15604_v46 = vpop.f32.mrf.mxu2 }
 0xa7c   : > { %7240 = vmatmul.bf16.gmra.mxu3 %v15409_v58  ;;  %11239 = vmatmul.msk.bf16.gmra.mxu2 %vm5699_vm1, %v15388_v10  ;;  %v6465_v58 = vmax.f32 %v15418_v42, 0.0  ;;  %v7098_v42 = vadd.f32 %v15563_v5, %v15493_v53 }
 0xa7e   : > { %v6500_v56 = vpack.c.bf16 %v6465_v58, %v6465_v58 }
 0xa7f   : > { %v7142_v29 = vpop.f32.mrf.mxu3  ;;  %v15609_v52 = vpop.f32.mrf.mxu2 }
 0xa80   : > { %v6650_v24 = vunpack.c.l.b16 %v6500_v56 }
 0xa87   : > { %v7143_v19 = vpop.f32.mrf.mxu3  ;;  %v7225_v62 = vpop.f32.mrf.mxu2 }
 0xa88   : > { %v15613_v63 = vadd.f32 %v7143_v19, %v7090_v23  ;;  %v7108_v23 = vadd.f32 %v15563_v5, %v15511_v13 }
 0xa8c   : > { %7245 = vmatmul.bf16.gmra.mxu3 %v15432_v25  ;;  %11240 = vmatmul.msk.bf16.gmra.mxu2 %vm5699_vm1, %v6651_v40  ;;  %v7095_v25 = vadd.f32 %v15563_v5, %v15485_v6  ;;  %v6652_v40 = vpack.c.b16 %v6650_v24, %v6650_v24  ;;  %v7100_v6 = vadd.f32 %v15563_v5, %v15497_v50 }
 0xa8f   : > { %v7146_v31 = vpop.f32.mrf.mxu3  ;;  %v15623_v59 = vpop.f32.mrf.mxu2 }
 0xa90   : > { %v15625_v28 = vadd.f32 %v7146_v31, %v7093_v57 }
 0xa97   : > { %v7148_v18 = vpop.f32.mrf.mxu3  ;;  %v7292_v47 = vpop.f32.mrf.mxu2 }
 0xa98   : > { %v15629_v2 = vadd.f32 %v7148_v18, %v7095_v25  ;;  %v6644_v25 = vpop.permute.xlu2 %6643 }
 0xa99   : > { %v6741_v18 = vsel %vm5699_vm1, %v15355_v22, %v6644_v25  ;;  %v7183_v22 = vadd.f32 %v15483_v21, %v15572_v49  ;;  %v7188_v49 = vadd.f32 %v15495_v3, %v15587_v8  ;;  %v7193_v8 = vadd.f32 %v15504_v61, %v15602_v30  ;;  %v12750_v61 = vld [vmem:[%s17444_s7 + $0xec] sm:$0xf0] }
 0xa9c   : > { %7249 = vmatmul.bf16.gmra.mxu3 %v15446_v11  ;;  %11241 = vmatmul.msk.bf16.gmra.mxu2 %vm5699_vm1, %v6652_v40 }
 0xa9f   : > { %v7151_v12 = vpop.f32.mrf.mxu3  ;;  %v15635_v33 = vpop.f32.mrf.mxu2 }
 0xaa0   : > { %v15637_v35 = vadd.f32 %v7151_v12, %v7098_v42 }
 0xaa7   : > { %v7153_v7 = vpop.f32.mrf.mxu3  ;;  %v15641_v14 = vpop.f32.mrf.mxu2 }
 0xaa8   : > { %v15643_v43 = vadd.f32 %v7153_v7, %v7100_v6  ;;  %v6646_v7 = vpop.permute.xlu0 %6645 }
 0xaac   : > { %7253 = vmatmul.bf16.gmra.mxu3 %v15457_v32  ;;  %v6642_v32 = vpop.permute.xlu1 %6641 }
 0xaad   : > { %v6737_v57 = vsel %vm5699_vm1, %v15339_v39, %v6642_v32  ;;  %v7116_v39 = vadd.f32 %v15563_v5, %v15545_v45  ;;  %v7185_v45 = vadd.f32 %v15487_v55, %v15576_v20  ;;  %v6634_v32 = vpack.c.b16 %v15400_v4, %v15400_v4 }
 0xaae   : > { %v7190_v4 = vadd.f32 %v15499_v38, %v15593_v16 }
 0xaaf   : > { %v7156_v11 = vpop.f32.mrf.mxu3  ;;  %v15646_v15 = vpop.f32.mrf.mxu2 }
 0xab0   : > { %v6745_v11 = vsel %vm5699_vm1, %v15388_v10, %v6646_v7 }
 0xab7   : > { %v7157_v1 = vpop.f32.mrf.mxu3  ;;  %v7302_v53 = vpop.f32.mrf.mxu2 }
 0xabc   : > { %7258 = vmatmul.bf16.gmra.mxu3 %v15477_v54  ;;  %v7111_v54 = vadd.f32 %v15563_v5, %v15520_v44 }
 0xabf   : > { %v7159_v0 = vpop.f32.mrf.mxu3  ;;  %v7304_v29 = vpop.f32.mrf.mxu2 }
 0xac0   : > { %v15651_v50 = vadd.f32 %v7159_v0, %v7106_v27 }
 0xac7   : > { %v7161_v19 = vpop.f32.mrf.mxu3  ;;  %v15655_v62 = vpop.f32.mrf.mxu2 }
 0xac8   : > { %v15657_v58 = vadd.f32 %v7161_v19, %v7108_v23  ;;  %v6648_v23 = vpop.permute.xlu1 %6647 }
 0xac9   : > { %v6749_v10 = vsel %vm5699_vm1, %v6634_v32, %v6648_v23  ;;  %v11340_v23 = vld [vmem:[%s17444_s7 + $0xc0] sm:$0xf] }
 0xacc   : > { %7263 = vmatmul.bf16.gmra.mxu3 %v6737_v57 }
 0xacf   : > { %v7164_v9 = vpop.f32.mrf.mxu3  ;;  %v15663_v31 = vpop.f32.mrf.mxu2 }
 0xad0   : > { %v15665_v56 = vadd.f32 %v7164_v9, %v7111_v54 }
 0xad7   : > { %v15667_v24 = vpop.f32.mrf.mxu3  ;;  %v15669_v13 = vpop.f32.mrf.mxu2 }
 0xadc   : > { %7266 = vmatmul.bf16.gmra.mxu3 %v6741_v18 }
 0xadf   : > { %v7169_v40 = vpop.f32.mrf.mxu3  ;;  %v15675_v42 = vpop.f32.mrf.mxu2 }
 0xae0   : > { %v15677_v44 = vadd.f32 %v7169_v40, %v7116_v39 }
 0xae7   : > { %v7171_v12 = vpop.f32.mrf.mxu3  ;;  %v15679_v6 = vpop.f32.mrf.mxu2 }
 0xaec   : > { %7271 = vmatmul.bf16.gmra.mxu3 %v6745_v11 }
 0xaef   : > { %v7236_v1 = vpop.f32.mrf.mxu3  ;;  %v7318_v53 = vpop.f32.mrf.mxu2 }
 0xaf0   : > { %v15685_v27 = vadd.f32 %v7236_v1, %v7183_v22 }
 0xaf7   : > { %v7238_v0 = vpop.f32.mrf.mxu3  ;;  %v7319_v29 = vpop.f32.mrf.mxu2 }
 0xaf8   : > { %v7239_v19 = vadd.f32 %v7238_v0, %v7185_v45 }
 0xafa   : > { %v7293_v57 = vadd.f32 %v7292_v47, %v7239_v19  ;;  %v12746_v19 = vld [vmem:[%s17444_s7 + $0xcc] sm:$0xf0] }
 0xafb   : > { %v11341_v32 = vor.u32 %v12746_v19, %v11340_v23  ;;  %v11244_v19 = vld [vmem:[%s17444_s7] sm:$0xf] }
 0xafc   : > { %v7336_v54 = vmax.f32 %v7293_v57, 0.0  ;;  %7276 = vmatmul.bf16.gmra.mxu3 %v6749_v10  ;;  %v7198_v57 = vadd.f32 %v15513_v17, %v15613_v63  ;;  %v11324_v10 = vld [vmem:[%s17444_s7 + $0xa0] sm:$0xf]  ;;  %v12738_v17 = vld [vmem:[%s17444_s7 + $0x8c] sm:$0xf0] }
 0xafe   : > { %v7351_v21 = vpack.c.bf16 %v7336_v54, %v7336_v54  ;;  %v12742_v54 = vld [vmem:[%s17444_s7 + $0xac] sm:$0xf0] }
 0xaff   : > { %v7241_v9 = vpop.f32.mrf.mxu3  ;;  %v15694_v25 = vpop.f32.mrf.mxu2 }
 0xb00   : > { %v15696_v55 = vadd.f32 %v7241_v9, %v7188_v49  ;;  %v7366_v20 = vunpack.c.l.b16 %v7351_v21  ;;  %v11325_v9 = vor.u32 %v12742_v54, %v11324_v10  ;;  %v11484_v54 = vld [vmem:[%s17444_s7 + $0x1e0] sm:$0xf] }
 0xb02   : > { %v7367_v18 = vpack.c.b16 %v7366_v20, %v7366_v20 }
 0xb04   : > { %7368 = vrot.lane.b32.xlu2 %v7367_v18, %s13043_s26 }
 0xb07   : > { %v7243_v47 = vpop.f32.mrf.mxu3  ;;  %v15701_v39 = vpop.f32.mrf.mxu2 }
 0xb08   : > { %v7244_v40 = vadd.f32 %v7243_v47, %v7190_v4  ;;  %v11308_v4 = vld [vmem:[%s17444_s7 + $0x80] sm:$0xf] }
 0xb09   : > { %v11309_v63 = vor.u32 %v12738_v17, %v11308_v4  ;;  %v11468_v17 = vld [vmem:[%s17444_s7 + $0x1c0] sm:$0xf] }
 0xb0a   : > { %v7298_v12 = vadd.f32 %v15641_v14, %v7244_v40  ;;  %v11356_v14 = vld [vmem:[%s17444_s7 + $0xe0] sm:$0xf] }
 0xb0b   : > { %v11357_v29 = vor.u32 %v12750_v61, %v11356_v14  ;;  %v7203_v14 = vadd.f32 %v15532_v37, %v15629_v2  ;;  %v11260_v61 = vld [vmem:[%s17444_s7 + $0x20] sm:$0xf] }
 0xb0c   : > { %v7338_v7 = vmax.f32 %v7298_v12, 0.0  ;;  %v7201_v12 = vadd.f32 %v15522_v26, %v15625_v28  ;;  %v12730_v26 = vld [vmem:[%s17444_s7 + $0x4c] sm:$0xf0] }
 0xb0d   : > { %8881 = vmatpush.bf16.msrb.mxu3 %v11357_v29 }
 0xb0e   : > { %v7353_v3 = vpack.c.bf16 %v7338_v7, %v7338_v7  ;;  %v11292_v7 = vld [vmem:[%s17444_s7 + $0x60] sm:$0xf] }
 0xb0f   : > { %v7246_v11 = vpop.f32.mrf.mxu3  ;;  %v15706_v22 = vpop.f32.mrf.mxu2 }
 0xb10   : > { %v15708_v1 = vadd.f32 %v7246_v11, %v7193_v8  ;;  %v7371_v53 = vunpack.c.l.b16 %v7353_v3 }
 0xb11   : > { %8882 = vmatpush.bf16.msrb.mxu3 %v11341_v32  ;;  %v12722_v32 = vld [vmem:[%s17444_s7 + $0xc] sm:$0xf0] }
 0xb12   : > { %v7372_v45 = vpack.c.b16 %v7371_v53, %v7371_v53  ;;  %v11245_v37 = vor.u32 %v12722_v32, %v11244_v19  ;;  %v11388_v32 = vld [vmem:[%s17444_s7 + $0x120] sm:$0xf] }
 0xb14   : > { %7373 = vrot.lane.b32.xlu0 %v7372_v45, %s13043_s26 }
 0xb15   : > { %8883 = vmatpush.bf16.msrb.mxu3 %v11325_v9 }
 0xb17   : > { %v7248_v38 = vpop.f32.mrf.mxu3  ;;  %v15711_v16 = vpop.f32.mrf.mxu2 }
 0xb18   : > { %v11276_v38 = vld [vmem:[%s17444_s7 + $0x40] sm:$0xf] }
 0xb19   : > { %8884 = vmatpush.bf16.msrb.mxu3 %v11309_v63  ;;  %v11277_v28 = vor.u32 %v12730_v26, %v11276_v38  ;;  %v12778_v63 = vld [vmem:[%s17444_s7 + $0x1cc] sm:$0xf0] }
 0xb1f   : > { %v7250_v30 = vpop.f32.mrf.mxu3  ;;  %v15719_v0 = vpop.f32.mrf.mxu2 }
 0xb20   : > { %v12726_v30 = vld [vmem:[%s17444_s7 + $0x2c] sm:$0xf0] }
 0xb21   : > { %v11261_v23 = vor.u32 %v12726_v30, %v11260_v61 }
 0xb27   : > { %v7251_v21 = vpop.f32.mrf.mxu3  ;;  %v7333_v49 = vpop.f32.mrf.mxu2 }
 0xb28   : > { %v7252_v20 = vadd.f32 %v7251_v21, %v7198_v57  ;;  %v12782_v21 = vld [vmem:[%s17444_s7 + $0x1ec] sm:$0xf0] }
 0xb29   : > { %v11485_v49 = vor.u32 %v12782_v21, %v11484_v54  ;;  %v11372_v54 = vld [vmem:[%s17444_s7 + $0x100] sm:$0xf]  ;;  %v12754_v21 = vld [vmem:[%s17444_s7 + $0x10c] sm:$0xf0] }
 0xb2a   : > { %v7306_v18 = vadd.f32 %v15655_v62, %v7252_v20  ;;  %v12734_v62 = vld [vmem:[%s17444_s7 + $0x6c] sm:$0xf0]  ;;  %v7206_v20 = vadd.f32 %v15547_v36, %v15637_v35  ;;  %v11452_v36 = vld [vmem:[%s17444_s7 + $0x1a0] sm:$0xf] }
 0xb2b   : > { %v11293_v8 = vor.u32 %v12734_v62, %v11292_v7  ;;  %v12774_v35 = vld [vmem:[%s17444_s7 + $0x1ac] sm:$0xf0]  ;;  %v7208_v7 = vadd.f32 %v15555_v51, %v15643_v43  ;;  %v11420_v51 = vld [vmem:[%s17444_s7 + $0x160] sm:$0xf] }
 0xb2c   : > { %v7340_v47 = vmax.f32 %v7306_v18, 0.0  ;;  %v12766_v43 = vld [vmem:[%s17444_s7 + $0x16c] sm:$0xf0] }
 0xb2d   : > { %8885 = vmatpush.bf16.msrb.mxu3 %v11293_v8  ;;  %v11436_v8 = vld [vmem:[%s17444_s7 + $0x180] sm:$0xf] }
 0xb2e   : > { %v7355_v40 = vpack.c.bf16 %v7340_v47, %v7340_v47  ;;  %v11469_v47 = vor.u32 %v12778_v63, %v11468_v17  ;;  %v7214_v17 = vadd.f32 %v15585_v41, %v15651_v50  ;;  %v11596_v63 = vld [vmem:[%s17444_s7 + $0x2c0] sm:$0xf]  ;;  %v12806_v50 = vld [vmem:[%s17444_s7 + $0x2ac] sm:$0xf0] }
 0xb2f   : > { %v7254_v3 = vpop.f32.mrf.mxu3  ;;  %v11580_v41 = vld [vmem:[%s17444_s7 + $0x2a0] sm:$0xf] }
 0xb30   : > { %v15750_v11 = vadd.f32 %v7254_v3, %v7201_v12  ;;  %v7376_v53 = vunpack.c.l.b16 %v7355_v40  ;;  %v11453_v12 = vor.u32 %v12774_v35, %v11452_v36 }
 0xb31   : > { %8886 = vmatpush.bf16.msrb.mxu3 %v11277_v28  ;;  %v11421_v28 = vor.u32 %v12766_v43, %v11420_v51  ;;  %v12798_v43 = vld [vmem:[%s17444_s7 + $0x26c] sm:$0xf0] }
 0xb32   : > { %v7377_v45 = vpack.c.b16 %v7376_v53, %v7376_v53  ;;  %v12770_v53 = vld [vmem:[%s17444_s7 + $0x18c] sm:$0xf0] }
 0xb34   : > { %7378 = vrot.lane.b32.xlu1 %v7377_v45, %s13043_s26  ;;  %v11437_v45 = vor.u32 %v12770_v53, %v11436_v8  ;;  %v12802_v8 = vld [vmem:[%s17444_s7 + $0x28c] sm:$0xf0] }
 0xb35   : > { %8887 = vmatpush.bf16.msrb.mxu3 %v11261_v23 }
 0xb37   : > { %v7256_v29 = vpop.f32.mrf.mxu3 }
 0xb38   : > { %v7257_v57 = vadd.f32 %v7256_v29, %v7203_v14  ;;  %v11404_v29 = vld [vmem:[%s17444_s7 + $0x140] sm:$0xf] }
 0xb39   : > { %8888 = vmatpush.bf16.msrb.mxu3 %v11245_v37  ;;  %v7291_v37 = vadd.f32 %v15623_v59, %v15685_v27  ;;  %v12814_v59 = vld [vmem:[%s17444_s7 + $0x2ec] sm:$0xf0] }
 0xb3a   : > { %v7311_v2 = vadd.f32 %v15669_v13, %v7257_v57  ;;  %v12758_v57 = vld [vmem:[%s17444_s7 + $0x12c] sm:$0xf0] }
 0xb3c   : > { %v7342_v10 = vmax.f32 %v7311_v2, 0.0  ;;  %v11389_v2 = vor.u32 %v12758_v57, %v11388_v32  ;;  %v7219_v32 = vadd.f32 %v15600_v60, %v15665_v56  ;;  %v11532_v57 = vld [vmem:[%s17444_s7 + $0x240] sm:$0xf]  ;;  %v12866_v56 = vld [vmem:[%s17444_s7 + $0x48c] sm:$0xf0] }
 0xb3d   : > { %8894 = vmatpush.bf16.msra.mxu3 %v11485_v49  ;;  %v7335_v49 = vmax.f32 %v7291_v37, 0.0  ;;  %v12794_v37 = vld [vmem:[%s17444_s7 + $0x24c] sm:$0xf0]  ;;  %v11820_v60 = vld [vmem:[%s17444_s7 + $0x480] sm:$0xf] }
 0xb3e   : > { %v7357_v9 = vpack.c.bf16 %v7342_v10, %v7342_v10 }
 0xb3f   : > { %v7259_v18 = vpop.f32.mrf.mxu3  ;;  %v7350_v27 = vpack.c.bf16 %v7335_v49, %v7335_v49 }
 0xb40   : > { %v15782_v4 = vadd.f32 %v7259_v18, %v7206_v20  ;;  %v7381_v13 = vunpack.c.l.b16 %v7357_v9  ;;  %v11373_v9 = vor.u32 %v12754_v21, %v11372_v54  ;;  %v11612_v20 = vld [vmem:[%s17444_s7 + $0x2e0] sm:$0xf] }
 0xb41   : > { %8895 = vmatpush.bf16.msra.mxu3 %v11469_v47  ;;  %v11613_v18 = vor.u32 %v12814_v59, %v11612_v20  ;;  %v12810_v47 = vld [vmem:[%s17444_s7 + $0x2cc] sm:$0xf0] }
 0xb42   : > { %v7382_v40 = vpack.c.b16 %v7381_v13, %v7381_v13 }
 0xb44   : > { %7383 = vrot.lane.b32.xlu2 %v7382_v40, %s13043_s26 }
 0xb45   : > { %8896 = vmatpush.bf16.msra.mxu3 %v11453_v12  ;;  %v11597_v12 = vor.u32 %v12810_v47, %v11596_v63  ;;  %v11500_v63 = vld [vmem:[%s17444_s7 + $0x200] sm:$0xf]  ;;  %v12786_v47 = vld [vmem:[%s17444_s7 + $0x20c] sm:$0xf0] }
 0xb47   : > { %v7261_v62 = vpop.f32.mrf.mxu3 }
 0xb48   : > { %v7262_v3 = vadd.f32 %v7261_v62, %v7208_v7  ;;  %v11581_v7 = vor.u32 %v12806_v50, %v11580_v41  ;;  %v7216_v62 = vadd.f32 %v15591_v48, %v15657_v58  ;;  %v11548_v48 = vld [vmem:[%s17444_s7 + $0x260] sm:$0xf]  ;;  %v12878_v58 = vld [vmem:[%s17444_s7 + $0x4ec] sm:$0xf0]  ;;  %v11501_v50 = vor.u32 %v12786_v47, %v11500_v63 }
 0xb49   : > { %8897 = vmatpush.bf16.msra.mxu3 %v11437_v45  ;;  %v11676_v63 = vld [vmem:[%s17444_s7 + $0x360] sm:$0xf]  ;;  %v12830_v47 = vld [vmem:[%s17444_s7 + $0x36c] sm:$0xf0] }
 0xb4a   : > { %v7316_v38 = vadd.f32 %v15679_v6, %v7262_v3  ;;  %v12762_v6 = vld [vmem:[%s17444_s7 + $0x14c] sm:$0xf0]  ;;  %v11564_v3 = vld [vmem:[%s17444_s7 + $0x280] sm:$0xf] }
 0xb4b   : > { %v11405_v23 = vor.u32 %v12762_v6, %v11404_v29  ;;  %v11549_v6 = vor.u32 %v12798_v43, %v11548_v48 }
 0xb4c   : > { %v7344_v26 = vmax.f32 %v7316_v38, 0.0  ;;  %v11868_v38 = vld [vmem:[%s17444_s7 + $0x4e0] sm:$0xf] }
 0xb4d   : > { %8898 = vmatpush.bf16.msra.mxu3 %v11421_v28  ;;  %v11869_v28 = vor.u32 %v12878_v58, %v11868_v38  ;;  %v12858_v38 = vld [vmem:[%s17444_s7 + $0x44c] sm:$0xf0]  ;;  %v11740_v58 = vld [vmem:[%s17444_s7 + $0x3e0] sm:$0xf] }
 0xb4e   : > { %v7359_v14 = vpack.c.bf16 %v7344_v26, %v7344_v26  ;;  %v11565_v26 = vor.u32 %v12802_v8, %v11564_v3  ;;  %v7224_v8 = vadd.f32 %v15609_v52, %v15677_v44  ;;  %v12854_v52 = vld [vmem:[%s17444_s7 + $0x42c] sm:$0xf0] }
 0xb4f   : > { %v7264_v61 = vpop.f32.mrf.mxu3  ;;  %8933 = vmatpush.bf16.msrb.mxu2 %v11869_v28 }
 0xb50   : > { %v7386_v30 = vunpack.c.l.b16 %v7359_v14  ;;  %v11852_v14 = vld [vmem:[%s17444_s7 + $0x4c0] sm:$0xf]  ;;  %v12874_v61 = vld [vmem:[%s17444_s7 + $0x4cc] sm:$0xf0] }
 0xb51   : > { %8899 = vmatpush.bf16.msra.mxu3 %v11405_v23  ;;  %v11853_v29 = vor.u32 %v12874_v61, %v11852_v14  ;;  %v12870_v23 = vld [vmem:[%s17444_s7 + $0x4ac] sm:$0xf0] }
 0xb52   : > { %v7387_v19 = vpack.c.b16 %v7386_v30, %v7386_v30 }
 0xb53   : > { %8934 = vmatpush.bf16.msrb.mxu2 %v11853_v29  ;;  %v12842_v29 = vld [vmem:[%s17444_s7 + $0x3cc] sm:$0xf0] }
 0xb54   : > { %7388 = vrot.lane.b32.xlu1 %v7387_v19, %s13043_s26 }
 0xb55   : > { %8900 = vmatpush.bf16.msra.mxu3 %v11389_v2 }
 0xb57   : > { %v7265_v10 = vpop.f32.mrf.mxu3 }
 0xb58   : > { %v7113_v10 = vadd.f32 %v15563_v5, %v15530_v34  ;;  %v11516_v34 = vld [vmem:[%s17444_s7 + $0x220] sm:$0xf]  ;;  %v12790_v5 = vld [vmem:[%s17444_s7 + $0x22c] sm:$0xf0] }
 0xb59   : > { %8901 = vmatpush.bf16.msra.mxu3 %v11373_v9  ;;  %v11533_v9 = vor.u32 %v12794_v37, %v11532_v57  ;;  %v12124_v57 = vld [vmem:[%s17444_s7 + $0x6e0] sm:$0xf]  ;;  %v12942_v37 = vld [vmem:[%s17444_s7 + $0x6ec] sm:$0xf0] }
 0xb5a   : > { %v7167_v20 = vadd.f32 %v15667_v24, %v7113_v10  ;;  %v12862_v24 = vld [vmem:[%s17444_s7 + $0x46c] sm:$0xf0]  ;;  %v12125_v10 = vor.u32 %v12942_v37, %v12124_v57 }
 0xb5e   : > { %v7369_v13 = vpop.permute.xlu2 %7368 }
 0xb5f   : > { %v15848_v40 = vsel %vm5699_vm1, %v7350_v27, %v7369_v13  ;;  %v7267_v36 = vpop.f32.mrf.mxu3  ;;  %v11821_v27 = vor.u32 %v12866_v56, %v11820_v60  ;;  %v11804_v13 = vld [vmem:[%s17444_s7 + $0x460] sm:$0xf]  ;;  %v12838_v60 = vld [vmem:[%s17444_s7 + $0x3ac] sm:$0xf0] }
 0xb60   : > { %v15850_v35 = vadd.f32 %v7267_v36, %v7214_v17  ;;  %8889 = vmatmul.bf16.vlgmr.msrb.gmra.mxu3 %v15848_v40  ;;  %v7221_v17 = vadd.f32 %v15604_v46, %v7167_v20  ;;  %v11805_v41 = vor.u32 %v12862_v24, %v11804_v13  ;;  %v7296_v46 = vadd.f32 %v15635_v33, %v15696_v55  ;;  %v11772_v33 = vld [vmem:[%s17444_s7 + $0x420] sm:$0xf]  ;;  %v12930_v24 = vld [vmem:[%s17444_s7 + $0x68c] sm:$0xf0] }
 0xb61   : > { %8907 = vmatpush.bf16.msrb.mxu3 %v11613_v18  ;;  %v11517_v18 = vor.u32 %v12790_v5, %v11516_v34  ;;  %v11773_v43 = vor.u32 %v12854_v52, %v11772_v33  ;;  %v12092_v20 = vld [vmem:[%s17444_s7 + $0x6a0] sm:$0xf]  ;;  %v12918_v33 = vld [vmem:[%s17444_s7 + $0x62c] sm:$0xf0]  ;;  %v7301_v52 = vadd.f32 %v15646_v15, %v15708_v1 }
 0xb62   : > { %v7337_v44 = vmax.f32 %v7296_v46, 0.0  ;;  %v11692_v5 = vld [vmem:[%s17444_s7 + $0x380] sm:$0xf]  ;;  %v12910_v15 = vld [vmem:[%s17444_s7 + $0x5ec] sm:$0xf0] }
 0xb63   : > { %v12076_v13 = vld [vmem:[%s17444_s7 + $0x680] sm:$0xf] }
 0xb64   : > { %v7352_v28 = vpack.c.bf16 %v7337_v44, %v7337_v44  ;;  %v12012_v1 = vld [vmem:[%s17444_s7 + $0x600] sm:$0xf] }
 0xb65   : > { %8908 = vmatpush.bf16.msrb.mxu3 %v11597_v12 }
 0xb67   : > { %v7269_v53 = vpop.f32.mrf.mxu3 }
 0xb68   : > { %v7270_v45 = vadd.f32 %v7269_v53, %v7216_v62 }
 0xb69   : > { %8909 = vmatpush.bf16.msrb.mxu3 %v11581_v7 }
 0xb6a   : > { %v7324_v51 = vadd.f32 %v15701_v39, %v7270_v45  ;;  %v11836_v39 = vld [vmem:[%s17444_s7 + $0x4a0] sm:$0xf] }
 0xb6b   : > { %v11837_v49 = vor.u32 %v12870_v23, %v11836_v39  ;;  %v11788_v45 = vld [vmem:[%s17444_s7 + $0x440] sm:$0xf] }
 0xb6c   : > { %v7346_v30 = vmax.f32 %v7324_v51, 0.0  ;;  %v11789_v48 = vor.u32 %v12858_v38, %v11788_v45  ;;  %v12846_v51 = vld [vmem:[%s17444_s7 + $0x3ec] sm:$0xf0]  ;;  %v11756_v23 = vld [vmem:[%s17444_s7 + $0x400] sm:$0xf] }
 0xb6d   : > { %8910 = vmatpush.bf16.msrb.mxu3 %v11565_v26  ;;  %8935 = vmatpush.bf16.msrb.mxu2 %v11837_v49  ;;  %v11741_v14 = vor.u32 %v12846_v51, %v11740_v58  ;;  %v12938_v49 = vld [vmem:[%s17444_s7 + $0x6cc] sm:$0xf0]  ;;  %v11644_v45 = vld [vmem:[%s17444_s7 + $0x320] sm:$0xf] }
 0xb6e   : > { %v7361_v19 = vpack.c.bf16 %v7346_v30, %v7346_v30  ;;  %v11724_v30 = vld [vmem:[%s17444_s7 + $0x3c0] sm:$0xf]  ;;  %v12822_v38 = vld [vmem:[%s17444_s7 + $0x32c] sm:$0xf0] }
 0xb6f   : > { %v7272_v2 = vpop.f32.mrf.mxu3  ;;  %v11645_v44 = vor.u32 %v12822_v38, %v11644_v45  ;;  %v12818_v58 = vld [vmem:[%s17444_s7 + $0x30c] sm:$0xf0] }
 0xb70   : > { %v15902_v54 = vadd.f32 %v7272_v2, %v7219_v32  ;;  %v7391_v21 = vunpack.c.l.b16 %v7361_v19  ;;  %v12850_v19 = vld [vmem:[%s17444_s7 + $0x40c] sm:$0xf0]  ;;  %v11725_v2 = vor.u32 %v12842_v29, %v11724_v30 }
 0xb71   : > { %8911 = vmatpush.bf16.msrb.mxu3 %v11549_v6  ;;  %8936 = vmatpush.bf16.msrb.mxu2 %v11821_v27  ;;  %v11757_v32 = vor.u32 %v12850_v19, %v11756_v23  ;;  %v12834_v27 = vld [vmem:[%s17444_s7 + $0x38c] sm:$0xf0]  ;;  %v11980_v19 = vld [vmem:[%s17444_s7 + $0x5c0] sm:$0xf] }
 0xb72   : > { %v7392_v59 = vpack.c.b16 %v7391_v21, %v7391_v21  ;;  %v12108_v21 = vld [vmem:[%s17444_s7 + $0x6c0] sm:$0xf] }
 0xb73   : > { %v12109_v56 = vor.u32 %v12938_v49, %v12108_v21  ;;  %v7309_v21 = vadd.f32 %v15663_v31, %v15750_v11  ;;  %v12894_v31 = vld [vmem:[%s17444_s7 + $0x56c] sm:$0xf0] }
 0xb74   : > { %7393 = vrot.lane.b32.xlu0 %v7392_v59, %s13043_s26  ;;  %v12934_v59 = vld [vmem:[%s17444_s7 + $0x6ac] sm:$0xf0] }
 0xb75   : > { %8912 = vmatpush.bf16.msrb.mxu3 %v11533_v9  ;;  %8937 = vmatpush.bf16.msrb.mxu2 %v11805_v41  ;;  %v11708_v9 = vld [vmem:[%s17444_s7 + $0x3a0] sm:$0xf] }
 0xb76   : > { %v11709_v34 = vor.u32 %v12838_v60, %v11708_v9  ;;  %v11660_v41 = vld [vmem:[%s17444_s7 + $0x340] sm:$0xf]  ;;  %v12898_v60 = vld [vmem:[%s17444_s7 + $0x58c] sm:$0xf0] }
 0xb77   : > { %v7274_v36 = vpop.f32.mrf.mxu3  ;;  %v11948_v9 = vld [vmem:[%s17444_s7 + $0x580] sm:$0xf] }
 0xb78   : > { %v7275_v12 = vadd.f32 %v7274_v36, %v7221_v17  ;;  %v11693_v17 = vor.u32 %v12834_v27, %v11692_v5  ;;  %v12077_v36 = vor.u32 %v12930_v24, %v12076_v13  ;;  %v11916_v27 = vld [vmem:[%s17444_s7 + $0x540] sm:$0xf] }
 0xb79   : > { %8913 = vmatpush.bf16.msrb.mxu3 %v11517_v18  ;;  %8938 = vmatpush.bf16.msrb.mxu2 %v11789_v48  ;;  %v12093_v18 = vor.u32 %v12934_v59, %v12092_v20  ;;  %v12028_v48 = vld [vmem:[%s17444_s7 + $0x620] sm:$0xf]  ;;  %v11949_v20 = vor.u32 %v12898_v60, %v11948_v9  ;;  %v12756_v60 = vld [vmem:[%s17444_s7 + $0x124] sm:$0xf] }
 0xb7a   : > { %v7329_v7 = vadd.f32 %v15711_v16, %v7275_v12  ;;  %v11677_v12 = vor.u32 %v12830_v47, %v11676_v63  ;;  %v12029_v51 = vor.u32 %v12918_v33, %v12028_v48  ;;  %v11932_v59 = vld [vmem:[%s17444_s7 + $0x560] sm:$0xf]  ;;  %v12886_v63 = vld [vmem:[%s17444_s7 + $0x52c] sm:$0xf0]  ;;  %v7314_v47 = vadd.f32 %v15675_v42, %v15782_v4  ;;  %v12780_v4 = vld [vmem:[%s17444_s7 + $0x1e4] sm:$0xf] }
 0xb7b   : > { %v11933_v5 = vor.u32 %v12894_v31, %v11932_v59  ;;  %v12776_v48 = vld [vmem:[%s17444_s7 + $0x1c4] sm:$0xf]  ;;  %v11470_v33 = vld [vmem:[%s17444_s7 + $0x1d0] sm:$0xf0] }
 0xb7c   : > { %v7348_v62 = vmax.f32 %v7329_v7, 0.0  ;;  %v12060_v7 = vld [vmem:[%s17444_s7 + $0x660] sm:$0xf]  ;;  %v12752_v31 = vld [vmem:[%s17444_s7 + $0x104] sm:$0xf] }
 0xb7d   : > { %8914 = vmatpush.bf16.msrb.mxu3 %v11501_v50  ;;  %8939 = vmatpush.bf16.msrb.mxu2 %v11773_v43  ;;  %v12826_v50 = vld [vmem:[%s17444_s7 + $0x34c] sm:$0xf0]  ;;  %v7339_v43 = vmax.f32 %v7301_v52, 0.0 }
 0xb7e   : > { %v7363_v3 = vpack.c.bf16 %v7348_v62, %v7348_v62  ;;  %v12926_v62 = vld [vmem:[%s17444_s7 + $0x66c] sm:$0xf0]  ;;  %v11661_v46 = vor.u32 %v12826_v50, %v11660_v41  ;;  %v12188_v50 = vld [vmem:[%s17444_s7 + $0x760] sm:$0xf] }
 0xb7f   : > { %v7277_v53 = vpop.f32.mrf.mxu3  ;;  %v7354_v30 = vpack.c.bf16 %v7339_v43, %v7339_v43  ;;  %v12882_v41 = vld [vmem:[%s17444_s7 + $0x50c] sm:$0xf0]  ;;  %v12772_v43 = vld [vmem:[%s17444_s7 + $0x1a4] sm:$0xf] }
 0xb80   : > { %v15942_v16 = vadd.f32 %v7277_v53, %v7224_v8  ;;  %v7396_v26 = vunpack.c.l.b16 %v7363_v3  ;;  %v12061_v3 = vor.u32 %v12926_v62, %v12060_v7  ;;  %v12044_v8 = vld [vmem:[%s17444_s7 + $0x640] sm:$0xf]  ;;  %v12922_v53 = vld [vmem:[%s17444_s7 + $0x64c] sm:$0xf0]  ;;  %v7343_v62 = vmax.f32 %v7314_v47, 0.0 }
 0xb81   : > { %8940 = vmatpush.bf16.msrb.mxu2 %v11757_v32  ;;  %v12906_v32 = vld [vmem:[%s17444_s7 + $0x5cc] sm:$0xf0]  ;;  %v12840_v47 = vld [vmem:[%s17444_s7 + $0x3c4] sm:$0xf] }
 0xb82   : > { %v7397_v55 = vpack.c.b16 %v7396_v26, %v7396_v26  ;;  %v12045_v26 = vor.u32 %v12922_v53, %v12044_v8  ;;  %v11981_v37 = vor.u32 %v12906_v32, %v11980_v19  ;;  %v12958_v7 = vld [vmem:[%s17444_s7 + $0x76c] sm:$0xf0]  ;;  %v12172_v8 = vld [vmem:[%s17444_s7 + $0x740] sm:$0xf]  ;;  %v7358_v45 = vpack.c.bf16 %v7343_v62, %v7343_v62  ;;  %v12764_v19 = vld [vmem:[%s17444_s7 + $0x164] sm:$0xf] }
 0xb83   : > { %v12954_v53 = vld [vmem:[%s17444_s7 + $0x74c] sm:$0xf0]  ;;  %v11422_v32 = vld [vmem:[%s17444_s7 + $0x170] sm:$0xf0]  ;;  %v12744_v62 = vld [vmem:[%s17444_s7 + $0xc4] sm:$0xf] }
 0xb84   : > { %7398 = vrot.lane.b32.xlu2 %v7397_v55, %s13043_s26  ;;  %v11628_v55 = vld [vmem:[%s17444_s7 + $0x300] sm:$0xf]  ;;  %v12173_v52 = vor.u32 %v12954_v53, %v12172_v8 }
 0xb85   : > { %8959 = vmatpush.bf16.msra.mxu2 %v12125_v10  ;;  %v12902_v10 = vld [vmem:[%s17444_s7 + $0x5ac] sm:$0xf0] }
 0xb86   : > { %v7374_v61 = vpop.permute.xlu0 %7373 }
 0xb87   : > { %v15964_v6 = vsel %vm5699_vm1, %v7352_v28, %v7374_v61  ;;  %v7279_v39 = vpop.f32.mrf.mxu3  ;;  %v11629_v28 = vor.u32 %v12818_v58, %v11628_v55  ;;  %v12914_v61 = vld [vmem:[%s17444_s7 + $0x60c] sm:$0xf0]  ;;  %v12156_v55 = vld [vmem:[%s17444_s7 + $0x720] sm:$0xf] }
 0xb88   : > { %8902 = vmatmul.bf16.vlgmr.msra.gmra.mxu3 %v15964_v6  ;;  %v12013_v39 = vor.u32 %v12914_v61, %v12012_v1  ;;  %v12950_v58 = vld [vmem:[%s17444_s7 + $0x72c] sm:$0xf0] }
 0xb89   : > { %8920 = vmatpush.bf16.msra.mxu3 %v11741_v14  ;;  %8960 = vmatpush.bf16.msra.mxu2 %v12109_v56  ;;  %v11996_v14 = vld [vmem:[%s17444_s7 + $0x5e0] sm:$0xf]  ;;  %v7341_v56 = vmax.f32 %v7309_v21, 0.0  ;;  %v12946_v1 = vld [vmem:[%s17444_s7 + $0x70c] sm:$0xf0] }
 0xb8a   : > { %v11997_v29 = vor.u32 %v12910_v15, %v11996_v14  ;;  %v12157_v14 = vor.u32 %v12950_v58, %v12156_v55  ;;  %v12140_v15 = vld [vmem:[%s17444_s7 + $0x700] sm:$0xf]  ;;  %v11406_v21 = vld [vmem:[%s17444_s7 + $0x150] sm:$0xf0]  ;;  %v7332_v55 = vadd.f32 %v15719_v0, %v15942_v16 }
 0xb8c   : > { %v7349_v16 = vmax.f32 %v7332_v55, 0.0  ;;  %v12800_v55 = vld [vmem:[%s17444_s7 + $0x284] sm:$0xf] }
 0xb8d   : > { %8921 = vmatpush.bf16.msra.mxu3 %v11725_v2  ;;  %8961 = vmatpush.bf16.msra.mxu2 %v12093_v18  ;;  %v11964_v2 = vld [vmem:[%s17444_s7 + $0x5a0] sm:$0xf]  ;;  %v12890_v18 = vld [vmem:[%s17444_s7 + $0x54c] sm:$0xf0] }
 0xb8e   : > { %v11965_v49 = vor.u32 %v12902_v10, %v11964_v2  ;;  %v11917_v24 = vor.u32 %v12890_v18, %v11916_v27  ;;  %v11425_v2 = vor.u32 %v12764_v19, %v11422_v32  ;;  %v12760_v10 = vld [vmem:[%s17444_s7 + $0x144] sm:$0xf] }
 0xb8f   : > { %v11409_v9 = vor.u32 %v12760_v10, %v11406_v21  ;;  %v12728_v32 = vld [vmem:[%s17444_s7 + $0x44] sm:$0xf]  ;;  %v11646_v10 = vld [vmem:[%s17444_s7 + $0x330] sm:$0xf0] }
 0xb91   : > { %8922 = vmatpush.bf16.msra.mxu3 %v11709_v34  ;;  %8962 = vmatpush.bf16.msra.mxu2 %v12077_v36  ;;  %v7356_v34 = vpack.c.bf16 %v7341_v56, %v7341_v56 }
 0xb95   : > { %8923 = vmatpush.bf16.msra.mxu3 %v11693_v17  ;;  %8963 = vmatpush.bf16.msra.mxu2 %v12061_v3  ;;  %v11900_v17 = vld [vmem:[%s17444_s7 + $0x520] sm:$0xf]  ;;  %v12189_v3 = vor.u32 %v12958_v7, %v12188_v50 }
 0xb96   : > { %v11901_v36 = vor.u32 %v12886_v63, %v11900_v17  ;;  %v11358_v17 = vld [vmem:[%s17444_s7 + $0xf0] sm:$0xf0] }
 0xb99   : > { %8924 = vmatpush.bf16.msra.mxu3 %v11677_v12  ;;  %8964 = vmatpush.bf16.msra.mxu2 %v12045_v26  ;;  %v11884_v12 = vld [vmem:[%s17444_s7 + $0x500] sm:$0xf] }
 0xb9a   : > { %v11885_v42 = vor.u32 %v12882_v41, %v11884_v12 }
 0xb9d   : > { %8925 = vmatpush.bf16.msra.mxu3 %v11661_v46  ;;  %8965 = vmatpush.bf16.msra.mxu2 %v12029_v51  ;;  %v11486_v46 = vld [vmem:[%s17444_s7 + $0x1f0] sm:$0xf0]  ;;  %v11473_v51 = vor.u32 %v12776_v48, %v11470_v33  ;;  %v12832_v48 = vld [vmem:[%s17444_s7 + $0x384] sm:$0xf] }
 0xb9e   : > { %v7384_v11 = vpop.permute.xlu2 %7383  ;;  %v11489_v38 = vor.u32 %v12780_v4, %v11486_v46  ;;  %v12836_v46 = vld [vmem:[%s17444_s7 + $0x3a4] sm:$0xf]  ;;  %v11694_v33 = vld [vmem:[%s17444_s7 + $0x390] sm:$0xf0] }
 0xb9f   : > { %v16102_v13 = vsel %vm5699_vm1, %v7356_v34, %v7384_v11  ;;  %v11374_v11 = vld [vmem:[%s17444_s7 + $0x110] sm:$0xf0]  ;;  %v11697_v58 = vor.u32 %v12832_v48, %v11694_v33 }
 0xba0   : > { %v11377_v27 = vor.u32 %v12752_v31, %v11374_v11  ;;  %v12720_v11 = vld [vmem:[%s17444_s7 + $0x4] sm:$0xf] }
 0xba1   : > { %8926 = vmatpush.bf16.msra.mxu3 %v11645_v44  ;;  %8966 = vmatpush.bf16.msra.mxu2 %v12013_v39  ;;  %v12141_v39 = vor.u32 %v12946_v1, %v12140_v15  ;;  %v12732_v1 = vld [vmem:[%s17444_s7 + $0x64] sm:$0xf] }
 0xba5   : > { %8927 = vmatpush.bf16.msra.mxu3 %v11629_v28  ;;  %v11454_v28 = vld [vmem:[%s17444_s7 + $0x1b0] sm:$0xf0] }
 0xba6   : > { %v7379_v23 = vpop.permute.xlu1 %7378  ;;  %v11457_v61 = vor.u32 %v12772_v43, %v11454_v28  ;;  %v11310_v43 = vld [vmem:[%s17444_s7 + $0x90] sm:$0xf0]  ;;  %v12828_v28 = vld [vmem:[%s17444_s7 + $0x364] sm:$0xf] }
 0xba7   : > { %v16072_v57 = vsel %vm5699_vm1, %v7354_v30, %v7379_v23  ;;  %v12768_v30 = vld [vmem:[%s17444_s7 + $0x184] sm:$0xf] }
 0xba8   : > { %8915 = vmatmul.bf16.vlgmr.msrb.gmra.mxu3 %v16072_v57 }
 0xba9   : > { %8946 = vmatpush.bf16.msrb.mxu3 %v11997_v29  ;;  %v11438_v29 = vld [vmem:[%s17444_s7 + $0x190] sm:$0xf0] }
 0xbaa   : > { %v11441_v23 = vor.u32 %v12768_v30, %v11438_v29  ;;  %v12824_v30 = vld [vmem:[%s17444_s7 + $0x344] sm:$0xf]  ;;  %v11662_v29 = vld [vmem:[%s17444_s7 + $0x350] sm:$0xf0] }
 0xbab   : > { %v11665_v19 = vor.u32 %v12824_v30, %v11662_v29 }
 0xbad   : > { %8947 = vmatpush.bf16.msrb.mxu3 %v11981_v37  ;;  %v7327_v37 = vadd.f32 %v15706_v22, %v15902_v54  ;;  %v11390_v22 = vld [vmem:[%s17444_s7 + $0x130] sm:$0xf0]  ;;  %v7322_v54 = vadd.f32 %v15694_v25, %v15850_v35 }
 0xbae   : > { %v11742_v25 = vld [vmem:[%s17444_s7 + $0x3f0] sm:$0xf0] }
 0xbaf   : > { %v7345_v35 = vmax.f32 %v7322_v54, 0.0  ;;  %v11630_v54 = vld [vmem:[%s17444_s7 + $0x310] sm:$0xf0] }
 0xbb1   : > { %8948 = vmatpush.bf16.msrb.mxu3 %v11965_v49  ;;  %v7347_v49 = vmax.f32 %v7327_v37, 0.0  ;;  %v7360_v12 = vpack.c.bf16 %v7345_v35, %v7345_v35  ;;  %v11278_v37 = vld [vmem:[%s17444_s7 + $0x50] sm:$0xf0]  ;;  %v12812_v35 = vld [vmem:[%s17444_s7 + $0x2e4] sm:$0xf] }
 0xbb2   : > { %v11281_v21 = vor.u32 %v12728_v32, %v11278_v37  ;;  %v12884_v32 = vld [vmem:[%s17444_s7 + $0x524] sm:$0xf]  ;;  %v11902_v37 = vld [vmem:[%s17444_s7 + $0x530] sm:$0xf0] }
 0xbb3   : > { %v7362_v56 = vpack.c.bf16 %v7347_v49, %v7347_v49 }
 0xbb5   : > { %8949 = vmatpush.bf16.msrb.mxu3 %v11949_v20  ;;  %v11393_v20 = vor.u32 %v12756_v60, %v11390_v22  ;;  %v11262_v60 = vld [vmem:[%s17444_s7 + $0x30] sm:$0xf0]  ;;  %v12816_v22 = vld [vmem:[%s17444_s7 + $0x304] sm:$0xf] }
 0xbb6   : > { %v11633_v31 = vor.u32 %v12816_v22, %v11630_v54  ;;  %v12956_v22 = vld [vmem:[%s17444_s7 + $0x764] sm:$0xf]  ;;  %v12190_v54 = vld [vmem:[%s17444_s7 + $0x770] sm:$0xf0] }
 0xbb8   : > { %8928 = vmatmul.bf16.vlgmr.msra.gmra.mxu3 %v16102_v13 }
 0xbb9   : > { %8950 = vmatpush.bf16.msrb.mxu3 %v11933_v5  ;;  %v12844_v5 = vld [vmem:[%s17444_s7 + $0x3e4] sm:$0xf] }
 0xbba   : > { %v11745_v18 = vor.u32 %v12844_v5, %v11742_v25  ;;  %v11246_v5 = vld [vmem:[%s17444_s7 + $0x10] sm:$0xf0] }
 0xbbd   : > { %8951 = vmatpush.bf16.msrb.mxu3 %v11917_v24  ;;  %v12748_v24 = vld [vmem:[%s17444_s7 + $0xe4] sm:$0xf] }
 0xbbe   : > { %v11361_v41 = vor.u32 %v12748_v24, %v11358_v17  ;;  %v11982_v24 = vld [vmem:[%s17444_s7 + $0x5d0] sm:$0xf0]  ;;  %v11249_v17 = vor.u32 %v12720_v11, %v11246_v5  ;;  %v12193_v11 = vor.u32 %v12956_v22, %v12190_v54  ;;  %v12876_v5 = vld [vmem:[%s17444_s7 + $0x4e4] sm:$0xf] }
 0xbbf   : > { %v12848_v22 = vld [vmem:[%s17444_s7 + $0x404] sm:$0xf]  ;;  %v11758_v54 = vld [vmem:[%s17444_s7 + $0x410] sm:$0xf0] }
 0xbc1   : > { %8952 = vmatpush.bf16.msrb.mxu3 %v11901_v36  ;;  %v11726_v36 = vld [vmem:[%s17444_s7 + $0x3d0] sm:$0xf0] }
 0xbc2   : > { %v11729_v7 = vor.u32 %v12840_v47, %v11726_v36  ;;  %v16333_v36 = vld [vmem:[%s17445_s8] sm:$0xf] }
 0xbc5   : > { %8953 = vmatpush.bf16.msrb.mxu3 %v11885_v42  ;;  %v11342_v42 = vld [vmem:[%s17444_s7 + $0xd0] sm:$0xf0] }
 0xbc6   : > { %v7389_v26 = vpop.permute.xlu1 %7388  ;;  %v11345_v8 = vor.u32 %v12744_v62, %v11342_v42  ;;  %v11966_v62 = vld [vmem:[%s17444_s7 + $0x5b0] sm:$0xf0]  ;;  %v7670_v42 = vperm.slane %v16333_v36, 0 }
 0xbc7   : > { %v16144_v44 = vsel %vm5699_vm1, %v7358_v45, %v7389_v26  ;;  %v12740_v45 = vld [vmem:[%s17444_s7 + $0xa4] sm:$0xf] }
 0xbc8   : > { %8941 = vmatmul.bf16.vlgmr.msrb.gmra.mxu2 %v16144_v44 }
 0xbc9   : > { %8976 = vmatpush.bf16.msra.mxu3 %v12189_v3  ;;  %8998 = vmatpush.bf16.msrb.mxu2 %v11489_v38  ;;  %v11710_v3 = vld [vmem:[%s17444_s7 + $0x3b0] sm:$0xf0] }
 0xbca   : > { %v11713_v53 = vor.u32 %v12836_v46, %v11710_v3  ;;  %v11326_v38 = vld [vmem:[%s17444_s7 + $0xb0] sm:$0xf0] }
 0xbcd   : > { %8977 = vmatpush.bf16.msra.mxu3 %v12173_v52  ;;  %8999 = vmatpush.bf16.msrb.mxu2 %v11473_v51  ;;  %v11329_v52 = vor.u32 %v12740_v45, %v11326_v38  ;;  %v12736_v51 = vld [vmem:[%s17444_s7 + $0x84] sm:$0xf]  ;;  %v11950_v38 = vld [vmem:[%s17444_s7 + $0x590] sm:$0xf0] }
 0xbce   : > { %v11313_v0 = vor.u32 %v12736_v51, %v11310_v43  ;;  %v12896_v45 = vld [vmem:[%s17444_s7 + $0x584] sm:$0xf] }
 0xbcf   : > { %v12892_v43 = vld [vmem:[%s17444_s7 + $0x564] sm:$0xf] }
 0xbd1   : > { %8978 = vmatpush.bf16.msra.mxu3 %v12157_v14  ;;  %9000 = vmatpush.bf16.msrb.mxu2 %v11457_v61  ;;  %v11678_v14 = vld [vmem:[%s17444_s7 + $0x370] sm:$0xf0] }
 0xbd2   : > { %v11681_v15 = vor.u32 %v12828_v28, %v11678_v14  ;;  %v11294_v61 = vld [vmem:[%s17444_s7 + $0x70] sm:$0xf0] }
 0xbd5   : > { %8979 = vmatpush.bf16.msra.mxu3 %v12141_v39  ;;  %9001 = vmatpush.bf16.msrb.mxu2 %v11441_v23  ;;  %v11297_v39 = vor.u32 %v12732_v1, %v11294_v61  ;;  %v16278_v23 = vpack.c.bf16 %v7349_v16, %v7349_v16  ;;  %v11550_v16 = vld [vmem:[%s17444_s7 + $0x270] sm:$0xf0] }
 0xbd6   : > { %v11918_v1 = vld [vmem:[%s17444_s7 + $0x550] sm:$0xf0] }
 0xbd9   : > { %9002 = vmatpush.bf16.msrb.mxu2 %v11425_v2  ;;  %v12820_v2 = vld [vmem:[%s17444_s7 + $0x324] sm:$0xf] }
 0xbda   : > { %v11649_v49 = vor.u32 %v12820_v2, %v11646_v10  ;;  %v11905_v10 = vor.u32 %v12884_v32, %v11902_v37 }
 0xbdd   : > { %9003 = vmatpush.bf16.msrb.mxu2 %v11409_v9  ;;  %v12724_v9 = vld [vmem:[%s17444_s7 + $0x24] sm:$0xf] }
 0xbde   : > { %v7399_v59 = vpop.permute.xlu2 %7398 }
 0xbdf   : > { %v16200_v34 = vsel %vm5699_vm1, %v7362_v56, %v7399_v59  ;;  %v12908_v56 = vld [vmem:[%s17444_s7 + $0x5e4] sm:$0xf]  ;;  %v11265_v59 = vor.u32 %v12724_v9, %v11262_v60  ;;  %v11886_v60 = vld [vmem:[%s17444_s7 + $0x510] sm:$0xf0] }
 0xbe0   : > { %8967 = vmatmul.bf16.vlgmr.msra.gmra.mxu2 %v16200_v34  ;;  %v12880_v9 = vld [vmem:[%s17444_s7 + $0x504] sm:$0xf] }
 0xbe1   : > { %9004 = vmatpush.bf16.msrb.mxu2 %v11393_v20  ;;  %v11998_v20 = vld [vmem:[%s17444_s7 + $0x5f0] sm:$0xf0] }
 0xbe2   : > { %v12001_v25 = vor.u32 %v12908_v56, %v11998_v20  ;;  %v11889_v20 = vor.u32 %v12880_v9, %v11886_v60  ;;  %v12735_v9 = vld [vmem:[%s17444_s7 + $0x74] sm:$0xf0] }
 0xbe3   : > { %v16215_v63 = vpop.f32.mrf.mxu3 }
 0xbe5   : > { %9005 = vmatpush.bf16.msrb.mxu2 %v11377_v27  ;;  %v11614_v27 = vld [vmem:[%s17444_s7 + $0x2f0] sm:$0xf0] }
 0xbe6   : > { %v7394_v50 = vpop.permute.xlu0 %7393  ;;  %v11617_v47 = vor.u32 %v12812_v35, %v11614_v27  ;;  %v12952_v35 = vld [vmem:[%s17444_s7 + $0x744] sm:$0xf]  ;;  %v12174_v27 = vld [vmem:[%s17444_s7 + $0x750] sm:$0xf0] }
 0xbe7   : > { %v16230_v4 = vsel %vm5699_vm1, %v7360_v12, %v7394_v50  ;;  %v11598_v50 = vld [vmem:[%s17444_s7 + $0x2d0] sm:$0xf0] }
 0xbe8   : > { %8954 = vmatmul.bf16.vlgmr.msrb.gmra.mxu3 %v16230_v4 }
 0xbe9   : > { %9024 = vmatpush.bf16.msra.mxu2 %v11745_v18  ;;  %8985 = vmatpush.bf16.msrb.mxu3 %v11361_v41  ;;  %v12904_v18 = vld [vmem:[%s17444_s7 + $0x5c4] sm:$0xf] }
 0xbea   : > { %v11985_v12 = vor.u32 %v12904_v18, %v11982_v24  ;;  %v12808_v41 = vld [vmem:[%s17444_s7 + $0x2c4] sm:$0xf] }
 0xbeb   : > { %v8892_v26 = vpop.f32.mrf.mxu3  ;;  %v11601_v46 = vor.u32 %v12808_v41, %v11598_v50  ;;  %v12948_v41 = vld [vmem:[%s17444_s7 + $0x724] sm:$0xf]  ;;  %v12158_v50 = vld [vmem:[%s17444_s7 + $0x730] sm:$0xf0] }
 0xbec   : > { %v8891_v26 = vadd.f32 %v16215_v63, %v7670_v42  ;;  %v11934_v63 = vld [vmem:[%s17444_s7 + $0x570] sm:$0xf0]  ;;  %v12868_v42 = vld [vmem:[%s17444_s7 + $0x4a4] sm:$0xf] }
 0xbed   : > { %9025 = vmatpush.bf16.msra.mxu2 %v11729_v7  ;;  %8986 = vmatpush.bf16.msrb.mxu3 %v11345_v8  ;;  %v12900_v7 = vld [vmem:[%s17444_s7 + $0x5a4] sm:$0xf]  ;;  %v11937_v14 = vor.u32 %v12892_v43, %v11934_v63 }
 0xbee   : > { %v11969_v3 = vor.u32 %v12900_v7, %v11966_v62  ;;  %v12804_v8 = vld [vmem:[%s17444_s7 + $0x2a4] sm:$0xf]  ;;  %v12161_v62 = vor.u32 %v12948_v41, %v12158_v50 }
 0xbf0   : > { %9006 = vmatmul.bf16.vlgmr.msrb.gmra.mxu2 %v15964_v6 }
 0xbf1   : > { %9026 = vmatpush.bf16.msra.mxu2 %v11713_v53  ;;  %8987 = vmatpush.bf16.msrb.mxu3 %v11329_v52  ;;  %v11582_v53 = vld [vmem:[%s17444_s7 + $0x2b0] sm:$0xf0]  ;;  %v11953_v52 = vor.u32 %v12896_v45, %v11950_v38  ;;  %v12751_v45 = vld [vmem:[%s17444_s7 + $0xf4] sm:$0xf0] }
 0xbf2   : > { %v11585_v48 = vor.u32 %v12804_v8, %v11582_v53  ;;  %v12142_v8 = vld [vmem:[%s17444_s7 + $0x710] sm:$0xf0]  ;;  %v11364_v53 = vld [vmem:[%s17444_s7 + $0xe8] sm:$0xf] }
 0xbf5   : > { %9027 = vmatpush.bf16.msra.mxu2 %v11697_v58  ;;  %8988 = vmatpush.bf16.msrb.mxu3 %v11313_v0  ;;  %v11566_v58 = vld [vmem:[%s17444_s7 + $0x290] sm:$0xf0]  ;;  %v12796_v0 = vld [vmem:[%s17444_s7 + $0x264] sm:$0xf] }
 0xbf6   : > { %v11569_v28 = vor.u32 %v12800_v55, %v11566_v58  ;;  %v11553_v61 = vor.u32 %v12796_v0, %v11550_v16  ;;  %v11348_v55 = vld [vmem:[%s17444_s7 + $0xc8] sm:$0xf]  ;;  %v12747_v58 = vld [vmem:[%s17444_s7 + $0xd4] sm:$0xf0]  ;;  %v11806_v0 = vld [vmem:[%s17444_s7 + $0x470] sm:$0xf0] }
 0xbf7   : > { %v11349_v16 = vor.u32 %v12747_v58, %v11348_v55  ;;  %v12811_v55 = vld [vmem:[%s17444_s7 + $0x2d4] sm:$0xf0] }
 0xbf8   : > { %12202 = vmatmul.msk.bf16.vlgmr.msra.gmra.mxu3 %vm5699_vm1, %v16278_v23 }
 0xbf9   : > { %9028 = vmatpush.bf16.msra.mxu2 %v11681_v15  ;;  %8989 = vmatpush.bf16.msrb.mxu3 %v11297_v39  ;;  %v12888_v15 = vld [vmem:[%s17444_s7 + $0x544] sm:$0xf] }
 0xbfa   : > { %v11921_v29 = vor.u32 %v12888_v15, %v11918_v1  ;;  %v12792_v39 = vld [vmem:[%s17444_s7 + $0x244] sm:$0xf]  ;;  %v11332_v15 = vld [vmem:[%s17444_s7 + $0xa8] sm:$0xf]  ;;  %v12743_v1 = vld [vmem:[%s17444_s7 + $0xb4] sm:$0xf0] }
 0xbfd   : > { %9029 = vmatpush.bf16.msra.mxu2 %v11665_v19  ;;  %8990 = vmatpush.bf16.msrb.mxu3 %v11281_v21  ;;  %v11534_v19 = vld [vmem:[%s17444_s7 + $0x250] sm:$0xf0]  ;;  %v12788_v21 = vld [vmem:[%s17444_s7 + $0x224] sm:$0xf] }
 0xbfe   : > { %v11537_v2 = vor.u32 %v12792_v39, %v11534_v19  ;;  %v11316_v39 = vld [vmem:[%s17444_s7 + $0x88] sm:$0xf]  ;;  %v12739_v19 = vld [vmem:[%s17444_s7 + $0x94] sm:$0xf0] }
 0xc01   : > { %9030 = vmatpush.bf16.msra.mxu2 %v11649_v49  ;;  %8991 = vmatpush.bf16.msrb.mxu3 %v11265_v59  ;;  %v11518_v49 = vld [vmem:[%s17444_s7 + $0x230] sm:$0xf0]  ;;  %v12784_v59 = vld [vmem:[%s17444_s7 + $0x204] sm:$0xf] }
 0xc02   : > { %v11521_v56 = vor.u32 %v12788_v21, %v11518_v49  ;;  %v11317_v21 = vor.u32 %v12739_v19, %v11316_v39  ;;  %v11300_v49 = vld [vmem:[%s17444_s7 + $0x68] sm:$0xf]  ;;  %v12803_v39 = vld [vmem:[%s17444_s7 + $0x294] sm:$0xf0] }
 0xc05   : > { %9031 = vmatpush.bf16.msra.mxu2 %v11633_v31  ;;  %8992 = vmatpush.bf16.msrb.mxu3 %v11249_v17  ;;  %v11502_v31 = vld [vmem:[%s17444_s7 + $0x210] sm:$0xf0]  ;;  %v12177_v17 = vor.u32 %v12952_v35, %v12174_v27 }
 0xc06   : > { %v11505_v18 = vor.u32 %v12784_v59, %v11502_v31  ;;  %v12126_v59 = vld [vmem:[%s17444_s7 + $0x6f0] sm:$0xf0]  ;;  %v11284_v31 = vld [vmem:[%s17444_s7 + $0x48] sm:$0xf] }
 0xc08   : > { %9032 = vmatmul.bf16.vlgmr.msra.gmra.mxu2 %v16102_v13  ;;  %8993 = vmatmul.bf16.vlgmr.msrb.gmra.mxu3 %v15848_v40 }
 0xc09   : > { %9050 = vmatpush.bf16.msrb.mxu2 %v12001_v25  ;;  %9011 = vmatpush.bf16.msra.mxu3 %v11617_v47  ;;  %v11870_v25 = vld [vmem:[%s17444_s7 + $0x4f0] sm:$0xf0]  ;;  %v12872_v47 = vld [vmem:[%s17444_s7 + $0x4c4] sm:$0xf] }
 0xc0a   : > { %v11873_v24 = vor.u32 %v12876_v5, %v11870_v25  ;;  %v11761_v25 = vor.u32 %v12848_v22, %v11758_v54  ;;  %v12014_v22 = vld [vmem:[%s17444_s7 + $0x610] sm:$0xf0] }
 0xc0b   : > { %v8903_v33 = vpop.f32.mrf.mxu3 }
 0xc0c   : > { %v16369_v51 = vadd.f32 %v8903_v33, %v8891_v26  ;;  %v11822_v33 = vld [vmem:[%s17444_s7 + $0x490] sm:$0xf0] }
 0xc0d   : > { %9051 = vmatpush.bf16.msrb.mxu2 %v11985_v12  ;;  %9012 = vmatpush.bf16.msra.mxu3 %v11601_v46  ;;  %v11854_v12 = vld [vmem:[%s17444_s7 + $0x4d0] sm:$0xf0] }
 0xc0e   : > { %v11857_v7 = vor.u32 %v12872_v47, %v11854_v12  ;;  %v11838_v46 = vld [vmem:[%s17444_s7 + $0x4b0] sm:$0xf0]  ;;  %v11268_v47 = vld [vmem:[%s17444_s7 + $0x28] sm:$0xf]  ;;  %v12727_v12 = vld [vmem:[%s17444_s7 + $0x34] sm:$0xf0] }
 0xc0f   : > { %v11841_v38 = vor.u32 %v12868_v42, %v11838_v46  ;;  %v11269_v50 = vor.u32 %v12727_v12, %v11268_v47  ;;  %v11252_v42 = vld [vmem:[%s17444_s7 + $0x8] sm:$0xf]  ;;  %v12723_v46 = vld [vmem:[%s17444_s7 + $0x14] sm:$0xf0] }
 0xc10   : > { %v11460_v12 = vld [vmem:[%s17444_s7 + $0x1a8] sm:$0xf] }
 0xc11   : > { %9052 = vmatpush.bf16.msrb.mxu2 %v11969_v3  ;;  %9013 = vmatpush.bf16.msra.mxu3 %v11585_v48  ;;  %v12944_v3 = vld [vmem:[%s17444_s7 + $0x704] sm:$0xf] }
 0xc12   : > { %v12145_v26 = vor.u32 %v12944_v3, %v12142_v8  ;;  %v12864_v48 = vld [vmem:[%s17444_s7 + $0x484] sm:$0xf]  ;;  %v11620_v8 = vld [vmem:[%s17444_s7 + $0x2e8] sm:$0xf] }
 0xc13   : > { %v8905_v30 = vpop.f32.mrf.mxu3  ;;  %v11825_v63 = vor.u32 %v12864_v48, %v11822_v33  ;;  %v12078_v48 = vld [vmem:[%s17444_s7 + $0x690] sm:$0xf0] }
 0xc14   : > { %v11790_v30 = vld [vmem:[%s17444_s7 + $0x450] sm:$0xf0] }
 0xc15   : > { %9053 = vmatpush.bf16.msrb.mxu2 %v11953_v52  ;;  %9014 = vmatpush.bf16.msra.mxu3 %v11569_v28  ;;  %v11365_v52 = vor.u32 %v12751_v45, %v11364_v53  ;;  %v12815_v53 = vld [vmem:[%s17444_s7 + $0x2f4] sm:$0xf0] }
 0xc16   : > { %v11621_v33 = vor.u32 %v12815_v53, %v11620_v8  ;;  %v11444_v8 = vld [vmem:[%s17444_s7 + $0x188] sm:$0xf]  ;;  %v12771_v53 = vld [vmem:[%s17444_s7 + $0x194] sm:$0xf0] }
 0xc19   : > { %9054 = vmatpush.bf16.msrb.mxu2 %v11937_v14  ;;  %9015 = vmatpush.bf16.msra.mxu3 %v11553_v61  ;;  %v12860_v14 = vld [vmem:[%s17444_s7 + $0x464] sm:$0xf] }
 0xc1a   : > { %v12856_v61 = vld [vmem:[%s17444_s7 + $0x444] sm:$0xf] }
 0xc1b   : > { %v11793_v37 = vor.u32 %v12856_v61, %v11790_v30  ;;  %v12046_v61 = vld [vmem:[%s17444_s7 + $0x650] sm:$0xf0] }
 0xc1d   : > { %9055 = vmatpush.bf16.msrb.mxu2 %v11921_v29  ;;  %9016 = vmatpush.bf16.msra.mxu3 %v11537_v2  ;;  %v11333_v29 = vor.u32 %v12743_v1, %v11332_v15  ;;  %v12852_v2 = vld [vmem:[%s17444_s7 + $0x424] sm:$0xf] }
 0xc21   : > { %9056 = vmatpush.bf16.msrb.mxu2 %v11905_v10  ;;  %9017 = vmatpush.bf16.msra.mxu3 %v11521_v56  ;;  %v11774_v10 = vld [vmem:[%s17444_s7 + $0x430] sm:$0xf0]  ;;  %v11301_v56 = vor.u32 %v12735_v9, %v11300_v49  ;;  %v12799_v49 = vld [vmem:[%s17444_s7 + $0x274] sm:$0xf0] }
 0xc22   : > { %v11777_v60 = vor.u32 %v12852_v2, %v11774_v10 }
 0xc25   : > { %9057 = vmatpush.bf16.msrb.mxu2 %v11889_v20  ;;  %9018 = vmatpush.bf16.msra.mxu3 %v11505_v18  ;;  %v12940_v20 = vld [vmem:[%s17444_s7 + $0x6e4] sm:$0xf] }
 0xc26   : > { %v12129_v27 = vor.u32 %v12940_v20, %v12126_v59  ;;  %v12783_v20 = vld [vmem:[%s17444_s7 + $0x1f4] sm:$0xf0]  ;;  %v11540_v59 = vld [vmem:[%s17444_s7 + $0x248] sm:$0xf] }
 0xc28   : > { %9058 = vmatmul.bf16.vlgmr.msrb.gmra.mxu2 %v16230_v4  ;;  %9019 = vmatmul.bf16.vlgmr.msra.gmra.mxu3 %v16072_v57 }
 0xc29   : > { %9080 = vmatpush.bf16.msra.mxu2 %v12193_v11  ;;  %9037 = vmatpush.bf16.msrb.mxu3 %v11873_v24  ;;  %v12731_v11 = vld [vmem:[%s17444_s7 + $0x54] sm:$0xf0]  ;;  %v12936_v24 = vld [vmem:[%s17444_s7 + $0x6c4] sm:$0xf] }
 0xc2a   : > { %v11285_v18 = vor.u32 %v12731_v11, %v11284_v31  ;;  %v12795_v31 = vld [vmem:[%s17444_s7 + $0x254] sm:$0xf0] }
 0xc2b   : > { %v8916_v43 = vpop.f32.mrf.mxu3 }
 0xc2c   : > { %v8917_v28 = vadd.f32 %v8916_v43, %v16369_v51  ;;  %v11809_v51 = vor.u32 %v12860_v14, %v11806_v0  ;;  %v12924_v43 = vld [vmem:[%s17444_s7 + $0x664] sm:$0xf]  ;;  %v11588_v0 = vld [vmem:[%s17444_s7 + $0x2a8] sm:$0xf] }
 0xc2d   : > { %9081 = vmatpush.bf16.msra.mxu2 %v12177_v17  ;;  %9038 = vmatpush.bf16.msrb.mxu3 %v11857_v7  ;;  %v12110_v17 = vld [vmem:[%s17444_s7 + $0x6d0] sm:$0xf0]  ;;  %v12932_v7 = vld [vmem:[%s17444_s7 + $0x6a4] sm:$0xf] }
 0xc2e   : > { %v12113_v41 = vor.u32 %v12936_v24, %v12110_v17  ;;  %v12791_v24 = vld [vmem:[%s17444_s7 + $0x234] sm:$0xf0] }
 0xc31   : > { %9082 = vmatpush.bf16.msra.mxu2 %v12161_v62  ;;  %9039 = vmatpush.bf16.msrb.mxu3 %v11841_v38  ;;  %v12094_v62 = vld [vmem:[%s17444_s7 + $0x6b0] sm:$0xf0]  ;;  %v11253_v38 = vor.u32 %v12723_v46, %v11252_v42  ;;  %v12879_v42 = vld [vmem:[%s17444_s7 + $0x4f4] sm:$0xf0] }
 0xc32   : > { %v12097_v45 = vor.u32 %v12932_v7, %v12094_v62  ;;  %v12787_v7 = vld [vmem:[%s17444_s7 + $0x214] sm:$0xf0]  ;;  %v11876_v62 = vld [vmem:[%s17444_s7 + $0x4e8] sm:$0xf] }
 0xc33   : > { %v8918_v32 = vpop.f32.mrf.mxu3 }
 0xc34   : > { %v12916_v32 = vld [vmem:[%s17444_s7 + $0x624] sm:$0xf] }
 0xc35   : > { %9083 = vmatpush.bf16.msra.mxu2 %v12145_v26  ;;  %9040 = vmatpush.bf16.msrb.mxu3 %v11825_v63  ;;  %v12928_v26 = vld [vmem:[%s17444_s7 + $0x684] sm:$0xf]  ;;  %v12062_v63 = vld [vmem:[%s17444_s7 + $0x670] sm:$0xf0] }
 0xc36   : > { %v12081_v58 = vor.u32 %v12928_v26, %v12078_v48  ;;  %v12065_v1 = vor.u32 %v12924_v43, %v12062_v63  ;;  %v11860_v26 = vld [vmem:[%s17444_s7 + $0x4c8] sm:$0xf]  ;;  %v12875_v48 = vld [vmem:[%s17444_s7 + $0x4d4] sm:$0xf0] }
 0xc37   : > { %v11844_v43 = vld [vmem:[%s17444_s7 + $0x4a8] sm:$0xf]  ;;  %v12871_v63 = vld [vmem:[%s17444_s7 + $0x4b4] sm:$0xf0] }
 0xc38   : > { %12203 = vmatmul.msk.bf16.vlgmr.msra.gmra.mxu2 %vm5699_vm1, %v16278_v23 }
 0xc39   : > { %9089 = vmatpush.bf16.msrb.mxu2 %v11365_v52  ;;  %9041 = vmatpush.bf16.msrb.mxu3 %v11809_v51  ;;  %v11604_v52 = vld [vmem:[%s17444_s7 + $0x2c8] sm:$0xf]  ;;  %v12920_v51 = vld [vmem:[%s17444_s7 + $0x644] sm:$0xf] }
 0xc3a   : > { %v12049_v19 = vor.u32 %v12920_v51, %v12046_v61  ;;  %v11845_v51 = vor.u32 %v12871_v63, %v11844_v43  ;;  %v11684_v43 = vld [vmem:[%s17444_s7 + $0x368] sm:$0xf]  ;;  %v12831_v63 = vld [vmem:[%s17444_s7 + $0x374] sm:$0xf0] }
 0xc3b   : > { %v8929_v5 = vpop.f32.mrf.mxu3 }
 0xc3c   : > { %v8930_v35 = vadd.f32 %v8929_v5, %v8917_v28  ;;  %v11605_v28 = vor.u32 %v12811_v55, %v11604_v52  ;;  %v11428_v52 = vld [vmem:[%s17444_s7 + $0x168] sm:$0xf]  ;;  %v12767_v55 = vld [vmem:[%s17444_s7 + $0x174] sm:$0xf0] }
 0xc3d   : > { %9090 = vmatpush.bf16.msrb.mxu2 %v11349_v16  ;;  %9042 = vmatpush.bf16.msrb.mxu3 %v11793_v37  ;;  %v12807_v16 = vld [vmem:[%s17444_s7 + $0x2b4] sm:$0xf0]  ;;  %v12030_v37 = vld [vmem:[%s17444_s7 + $0x630] sm:$0xf0] }
 0xc3e   : > { %v11589_v30 = vor.u32 %v12807_v16, %v11588_v0  ;;  %v12033_v9 = vor.u32 %v12916_v32, %v12030_v37  ;;  %v12763_v0 = vld [vmem:[%s17444_s7 + $0x154] sm:$0xf0] }
 0xc3f   : > { %v12759_v32 = vld [vmem:[%s17444_s7 + $0x134] sm:$0xf0] }
 0xc41   : > { %9091 = vmatpush.bf16.msrb.mxu2 %v11333_v29  ;;  %9043 = vmatpush.bf16.msrb.mxu3 %v11777_v60  ;;  %v11572_v29 = vld [vmem:[%s17444_s7 + $0x288] sm:$0xf]  ;;  %v12912_v60 = vld [vmem:[%s17444_s7 + $0x604] sm:$0xf] }
 0xc42   : > { %v11573_v2 = vor.u32 %v12803_v39, %v11572_v29  ;;  %v12017_v11 = vor.u32 %v12912_v60, %v12014_v22  ;;  %v12867_v29 = vld [vmem:[%s17444_s7 + $0x494] sm:$0xf0] }
 0xc43   : > { %v8931_v3 = vpop.f32.mrf.mxu3 }
 0xc45   : > { %9092 = vmatpush.bf16.msrb.mxu2 %v11317_v21  ;;  %9044 = vmatpush.bf16.msrb.mxu3 %v11761_v25  ;;  %v11556_v21 = vld [vmem:[%s17444_s7 + $0x268] sm:$0xf]  ;;  %v11541_v25 = vor.u32 %v12795_v31, %v11540_v59  ;;  %v12859_v31 = vld [vmem:[%s17444_s7 + $0x454] sm:$0xf0] }
 0xc46   : > { %v11557_v54 = vor.u32 %v12799_v49, %v11556_v21  ;;  %v11380_v49 = vld [vmem:[%s17444_s7 + $0x108] sm:$0xf] }
 0xc47   : > { %v11796_v59 = vld [vmem:[%s17444_s7 + $0x448] sm:$0xf] }
 0xc48   : > { %9045 = vmatmul.bf16.vlgmr.msrb.gmra.mxu3 %v16144_v44 }
 0xc49   : > { %9093 = vmatpush.bf16.msrb.mxu2 %v11301_v56  ;;  %9063 = vmatpush.bf16.msra.mxu3 %v12129_v27  ;;  %v11492_v56 = vld [vmem:[%s17444_s7 + $0x1e8] sm:$0xf]  ;;  %v12779_v27 = vld [vmem:[%s17444_s7 + $0x1d4] sm:$0xf0] }
 0xc4a   : > { %v11493_v5 = vor.u32 %v12783_v20, %v11492_v56  ;;  %v11748_v56 = vld [vmem:[%s17444_s7 + $0x3e8] sm:$0xf]  ;;  %v12847_v20 = vld [vmem:[%s17444_s7 + $0x3f4] sm:$0xf0] }
 0xc4b   : > { %v8942_v14 = vpop.f32.mrf.mxu2 }
 0xc4c   : > { %v16593_v15 = vadd.f32 %v8942_v14, %v8930_v35  ;;  %v11476_v35 = vld [vmem:[%s17444_s7 + $0x1c8] sm:$0xf] }
 0xc4d   : > { %9094 = vmatpush.bf16.msrb.mxu2 %v11285_v18  ;;  %9064 = vmatpush.bf16.msra.mxu3 %v12113_v41  ;;  %v11524_v18 = vld [vmem:[%s17444_s7 + $0x228] sm:$0xf]  ;;  %v11477_v17 = vor.u32 %v12779_v27, %v11476_v35  ;;  %v12775_v41 = vld [vmem:[%s17444_s7 + $0x1b4] sm:$0xf0] }
 0xc4e   : > { %v11525_v47 = vor.u32 %v12791_v24, %v11524_v18  ;;  %v11461_v46 = vor.u32 %v12775_v41, %v11460_v12  ;;  %v11412_v14 = vld [vmem:[%s17444_s7 + $0x148] sm:$0xf]  ;;  %v12843_v27 = vld [vmem:[%s17444_s7 + $0x3d4] sm:$0xf0] }
 0xc4f   : > { %v11413_v39 = vor.u32 %v12763_v0, %v11412_v14  ;;  %v11732_v35 = vld [vmem:[%s17444_s7 + $0x3c8] sm:$0xf]  ;;  %v12855_v24 = vld [vmem:[%s17444_s7 + $0x434] sm:$0xf0] }
 0xc50   : > { %v11780_v18 = vld [vmem:[%s17444_s7 + $0x428] sm:$0xf]  ;;  %v12935_v0 = vld [vmem:[%s17444_s7 + $0x6b4] sm:$0xf0] }
 0xc51   : > { %9095 = vmatpush.bf16.msrb.mxu2 %v11269_v50  ;;  %9065 = vmatpush.bf16.msra.mxu3 %v12097_v45  ;;  %v11508_v50 = vld [vmem:[%s17444_s7 + $0x208] sm:$0xf]  ;;  %v11781_v41 = vor.u32 %v12855_v24, %v11780_v18 }
 0xc52   : > { %v11509_v3 = vor.u32 %v12787_v7, %v11508_v50  ;;  %v11716_v50 = vld [vmem:[%s17444_s7 + $0x3a8] sm:$0xf]  ;;  %v12839_v7 = vld [vmem:[%s17444_s7 + $0x3b4] sm:$0xf0] }
 0xc53   : > { %v8944_v10 = vpop.f32.mrf.mxu2  ;;  %v12100_v14 = vld [vmem:[%s17444_s7 + $0x6a8] sm:$0xf] }
 0xc54   : > { %v12863_v10 = vld [vmem:[%s17444_s7 + $0x474] sm:$0xf0]  ;;  %v11988_v24 = vld [vmem:[%s17444_s7 + $0x5c8] sm:$0xf] }
 0xc55   : > { %9096 = vmatpush.bf16.msrb.mxu2 %v11253_v38  ;;  %9066 = vmatpush.bf16.msra.mxu3 %v12081_v58  ;;  %v11877_v38 = vor.u32 %v12879_v42, %v11876_v62  ;;  %v11861_v58 = vor.u32 %v12875_v48, %v11860_v26  ;;  %v11764_v42 = vld [vmem:[%s17444_s7 + $0x408] sm:$0xf]  ;;  %v12835_v26 = vld [vmem:[%s17444_s7 + $0x394] sm:$0xf0] }
 0xc58   : > { %9097 = vmatmul.bf16.vlgmr.msrb.gmra.mxu2 %v15848_v40 }
 0xc59   : > { %9115 = vmatpush.bf16.msra.mxu2 %v11621_v33  ;;  %9067 = vmatpush.bf16.msra.mxu3 %v12065_v1  ;;  %v11445_v33 = vor.u32 %v12771_v53, %v11444_v8  ;;  %v12943_v8 = vld [vmem:[%s17444_s7 + $0x6f4] sm:$0xf0]  ;;  %v11717_v53 = vor.u32 %v12839_v7, %v11716_v50  ;;  %v11972_v7 = vld [vmem:[%s17444_s7 + $0x5a8] sm:$0xf] }
 0xc5d   : > { %9116 = vmatpush.bf16.msra.mxu2 %v11605_v28  ;;  %9068 = vmatpush.bf16.msra.mxu3 %v12049_v19  ;;  %v11429_v28 = vor.u32 %v12767_v55, %v11428_v52  ;;  %v11396_v19 = vld [vmem:[%s17444_s7 + $0x128] sm:$0xf]  ;;  %v12939_v52 = vld [vmem:[%s17444_s7 + $0x6d4] sm:$0xf0] }
 0xc5e   : > { %v11397_v21 = vor.u32 %v12759_v32, %v11396_v19  ;;  %v12931_v19 = vld [vmem:[%s17444_s7 + $0x694] sm:$0xf0] }
 0xc61   : > { %9117 = vmatpush.bf16.msra.mxu2 %v11589_v30  ;;  %9069 = vmatpush.bf16.msra.mxu3 %v12033_v9  ;;  %v11828_v30 = vld [vmem:[%s17444_s7 + $0x488] sm:$0xf]  ;;  %v12755_v9 = vld [vmem:[%s17444_s7 + $0x114] sm:$0xf0] }
 0xc63   : > { %v8968_v45 = vpop.f32.mrf.mxu2 }
 0xc65   : > { %9118 = vmatpush.bf16.msra.mxu2 %v11573_v2  ;;  %9070 = vmatpush.bf16.msra.mxu3 %v12017_v11  ;;  %v11812_v2 = vld [vmem:[%s17444_s7 + $0x468] sm:$0xf]  ;;  %v11381_v11 = vor.u32 %v12755_v9, %v11380_v49  ;;  %v12927_v49 = vld [vmem:[%s17444_s7 + $0x674] sm:$0xf0] }
 0xc68   : > { %9071 = vmatmul.bf16.vlgmr.msra.gmra.mxu3 %v16200_v34 }
 0xc69   : > { %9119 = vmatpush.bf16.msra.mxu2 %v11557_v54  ;;  %9102 = vmatpush.bf16.msrb.mxu3 %v11493_v5  ;;  %v11813_v54 = vor.u32 %v12863_v10, %v11812_v2  ;;  %v11749_v5 = vor.u32 %v12847_v20, %v11748_v56  ;;  %v12819_v56 = vld [vmem:[%s17444_s7 + $0x314] sm:$0xf0] }
 0xc6b   : > { %v8955_v16 = vpop.f32.mrf.mxu3  ;;  %v8970_v1 = vpop.f32.mrf.mxu2 }
 0xc6c   : > { %v8956_v61 = vadd.f32 %v8955_v16, %v16593_v15  ;;  %v11829_v15 = vor.u32 %v12867_v29, %v11828_v30  ;;  %v11685_v16 = vor.u32 %v12831_v63, %v11684_v43  ;;  %v11668_v1 = vld [vmem:[%s17444_s7 + $0x348] sm:$0xf]  ;;  %v7671_v30 = vperm.slane %v16333_v36, 1  ;;  %v12823_v36 = vld [vmem:[%s17444_s7 + $0x334] sm:$0xf0] }
 0xc6d   : > { %9120 = vmatpush.bf16.msra.mxu2 %v11541_v25  ;;  %9103 = vmatpush.bf16.msrb.mxu3 %v11477_v17  ;;  %v11797_v25 = vor.u32 %v12859_v31, %v11796_v59  ;;  %v11733_v17 = vor.u32 %v12843_v27, %v11732_v35  ;;  %v12101_v29 = vor.u32 %v12935_v0, %v12100_v14  ;;  %v12004_v31 = vld [vmem:[%s17444_s7 + $0x5e8] sm:$0xf]  ;;  %v12895_v63 = vld [vmem:[%s17444_s7 + $0x574] sm:$0xf0]  ;;  %v12773_v14 = vld [vmem:[%s17444_s7 + $0x1ac] sm:$0xf] }
 0xc6e   : > { %v8969_v37 = vadd.f32 %v8968_v45, %v8956_v61  ;;  %v11940_v43 = vld [vmem:[%s17444_s7 + $0x568] sm:$0xf]  ;;  %v11462_v0 = vld [vmem:[%s17444_s7 + $0x1b8] sm:$0xf0] }
 0xc71   : > { %9121 = vmatpush.bf16.msra.mxu2 %v11525_v47  ;;  %9104 = vmatpush.bf16.msrb.mxu3 %v11461_v46  ;;  %v12851_v46 = vld [vmem:[%s17444_s7 + $0x414] sm:$0xf0] }
 0xc72   : > { %v11765_v45 = vor.u32 %v12851_v46, %v11764_v42  ;;  %v12903_v42 = vld [vmem:[%s17444_s7 + $0x5b4] sm:$0xf0]  ;;  %v12020_v46 = vld [vmem:[%s17444_s7 + $0x608] sm:$0xf] }
 0xc73   : > { %v8957_v60 = vpop.f32.mrf.mxu3  ;;  %v16725_v22 = vpop.f32.mrf.mxu2 }
 0xc75   : > { %9122 = vmatpush.bf16.msra.mxu2 %v11509_v3  ;;  %9105 = vmatpush.bf16.msrb.mxu3 %v11445_v33  ;;  %v12132_v3 = vld [vmem:[%s17444_s7 + $0x6e8] sm:$0xf] }
 0xc76   : > { %v12133_v48 = vor.u32 %v12943_v8, %v12132_v3  ;;  %v12116_v33 = vld [vmem:[%s17444_s7 + $0x6c8] sm:$0xf]  ;;  %v12915_v3 = vld [vmem:[%s17444_s7 + $0x614] sm:$0xf0]  ;;  %v12781_v8 = vld [vmem:[%s17444_s7 + $0x1ec] sm:$0xf] }
 0xc78   : > { %9123 = vmatmul.bf16.vlgmr.msra.gmra.mxu2 %v16072_v57 }
 0xc79   : > { %9141 = vmatpush.bf16.msrb.mxu2 %v11877_v38  ;;  %9106 = vmatpush.bf16.msrb.mxu3 %v11429_v28  ;;  %v11700_v38 = vld [vmem:[%s17444_s7 + $0x388] sm:$0xf]  ;;  %v12117_v28 = vor.u32 %v12939_v52, %v12116_v33  ;;  %v12777_v52 = vld [vmem:[%s17444_s7 + $0x1cc] sm:$0xf] }
 0xc7a   : > { %v11701_v55 = vor.u32 %v12835_v26, %v11700_v38  ;;  %v12021_v38 = vor.u32 %v12915_v3, %v12020_v46  ;;  %v11956_v26 = vld [vmem:[%s17444_s7 + $0x588] sm:$0xf]  ;;  %v12753_v46 = vld [vmem:[%s17444_s7 + $0x10c] sm:$0xf]  ;;  %v11382_v3 = vld [vmem:[%s17444_s7 + $0x118] sm:$0xf0] }
 0xc7b   : > { %v8981_v47 = vpop.f32.mrf.mxu3  ;;  %v9009_v12 = vpop.f32.mrf.mxu2 }
 0xc7c   : > { %v16757_v62 = vadd.f32 %v8981_v47, %v8969_v37  ;;  %v12036_v47 = vld [vmem:[%s17444_s7 + $0x628] sm:$0xf]  ;;  %v12919_v12 = vld [vmem:[%s17444_s7 + $0x634] sm:$0xf0] }
 0xc7d   : > { %9142 = vmatpush.bf16.msrb.mxu2 %v11861_v58  ;;  %9107 = vmatpush.bf16.msrb.mxu3 %v11413_v39  ;;  %v12084_v39 = vld [vmem:[%s17444_s7 + $0x688] sm:$0xf]  ;;  %v12037_v50 = vor.u32 %v12919_v12, %v12036_v47  ;;  %v11398_v47 = vld [vmem:[%s17444_s7 + $0x138] sm:$0xf0] }
 0xc7e   : > { %v12085_v10 = vor.u32 %v12931_v19, %v12084_v39  ;;  %v12769_v39 = vld [vmem:[%s17444_s7 + $0x18c] sm:$0xf]  ;;  %v11446_v19 = vld [vmem:[%s17444_s7 + $0x198] sm:$0xf0] }
 0xc81   : > { %9143 = vmatpush.bf16.msrb.mxu2 %v11845_v51  ;;  %9108 = vmatpush.bf16.msrb.mxu3 %v11397_v21  ;;  %v12827_v51 = vld [vmem:[%s17444_s7 + $0x354] sm:$0xf0]  ;;  %v12068_v21 = vld [vmem:[%s17444_s7 + $0x668] sm:$0xf] }
 0xc82   : > { %v11669_v32 = vor.u32 %v12827_v51, %v11668_v1  ;;  %v12069_v59 = vor.u32 %v12927_v49, %v12068_v21  ;;  %v11924_v1 = vld [vmem:[%s17444_s7 + $0x548] sm:$0xf]  ;;  %v12891_v51 = vld [vmem:[%s17444_s7 + $0x554] sm:$0xf0]  ;;  %v12765_v21 = vld [vmem:[%s17444_s7 + $0x16c] sm:$0xf] }
 0xc83   : > { %v8983_v58 = vpop.f32.mrf.mxu3  ;;  %v11430_v49 = vld [vmem:[%s17444_s7 + $0x178] sm:$0xf0] }
 0xc85   : > { %9144 = vmatpush.bf16.msrb.mxu2 %v11829_v15  ;;  %9109 = vmatpush.bf16.msrb.mxu3 %v11381_v11  ;;  %v11652_v15 = vld [vmem:[%s17444_s7 + $0x328] sm:$0xf] }
 0xc86   : > { %v11653_v9 = vor.u32 %v12823_v36, %v11652_v15  ;;  %v12052_v11 = vld [vmem:[%s17444_s7 + $0x648] sm:$0xf]  ;;  %v12887_v36 = vld [vmem:[%s17444_s7 + $0x534] sm:$0xf0] }
 0xc87   : > { %v11908_v15 = vld [vmem:[%s17444_s7 + $0x528] sm:$0xf] }
 0xc88   : > { %9110 = vmatmul.bf16.vlgmr.msrb.gmra.mxu3 %v15964_v6 }
 0xc89   : > { %9145 = vmatpush.bf16.msrb.mxu2 %v11813_v54  ;;  %9128 = vmatpush.bf16.msra.mxu3 %v11749_v5  ;;  %v11636_v54 = vld [vmem:[%s17444_s7 + $0x308] sm:$0xf]  ;;  %v12923_v5 = vld [vmem:[%s17444_s7 + $0x654] sm:$0xf0] }
 0xc8a   : > { %v12053_v18 = vor.u32 %v12923_v5, %v12052_v11  ;;  %v11414_v11 = vld [vmem:[%s17444_s7 + $0x158] sm:$0xf0] }
 0xc8b   : > { %v16803_v61 = vpop.f32.mrf.mxu2  ;;  %v8994_v37 = vpop.f32.mrf.mxu3 }
 0xc8c   : > { %v8995_v2 = vadd.f32 %v8994_v37, %v7671_v30 }
 0xc8d   : > { %9146 = vmatpush.bf16.msrb.mxu2 %v11797_v25  ;;  %9129 = vmatpush.bf16.msra.mxu3 %v11733_v17  ;;  %v11637_v25 = vor.u32 %v12819_v56, %v11636_v54  ;;  %v12907_v17 = vld [vmem:[%s17444_s7 + $0x5d4] sm:$0xf0]  ;;  %v11892_v56 = vld [vmem:[%s17444_s7 + $0x508] sm:$0xf] }
 0xc8e   : > { %v16825_v60 = vadd.f32 %v16725_v22, %v8995_v2  ;;  %v12911_v22 = vld [vmem:[%s17444_s7 + $0x5f4] sm:$0xf0] }
 0xc8f   : > { %v12005_v27 = vor.u32 %v12911_v22, %v12004_v31  ;;  %v12196_v31 = vld [vmem:[%s17444_s7 + $0x768] sm:$0xf]  ;;  %v12761_v22 = vld [vmem:[%s17444_s7 + $0x14c] sm:$0xf] }
 0xc91   : > { %9147 = vmatpush.bf16.msrb.mxu2 %v11781_v41  ;;  %9130 = vmatpush.bf16.msra.mxu3 %v11717_v53  ;;  %v11989_v41 = vor.u32 %v12907_v17, %v11988_v24  ;;  %v11494_v53 = vld [vmem:[%s17444_s7 + $0x1f8] sm:$0xf0]  ;;  %v12955_v24 = vld [vmem:[%s17444_s7 + $0x754] sm:$0xf0]  ;;  %v12757_v17 = vld [vmem:[%s17444_s7 + $0x12c] sm:$0xf] }
 0xc92   : > { %v11497_v33 = vor.u32 %v12781_v8, %v11494_v53  ;;  %v12845_v8 = vld [vmem:[%s17444_s7 + $0x3ec] sm:$0xf]  ;;  %v11750_v53 = vld [vmem:[%s17444_s7 + $0x3f8] sm:$0xf0] }
 0xc93   : > { %v9035_v20 = vpop.f32.mrf.mxu2  ;;  %v8996_v35 = vpop.f32.mrf.mxu3 }
 0xc95   : > { %9148 = vmatpush.bf16.msrb.mxu2 %v11765_v45  ;;  %9131 = vmatpush.bf16.msra.mxu3 %v11701_v55  ;;  %v11973_v45 = vor.u32 %v12903_v42, %v11972_v7  ;;  %v11478_v55 = vld [vmem:[%s17444_s7 + $0x1d8] sm:$0xf0]  ;;  %v12164_v7 = vld [vmem:[%s17444_s7 + $0x728] sm:$0xf]  ;;  %v12951_v42 = vld [vmem:[%s17444_s7 + $0x734] sm:$0xf0] }
 0xc98   : > { %9149 = vmatmul.bf16.vlgmr.msrb.gmra.mxu2 %v16144_v44 }
 0xc99   : > { %9167 = vmatpush.bf16.msra.mxu2 %v12133_v48  ;;  %9132 = vmatpush.bf16.msra.mxu3 %v11685_v16  ;;  %v12899_v48 = vld [vmem:[%s17444_s7 + $0x594] sm:$0xf0]  ;;  %v11941_v16 = vor.u32 %v12895_v63, %v11940_v43  ;;  %v11734_v43 = vld [vmem:[%s17444_s7 + $0x3d8] sm:$0xf0] }
 0xc9a   : > { %v11957_v58 = vor.u32 %v12899_v48, %v11956_v26  ;;  %v12148_v26 = vld [vmem:[%s17444_s7 + $0x708] sm:$0xf]  ;;  %v12947_v48 = vld [vmem:[%s17444_s7 + $0x714] sm:$0xf0] }
 0xc9b   : > { %v12149_v63 = vor.u32 %v12947_v48, %v12148_v26  ;;  %v11254_v26 = vld [vmem:[%s17444_s7 + $0x18] sm:$0xf0] }
 0xc9d   : > { %9168 = vmatpush.bf16.msra.mxu2 %v12117_v28  ;;  %9133 = vmatpush.bf16.msra.mxu3 %v11669_v32  ;;  %v11481_v28 = vor.u32 %v12777_v52, %v11478_v55  ;;  %v11925_v32 = vor.u32 %v12891_v51, %v11924_v1  ;;  %v12749_v52 = vld [vmem:[%s17444_s7 + $0xec] sm:$0xf]  ;;  %v11366_v55 = vld [vmem:[%s17444_s7 + $0xf8] sm:$0xf0] }
 0xc9e   : > { %v11350_v1 = vld [vmem:[%s17444_s7 + $0xd8] sm:$0xf0]  ;;  %v12837_v51 = vld [vmem:[%s17444_s7 + $0x3ac] sm:$0xf] }
 0xca1   : > { %9169 = vmatpush.bf16.msra.mxu2 %v12101_v29  ;;  %9134 = vmatpush.bf16.msra.mxu3 %v11653_v9  ;;  %v11465_v29 = vor.u32 %v12773_v14, %v11462_v0  ;;  %v11909_v9 = vor.u32 %v12887_v36, %v11908_v15  ;;  %v11369_v14 = vor.u32 %v12749_v52, %v11366_v55  ;;  %v12833_v15 = vld [vmem:[%s17444_s7 + $0x38c] sm:$0xf]  ;;  %v11622_v55 = vld [vmem:[%s17444_s7 + $0x2f8] sm:$0xf0] }
 0xca2   : > { %v12813_v52 = vld [vmem:[%s17444_s7 + $0x2ec] sm:$0xf] }
 0xca5   : > { %9170 = vmatpush.bf16.msra.mxu2 %v12085_v10  ;;  %9135 = vmatpush.bf16.msra.mxu3 %v11637_v25  ;;  %v11449_v10 = vor.u32 %v12769_v39, %v11446_v19 }
 0xca8   : > { %9136 = vmatmul.bf16.vlgmr.msra.gmra.mxu3 %v16102_v13 }
 0xca9   : > { %9171 = vmatpush.bf16.msra.mxu2 %v12069_v59  ;;  %9154 = vmatpush.bf16.msrb.mxu3 %v12005_v27  ;;  %v11433_v59 = vor.u32 %v12765_v21, %v11430_v49  ;;  %v11417_v27 = vor.u32 %v12761_v22, %v11414_v11  ;;  %v12737_v49 = vld [vmem:[%s17444_s7 + $0x8c] sm:$0xf] }
 0xcaa   : > { %v12825_v22 = vld [vmem:[%s17444_s7 + $0x34c] sm:$0xf] }
 0xcab   : > { %v16907_v30 = vpop.f32.mrf.mxu2  ;;  %v9020_v37 = vpop.f32.mrf.mxu3 }
 0xcac   : > { %v9021_v2 = vadd.f32 %v9020_v37, %v16825_v60  ;;  %v12883_v60 = vld [vmem:[%s17444_s7 + $0x514] sm:$0xf0]  ;;  %v11334_v37 = vld [vmem:[%s17444_s7 + $0xb8] sm:$0xf0] }
 0xcad   : > { %9172 = vmatpush.bf16.msra.mxu2 %v12053_v18  ;;  %9155 = vmatpush.bf16.msrb.mxu3 %v11989_v41  ;;  %v11893_v5 = vor.u32 %v12883_v60, %v11892_v56  ;;  %v12180_v18 = vld [vmem:[%s17444_s7 + $0x748] sm:$0xf]  ;;  %v12829_v56 = vld [vmem:[%s17444_s7 + $0x36c] sm:$0xf] }
 0xcae   : > { %v16929_v54 = vadd.f32 %v16803_v61, %v9021_v2  ;;  %v12959_v61 = vld [vmem:[%s17444_s7 + $0x774] sm:$0xf0]  ;;  %v12181_v12 = vor.u32 %v12955_v24, %v12180_v18  ;;  %v12821_v24 = vld [vmem:[%s17444_s7 + $0x32c] sm:$0xf] }
 0xcaf   : > { %v12197_v35 = vor.u32 %v12959_v61, %v12196_v31  ;;  %v12733_v31 = vld [vmem:[%s17444_s7 + $0x6c] sm:$0xf]  ;;  %v11302_v61 = vld [vmem:[%s17444_s7 + $0x78] sm:$0xf0] }
 0xcb1   : > { %9173 = vmatpush.bf16.msra.mxu2 %v12037_v50  ;;  %9156 = vmatpush.bf16.msrb.mxu3 %v11973_v45  ;;  %v11401_v50 = vor.u32 %v12757_v17, %v11398_v47  ;;  %v12165_v45 = vor.u32 %v12951_v42, %v12164_v7  ;;  %v11654_v17 = vld [vmem:[%s17444_s7 + $0x338] sm:$0xf0]  ;;  %v12817_v42 = vld [vmem:[%s17444_s7 + $0x30c] sm:$0xf] }
 0xcb2   : > { %v11270_v7 = vld [vmem:[%s17444_s7 + $0x38] sm:$0xf0] }
 0xcb3   : > { %v9061_v20 = vpop.f32.mrf.mxu2  ;;  %v9022_v25 = vpop.f32.mrf.mxu3 }
 0xcb5   : > { %9174 = vmatpush.bf16.msra.mxu2 %v12021_v38  ;;  %9157 = vmatpush.bf16.msrb.mxu3 %v11957_v58  ;;  %v11385_v38 = vor.u32 %v12753_v46, %v11382_v3  ;;  %v12841_v58 = vld [vmem:[%s17444_s7 + $0x3cc] sm:$0xf]  ;;  %v11638_v46 = vld [vmem:[%s17444_s7 + $0x318] sm:$0xf0] }
 0xcb6   : > { %v11737_v0 = vor.u32 %v12841_v58, %v11734_v43  ;;  %v12909_v3 = vld [vmem:[%s17444_s7 + $0x5ec] sm:$0xf]  ;;  %v11990_v43 = vld [vmem:[%s17444_s7 + $0x5d8] sm:$0xf0] }
 0xcb7   : > { %v12905_v58 = vld [vmem:[%s17444_s7 + $0x5cc] sm:$0xf] }
 0xcb8   : > { %9175 = vmatmul.bf16.vlgmr.msra.gmra.mxu2 %v16200_v34 }
 0xcb9   : > { %9206 = vmatpush.bf16.msrb.mxu2 %v11497_v33  ;;  %9158 = vmatpush.bf16.msrb.mxu3 %v11941_v16  ;;  %v11753_v33 = vor.u32 %v12845_v8, %v11750_v53  ;;  %v12745_v16 = vld [vmem:[%s17444_s7 + $0xcc] sm:$0xf]  ;;  %v12006_v8 = vld [vmem:[%s17444_s7 + $0x5f8] sm:$0xf0] }
 0xcba   : > { %v11353_v39 = vor.u32 %v12745_v16, %v11350_v1  ;;  %v11606_v16 = vld [vmem:[%s17444_s7 + $0x2d8] sm:$0xf0]  ;;  %v12901_v1 = vld [vmem:[%s17444_s7 + $0x5ac] sm:$0xf] }
 0xcbb   : > { %v16961_v41 = vpop.f32.mrf.mxu2 }
 0xcbd   : > { %9207 = vmatpush.bf16.msrb.mxu2 %v11481_v28  ;;  %9159 = vmatpush.bf16.msrb.mxu3 %v11925_v32  ;;  %v12741_v32 = vld [vmem:[%s17444_s7 + $0xac] sm:$0xf] }
 0xcbe   : > { %v11337_v2 = vor.u32 %v12741_v32, %v11334_v37  ;;  %v11590_v32 = vld [vmem:[%s17444_s7 + $0x2b8] sm:$0xf0]  ;;  %v12897_v37 = vld [vmem:[%s17444_s7 + $0x58c] sm:$0xf] }
 0xcc1   : > { %9208 = vmatpush.bf16.msrb.mxu2 %v11465_v29  ;;  %9160 = vmatpush.bf16.msrb.mxu3 %v11909_v9  ;;  %v11718_v29 = vld [vmem:[%s17444_s7 + $0x3b8] sm:$0xf0] }
 0xcc2   : > { %v11721_v19 = vor.u32 %v12837_v51, %v11718_v29  ;;  %v11318_v9 = vld [vmem:[%s17444_s7 + $0x98] sm:$0xf0] }
 0xcc3   : > { %v9087_v28 = vpop.f32.mrf.mxu2  ;;  %v11321_v20 = vor.u32 %v12737_v49, %v11318_v9  ;;  %v11974_v51 = vld [vmem:[%s17444_s7 + $0x5b8] sm:$0xf0] }
 0xcc4   : > { %v11625_v28 = vor.u32 %v12813_v52, %v11622_v55  ;;  %v11942_v49 = vld [vmem:[%s17444_s7 + $0x578] sm:$0xf0] }
 0xcc5   : > { %9209 = vmatpush.bf16.msrb.mxu2 %v11449_v10  ;;  %9161 = vmatpush.bf16.msrb.mxu3 %v11893_v5  ;;  %v11305_v5 = vor.u32 %v12733_v31, %v11302_v61  ;;  %v12182_v52 = vld [vmem:[%s17444_s7 + $0x758] sm:$0xf0] }
 0xcc8   : > { %9162 = vmatmul.bf16.vlgmr.msrb.gmra.mxu3 %v16230_v4 }
 0xcc9   : > { %9210 = vmatpush.bf16.msrb.mxu2 %v11433_v59  ;;  %9184 = vmatpush.bf16.msra.mxu3 %v12197_v35  ;;  %v12729_v35 = vld [vmem:[%s17444_s7 + $0x4c] sm:$0xf] }
 0xccb   : > { %v9046_v36 = vpop.f32.mrf.mxu3 }
 0xccc   : > { %v9047_v10 = vadd.f32 %v9046_v36, %v16929_v54  ;;  %v11686_v54 = vld [vmem:[%s17444_s7 + $0x378] sm:$0xf0] }
 0xccd   : > { %9211 = vmatpush.bf16.msrb.mxu2 %v11417_v27  ;;  %9185 = vmatpush.bf16.msra.mxu3 %v12181_v12  ;;  %v11689_v59 = vor.u32 %v12829_v56, %v11686_v54  ;;  %v11286_v27 = vld [vmem:[%s17444_s7 + $0x58] sm:$0xf0]  ;;  %v11657_v12 = vor.u32 %v12821_v24, %v11654_v17  ;;  %v12789_v17 = vld [vmem:[%s17444_s7 + $0x22c] sm:$0xf] }
 0xcce   : > { %v17041_v60 = vadd.f32 %v16907_v30, %v9047_v10  ;;  %v11670_v30 = vld [vmem:[%s17444_s7 + $0x358] sm:$0xf0]  ;;  %v11289_v47 = vor.u32 %v12729_v35, %v11286_v27  ;;  %v12801_v10 = vld [vmem:[%s17444_s7 + $0x28c] sm:$0xf] }
 0xccf   : > { %v11673_v25 = vor.u32 %v12825_v22, %v11670_v30  ;;  %v12793_v30 = vld [vmem:[%s17444_s7 + $0x24c] sm:$0xf]  ;;  %v11910_v35 = vld [vmem:[%s17444_s7 + $0x538] sm:$0xf0] }
 0xcd1   : > { %9212 = vmatpush.bf16.msrb.mxu2 %v11401_v50  ;;  %9186 = vmatpush.bf16.msra.mxu3 %v12165_v45  ;;  %v12725_v50 = vld [vmem:[%s17444_s7 + $0x2c] sm:$0xf]  ;;  %v11641_v45 = vor.u32 %v12817_v42, %v11638_v46  ;;  %v12198_v42 = vld [vmem:[%s17444_s7 + $0x778] sm:$0xf0] }
 0xcd2   : > { %v11273_v53 = vor.u32 %v12725_v50, %v11270_v7  ;;  %v11894_v50 = vld [vmem:[%s17444_s7 + $0x518] sm:$0xf0]  ;;  %v12957_v7 = vld [vmem:[%s17444_s7 + $0x76c] sm:$0xf] }
 0xcd3   : > { %v9048_v11 = vpop.f32.mrf.mxu3 }
 0xcd4   : > { %v11542_v11 = vld [vmem:[%s17444_s7 + $0x258] sm:$0xf0] }
 0xcd5   : > { %9213 = vmatpush.bf16.msrb.mxu2 %v11385_v38  ;;  %9187 = vmatpush.bf16.msra.mxu3 %v12149_v63  ;;  %v12721_v38 = vld [vmem:[%s17444_s7 + $0xc] sm:$0xf]  ;;  %v11545_v27 = vor.u32 %v12793_v30, %v11542_v11  ;;  %v11782_v30 = vld [vmem:[%s17444_s7 + $0x438] sm:$0xf0]  ;;  %v12964_v11 = vld [vmem:[%s17446_s9 + $0x20] sm:$0xff] }
 0xcd6   : > { %v11257_v63 = vor.u32 %v12721_v38, %v11254_v26  ;;  %v12201_v38 = vor.u32 %v12957_v7, %v12198_v42  ;;  %v12877_v26 = vld [vmem:[%s17444_s7 + $0x4ec] sm:$0xf]  ;;  %v12118_v42 = vld [vmem:[%s17444_s7 + $0x6d8] sm:$0xf0] }
 0xcd7   : > { %v12937_v7 = vld [vmem:[%s17444_s7 + $0x6cc] sm:$0xf] }
 0xcd8   : > { %9214 = vmatmul.bf16.vlgmr.msrb.gmra.mxu2 %v15964_v6  ;;  %v11702_v6 = vld [vmem:[%s17444_s7 + $0x398] sm:$0xf0]  ;;  %12204 = vmatmul.msk.bf16.vlgmr.msra.gmra.mxu3 %vm5699_vm1, %v16278_v23 }
 0xcd9   : > { %9232 = vmatpush.bf16.msra.mxu2 %v11753_v33  ;;  %9193 = vmatpush.bf16.msrb.mxu3 %v11369_v14  ;;  %v11705_v21 = vor.u32 %v12833_v15, %v11702_v6  ;;  %v12009_v33 = vor.u32 %v12909_v3, %v12006_v8  ;;  %v11993_v14 = vor.u32 %v12905_v58, %v11990_v43  ;;  %v12785_v8 = vld [vmem:[%s17444_s7 + $0x20c] sm:$0xf] }
 0xcdb   : > { %v17061_v18 = vpop.f32.mrf.mxu2 }
 0xcdd   : > { %9233 = vmatpush.bf16.msra.mxu2 %v11737_v0  ;;  %9194 = vmatpush.bf16.msrb.mxu3 %v11353_v39  ;;  %v12809_v0 = vld [vmem:[%s17444_s7 + $0x2cc] sm:$0xf]  ;;  %v11977_v39 = vor.u32 %v12901_v1, %v11974_v51 }
 0xcde   : > { %v11609_v29 = vor.u32 %v12809_v0, %v11606_v16  ;;  %v12166_v0 = vld [vmem:[%s17444_s7 + $0x738] sm:$0xf0]  ;;  %v17222_v16 = vld [vmem:[%s17445_s8] sm:$0xf] }
 0xcdf   : > { %v7672_v1 = vperm.slane %v17222_v16, 2 }
 0xce1   : > { %9234 = vmatpush.bf16.msra.mxu2 %v11721_v19  ;;  %9195 = vmatpush.bf16.msrb.mxu3 %v11337_v2  ;;  %v12805_v19 = vld [vmem:[%s17444_s7 + $0x2ac] sm:$0xf] }
 0xce2   : > { %v11593_v6 = vor.u32 %v12805_v19, %v11590_v32  ;;  %v11846_v19 = vld [vmem:[%s17444_s7 + $0x4b8] sm:$0xf0]  ;;  %v12945_v32 = vld [vmem:[%s17444_s7 + $0x70c] sm:$0xf] }
 0xce3   : > { %v9100_v48 = vpop.f32.mrf.mxu2 }
 0xce4   : > { %v11878_v48 = vld [vmem:[%s17444_s7 + $0x4f8] sm:$0xf0] }
 0xce5   : > { %9235 = vmatpush.bf16.msra.mxu2 %v11705_v21  ;;  %9196 = vmatpush.bf16.msrb.mxu3 %v11321_v20  ;;  %v12893_v21 = vld [vmem:[%s17444_s7 + $0x56c] sm:$0xf]  ;;  %v11558_v20 = vld [vmem:[%s17444_s7 + $0x278] sm:$0xf0]  ;;  %v11881_v58 = vor.u32 %v12877_v26, %v11878_v48  ;;  %v12960_v26 = vld [vmem:[%s17446_s9] sm:$0xff] }
 0xce6   : > { %v11945_v54 = vor.u32 %v12893_v21, %v11942_v49  ;;  %v12861_v21 = vld [vmem:[%s17444_s7 + $0x46c] sm:$0xf]  ;;  %v11814_v49 = vld [vmem:[%s17444_s7 + $0x478] sm:$0xf0] }
 0xce7   : > { %v12929_v48 = vld [vmem:[%s17444_s7 + $0x68c] sm:$0xf] }
 0xce9   : > { %9236 = vmatpush.bf16.msra.mxu2 %v11689_v59  ;;  %9197 = vmatpush.bf16.msrb.mxu3 %v11305_v5  ;;  %v12889_v59 = vld [vmem:[%s17444_s7 + $0x54c] sm:$0xf] }
 0xceb   : > { %v9072_v15 = vpop.f32.mrf.mxu3 }
 0xcec   : > { %v9073_v36 = vadd.f32 %v9072_v15, %v17041_v60  ;;  %v12797_v60 = vld [vmem:[%s17444_s7 + $0x26c] sm:$0xf] }
 0xced   : > { %9237 = vmatpush.bf16.msra.mxu2 %v11673_v25  ;;  %9198 = vmatpush.bf16.msrb.mxu3 %v11289_v47  ;;  %v11561_v61 = vor.u32 %v12797_v60, %v11558_v20  ;;  %v12885_v25 = vld [vmem:[%s17444_s7 + $0x52c] sm:$0xf]  ;;  %v11526_v47 = vld [vmem:[%s17444_s7 + $0x238] sm:$0xf0]  ;;  %v11817_v60 = vor.u32 %v12861_v21, %v11814_v49 }
 0xcee   : > { %v17145_v9 = vadd.f32 %v16961_v41, %v9073_v36  ;;  %v11926_v41 = vld [vmem:[%s17444_s7 + $0x558] sm:$0xf0]  ;;  %v11913_v24 = vor.u32 %v12885_v25, %v11910_v35  ;;  %v11529_v46 = vor.u32 %v12789_v17, %v11526_v47  ;;  %v12857_v20 = vld [vmem:[%s17444_s7 + $0x44c] sm:$0xf] }
 0xcef   : > { %v11929_v22 = vor.u32 %v12889_v59, %v11926_v41  ;;  %v11798_v59 = vld [vmem:[%s17444_s7 + $0x458] sm:$0xf0]  ;;  %v12977_v21 = vld [vmem:[%s17446_s9 + $0x88] sm:$0xff] }
 0xcf0   : > { %v11766_v25 = vld [vmem:[%s17444_s7 + $0x418] sm:$0xf0] }
 0xcf1   : > { %9238 = vmatpush.bf16.msra.mxu2 %v11657_v12  ;;  %9199 = vmatpush.bf16.msrb.mxu3 %v11273_v53  ;;  %v12881_v12 = vld [vmem:[%s17444_s7 + $0x50c] sm:$0xf]  ;;  %v11510_v53 = vld [vmem:[%s17444_s7 + $0x218] sm:$0xf0] }
 0xcf2   : > { %v11897_v3 = vor.u32 %v12881_v12, %v11894_v50  ;;  %v11513_v55 = vor.u32 %v12785_v8, %v11510_v53  ;;  %v12134_v17 = vld [vmem:[%s17444_s7 + $0x6f8] sm:$0xf0]  ;;  %v12962_v50 = vld [vmem:[%s17446_s9 + $0x10] sm:$0xff]  ;;  %v12933_v8 = vld [vmem:[%s17444_s7 + $0x6ac] sm:$0xf] }
 0xcf3   : > { %v9074_v31 = vpop.f32.mrf.mxu3  ;;  %v12102_v53 = vld [vmem:[%s17444_s7 + $0x6b8] sm:$0xf0] }
 0xcf4   : > { %v12965_v31 = vld [vmem:[%s17446_s9 + $0x28] sm:$0xff] }
 0xcf5   : > { %9239 = vmatpush.bf16.msra.mxu2 %v11641_v45  ;;  %9200 = vmatpush.bf16.msrb.mxu3 %v11257_v63  ;;  %v12873_v63 = vld [vmem:[%s17444_s7 + $0x4cc] sm:$0xf] }
 0xcf8   : > { %9240 = vmatmul.bf16.vlgmr.msra.gmra.mxu2 %v16102_v13  ;;  %9201 = vmatmul.bf16.vlgmr.msrb.gmra.mxu3 %v15848_v40  ;;  %v11958_v13 = vld [vmem:[%s17444_s7 + $0x598] sm:$0xf0] }
 0xcf9   : > { %9258 = vmatpush.bf16.msrb.mxu2 %v12009_v33  ;;  %9219 = vmatpush.bf16.msra.mxu3 %v11625_v28  ;;  %v11961_v2 = vor.u32 %v12897_v37, %v11958_v13  ;;  %v11574_v40 = vld [vmem:[%s17444_s7 + $0x298] sm:$0xf0]  ;;  %v12953_v33 = vld [vmem:[%s17444_s7 + $0x74c] sm:$0xf]  ;;  %v9099_v37 = vadd.f32 %v17061_v18, %v7672_v1 }
 0xcfa   : > { %v11577_v56 = vor.u32 %v12801_v10, %v11574_v40  ;;  %v12185_v43 = vor.u32 %v12953_v33, %v12182_v52  ;;  %v11862_v28 = vld [vmem:[%s17444_s7 + $0x4d8] sm:$0xf0]  ;;  %v9297_v52 = vmax.f32 %v16757_v62, 0.0  ;;  %v12982_v62 = vld [vmem:[%s17446_s9 + $0xb0] sm:$0xff] }
 0xcfb   : > { %v9124_v5 = vpop.f32.mrf.mxu2  ;;  %v11865_v51 = vor.u32 %v12873_v63, %v11862_v28  ;;  %v12967_v10 = vld [vmem:[%s17446_s9 + $0x38] sm:$0xff] }
 0xcfc   : > { %v12086_v33 = vld [vmem:[%s17444_s7 + $0x698] sm:$0xf0]  ;;  %v9301_v63 = vpack.c.bf16 %v9297_v52, %v9297_v52  ;;  %v12989_v52 = vld [vmem:[%s17446_s9 + $0xe8] sm:$0xff] }
 0xcfd   : > { %9259 = vmatpush.bf16.msrb.mxu2 %v11993_v14  ;;  %9220 = vmatpush.bf16.msra.mxu3 %v11609_v29  ;;  %v12949_v14 = vld [vmem:[%s17444_s7 + $0x72c] sm:$0xf]  ;;  %v12054_v1 = vld [vmem:[%s17444_s7 + $0x658] sm:$0xf0] }
 0xcfe   : > { %v12169_v29 = vor.u32 %v12949_v14, %v12166_v0  ;;  %v12921_v0 = vld [vmem:[%s17444_s7 + $0x64c] sm:$0xf] }
 0xd01   : > { %9260 = vmatpush.bf16.msrb.mxu2 %v11977_v39  ;;  %9221 = vmatpush.bf16.msra.mxu3 %v11593_v6  ;;  %v12869_v39 = vld [vmem:[%s17444_s7 + $0x4ac] sm:$0xf] }
 0xd02   : > { %v11849_v15 = vor.u32 %v12869_v39, %v11846_v19  ;;  %v12057_v39 = vor.u32 %v12921_v0, %v12054_v1  ;;  %v12917_v19 = vld [vmem:[%s17444_s7 + $0x62c] sm:$0xf] }
 0xd03   : > { %v9126_v45 = vpop.f32.mrf.mxu2 }
 0xd05   : > { %9261 = vmatpush.bf16.msrb.mxu2 %v11961_v2  ;;  %9222 = vmatpush.bf16.msra.mxu3 %v11577_v56  ;;  %v11830_v2 = vld [vmem:[%s17444_s7 + $0x498] sm:$0xf0]  ;;  %v12966_v56 = vld [vmem:[%s17446_s9 + $0x30] sm:$0xff] }
 0xd09   : > { %9262 = vmatpush.bf16.msrb.mxu2 %v11945_v54  ;;  %9223 = vmatpush.bf16.msra.mxu3 %v11561_v61  ;;  %v11801_v61 = vor.u32 %v12857_v20, %v11798_v59  ;;  %v12971_v59 = vld [vmem:[%s17446_s9 + $0x58] sm:$0xff] }
 0xd0b   : > { %v9111_v13 = vpop.f32.mrf.mxu3 }
 0xd0c   : > { %v9112_v6 = vadd.f32 %v9111_v13, %v9099_v37  ;;  %v12913_v13 = vld [vmem:[%s17444_s7 + $0x60c] sm:$0xf] }
 0xd0d   : > { %9263 = vmatpush.bf16.msrb.mxu2 %v11929_v22  ;;  %9224 = vmatpush.bf16.msra.mxu3 %v11545_v27  ;;  %v12853_v22 = vld [vmem:[%s17444_s7 + $0x42c] sm:$0xf]  ;;  %v12963_v27 = vld [vmem:[%s17446_s9 + $0x18] sm:$0xff] }
 0xd0e   : > { %v17249_v40 = vadd.f32 %v9124_v5, %v9112_v6  ;;  %v11785_v5 = vor.u32 %v12853_v22, %v11782_v30  ;;  %v12970_v30 = vld [vmem:[%s17446_s9 + $0x50] sm:$0xff] }
 0xd11   : > { %9264 = vmatpush.bf16.msrb.mxu2 %v11913_v24  ;;  %9225 = vmatpush.bf16.msra.mxu3 %v11529_v46  ;;  %v12941_v24 = vld [vmem:[%s17444_s7 + $0x6ec] sm:$0xf]  ;;  %v12121_v46 = vor.u32 %v12937_v7, %v12118_v42 }
 0xd12   : > { %v12137_v12 = vor.u32 %v12941_v24, %v12134_v17 }
 0xd13   : > { %v9113_v54 = vpop.f32.mrf.mxu3 }
 0xd14   : > { %v12976_v54 = vld [vmem:[%s17446_s9 + $0x80] sm:$0xff] }
 0xd15   : > { %9265 = vmatpush.bf16.msrb.mxu2 %v11897_v3  ;;  %9226 = vmatpush.bf16.msra.mxu3 %v11513_v55  ;;  %v12961_v3 = vld [vmem:[%s17446_s9 + $0x8] sm:$0xff]  ;;  %v12089_v55 = vor.u32 %v12929_v48, %v12086_v33  ;;  %v12990_v33 = vld [vmem:[%s17446_s9 + $0xf0] sm:$0xff] }
 0xd18   : > { %9266 = vmatmul.bf16.vlgmr.msrb.gmra.mxu2 %v16230_v4  ;;  %9227 = vmatmul.bf16.vlgmr.msra.gmra.mxu3 %v16072_v57  ;;  %v12150_v4 = vld [vmem:[%s17444_s7 + $0x718] sm:$0xf0]  ;;  %v12865_v57 = vld [vmem:[%s17444_s7 + $0x48c] sm:$0xf] }
 0xd19   : > { %9288 = vmatpush.bf16.msra.mxu2 %v12201_v38  ;;  %9245 = vmatpush.bf16.msrb.mxu3 %v11881_v58  ;;  %v12153_v36 = vor.u32 %v12945_v32, %v12150_v4  ;;  %v11833_v18 = vor.u32 %v12865_v57, %v11830_v2  ;;  %v12105_v38 = vor.u32 %v12933_v8, %v12102_v53  ;;  %v12925_v58 = vld [vmem:[%s17444_s7 + $0x66c] sm:$0xf]  ;;  %v12038_v32 = vld [vmem:[%s17444_s7 + $0x638] sm:$0xf0]  ;;  %v12980_v4 = vld [vmem:[%s17446_s9 + $0xa0] sm:$0xff] }
 0xd1a   : > { %v12041_v37 = vor.u32 %v12917_v19, %v12038_v32  ;;  %v12975_v2 = vld [vmem:[%s17446_s9 + $0x78] sm:$0xff] }
 0xd1b   : > { %v17266_v41 = vpop.f32.mrf.mxu2 }
 0xd1d   : > { %9289 = vmatpush.bf16.msra.mxu2 %v12185_v43  ;;  %9246 = vmatpush.bf16.msrb.mxu3 %v11865_v51  ;;  %v12070_v43 = vld [vmem:[%s17444_s7 + $0x678] sm:$0xf0] }
 0xd1e   : > { %v12073_v14 = vor.u32 %v12925_v58, %v12070_v43  ;;  %v12987_v58 = vld [vmem:[%s17446_s9 + $0xd8] sm:$0xff]  ;;  %v12986_v43 = vld [vmem:[%s17446_s9 + $0xd0] sm:$0xff] }
 0xd21   : > { %9290 = vmatpush.bf16.msra.mxu2 %v12169_v29  ;;  %9247 = vmatpush.bf16.msrb.mxu3 %v11849_v15  ;;  %v12981_v29 = vld [vmem:[%s17446_s9 + $0xa8] sm:$0xff]  ;;  %v12022_v15 = vld [vmem:[%s17444_s7 + $0x618] sm:$0xf0] }
 0xd22   : > { %v12025_v57 = vor.u32 %v12913_v13, %v12022_v15 }
 0xd23   : > { %v9152_v35 = vpop.f32.mrf.mxu2 }
 0xd25   : > { %9291 = vmatpush.bf16.msra.mxu2 %v12153_v36  ;;  %9248 = vmatpush.bf16.msrb.mxu3 %v11833_v18  ;;  %v12979_v36 = vld [vmem:[%s17446_s9 + $0x98] sm:$0xff]  ;;  %v12974_v18 = vld [vmem:[%s17446_s9 + $0x70] sm:$0xff] }
 0xd28   : > { %12205 = vmatmul.msk.bf16.vlgmr.msra.gmra.mxu2 %vm5699_vm1, %v16278_v23  ;;  %v12849_v23 = vld [vmem:[%s17444_s7 + $0x40c] sm:$0xf] }
 0xd29   : > { %9565 = vmatpush.bf16.msrb.mxu2 %v12967_v10  ;;  %9249 = vmatpush.bf16.msrb.mxu3 %v11817_v60  ;;  %v11769_v47 = vor.u32 %v12849_v23, %v11766_v25  ;;  %v12978_v10 = vld [vmem:[%s17446_s9 + $0x90] sm:$0xff]  ;;  %v12972_v60 = vld [vmem:[%s17446_s9 + $0x60] sm:$0xff] }
 0xd2b   : > { %v9137_v45 = vpop.f32.mrf.mxu3 }
 0xd2c   : > { %v9138_v20 = vadd.f32 %v9137_v45, %v17249_v40  ;;  %v12969_v40 = vld [vmem:[%s17446_s9 + $0x48] sm:$0xff]  ;;  %v12991_v45 = vld [vmem:[%s17446_s9 + $0xf8] sm:$0xff] }
 0xd2d   : > { %9566 = vmatpush.bf16.msrb.mxu2 %v12966_v56  ;;  %9250 = vmatpush.bf16.msrb.mxu3 %v11801_v61  ;;  %v12973_v56 = vld [vmem:[%s17446_s9 + $0x68] sm:$0xff] }
 0xd31   : > { %9567 = vmatpush.bf16.msrb.mxu2 %v12965_v31  ;;  %9251 = vmatpush.bf16.msrb.mxu3 %v11785_v5  ;;  %v9151_v31 = vadd.f32 %v17266_v41, %v9138_v20  ;;  %v12968_v41 = vld [vmem:[%s17446_s9 + $0x40] sm:$0xff] }
 0xd33   : > { %v9139_v28 = vpop.f32.mrf.mxu3 }
 0xd35   : > { %9568 = vmatpush.bf16.msrb.mxu2 %v12964_v11  ;;  %9252 = vmatpush.bf16.msrb.mxu3 %v11769_v47 }
 0xd38   : > { %9253 = vmatmul.bf16.vlgmr.msrb.gmra.mxu3 %v16144_v44  ;;  %v12983_v44 = vld [vmem:[%s17446_s9 + $0xb8] sm:$0xff] }
 0xd39   : > { %9569 = vmatpush.bf16.msrb.mxu2 %v12963_v27  ;;  %9271 = vmatpush.bf16.msra.mxu3 %v12137_v12  ;;  %v9298_v27 = vmax.f32 %v17145_v9, 0.0 }
 0xd3b   : > { %v9176_v51 = vpop.f32.mrf.mxu2  ;;  %v9302_v47 = vpack.c.bf16 %v9298_v27, %v9298_v27 }
 0xd3d   : > { %9570 = vmatpush.bf16.msrb.mxu2 %v12962_v50  ;;  %9272 = vmatpush.bf16.msra.mxu3 %v12121_v46  ;;  %v7673_v50 = vperm.slane %v17222_v16, 3 }
 0xd41   : > { %9571 = vmatpush.bf16.msrb.mxu2 %v12961_v3  ;;  %9273 = vmatpush.bf16.msra.mxu3 %v12105_v38 }
 0xd43   : > { %v9178_v6 = vpop.f32.mrf.mxu2 }
 0xd44   : > { %v13023_v6 = vld [vmem:[%s17447_s10] ss:$0 sm:$0xff] }
 0xd45   : > { %9572 = vmatpush.bf16.msrb.mxu2 %v12960_v26  ;;  %9274 = vmatpush.bf16.msra.mxu3 %v12089_v55  ;;  %v12988_v55 = vld [vmem:[%s17446_s9 + $0xe0] sm:$0xff] }
 0xd48   : > { %9573 = vmatmul.bf16.vlgmr.msrb.gmra.mxu2 %v9301_v63 }
 0xd49   : > { %9591 = vmatpush.bf16.msra.mxu2 %v12983_v44  ;;  %9275 = vmatpush.bf16.msra.mxu3 %v12073_v14  ;;  %v12984_v14 = vld [vmem:[%s17446_s9 + $0xc0] sm:$0xff] }
 0xd4b   : > { %v9163_v49 = vpop.f32.mrf.mxu3 }
 0xd4c   : > { %v9164_v22 = vadd.f32 %v9163_v49, %v9151_v31 }
 0xd4d   : > { %9592 = vmatpush.bf16.msra.mxu2 %v12982_v62  ;;  %9276 = vmatpush.bf16.msra.mxu3 %v12057_v39  ;;  %v12985_v62 = vld [vmem:[%s17446_s9 + $0xc8] sm:$0xff] }
 0xd4e   : > { %v9177_v11 = vadd.f32 %v9176_v51, %v9164_v22 }
 0xd51   : > { %9593 = vmatpush.bf16.msra.mxu2 %v12981_v29  ;;  %9277 = vmatpush.bf16.msra.mxu3 %v12041_v37 }
 0xd55   : > { %9594 = vmatpush.bf16.msra.mxu2 %v12980_v4  ;;  %9278 = vmatpush.bf16.msra.mxu3 %v12025_v57 }
 0xd58   : > { %9279 = vmatmul.bf16.vlgmr.msra.gmra.mxu3 %v16200_v34  ;;  %v9165_v34 = vpop.f32.mrf.mxu3 }
 0xd59   : > { %9595 = vmatpush.bf16.msra.mxu2 %v12979_v36  ;;  %9578 = vmatpush.bf16.msrb.mxu3 %v12975_v2 }
 0xd5b   : > { %v9215_v61 = vpop.f32.mrf.mxu2 }
 0xd5d   : > { %9596 = vmatpush.bf16.msra.mxu2 %v12978_v10  ;;  %9579 = vmatpush.bf16.msrb.mxu3 %v12974_v18 }
 0xd60   : > { %v9189_v5 = vpop.f32.mrf.mxu3 }
 0xd61   : > { %9597 = vmatpush.bf16.msra.mxu2 %v12977_v21  ;;  %9580 = vmatpush.bf16.msrb.mxu3 %v12973_v56  ;;  %v9190_v23 = vadd.f32 %v9189_v5, %v9177_v11 }
 0xd63   : > { %v9217_v25 = vpop.f32.mrf.mxu2  ;;  %v9299_v35 = vmax.f32 %v9190_v23, 0.0 }
 0xd65   : > { %9598 = vmatpush.bf16.msra.mxu2 %v12976_v54  ;;  %9581 = vmatpush.bf16.msrb.mxu3 %v12972_v60  ;;  %v9303_v24 = vpack.c.bf16 %v9299_v35, %v9299_v35 }
 0xd68   : > { %9599 = vmatmul.bf16.vlgmr.msra.gmra.mxu2 %v9303_v24  ;;  %v9191_v17 = vpop.f32.mrf.mxu3 }
 0xd69   : > { %9582 = vmatpush.bf16.msrb.mxu3 %v12971_v59 }
 0xd6d   : > { %9583 = vmatpush.bf16.msrb.mxu3 %v12970_v30 }
 0xd71   : > { %9584 = vmatpush.bf16.msrb.mxu3 %v12969_v40 }
 0xd75   : > { %9585 = vmatpush.bf16.msrb.mxu3 %v12968_v41 }
 0xd78   : > { %9586 = vmatmul.bf16.vlgmr.msrb.gmra.mxu3 %v9302_v47 }
 0xd79   : > { %9604 = vmatpush.bf16.msra.mxu3 %v12991_v45 }
 0xd7b   : > { %v9241_v12 = vpop.f32.mrf.mxu2  ;;  %v9202_v7 = vpop.f32.mrf.mxu3 }
 0xd7c   : > { %v9203_v42 = vadd.f32 %v9202_v7, %v7673_v50 }
 0xd7d   : > { %9605 = vmatpush.bf16.msra.mxu3 %v12990_v33 }
 0xd7e   : > { %v9216_v46 = vadd.f32 %v9215_v61, %v9203_v42 }
 0xd81   : > { %9606 = vmatpush.bf16.msra.mxu3 %v12989_v52 }
 0xd83   : > { %v9243_v3 = vpop.f32.mrf.mxu2  ;;  %v9204_v8 = vpop.f32.mrf.mxu3 }
 0xd85   : > { %9607 = vmatpush.bf16.msra.mxu3 %v12988_v55 }
 0xd89   : > { %9608 = vmatpush.bf16.msra.mxu3 %v12987_v58 }
 0xd8d   : > { %9609 = vmatpush.bf16.msra.mxu3 %v12986_v43 }
 0xd91   : > { %9610 = vmatpush.bf16.msra.mxu3 %v12985_v62 }
 0xd95   : > { %9611 = vmatpush.bf16.msra.mxu3 %v12984_v14 }
 0xd9b   : > { %v9267_v53 = vpop.f32.mrf.mxu2  ;;  %v9228_v9 = vpop.f32.mrf.mxu3 }
 0xd9c   : > { %v9229_v38 = vadd.f32 %v9228_v9, %v9216_v46 }
 0xd9e   : > { %v9242_v26 = vadd.f32 %v9241_v12, %v9229_v38 }
 0xda3   : > { %v9269_v48 = vpop.f32.mrf.mxu2  ;;  %v9230_v16 = vpop.f32.mrf.mxu3 }
 0xdab   : > { %v9293_v44 = vpop.f32.mrf.mxu2 }
 0xdb3   : > { %v9295_v63 = vpop.f32.mrf.mxu2 }
 0xdbb   : > { %v9254_v28 = vpop.f32.mrf.mxu3 }
 0xdbc   : > { %v9255_v29 = vadd.f32 %v9254_v28, %v9242_v26 }
 0xdbe   : > { %v9268_v39 = vadd.f32 %v9267_v53, %v9255_v29 }
 0xdc3   : > { %v9256_v0 = vpop.f32.mrf.mxu3 }
 0xdcb   : > { %v9574_v1 = vpop.f32.mrf.mxu2 }
 0xdcc   : > { %v9575_v57 = vadd.f32 %v13023_v6, %v9574_v1 }
 0xdd3   : > { %v9576_v51 = vpop.f32.mrf.mxu2 }
 0xddb   : > { %v9280_v19 = vpop.f32.mrf.mxu3 }
 0xddc   : > { %v9281_v32 = vadd.f32 %v9280_v19, %v9268_v39 }
 0xdde   : > { %v9294_v4 = vadd.f32 %v9293_v44, %v9281_v32 }
 0xde0   : > { %v9300_v37 = vmax.f32 %v9294_v4, 0.0 }
 0xde2   : > { %v9304_v13 = vpack.c.bf16 %v9300_v37, %v9300_v37 }
 0xde3   : > { %v9282_v15 = vpop.f32.mrf.mxu3 }
 0xde4   : > { %9612 = vmatmul.bf16.vlgmr.msra.gmra.mxu3 %v9304_v13 }
 0xdeb   : > { %v9600_v36 = vpop.f32.mrf.mxu2 }
 0xdf3   : > { %v9602_v21 = vpop.f32.mrf.mxu2 }
 0xdfb   : > { %v9587_v2 = vpop.f32.mrf.mxu3 }
 0xdfc   : > { %v9588_v10 = vadd.f32 %v9587_v2, %v9575_v57 }
 0xdfe   : > { %v9601_v18 = vadd.f32 %v9600_v36, %v9588_v10 }
 0xe03   : > { %v9589_v49 = vpop.f32.mrf.mxu3 }
 0xe67   : > { %v9613_v56 = vpop.f32.mrf.mxu3 }
 0xe68   : > { %v9614_v54 = vadd.f32 %v9613_v56, %v9601_v18 }
 0xe6a   : > { %9617 = vst [vmem:[%s384_s23] sm:$0xff] %v9614_v54 }
 0xe6f   : > { %v9615_v60 = vpop.f32.mrf.mxu3 }
 0xe70 PF: > { %s21_s17 = sadd.s32 1, %s13040_s17  }
 0xe71   : > { %p18_p4 = scmp.ge.s32.totalorder %s21_s17, 4  }
 0xe73   :  { %20 = sbr.rel (!%p18_p4) target bundleno = 1 (0x1), region = 94 }

</bundles_post_ra>
